<compile_context>
chip_gen: v6e
topology: v6e:2x2x1
jax: 0.10.0
libtpu: 0.0.40
codegen_flags: <defaults>
</compile_context>

<pallas_src>
import functools

import jax
import jax.numpy as jnp
import numpy as np
from jax import lax
from jax.experimental import pallas as pl
from jax.experimental.pallas import tpu as pltpu


# ---------------------------------------------------------------------------
# Stage 1: time-independent input convolution as one batched im2col GEMM.
# ---------------------------------------------------------------------------
def xconv_gemm_kernel(lhs_ref, w_ref, b_ref, out_ref):
    """One row tile of  gx = im2col(x) @ Wx + bias  over all (t, b) frames.

    lhs_ref: (TM, K*K*Cx)   bf16 im2col rows
    w_ref:   (K*K*Cx, 4*NF) bf16 input->gates weight
    b_ref:   (1, 4*NF)      fp32 conv bias
    out_ref: (TM, 4*NF)     fp32 gate pre-activations (x part)
    """
    out_ref[...] = (jnp.dot(lhs_ref[...], w_ref[...],
                            preferred_element_type=jnp.float32)
                    + b_ref[...])


# ---------------------------------------------------------------------------
# Stage 2: the whole ConvLSTM recurrence in a single pallas_call.
# ---------------------------------------------------------------------------
def clstm_recurrent_kernel(gx_ref, wh_ref, gnorm_ref, consts_ref, hy_ref,
                           hpad_ref, c_ref, *, H, W, NF, K, BB, eps):
    """One (batch-block, t) grid step of the fused ConvLSTM recurrence.

    gx_ref:     (BB, H*W, 4*NF)   precomputed conv_x(x_t) + bias for this (t, bb)
    wh_ref:     (K*K*NF, 4*NF)    hidden->gates conv weight (bf16), fully folded
    gnorm_ref:  (4*NF, 4*NF)      block-diagonal group-sum matrix, pre-scaled by
                                  1/(H*W*cpg)  (hoisted constant)
    consts_ref: (8, 4*NF)         rows 0..4: gamma, beta, gate pre-scale,
                                  post-scale, post-shift (hoisted constants)
    hy_ref:     (BB, H, W, NF)    final hidden state (written only at t == S-1)
    hpad_ref:   VMEM (BB, H+K-1, W+K-1, NF)  zero-padded h, persists across t
    c_ref:      VMEM (BB*H*W, NF)            cell state, persists across t
    """
    t = pl.program_id(1)
    S = pl.num_programs(1)
    P = (K - 1) // 2
    HW = H * W
    Cout = 4 * NF

    # h = c = 0 at the start of each batch block's sequence.  The halo of hpad
    # stays zero forever because only the interior is rewritten below.
    @pl.when(t == 0)
    def _init():
        hpad_ref[...] = jnp.zeros_like(hpad_ref)
        c_ref[...] = jnp.zeros_like(c_ref)

    gamma = consts_ref[0:1, :]
    beta = consts_ref[1:2, :]
    pre_s = consts_ref[2:3, :]
    post_s = consts_ref[3:4, :]
    post_b = consts_ref[4:5, :]

    # conv_h(h_{t-1}) with ALL K*K taps folded into one MXU contraction of
    # depth K*K*NF, rows stacked over the BB batch elements (M = BB*H*W).
    # bf16 operands, fp32 accumulation inside the MXU.
    lhs = jnp.concatenate(
        [jnp.concatenate(
            [hpad_ref[b, ky:ky + H, kx:kx + W, :]
             for ky in range(K) for kx in range(K)],
            axis=-1).reshape(HW, K * K * NF)
         for b in range(BB)],
        axis=0)
    acc = (gx_ref[...].reshape(BB * HW, Cout)
           + jnp.dot(lhs.astype(jnp.bfloat16), wh_ref[...],
                     preferred_element_type=jnp.float32))

    # GroupNorm (per sample, per 32-channel group over H*W): per-sample sum and
    # sum-of-squares sublane reductions, then one small matmul with the hoisted
    # block-diagonal matrix that sums within each group AND broadcasts the
    # (already 1/(HW*cpg)-scaled) statistics back to every lane. Lane-dense.
    stat_rows = []
    for b in range(BB):
        ab = acc[b * HW:(b + 1) * HW, :]
        stat_rows.append(jnp.sum(ab, axis=0, keepdims=True))
        stat_rows.append(jnp.sum(ab * ab, axis=0, keepdims=True))
    pad_rows = (-2 * BB) % 8
    if pad_rows:
        stat_rows.append(jnp.zeros((pad_rows, Cout), jnp.float32))
    stats = jnp.dot(jnp.concatenate(stat_rows, axis=0), gnorm_ref[...],
                    preferred_element_type=jnp.float32)

    norm_rows = []
    for b in range(BB):
        ab = acc[b * HW:(b + 1) * HW, :]
        mean = stats[2 * b:2 * b + 1, :]
        var = stats[2 * b + 1:2 * b + 2, :] - mean * mean
        norm_rows.append((ab - mean) * lax.rsqrt(var + eps))
    gates = jnp.concatenate(norm_rows, axis=0) * gamma + beta

    # All four gate nonlinearities via ONE full-width tanh over the whole
    # (BB*H*W, 4*NF) tile:  sigmoid(x) = 0.5*tanh(0.5*x) + 0.5 ;  tanh(x) = tanh(x).
    g_act = jnp.tanh(gates * pre_s) * post_s + post_b
    i_g = g_act[:, 0:NF]
    f_g = g_act[:, NF:2 * NF]
    g_g = g_act[:, 2 * NF:3 * NF]
    o_g = g_act[:, 3 * NF:4 * NF]

    c_new = f_g * c_ref[...] + i_g * g_g
    h_new = o_g * jnp.tanh(c_new)
    c_ref[...] = c_new

    h_new_b = h_new.reshape(BB, H, W, NF)
    for b in range(BB):
        hpad_ref[b, P:P + H, P:P + W, :] = h_new_b[b]

    # Only the final hidden state ever leaves VMEM.
    @pl.when(t == S - 1)
    def _emit():
        hy_ref[...] = h_new_b


# ---------------------------------------------------------------------------
# Wrapper
# ---------------------------------------------------------------------------
def _pick_batch_block(batch):
    """Batch elements per stage-2 grid step.

    Single-TC chips (v5e / v6e): fold the whole batch into one block (fewer grid
    steps, wider matmul M).  Multi-TC chips (v4 / v5p / v7x): keep a 'parallel'
    batch grid axis so the recurrence splits across TensorCores.
    """
    num_tc = 1
    try:
        kind = (jax.devices()[0].device_kind or "").lower()
        if ("v7" in kind) or ("v5p" in kind) or ("v4" in kind):
            num_tc = 2
    except Exception:
        num_tc = 1
    if num_tc > 1 and batch % num_tc == 0:
        return batch // num_tc
    return batch


@functools.partial(jax.jit,
                   static_argnames=("NF", "K", "G", "seq_len", "eps", "BB"))
def _lstm_event_forward_impl(inputs, w_hwio, bias, gamma, beta, *, NF, K, G,
                             seq_len, eps, BB):
    S_total, B, Cx, H, W = inputs.shape
    assert seq_len <= S_total
    assert B % BB == 0
    S = seq_len
    Cout = 4 * NF
    HW = H * W
    P = (K - 1) // 2
    cpg = Cout // G

    # NHWC layout (channels on the lane axis) for the kernels.
    x_nhwc = jnp.transpose(inputs[:S], (0, 1, 3, 4, 2)).astype(jnp.float32)

    # Split the conv weight into input / hidden halves (torch concatenates
    # (x, h) with x first) and fold all taps for the MXU.
    wx = w_hwio[:, :, :Cx, :].reshape(K * K * Cx, Cout).astype(jnp.bfloat16)
    wh = w_hwio[:, :, Cx:, :].reshape(K * K * NF, Cout).astype(jnp.bfloat16)
    bias_r = bias.reshape(1, Cout).astype(jnp.float32)

    # Hoisted constants: GroupNorm block-diagonal group-sum matrix (pre-scaled
    # so the in-kernel matmul directly yields mean / E[x^2]) plus a one-vreg
    # (8, Cout) table with gamma, beta and the gate-activation affine vectors.
    lane = jnp.arange(Cout)
    gnorm = ((lane[:, None] // cpg) == (lane[None, :] // cpg)).astype(jnp.float32)
    gnorm = gnorm * (1.0 / (HW * cpg))

    half = jnp.full((NF,), 0.5, jnp.float32)
    one = jnp.ones((NF,), jnp.float32)
    zero = jnp.zeros((NF,), jnp.float32)
    pre_s = jnp.concatenate([half, half, one, half])     # i, f: 0.5x ; g: x ; o: 0.5x
    post_s = pre_s                                       # i, f, o: 0.5*tanh ; g: tanh
    post_b = jnp.concatenate([half, half, zero, half])   # i, f, o: +0.5 ; g: +0
    consts = jnp.zeros((8, Cout), jnp.float32)
    consts = consts.at[0].set(gamma.reshape(-1).astype(jnp.float32))
    consts = consts.at[1].set(beta.reshape(-1).astype(jnp.float32))
    consts = consts.at[2].set(pre_s).at[3].set(post_s).at[4].set(post_b)

    # ---- Stage 1: hoisted input conv (+ bias) for ALL frames, one tiled GEMM.
    xp = jnp.pad(x_nhwc, ((0, 0), (0, 0), (P, P), (P, P), (0, 0)))
    x_cols = jnp.concatenate(
        [xp[:, :, ky:ky + H, kx:kx + W, :] for ky in range(K) for kx in range(K)],
        axis=-1).reshape(S * B * HW, K * K * Cx).astype(jnp.bfloat16)

    Mrows = S * B * HW
    if Mrows % 512 == 0:
        TM = 512
    elif Mrows % 256 == 0:
        TM = 256
    else:
        TM = Mrows

    gx = pl.pallas_call(
        xconv_gemm_kernel,
        grid=(Mrows // TM,),
        in_specs=[
            pl.BlockSpec((TM, K * K * Cx), lambda i: (i, 0)),
            pl.BlockSpec((K * K * Cx, Cout), lambda i: (0, 0)),
            pl.BlockSpec((1, Cout), lambda i: (0, 0)),
        ],
        out_specs=pl.BlockSpec((TM, Cout), lambda i: (i, 0)),
        out_shape=jax.ShapeDtypeStruct((Mrows, Cout), jnp.float32),
        compiler_params=pltpu.CompilerParams(
            dimension_semantics=("parallel",)),
    )(x_cols, wx, bias_r)
    gx = gx.reshape(S, B, HW, Cout)

    # ---- Stage 2: the entire recurrence in one pallas_call.  h and c stay
    # resident in VMEM scratch across the inner ("arbitrary") t axis; the batch
    # blocks form the outer "parallel" axis.
    hy = pl.pallas_call(
        functools.partial(clstm_recurrent_kernel, H=H, W=W, NF=NF, K=K, BB=BB,
                          eps=eps),
        grid=(B // BB, S),
        in_specs=[
            pl.BlockSpec((None, BB, HW, Cout), lambda bb, t: (t, bb, 0, 0)),
            pl.BlockSpec((K * K * NF, Cout), lambda bb, t: (0, 0)),
            pl.BlockSpec((Cout, Cout), lambda bb, t: (0, 0)),
            pl.BlockSpec((8, Cout), lambda bb, t: (0, 0)),
        ],
        out_specs=pl.BlockSpec((BB, H, W, NF), lambda bb, t: (bb, 0, 0, 0)),
        out_shape=jax.ShapeDtypeStruct((B, H, W, NF), jnp.float32),
        scratch_shapes=[
            pltpu.VMEM((BB, H + K - 1, W + K - 1, NF), jnp.float32),
            pltpu.VMEM((BB * HW, NF), jnp.float32),
        ],
        compiler_params=pltpu.CompilerParams(
            dimension_semantics=("parallel", "arbitrary")),
    )(gx, wh, gnorm, consts)

    return jnp.transpose(hy, (0, 3, 1, 2))  # (B, NF, H, W)


def lstm_event_forward(inputs, w_hwio, bias, gamma, beta, *, NF, K, G,
                       seq_len, eps=1e-5):
    """LSTMEvent.forward: returns the final hidden state h_output (B, NF, H, W)."""
    # TODO(synk): only the default call mode (inputs given, hidden_state=None)
    # is implemented; the inputs=None / externally-supplied (hx, cx) paths are not.
    BB = _pick_batch_block(inputs.shape[1])
    return _lstm_event_forward_impl(inputs, w_hwio, bias, gamma, beta, NF=NF,
                                    K=K, G=G, seq_len=seq_len, eps=eps, BB=BB)


# ---------------------------------------------------------------------------
# Pure-JAX reference (for verification)
# ---------------------------------------------------------------------------
def reference_forward(inputs, w_hwio, bias, gamma, beta, *, NF, G, seq_len,
                      eps=1e-5):
    S, B, Cx, H, W = inputs.shape
    x_nhwc = jnp.transpose(inputs, (0, 1, 3, 4, 2)).astype(jnp.float32)
    hx = jnp.zeros((B, H, W, NF), jnp.float32)
    cx = jnp.zeros((B, H, W, NF), jnp.float32)
    Cout = 4 * NF
    cpg = Cout // G
    for t in range(seq_len):
        comb = jnp.concatenate([x_nhwc[t], hx], axis=-1)
        gates = lax.conv_general_dilated(
            comb, w_hwio, window_strides=(1, 1), padding="SAME",
            dimension_numbers=("NHWC", "HWIO", "NHWC")) + bias
        gr = gates.reshape(B, H, W, G, cpg)
        m = jnp.mean(gr, axis=(1, 2, 4), keepdims=True)
        v = jnp.mean((gr - m) ** 2, axis=(1, 2, 4), keepdims=True)
        gates = ((gr - m) * lax.rsqrt(v + eps)).reshape(B, H, W, Cout)
        gates = gates * gamma + beta
        i = jax.nn.sigmoid(gates[..., 0:NF])
        f = jax.nn.sigmoid(gates[..., NF:2 * NF])
        g = jnp.tanh(gates[..., 2 * NF:3 * NF])
        o = jax.nn.sigmoid(gates[..., 3 * NF:4 * NF])
        cx = f * cx + i * g
        hx = o * jnp.tanh(cx)
    return jnp.transpose(hx, (0, 3, 1, 2))


if __name__ == "__main__":
    # Shapes consistent with the module:
    #   shape=(16,16), input_channels=4, filter_size=3, num_features=32
    SEQ, B, Cx, H, W = 8, 2, 4, 16, 16
    NF = 32
    K = 3
    Cin = Cx + NF
    Cout = 4 * NF
    G = Cout // 32  # GroupNorm(4*nf // 32, 4*nf)

    key = jax.random.PRNGKey(0)
    k1, k2, k3, k4, k5 = jax.random.split(key, 5)

    fan_in = Cin * K * K
    bound = 1.0 / np.sqrt(fan_in)
    w_hwio = jax.random.uniform(k1, (K, K, Cin, Cout), jnp.float32,
                                -bound, bound)
    bias = jax.random.uniform(k2, (1, Cout), jnp.float32, -bound, bound)
    gamma = 1.0 + 0.1 * jax.random.normal(k3, (1, Cout), jnp.float32)
    beta = 0.1 * jax.random.normal(k4, (1, Cout), jnp.float32)

    inputs = jax.random.normal(k5, (SEQ, B, Cx, H, W), jnp.float32)

    h_out = lstm_event_forward(inputs, w_hwio, bias, gamma, beta,
                               NF=NF, K=K, G=G, seq_len=SEQ)
    h_out = jax.block_until_ready(h_out)

    h_ref = reference_forward(inputs, w_hwio, bias, gamma, beta,
                              NF=NF, G=G, seq_len=SEQ)
    # Tolerance accounts for bf16 MXU operands in the conv matmuls (the gate
    # nonlinearities themselves are now exact -- no approx reciprocal).
    np.testing.assert_allclose(np.asarray(h_out), np.asarray(h_ref),
                               rtol=2e-2, atol=2e-2)
    print("KERNEL_OK")
</pallas_src>

<mosaic_0001>
module attributes {stable_mosaic.version = 11 : i64} {
  func.func @xconv_gemm_kernel(%arg0: i32, %arg1: memref<512x36xbf16, #tpu.memory_space<vmem>>, %arg2: memref<36x128xbf16, #tpu.memory_space<vmem>>, %arg3: memref<1x128xf32, #tpu.memory_space<vmem>>, %arg4: memref<512x128xf32, #tpu.memory_space<vmem>>) attributes {dimension_semantics = [#tpu.dimension_semantics<parallel>], iteration_bounds = array<i64: 8>, scalar_prefetch = 0 : i64, scratch_operands = 0 : i64, tpu.core_type = #tpu.core_type<tc>, window_params = [{transform_indices = @transform_0, window_bounds = array<i64: 512, 36>}, {pipeline_mode = #tpu.pipeline_mode<synchronous>, transform_indices = @transform_1, window_bounds = array<i64: 36, 128>}, {pipeline_mode = #tpu.pipeline_mode<synchronous>, transform_indices = @transform_2, window_bounds = array<i64: 1, 128>}, {transform_indices = @transform_3, window_bounds = array<i64: 512, 128>}]} {
    %c0 = arith.constant 0 : index
    %c0_0 = arith.constant 0 : index
    %0 = vector.load %arg1[%c0, %c0_0] : memref<512x36xbf16, #tpu.memory_space<vmem>>, vector<512x36xbf16>
    %c0_1 = arith.constant 0 : index
    %c0_2 = arith.constant 0 : index
    %1 = vector.load %arg2[%c0_1, %c0_2] : memref<36x128xbf16, #tpu.memory_space<vmem>>, vector<36x128xbf16>
    %cst = arith.constant dense<0.000000e+00> : vector<512x128xf32>
    %2 = tpu.matmul %0, %1, %cst {dimension_numbers = #tpu.dot_dimension_numbers<[1], [0], [0], [1], [0, 0, 1, 1], [], []>} : vector<512x36xbf16>, vector<36x128xbf16>, vector<512x128xf32> -> vector<512x128xf32>
    %c0_3 = arith.constant 0 : index
    %c0_4 = arith.constant 0 : index
    %3 = vector.load %arg3[%c0_3, %c0_4] : memref<1x128xf32, #tpu.memory_space<vmem>>, vector<1x128xf32>
    %4 = vector.broadcast %3 : vector<1x128xf32> to vector<512x128xf32>
    %5 = arith.addf %2, %4 : vector<512x128xf32>
    %c0_5 = arith.constant 0 : index
    %c0_6 = arith.constant 0 : index
    %6 = vector.load %arg4[%c0_5, %c0_6] : memref<512x128xf32, #tpu.memory_space<vmem>>, vector<512x128xf32>
    tpu.vector_store %arg4[%c0_5, %c0_6], %5 {strides = array<i32>} : memref<512x128xf32, #tpu.memory_space<vmem>>, vector<512x128xf32>,
    return
  }
  func.func @transform_0(%arg0: i32) -> (i32, i32) {
    %c0_i32 = arith.constant 0 : i32
    %c0_i32_0 = arith.constant 0 : i32
    return %arg0, %c0_i32 : i32, i32
  }
  func.func @transform_1(%arg0: i32) -> (i32, i32) {
    %c0_i32 = arith.constant 0 : i32
    %c0_i32_0 = arith.constant 0 : i32
    %c0_i32_1 = arith.constant 0 : i32
    return %c0_i32, %c0_i32_0 : i32, i32
  }
  func.func @transform_2(%arg0: i32) -> (i32, i32) {
    %c0_i32 = arith.constant 0 : i32
    %c0_i32_0 = arith.constant 0 : i32
    %c0_i32_1 = arith.constant 0 : i32
    return %c0_i32, %c0_i32_0 : i32, i32
  }
  func.func @transform_3(%arg0: i32) -> (i32, i32) {
    %c0_i32 = arith.constant 0 : i32
    %c0_i32_0 = arith.constant 0 : i32
    return %arg0, %c0_i32 : i32, i32
  }
}

module attributes {stable_mosaic.version = 11 : i64} {
  func.func @clstm_recurrent_kernel(%arg0: i32, %arg1: i32, %arg2: memref<1x2x256x128xf32, #tpu.memory_space<vmem>>, %arg3: memref<288x128xbf16, #tpu.memory_space<vmem>>, %arg4: memref<128x128xf32, #tpu.memory_space<vmem>>, %arg5: memref<8x128xf32, #tpu.memory_space<vmem>>, %arg6: memref<2x16x16x32xf32, #tpu.memory_space<vmem>>, %arg7: memref<2x18x18x32xf32, #tpu.memory_space<vmem>>, %arg8: memref<512x32xf32, #tpu.memory_space<vmem>>) attributes {dimension_semantics = [#tpu.dimension_semantics<parallel>, #tpu.dimension_semantics<arbitrary>], iteration_bounds = array<i64: 1, 8>, scalar_prefetch = 0 : i64, scratch_operands = 2 : i64, tpu.core_type = #tpu.core_type<tc>, window_params = [{transform_indices = @transform_0, window_bounds = array<i64: 1, 2, 256, 128>}, {pipeline_mode = #tpu.pipeline_mode<synchronous>, transform_indices = @transform_1, window_bounds = array<i64: 288, 128>}, {pipeline_mode = #tpu.pipeline_mode<synchronous>, transform_indices = @transform_2, window_bounds = array<i64: 128, 128>}, {pipeline_mode = #tpu.pipeline_mode<synchronous>, transform_indices = @transform_3, window_bounds = array<i64: 8, 128>}, {transform_indices = @transform_4, window_bounds = array<i64: 2, 16, 16, 32>}]} {
    %c0_i32 = arith.constant 0 : i32
    %0 = arith.cmpi eq, %arg1, %c0_i32 : i32
    %1 = arith.extui %0 : i1 to i32
    %c0_i32_0 = arith.constant 0 : i32
    %2 = arith.cmpi ne, %1, %c0_i32_0 : i32
    scf.if %2 {
      %cst_107 = arith.constant 0.000000e+00 : f32
      %133 = vector.broadcast %cst_107 : f32 to vector<2x18x18x32xf32>
      %c0_108 = arith.constant 0 : index
      %c0_109 = arith.constant 0 : index
      %c0_110 = arith.constant 0 : index
      %c0_111 = arith.constant 0 : index
      %134 = vector.load %arg7[%c0_108, %c0_109, %c0_110, %c0_111] : memref<2x18x18x32xf32, #tpu.memory_space<vmem>>, vector<2x18x18x32xf32>
      tpu.vector_store %arg7[%c0_108, %c0_109, %c0_110, %c0_111], %133 {strides = array<i32>} : memref<2x18x18x32xf32, #tpu.memory_space<vmem>>, vector<2x18x18x32xf32>,
      %cst_112 = arith.constant 0.000000e+00 : f32
      %135 = vector.broadcast %cst_112 : f32 to vector<512x32xf32>
      %c0_113 = arith.constant 0 : index
      %c0_114 = arith.constant 0 : index
      %136 = vector.load %arg8[%c0_113, %c0_114] : memref<512x32xf32, #tpu.memory_space<vmem>>, vector<512x32xf32>
      tpu.vector_store %arg8[%c0_113, %c0_114], %135 {strides = array<i32>} : memref<512x32xf32, #tpu.memory_space<vmem>>, vector<512x32xf32>,
    } else {
    }
    %c0 = arith.constant 0 : index
    %c0_1 = arith.constant 0 : index
    %3 = vector.load %arg5[%c0, %c0_1] : memref<8x128xf32, #tpu.memory_space<vmem>>, vector<1x128xf32>
    %c1 = arith.constant 1 : index
    %c0_2 = arith.constant 0 : index
    %4 = vector.load %arg5[%c1, %c0_2] : memref<8x128xf32, #tpu.memory_space<vmem>>, vector<1x128xf32>
    %c2 = arith.constant 2 : index
    %c0_3 = arith.constant 0 : index
    %5 = vector.load %arg5[%c2, %c0_3] : memref<8x128xf32, #tpu.memory_space<vmem>>, vector<1x128xf32>
    %c3 = arith.constant 3 : index
    %c0_4 = arith.constant 0 : index
    %6 = vector.load %arg5[%c3, %c0_4] : memref<8x128xf32, #tpu.memory_space<vmem>>, vector<1x128xf32>
    %c4 = arith.constant 4 : index
    %c0_5 = arith.constant 0 : index
    %7 = vector.load %arg5[%c4, %c0_5] : memref<8x128xf32, #tpu.memory_space<vmem>>, vector<1x128xf32>
    %c0_6 = arith.constant 0 : index
    %c0_7 = arith.constant 0 : index
    %c0_8 = arith.constant 0 : index
    %c0_9 = arith.constant 0 : index
    %8 = vector.load %arg7[%c0_6, %c0_7, %c0_8, %c0_9] : memref<2x18x18x32xf32, #tpu.memory_space<vmem>>, vector<1x16x16x32xf32>
    %9 = vector.shape_cast %8 : vector<1x16x16x32xf32> to vector<16x16x32xf32>
    %c0_10 = arith.constant 0 : index
    %c0_11 = arith.constant 0 : index
    %c1_12 = arith.constant 1 : index
    %c0_13 = arith.constant 0 : index
    %10 = vector.load %arg7[%c0_10, %c0_11, %c1_12, %c0_13] : memref<2x18x18x32xf32, #tpu.memory_space<vmem>>, vector<1x16x16x32xf32>
    %11 = vector.shape_cast %10 : vector<1x16x16x32xf32> to vector<16x16x32xf32>
    %c0_14 = arith.constant 0 : index
    %c0_15 = arith.constant 0 : index
    %c2_16 = arith.constant 2 : index
    %c0_17 = arith.constant 0 : index
    %12 = vector.load %arg7[%c0_14, %c0_15, %c2_16, %c0_17] : memref<2x18x18x32xf32, #tpu.memory_space<vmem>>, vector<1x16x16x32xf32>
    %13 = vector.shape_cast %12 : vector<1x16x16x32xf32> to vector<16x16x32xf32>
    %c0_18 = arith.constant 0 : index
    %c1_19 = arith.constant 1 : index
    %c0_20 = arith.constant 0 : index
    %c0_21 = arith.constant 0 : index
    %14 = vector.load %arg7[%c0_18, %c1_19, %c0_20, %c0_21] : memref<2x18x18x32xf32, #tpu.memory_space<vmem>>, vector<1x16x16x32xf32>
    %15 = vector.shape_cast %14 : vector<1x16x16x32xf32> to vector<16x16x32xf32>
    %c0_22 = arith.constant 0 : index
    %c1_23 = arith.constant 1 : index
    %c1_24 = arith.constant 1 : index
    %c0_25 = arith.constant 0 : index
    %16 = vector.load %arg7[%c0_22, %c1_23, %c1_24, %c0_25] : memref<2x18x18x32xf32, #tpu.memory_space<vmem>>, vector<1x16x16x32xf32>
    %17 = vector.shape_cast %16 : vector<1x16x16x32xf32> to vector<16x16x32xf32>
    %c0_26 = arith.constant 0 : index
    %c1_27 = arith.constant 1 : index
    %c2_28 = arith.constant 2 : index
    %c0_29 = arith.constant 0 : index
    %18 = vector.load %arg7[%c0_26, %c1_27, %c2_28, %c0_29] : memref<2x18x18x32xf32, #tpu.memory_space<vmem>>, vector<1x16x16x32xf32>
    %19 = vector.shape_cast %18 : vector<1x16x16x32xf32> to vector<16x16x32xf32>
    %c0_30 = arith.constant 0 : index
    %c2_31 = arith.constant 2 : index
    %c0_32 = arith.constant 0 : index
    %c0_33 = arith.constant 0 : index
    %20 = vector.load %arg7[%c0_30, %c2_31, %c0_32, %c0_33] : memref<2x18x18x32xf32, #tpu.memory_space<vmem>>, vector<1x16x16x32xf32>
    %21 = vector.shape_cast %20 : vector<1x16x16x32xf32> to vector<16x16x32xf32>
    %c0_34 = arith.constant 0 : index
    %c2_35 = arith.constant 2 : index
    %c1_36 = arith.constant 1 : index
    %c0_37 = arith.constant 0 : index
    %22 = vector.load %arg7[%c0_34, %c2_35, %c1_36, %c0_37] : memref<2x18x18x32xf32, #tpu.memory_space<vmem>>, vector<1x16x16x32xf32>
    %23 = vector.shape_cast %22 : vector<1x16x16x32xf32> to vector<16x16x32xf32>
    %c0_38 = arith.constant 0 : index
    %c2_39 = arith.constant 2 : index
    %c2_40 = arith.constant 2 : index
    %c0_41 = arith.constant 0 : index
    %24 = vector.load %arg7[%c0_38, %c2_39, %c2_40, %c0_41] : memref<2x18x18x32xf32, #tpu.memory_space<vmem>>, vector<1x16x16x32xf32>
    %25 = vector.shape_cast %24 : vector<1x16x16x32xf32> to vector<16x16x32xf32>
    %26 = tpu.concatenate %9, %11, %13, %15, %17, %19, %21, %23, %25 in 2 : vector<16x16x32xf32>, vector<16x16x32xf32>, vector<16x16x32xf32>, vector<16x16x32xf32>, vector<16x16x32xf32>, vector<16x16x32xf32>, vector<16x16x32xf32>, vector<16x16x32xf32>, vector<16x16x32xf32> -> vector<16x16x288xf32>
    %27 = vector.shape_cast %26 : vector<16x16x288xf32> to vector<256x288xf32>
    %c1_42 = arith.constant 1 : index
    %c0_43 = arith.constant 0 : index
    %c0_44 = arith.constant 0 : index
    %c0_45 = arith.constant 0 : index
    %28 = vector.load %arg7[%c1_42, %c0_43, %c0_44, %c0_45] : memref<2x18x18x32xf32, #tpu.memory_space<vmem>>, vector<1x16x16x32xf32>
    %29 = vector.shape_cast %28 : vector<1x16x16x32xf32> to vector<16x16x32xf32>
    %c1_46 = arith.constant 1 : index
    %c0_47 = arith.constant 0 : index
    %c1_48 = arith.constant 1 : index
    %c0_49 = arith.constant 0 : index
    %30 = vector.load %arg7[%c1_46, %c0_47, %c1_48, %c0_49] : memref<2x18x18x32xf32, #tpu.memory_space<vmem>>, vector<1x16x16x32xf32>
    %31 = vector.shape_cast %30 : vector<1x16x16x32xf32> to vector<16x16x32xf32>
    %c1_50 = arith.constant 1 : index
    %c0_51 = arith.constant 0 : index
    %c2_52 = arith.constant 2 : index
    %c0_53 = arith.constant 0 : index
    %32 = vector.load %arg7[%c1_50, %c0_51, %c2_52, %c0_53] : memref<2x18x18x32xf32, #tpu.memory_space<vmem>>, vector<1x16x16x32xf32>
    %33 = vector.shape_cast %32 : vector<1x16x16x32xf32> to vector<16x16x32xf32>
    %c1_54 = arith.constant 1 : index
    %c1_55 = arith.constant 1 : index
    %c0_56 = arith.constant 0 : index
    %c0_57 = arith.constant 0 : index
    %34 = vector.load %arg7[%c1_54, %c1_55, %c0_56, %c0_57] : memref<2x18x18x32xf32, #tpu.memory_space<vmem>>, vector<1x16x16x32xf32>
    %35 = vector.shape_cast %34 : vector<1x16x16x32xf32> to vector<16x16x32xf32>
    %c1_58 = arith.constant 1 : index
    %c1_59 = arith.constant 1 : index
    %c1_60 = arith.constant 1 : index
    %c0_61 = arith.constant 0 : index
    %36 = vector.load %arg7[%c1_58, %c1_59, %c1_60, %c0_61] : memref<2x18x18x32xf32, #tpu.memory_space<vmem>>, vector<1x16x16x32xf32>
    %37 = vector.shape_cast %36 : vector<1x16x16x32xf32> to vector<16x16x32xf32>
    %c1_62 = arith.constant 1 : index
    %c1_63 = arith.constant 1 : index
    %c2_64 = arith.constant 2 : index
    %c0_65 = arith.constant 0 : index
    %38 = vector.load %arg7[%c1_62, %c1_63, %c2_64, %c0_65] : memref<2x18x18x32xf32, #tpu.memory_space<vmem>>, vector<1x16x16x32xf32>
    %39 = vector.shape_cast %38 : vector<1x16x16x32xf32> to vector<16x16x32xf32>
    %c1_66 = arith.constant 1 : index
    %c2_67 = arith.constant 2 : index
    %c0_68 = arith.constant 0 : index
    %c0_69 = arith.constant 0 : index
    %40 = vector.load %arg7[%c1_66, %c2_67, %c0_68, %c0_69] : memref<2x18x18x32xf32, #tpu.memory_space<vmem>>, vector<1x16x16x32xf32>
    %41 = vector.shape_cast %40 : vector<1x16x16x32xf32> to vector<16x16x32xf32>
    %c1_70 = arith.constant 1 : index
    %c2_71 = arith.constant 2 : index
    %c1_72 = arith.constant 1 : index
    %c0_73 = arith.constant 0 : index
    %42 = vector.load %arg7[%c1_70, %c2_71, %c1_72, %c0_73] : memref<2x18x18x32xf32, #tpu.memory_space<vmem>>, vector<1x16x16x32xf32>
    %43 = vector.shape_cast %42 : vector<1x16x16x32xf32> to vector<16x16x32xf32>
    %c1_74 = arith.constant 1 : index
    %c2_75 = arith.constant 2 : index
    %c2_76 = arith.constant 2 : index
    %c0_77 = arith.constant 0 : index
    %44 = vector.load %arg7[%c1_74, %c2_75, %c2_76, %c0_77] : memref<2x18x18x32xf32, #tpu.memory_space<vmem>>, vector<1x16x16x32xf32>
    %45 = vector.shape_cast %44 : vector<1x16x16x32xf32> to vector<16x16x32xf32>
    %46 = tpu.concatenate %29, %31, %33, %35, %37, %39, %41, %43, %45 in 2 : vector<16x16x32xf32>, vector<16x16x32xf32>, vector<16x16x32xf32>, vector<16x16x32xf32>, vector<16x16x32xf32>, vector<16x16x32xf32>, vector<16x16x32xf32>, vector<16x16x32xf32>, vector<16x16x32xf32> -> vector<16x16x288xf32>
    %47 = vector.shape_cast %46 : vector<16x16x288xf32> to vector<256x288xf32>
    %48 = tpu.concatenate %27, %47 in 0 : vector<256x288xf32>, vector<256x288xf32> -> vector<512x288xf32>
    %c0_78 = arith.constant 0 : index
    %c0_79 = arith.constant 0 : index
    %c0_80 = arith.constant 0 : index
    %c0_81 = arith.constant 0 : index
    %49 = vector.load %arg2[%c0_78, %c0_79, %c0_80, %c0_81] : memref<1x2x256x128xf32, #tpu.memory_space<vmem>>, vector<1x2x256x128xf32>
    %50 = vector.shape_cast %49 : vector<1x2x256x128xf32> to vector<2x256x128xf32>
    %51 = vector.shape_cast %50 : vector<2x256x128xf32> to vector<512x128xf32>
    %52 = arith.truncf %48 : vector<512x288xf32> to vector<512x288xbf16>
    %c0_82 = arith.constant 0 : index
    %c0_83 = arith.constant 0 : index
    %53 = vector.load %arg3[%c0_82, %c0_83] : memref<288x128xbf16, #tpu.memory_space<vmem>>, vector<288x128xbf16>
    %cst = arith.constant dense<0.000000e+00> : vector<512x128xf32>
    %54 = tpu.matmul %52, %53, %cst {dimension_numbers = #tpu.dot_dimension_numbers<[1], [0], [0], [1], [0, 0, 1, 1], [], []>} : vector<512x288xbf16>, vector<288x128xbf16>, vector<512x128xf32> -> vector<512x128xf32>
    %55 = arith.addf %51, %54 : vector<512x128xf32>
    %56 = vector.extract_strided_slice %55 {offsets = [0, 0], sizes = [256, 128], strides = [1, 1]} : vector<512x128xf32> to vector<256x128xf32>
    %cst_84 = arith.constant dense<0.000000e+00> : vector<128xf32>
    %57 = vector.multi_reduction <add>, %56, %cst_84 [0] : vector<256x128xf32> to vector<128xf32>
    %58 = vector.shape_cast %57 : vector<128xf32> to vector<1x128xf32>
    %59 = arith.mulf %56, %56 : vector<256x128xf32>
    %cst_85 = arith.constant dense<0.000000e+00> : vector<128xf32>
    %60 = vector.multi_reduction <add>, %59, %cst_85 [0] : vector<256x128xf32> to vector<128xf32>
    %61 = vector.shape_cast %60 : vector<128xf32> to vector<1x128xf32>
    %62 = vector.extract_strided_slice %55 {offsets = [256, 0], sizes = [256, 128], strides = [1, 1]} : vector<512x128xf32> to vector<256x128xf32>
    %cst_86 = arith.constant dense<0.000000e+00> : vector<128xf32>
    %63 = vector.multi_reduction <add>, %62, %cst_86 [0] : vector<256x128xf32> to vector<128xf32>
    %64 = vector.shape_cast %63 : vector<128xf32> to vector<1x128xf32>
    %65 = arith.mulf %62, %62 : vector<256x128xf32>
    %cst_87 = arith.constant dense<0.000000e+00> : vector<128xf32>
    %66 = vector.multi_reduction <add>, %65, %cst_87 [0] : vector<256x128xf32> to vector<128xf32>
    %67 = vector.shape_cast %66 : vector<128xf32> to vector<1x128xf32>
    %cst_88 = arith.constant 0.000000e+00 : f32
    %68 = vector.broadcast %cst_88 : f32 to vector<4x128xf32>
    %69 = tpu.concatenate %58, %61, %64, %67, %68 in 0 : vector<1x128xf32>, vector<1x128xf32>, vector<1x128xf32>, vector<1x128xf32>, vector<4x128xf32> -> vector<8x128xf32>
    %c0_89 = arith.constant 0 : index
    %c0_90 = arith.constant 0 : index
    %70 = vector.load %arg4[%c0_89, %c0_90] : memref<128x128xf32, #tpu.memory_space<vmem>>, vector<128x128xf32>
    %cst_91 = arith.constant dense<0.000000e+00> : vector<8x128xf32>
    %71 = tpu.matmul %69, %70, %cst_91 {dimension_numbers = #tpu.dot_dimension_numbers<[1], [0], [0], [1], [0, 0, 1, 1], [], []>} : vector<8x128xf32>, vector<128x128xf32>, vector<8x128xf32> -> vector<8x128xf32>
    %72 = vector.extract_strided_slice %55 {offsets = [0, 0], sizes = [256, 128], strides = [1, 1]} : vector<512x128xf32> to vector<256x128xf32>
    %73 = vector.extract_strided_slice %71 {offsets = [0, 0], sizes = [1, 128], strides = [1, 1]} : vector<8x128xf32> to vector<1x128xf32>
    %74 = vector.extract_strided_slice %71 {offsets = [1, 0], sizes = [1, 128], strides = [1, 1]} : vector<8x128xf32> to vector<1x128xf32>
    %75 = arith.mulf %73, %73 : vector<1x128xf32>
    %76 = arith.subf %74, %75 : vector<1x128xf32>
    %77 = vector.broadcast %73 : vector<1x128xf32> to vector<256x128xf32>
    %78 = arith.subf %72, %77 : vector<256x128xf32>
    %cst_92 = arith.constant 9.99999974E-6 : f32
    %79 = vector.broadcast %cst_92 : f32 to vector<1x128xf32>
    %80 = arith.addf %76, %79 : vector<1x128xf32>
    %81 = math.rsqrt %80 : vector<1x128xf32>
    %82 = vector.broadcast %81 : vector<1x128xf32> to vector<256x128xf32>
    %83 = arith.mulf %78, %82 : vector<256x128xf32>
    %84 = vector.extract_strided_slice %55 {offsets = [256, 0], sizes = [256, 128], strides = [1, 1]} : vector<512x128xf32> to vector<256x128xf32>
    %85 = vector.extract_strided_slice %71 {offsets = [2, 0], sizes = [1, 128], strides = [1, 1]} : vector<8x128xf32> to vector<1x128xf32>
    %86 = vector.extract_strided_slice %71 {offsets = [3, 0], sizes = [1, 128], strides = [1, 1]} : vector<8x128xf32> to vector<1x128xf32>
    %87 = arith.mulf %85, %85 : vector<1x128xf32>
    %88 = arith.subf %86, %87 : vector<1x128xf32>
    %89 = vector.broadcast %85 : vector<1x128xf32> to vector<256x128xf32>
    %90 = arith.subf %84, %89 : vector<256x128xf32>
    %cst_93 = arith.constant 9.99999974E-6 : f32
    %91 = vector.broadcast %cst_93 : f32 to vector<1x128xf32>
    %92 = arith.addf %88, %91 : vector<1x128xf32>
    %93 = math.rsqrt %92 : vector<1x128xf32>
    %94 = vector.broadcast %93 : vector<1x128xf32> to vector<256x128xf32>
    %95 = arith.mulf %90, %94 : vector<256x128xf32>
    %96 = tpu.concatenate %83, %95 in 0 : vector<256x128xf32>, vector<256x128xf32> -> vector<512x128xf32>
    %97 = vector.broadcast %3 : vector<1x128xf32> to vector<512x128xf32>
    %98 = arith.mulf %96, %97 : vector<512x128xf32>
    %99 = vector.broadcast %4 : vector<1x128xf32> to vector<512x128xf32>
    %100 = arith.addf %98, %99 : vector<512x128xf32>
    %101 = vector.broadcast %5 : vector<1x128xf32> to vector<512x128xf32>
    %102 = arith.mulf %100, %101 : vector<512x128xf32>
    %103 = math.tanh %102 : vector<512x128xf32>
    %104 = vector.broadcast %6 : vector<1x128xf32> to vector<512x128xf32>
    %105 = arith.mulf %103, %104 : vector<512x128xf32>
    %106 = vector.broadcast %7 : vector<1x128xf32> to vector<512x128xf32>
    %107 = arith.addf %105, %106 : vector<512x128xf32>
    %108 = vector.extract_strided_slice %107 {offsets = [0, 0], sizes = [512, 32], strides = [1, 1]} : vector<512x128xf32> to vector<512x32xf32>
    %109 = vector.extract_strided_slice %107 {offsets = [0, 32], sizes = [512, 32], strides = [1, 1]} : vector<512x128xf32> to vector<512x32xf32>
    %110 = vector.extract_strided_slice %107 {offsets = [0, 64], sizes = [512, 32], strides = [1, 1]} : vector<512x128xf32> to vector<512x32xf32>
    %111 = vector.extract_strided_slice %107 {offsets = [0, 96], sizes = [512, 32], strides = [1, 1]} : vector<512x128xf32> to vector<512x32xf32>
    %c0_94 = arith.constant 0 : index
    %c0_95 = arith.constant 0 : index
    %112 = vector.load %arg8[%c0_94, %c0_95] : memref<512x32xf32, #tpu.memory_space<vmem>>, vector<512x32xf32>
    %113 = arith.mulf %109, %112 : vector<512x32xf32>
    %114 = arith.mulf %108, %110 : vector<512x32xf32>
    %115 = arith.addf %113, %114 : vector<512x32xf32>
    %116 = math.tanh %115 : vector<512x32xf32>
    %117 = arith.mulf %111, %116 : vector<512x32xf32>
    %c0_96 = arith.constant 0 : index
    %c0_97 = arith.constant 0 : index
    %118 = vector.load %arg8[%c0_96, %c0_97] : memref<512x32xf32, #tpu.memory_space<vmem>>, vector<512x32xf32>
    tpu.vector_store %arg8[%c0_96, %c0_97], %115 {strides = array<i32>} : memref<512x32xf32, #tpu.memory_space<vmem>>, vector<512x32xf32>,
    %119 = vector.shape_cast %117 : vector<512x32xf32> to vector<2x16x16x32xf32>
    %120 = vector.extract_strided_slice %119 {offsets = [0, 0, 0, 0], sizes = [1, 16, 16, 32], strides = [1, 1, 1, 1]} : vector<2x16x16x32xf32> to vector<1x16x16x32xf32>
    %121 = vector.shape_cast %120 : vector<1x16x16x32xf32> to vector<16x16x32xf32>
    %c0_98 = arith.constant 0 : index
    %c1_99 = arith.constant 1 : index
    %c1_100 = arith.constant 1 : index
    %c0_101 = arith.constant 0 : index
    %122 = vector.load %arg7[%c0_98, %c1_99, %c1_100, %c0_101] : memref<2x18x18x32xf32, #tpu.memory_space<vmem>>, vector<1x16x16x32xf32>
    %123 = vector.shape_cast %122 : vector<1x16x16x32xf32> to vector<16x16x32xf32>
    %124 = vector.shape_cast %121 : vector<16x16x32xf32> to vector<1x16x16x32xf32>
    tpu.vector_store %arg7[%c0_98, %c1_99, %c1_100, %c0_101], %124 {strides = array<i32>} : memref<2x18x18x32xf32, #tpu.memory_space<vmem>>, vector<1x16x16x32xf32>,
    %125 = vector.extract_strided_slice %119 {offsets = [1, 0, 0, 0], sizes = [1, 16, 16, 32], strides = [1, 1, 1, 1]} : vector<2x16x16x32xf32> to vector<1x16x16x32xf32>
    %126 = vector.shape_cast %125 : vector<1x16x16x32xf32> to vector<16x16x32xf32>
    %c1_102 = arith.constant 1 : index
    %c1_103 = arith.constant 1 : index
    %c1_104 = arith.constant 1 : index
    %c0_105 = arith.constant 0 : index
    %127 = vector.load %arg7[%c1_102, %c1_103, %c1_104, %c0_105] : memref<2x18x18x32xf32, #tpu.memory_space<vmem>>, vector<1x16x16x32xf32>
    %128 = vector.shape_cast %127 : vector<1x16x16x32xf32> to vector<16x16x32xf32>
    %129 = vector.shape_cast %126 : vector<16x16x32xf32> to vector<1x16x16x32xf32>
    tpu.vector_store %arg7[%c1_102, %c1_103, %c1_104, %c0_105], %129 {strides = array<i32>} : memref<2x18x18x32xf32, #tpu.memory_space<vmem>>, vector<1x16x16x32xf32>,
    %c7_i32 = arith.constant 7 : i32
    %130 = arith.cmpi eq, %arg1, %c7_i32 : i32
    %131 = arith.extui %130 : i1 to i32
    %c0_i32_106 = arith.constant 0 : i32
    %132 = arith.cmpi ne, %131, %c0_i32_106 : i32
    scf.if %132 {
      %c0_107 = arith.constant 0 : index
      %c0_108 = arith.constant 0 : index
      %c0_109 = arith.constant 0 : index
      %c0_110 = arith.constant 0 : index
      %133 = vector.load %arg6[%c0_107, %c0_108, %c0_109, %c0_110] : memref<2x16x16x32xf32, #tpu.memory_space<vmem>>, vector<2x16x16x32xf32>
      tpu.vector_store %arg6[%c0_107, %c0_108, %c0_109, %c0_110], %119 {strides = array<i32>} : memref<2x16x16x32xf32, #tpu.memory_space<vmem>>, vector<2x16x16x32xf32>,
    } else {
    }
    return
  }
  func.func @transform_0(%arg0: i32, %arg1: i32) -> (i32, i32, i32, i32) {
    %c0_i32 = arith.constant 0 : i32
    %c0_i32_0 = arith.constant 0 : i32
    %c0_i32_1 = arith.constant 0 : i32
    return %arg1, %arg0, %c0_i32, %c0_i32_0 : i32, i32, i32, i32
  }
  func.func @transform_1(%arg0: i32, %arg1: i32) -> (i32, i32) {
    %c0_i32 = arith.constant 0 : i32
    %c0_i32_0 = arith.constant 0 : i32
    %c0_i32_1 = arith.constant 0 : i32
    return %c0_i32, %c0_i32_0 : i32, i32
  }
  func.func @transform_2(%arg0: i32, %arg1: i32) -> (i32, i32) {
    %c0_i32 = arith.constant 0 : i32
    %c0_i32_0 = arith.constant 0 : i32
    %c0_i32_1 = arith.constant 0 : i32
    return %c0_i32, %c0_i32_0 : i32, i32
  }
  func.func @transform_3(%arg0: i32, %arg1: i32) -> (i32, i32) {
    %c0_i32 = arith.constant 0 : i32
    %c0_i32_0 = arith.constant 0 : i32
    %c0_i32_1 = arith.constant 0 : i32
    return %c0_i32, %c0_i32_0 : i32, i32
  }
  func.func @transform_4(%arg0: i32, %arg1: i32) -> (i32, i32, i32, i32) {
    %c0_i32 = arith.constant 0 : i32
    %c0_i32_0 = arith.constant 0 : i32
    %c0_i32_1 = arith.constant 0 : i32
    %c0_i32_2 = arith.constant 0 : i32
    return %arg0, %c0_i32, %c0_i32_0, %c0_i32_1 : i32, i32, i32, i32
  }
}

</mosaic_0001>

<bundles_post_ra>
// kernel: _lstm_event_forward_impl.2
= control target key start
LH: loop header
LB: loop body
LE: loop exit
PB: predicated region body
PF: predicated region fallthrough
CT: control target
= control target key end

     0   :  { %s1199_s12 = smov 0   ;;  %s1430_s0 = inlined_call_operand.vmem [shape: bf16[4096,36], index: 0, kind: input, shape index: {}]   ;;  %s1431_s1 = inlined_call_operand.vmem [shape: bf16[36,128], index: 1, kind: input, shape index: {}]   ;;  %s1432_s2 = inlined_call_operand.vmem [shape: f32[1,128], index: 2, kind: input, shape index: {}]   ;;  %s1433_s3 = inlined_call_operand.vmem [shape: f32[4096,128], index: 3, kind: output, shape index: {}]  }
   0x1 LB: > { %s936_s13 = sadd.s32 4294967295, %s1177_s12   ;;  %p940_p0 = scmp.ge.s32.totalorder %s1177_s12, 1  ;;  %s1177_s12 = sphi %s1199_s12, %s13_s12  }
   0x2   : > { %p138_p1 = scmp.lt.s32.totalorder %s1177_s12, 9 }
   0x4   : > { %p139_p2 = pnand %p940_p0, %p138_p1 }
   0x5   : > { %s941_s18 = sshll.u32 (!%p139_p2), %s936_s13, 6 }
   0x6   : > { %142 = sbr.rel (%p139_p2) target bundleno = 282 (0x11a), region = 32  ;;  %p163_p3 = scmp.lt.s32.totalorder (!%p139_p2), %s941_s18, 511 }
   0xb   : > { %v1136_v0 = vld [vmem:[%s1431_s1 + $0x10] ss:$0 sps:$4 sm:$0x33]   ;;  %vm523_vm0 = vcmask 1041408   ;;  %v1137_v1 = vld [vmem:[%s1431_s1 + $0x8] sm:$0xff]   ;;  %v1138_v3 = vld [vmem:[%s1431_s1] sm:$0xff]  }
   0xc   : > { %1126 = vmatprep.subr.msk.bf16.mxu0 %vm523_vm0, %v1136_v0  ;;  %1127 = vmatprep.subr.msk.bf16.mxu1 %vm523_vm0, %v1136_v0  ;;  %v525_v2 = vsel %vm523_vm0, %v1136_v0, 0  ;;  %s1435_s18 = smov (!%p163_p3, %s941_s18), 511  ;;  %vm426_vm1 = vcmask 293888   ;;  %v1292_v36 = vld [vmem:[%s1432_s2] ss:$0 sm:$0xff] }
   0xd   : > { %1051 = vmatpush3.bf16.msra.mxu0 %v525_v2  ;;  %1123 = vmatpush3.bf16.msra.mxu1 %v525_v2  ;;  %s942_s21 = sshll.u32 %s1435_s18, 2  ;;  %s944_s25 = sshll.u32 %s1435_s18, 3 }
   0xe   : > { %1052 = vmatprep.subr.bf16.mxu0 %v1137_v1  ;;  %1121 = vmatprep.subr.bf16.mxu1 %v1137_v1  ;;  %s1222_s24 = scalar_lea.vmem %s1430_s0, %s942_s21  ;;  %s1297_s30 = scalar_lea.vmem %s1433_s3, %s944_s25 }
   0xf   : > { %v1139_v4 = vld [vmem:[%s1222_s24] sm:$0xff]   ;;  %v1141_v6 = vld [vmem:[%s1222_s24 + $0x8] sm:$0xff]   ;;  %v1143_v8 = vld [vmem:[%s1222_s24 + $0x10] sm:$0xff]  }
  0x10   : > { %v1140_v5 = vld [vmem:[%s1222_s24 + $0x80] sm:$0xff]   ;;  %1056 = vmatprep.mubr.msk.bf16.mxu0 %vm426_vm1, %v1139_v4  ;;  %v1142_v7 = vld [vmem:[%s1222_s24 + $0x88] sm:$0xff]   ;;  %v1144_v9 = vld [vmem:[%s1222_s24 + $0x90] sm:$0xff]  }
  0x11   : > { %1053 = vmatpush3.bf16.msra.mxu0 %v1137_v1  ;;  %1124 = vmatpush3.bf16.msra.mxu1 %v1137_v1  ;;  %v1145_v10 = vld [vmem:[%s1222_s24 + $0x18] sm:$0xff]   ;;  %v1147_v12 = vld [vmem:[%s1222_s24 + $0x20] sm:$0xff]   ;;  %v1149_v14 = vld [vmem:[%s1222_s24 + $0x28] sm:$0xff]  }
  0x12   : > { %1054 = vmatprep.subr.bf16.mxu0 %v1138_v3  ;;  %1122 = vmatprep.subr.bf16.mxu1 %v1138_v3  ;;  %v1146_v11 = vld [vmem:[%s1222_s24 + $0x98] sm:$0xff]   ;;  %v1148_v13 = vld [vmem:[%s1222_s24 + $0xa0] sm:$0xff]   ;;  %v1150_v15 = vld [vmem:[%s1222_s24 + $0xa8] sm:$0xff]  }
  0x13   : > { %1088 = vmatprep.mubr.msk.bf16.mxu1 %vm426_vm1, %v1140_v5  ;;  %v1151_v16 = vld [vmem:[%s1222_s24 + $0x30] sm:$0xff]   ;;  %v1153_v18 = vld [vmem:[%s1222_s24 + $0x38] sm:$0xff]   ;;  %v1155_v20 = vld [vmem:[%s1222_s24 + $0x40] sm:$0xff]  }
  0x14   : > { %v1152_v17 = vld [vmem:[%s1222_s24 + $0xb0] sm:$0xff]   ;;  %v1154_v19 = vld [vmem:[%s1222_s24 + $0xb8] sm:$0xff]   ;;  %v1156_v21 = vld [vmem:[%s1222_s24 + $0xc0] sm:$0xff]  }
  0x15   : > { %1055 = vmatpush3.bf16.msra.mxu0 %v1138_v3  ;;  %1125 = vmatpush3.bf16.msra.mxu1 %v1138_v3  ;;  %v1157_v22 = vld [vmem:[%s1222_s24 + $0x48] sm:$0xff]   ;;  %v1159_v24 = vld [vmem:[%s1222_s24 + $0x50] sm:$0xff]   ;;  %v1161_v26 = vld [vmem:[%s1222_s24 + $0x58] sm:$0xff]  }
  0x16   : > { %v1158_v23 = vld [vmem:[%s1222_s24 + $0xc8] sm:$0xff]   ;;  %v1160_v25 = vld [vmem:[%s1222_s24 + $0xd0] sm:$0xff]   ;;  %v1162_v27 = vld [vmem:[%s1222_s24 + $0xd8] sm:$0xff]  }
  0x17   : > { %v1163_v28 = vld [vmem:[%s1222_s24 + $0x60] sm:$0xff]   ;;  %v1165_v30 = vld [vmem:[%s1222_s24 + $0x68] sm:$0xff]   ;;  %v1167_v32 = vld [vmem:[%s1222_s24 + $0x70] sm:$0xff]  }
  0x18   : > { %1057 = vmatmul.mubr.msk.bf16.vlgmr.msra.gmra.mxu0 %vm426_vm1, %v1141_v6  ;;  %1089 = vmatmul.mubr.msk.bf16.vlgmr.msra.gmra.mxu1 %vm426_vm1, %v1142_v7  ;;  %v1164_v29 = vld [vmem:[%s1222_s24 + $0xe0] sm:$0xff]   ;;  %v1166_v31 = vld [vmem:[%s1222_s24 + $0xe8] sm:$0xff]   ;;  %v1168_v33 = vld [vmem:[%s1222_s24 + $0xf0] sm:$0xff]  }
  0x19   : > { %1060 = vmatprep.mubr.msk.bf16.mxu0 %vm426_vm1, %v1143_v8  ;;  %1092 = vmatprep.mubr.msk.bf16.mxu1 %vm426_vm1, %v1144_v9  ;;  %v1169_v34 = vld [vmem:[%s1222_s24 + $0x78] sm:$0xff]  }
  0x1a   : > { %v1170_v35 = vld [vmem:[%s1222_s24 + $0xf8] sm:$0xff]  }
  0x20   : > { %1061 = vmatmul.mubr.msk.bf16.gmra.mxu0 %vm426_vm1, %v1145_v10  ;;  %1093 = vmatmul.mubr.msk.bf16.gmra.mxu1 %vm426_vm1, %v1146_v11 }
  0x21   : > { %1064 = vmatprep.mubr.msk.bf16.mxu0 %vm426_vm1, %v1147_v12  ;;  %1096 = vmatprep.mubr.msk.bf16.mxu1 %vm426_vm1, %v1148_v13 }
  0x28   : > { %1065 = vmatmul.mubr.msk.bf16.gmra.mxu0 %vm426_vm1, %v1149_v14  ;;  %1097 = vmatmul.mubr.msk.bf16.gmra.mxu1 %vm426_vm1, %v1150_v15 }
  0x29   : > { %1068 = vmatprep.mubr.msk.bf16.mxu0 %vm426_vm1, %v1151_v16  ;;  %1100 = vmatprep.mubr.msk.bf16.mxu1 %vm426_vm1, %v1152_v17 }
  0x30   : > { %1069 = vmatmul.mubr.msk.bf16.gmra.mxu0 %vm426_vm1, %v1153_v18  ;;  %1101 = vmatmul.mubr.msk.bf16.gmra.mxu1 %vm426_vm1, %v1154_v19 }
  0x31   : > { %1072 = vmatprep.mubr.msk.bf16.mxu0 %vm426_vm1, %v1155_v20  ;;  %1104 = vmatprep.mubr.msk.bf16.mxu1 %vm426_vm1, %v1156_v21 }
  0x38   : > { %1073 = vmatmul.mubr.msk.bf16.gmra.mxu0 %vm426_vm1, %v1157_v22  ;;  %1105 = vmatmul.mubr.msk.bf16.gmra.mxu1 %vm426_vm1, %v1158_v23 }
  0x39   : > { %1076 = vmatprep.mubr.msk.bf16.mxu0 %vm426_vm1, %v1159_v24  ;;  %1108 = vmatprep.mubr.msk.bf16.mxu1 %vm426_vm1, %v1160_v25 }
  0x40   : > { %1077 = vmatmul.mubr.msk.bf16.gmra.mxu0 %vm426_vm1, %v1161_v26  ;;  %1109 = vmatmul.mubr.msk.bf16.gmra.mxu1 %vm426_vm1, %v1162_v27 }
  0x41   : > { %1080 = vmatprep.mubr.msk.bf16.mxu0 %vm426_vm1, %v1163_v28  ;;  %1112 = vmatprep.mubr.msk.bf16.mxu1 %vm426_vm1, %v1164_v29 }
  0x48   : > { %1081 = vmatmul.mubr.msk.bf16.gmra.mxu0 %vm426_vm1, %v1165_v30  ;;  %1113 = vmatmul.mubr.msk.bf16.gmra.mxu1 %vm426_vm1, %v1166_v31 }
  0x49   : > { %1084 = vmatprep.mubr.msk.bf16.mxu0 %vm426_vm1, %v1167_v32  ;;  %1116 = vmatprep.mubr.msk.bf16.mxu1 %vm426_vm1, %v1168_v33 }
  0x50   : > { %1085 = vmatmul.mubr.msk.bf16.gmra.mxu0 %vm426_vm1, %v1169_v34  ;;  %1117 = vmatmul.mubr.msk.bf16.gmra.mxu1 %vm426_vm1, %v1170_v35 }
  0xd8   : > { %v1058_v37 = vpop.f32.mrf.mxu0  ;;  %v1090_v38 = vpop.f32.mrf.mxu1 }
  0xd9   : > { %v570_v39 = vadd.f32 %v1058_v37, %v1292_v36  ;;  %v698_v40 = vadd.f32 %v1090_v38, %v1292_v36 }
  0xda   : > { %v561_v41 = vpop.f32.mrf.mxu0  ;;  %v689_v42 = vpop.f32.mrf.mxu1 }
  0xdb   : > { %818 = vst [vmem:[%s1297_s30 + $0x10] sm:$0xff] %v570_v39  ;;  %850 = vst [vmem:[%s1297_s30 + $0x110] sm:$0xff] %v698_v40  ;;  %v562_v43 = vadd.f32 %v1292_v36, %v561_v41  ;;  %v690_v44 = vadd.f32 %v1292_v36, %v689_v42 }
  0xdc   : > { %v1059_v45 = vpop.f32.mrf.mxu0  ;;  %v1091_v46 = vpop.f32.mrf.mxu1 }
  0xdd   : > { %816 = vst [vmem:[%s1297_s30] sm:$0xff] %v562_v43  ;;  %848 = vst [vmem:[%s1297_s30 + $0x100] sm:$0xff] %v690_v44  ;;  %v573_v47 = vadd.f32 %v1059_v45, %v1292_v36  ;;  %v701_v48 = vadd.f32 %v1091_v46, %v1292_v36 }
  0xde   : > { %v564_v49 = vpop.f32.mrf.mxu0  ;;  %v692_v50 = vpop.f32.mrf.mxu1 }
  0xdf   : > { %819 = vst [vmem:[%s1297_s30 + $0x18] sm:$0xff] %v573_v47  ;;  %851 = vst [vmem:[%s1297_s30 + $0x118] sm:$0xff] %v701_v48  ;;  %v565_v51 = vadd.f32 %v1292_v36, %v564_v49  ;;  %v693_v52 = vadd.f32 %v1292_v36, %v692_v50 }
  0xe0   : > { %v1062_v53 = vpop.f32.mrf.mxu0  ;;  %v1094_v54 = vpop.f32.mrf.mxu1 }
  0xe1   : > { %817 = vst [vmem:[%s1297_s30 + $0x8] sm:$0xff] %v565_v51  ;;  %849 = vst [vmem:[%s1297_s30 + $0x108] sm:$0xff] %v693_v52  ;;  %v586_v55 = vadd.f32 %v1062_v53, %v1292_v36  ;;  %v714_v56 = vadd.f32 %v1094_v54, %v1292_v36 }
  0xe2   : > { %v577_v57 = vpop.f32.mrf.mxu0  ;;  %v705_v58 = vpop.f32.mrf.mxu1 }
  0xe3   : > { %822 = vst [vmem:[%s1297_s30 + $0x30] sm:$0xff] %v586_v55  ;;  %854 = vst [vmem:[%s1297_s30 + $0x130] sm:$0xff] %v714_v56  ;;  %v578_v59 = vadd.f32 %v1292_v36, %v577_v57  ;;  %v706_v60 = vadd.f32 %v1292_v36, %v705_v58 }
  0xe4   : > { %v1063_v61 = vpop.f32.mrf.mxu0  ;;  %v1095_v62 = vpop.f32.mrf.mxu1 }
  0xe5   : > { %820 = vst [vmem:[%s1297_s30 + $0x20] sm:$0xff] %v578_v59  ;;  %852 = vst [vmem:[%s1297_s30 + $0x120] sm:$0xff] %v706_v60  ;;  %v589_v63 = vadd.f32 %v1063_v61, %v1292_v36  ;;  %v717_v0 = vadd.f32 %v1095_v62, %v1292_v36 }
  0xe6   : > { %v580_v1 = vpop.f32.mrf.mxu0  ;;  %v708_v2 = vpop.f32.mrf.mxu1 }
  0xe7   : > { %823 = vst [vmem:[%s1297_s30 + $0x38] sm:$0xff] %v589_v63  ;;  %855 = vst [vmem:[%s1297_s30 + $0x138] sm:$0xff] %v717_v0  ;;  %v581_v3 = vadd.f32 %v1292_v36, %v580_v1  ;;  %v709_v4 = vadd.f32 %v1292_v36, %v708_v2 }
  0xe8   : > { %v1066_v5 = vpop.f32.mrf.mxu0  ;;  %v1098_v6 = vpop.f32.mrf.mxu1 }
  0xe9   : > { %821 = vst [vmem:[%s1297_s30 + $0x28] sm:$0xff] %v581_v3  ;;  %853 = vst [vmem:[%s1297_s30 + $0x128] sm:$0xff] %v709_v4  ;;  %v602_v7 = vadd.f32 %v1066_v5, %v1292_v36  ;;  %v730_v8 = vadd.f32 %v1098_v6, %v1292_v36 }
  0xea   : > { %v593_v9 = vpop.f32.mrf.mxu0  ;;  %v721_v10 = vpop.f32.mrf.mxu1 }
  0xeb   : > { %826 = vst [vmem:[%s1297_s30 + $0x50] sm:$0xff] %v602_v7  ;;  %858 = vst [vmem:[%s1297_s30 + $0x150] sm:$0xff] %v730_v8  ;;  %v594_v11 = vadd.f32 %v1292_v36, %v593_v9  ;;  %v722_v12 = vadd.f32 %v1292_v36, %v721_v10 }
  0xec   : > { %v1067_v13 = vpop.f32.mrf.mxu0  ;;  %v1099_v14 = vpop.f32.mrf.mxu1 }
  0xed   : > { %824 = vst [vmem:[%s1297_s30 + $0x40] sm:$0xff] %v594_v11  ;;  %856 = vst [vmem:[%s1297_s30 + $0x140] sm:$0xff] %v722_v12  ;;  %v605_v15 = vadd.f32 %v1067_v13, %v1292_v36  ;;  %v733_v16 = vadd.f32 %v1099_v14, %v1292_v36 }
  0xee   : > { %v596_v17 = vpop.f32.mrf.mxu0  ;;  %v724_v18 = vpop.f32.mrf.mxu1 }
  0xef   : > { %827 = vst [vmem:[%s1297_s30 + $0x58] sm:$0xff] %v605_v15  ;;  %859 = vst [vmem:[%s1297_s30 + $0x158] sm:$0xff] %v733_v16  ;;  %v597_v19 = vadd.f32 %v1292_v36, %v596_v17  ;;  %v725_v20 = vadd.f32 %v1292_v36, %v724_v18 }
  0xf0   : > { %v1070_v21 = vpop.f32.mrf.mxu0  ;;  %v1102_v22 = vpop.f32.mrf.mxu1 }
  0xf1   : > { %825 = vst [vmem:[%s1297_s30 + $0x48] sm:$0xff] %v597_v19  ;;  %857 = vst [vmem:[%s1297_s30 + $0x148] sm:$0xff] %v725_v20  ;;  %v618_v23 = vadd.f32 %v1070_v21, %v1292_v36  ;;  %v746_v24 = vadd.f32 %v1102_v22, %v1292_v36 }
  0xf2   : > { %v609_v25 = vpop.f32.mrf.mxu0  ;;  %v737_v26 = vpop.f32.mrf.mxu1 }
  0xf3   : > { %830 = vst [vmem:[%s1297_s30 + $0x70] sm:$0xff] %v618_v23  ;;  %862 = vst [vmem:[%s1297_s30 + $0x170] sm:$0xff] %v746_v24  ;;  %v610_v27 = vadd.f32 %v1292_v36, %v609_v25  ;;  %v738_v28 = vadd.f32 %v1292_v36, %v737_v26 }
  0xf4   : > { %v1071_v29 = vpop.f32.mrf.mxu0  ;;  %v1103_v30 = vpop.f32.mrf.mxu1 }
  0xf5   : > { %828 = vst [vmem:[%s1297_s30 + $0x60] sm:$0xff] %v610_v27  ;;  %860 = vst [vmem:[%s1297_s30 + $0x160] sm:$0xff] %v738_v28  ;;  %v621_v31 = vadd.f32 %v1071_v29, %v1292_v36  ;;  %v749_v32 = vadd.f32 %v1103_v30, %v1292_v36 }
  0xf6   : > { %v612_v33 = vpop.f32.mrf.mxu0  ;;  %v740_v34 = vpop.f32.mrf.mxu1 }
  0xf7   : > { %831 = vst [vmem:[%s1297_s30 + $0x78] sm:$0xff] %v621_v31  ;;  %863 = vst [vmem:[%s1297_s30 + $0x178] sm:$0xff] %v749_v32  ;;  %v613_v35 = vadd.f32 %v1292_v36, %v612_v33  ;;  %v741_v37 = vadd.f32 %v1292_v36, %v740_v34 }
  0xf8   : > { %v1074_v38 = vpop.f32.mrf.mxu0  ;;  %v1106_v39 = vpop.f32.mrf.mxu1 }
  0xf9   : > { %829 = vst [vmem:[%s1297_s30 + $0x68] sm:$0xff] %v613_v35  ;;  %861 = vst [vmem:[%s1297_s30 + $0x168] sm:$0xff] %v741_v37  ;;  %v634_v40 = vadd.f32 %v1074_v38, %v1292_v36  ;;  %v762_v41 = vadd.f32 %v1106_v39, %v1292_v36 }
  0xfa   : > { %v625_v42 = vpop.f32.mrf.mxu0  ;;  %v753_v43 = vpop.f32.mrf.mxu1 }
  0xfb   : > { %834 = vst [vmem:[%s1297_s30 + $0x90] sm:$0xff] %v634_v40  ;;  %866 = vst [vmem:[%s1297_s30 + $0x190] sm:$0xff] %v762_v41  ;;  %v626_v44 = vadd.f32 %v1292_v36, %v625_v42  ;;  %v754_v45 = vadd.f32 %v1292_v36, %v753_v43 }
  0xfc   : > { %v1075_v46 = vpop.f32.mrf.mxu0  ;;  %v1107_v47 = vpop.f32.mrf.mxu1 }
  0xfd   : > { %832 = vst [vmem:[%s1297_s30 + $0x80] sm:$0xff] %v626_v44  ;;  %864 = vst [vmem:[%s1297_s30 + $0x180] sm:$0xff] %v754_v45  ;;  %v637_v48 = vadd.f32 %v1075_v46, %v1292_v36  ;;  %v765_v49 = vadd.f32 %v1107_v47, %v1292_v36 }
  0xfe   : > { %v628_v50 = vpop.f32.mrf.mxu0  ;;  %v756_v51 = vpop.f32.mrf.mxu1 }
  0xff   : > { %835 = vst [vmem:[%s1297_s30 + $0x98] sm:$0xff] %v637_v48  ;;  %867 = vst [vmem:[%s1297_s30 + $0x198] sm:$0xff] %v765_v49  ;;  %v629_v52 = vadd.f32 %v1292_v36, %v628_v50  ;;  %v757_v53 = vadd.f32 %v1292_v36, %v756_v51 }
 0x100   : > { %v1078_v54 = vpop.f32.mrf.mxu0  ;;  %v1110_v55 = vpop.f32.mrf.mxu1 }
 0x101   : > { %833 = vst [vmem:[%s1297_s30 + $0x88] sm:$0xff] %v629_v52  ;;  %865 = vst [vmem:[%s1297_s30 + $0x188] sm:$0xff] %v757_v53  ;;  %v650_v56 = vadd.f32 %v1078_v54, %v1292_v36  ;;  %v778_v57 = vadd.f32 %v1110_v55, %v1292_v36 }
 0x102   : > { %v641_v58 = vpop.f32.mrf.mxu0  ;;  %v769_v59 = vpop.f32.mrf.mxu1 }
 0x103   : > { %838 = vst [vmem:[%s1297_s30 + $0xb0] sm:$0xff] %v650_v56  ;;  %870 = vst [vmem:[%s1297_s30 + $0x1b0] sm:$0xff] %v778_v57  ;;  %v642_v60 = vadd.f32 %v1292_v36, %v641_v58  ;;  %v770_v61 = vadd.f32 %v1292_v36, %v769_v59 }
 0x104   : > { %v1079_v62 = vpop.f32.mrf.mxu0  ;;  %v1111_v63 = vpop.f32.mrf.mxu1 }
 0x105   : > { %836 = vst [vmem:[%s1297_s30 + $0xa0] sm:$0xff] %v642_v60  ;;  %868 = vst [vmem:[%s1297_s30 + $0x1a0] sm:$0xff] %v770_v61  ;;  %v653_v0 = vadd.f32 %v1079_v62, %v1292_v36  ;;  %v781_v1 = vadd.f32 %v1111_v63, %v1292_v36 }
 0x106   : > { %v644_v2 = vpop.f32.mrf.mxu0  ;;  %v772_v3 = vpop.f32.mrf.mxu1 }
 0x107   : > { %839 = vst [vmem:[%s1297_s30 + $0xb8] sm:$0xff] %v653_v0  ;;  %871 = vst [vmem:[%s1297_s30 + $0x1b8] sm:$0xff] %v781_v1  ;;  %v645_v4 = vadd.f32 %v1292_v36, %v644_v2  ;;  %v773_v5 = vadd.f32 %v1292_v36, %v772_v3 }
 0x108   : > { %v1082_v6 = vpop.f32.mrf.mxu0  ;;  %v1114_v7 = vpop.f32.mrf.mxu1 }
 0x109   : > { %837 = vst [vmem:[%s1297_s30 + $0xa8] sm:$0xff] %v645_v4  ;;  %869 = vst [vmem:[%s1297_s30 + $0x1a8] sm:$0xff] %v773_v5  ;;  %v666_v8 = vadd.f32 %v1082_v6, %v1292_v36  ;;  %v794_v9 = vadd.f32 %v1114_v7, %v1292_v36 }
 0x10a   : > { %v657_v10 = vpop.f32.mrf.mxu0  ;;  %v785_v11 = vpop.f32.mrf.mxu1 }
 0x10b   : > { %842 = vst [vmem:[%s1297_s30 + $0xd0] sm:$0xff] %v666_v8  ;;  %874 = vst [vmem:[%s1297_s30 + $0x1d0] sm:$0xff] %v794_v9  ;;  %v658_v12 = vadd.f32 %v1292_v36, %v657_v10  ;;  %v786_v13 = vadd.f32 %v1292_v36, %v785_v11 }
 0x10c   : > { %v1083_v14 = vpop.f32.mrf.mxu0  ;;  %v1115_v15 = vpop.f32.mrf.mxu1 }
 0x10d   : > { %840 = vst [vmem:[%s1297_s30 + $0xc0] sm:$0xff] %v658_v12  ;;  %872 = vst [vmem:[%s1297_s30 + $0x1c0] sm:$0xff] %v786_v13  ;;  %v669_v16 = vadd.f32 %v1083_v14, %v1292_v36  ;;  %v797_v17 = vadd.f32 %v1115_v15, %v1292_v36 }
 0x10e   : > { %v660_v18 = vpop.f32.mrf.mxu0  ;;  %v788_v19 = vpop.f32.mrf.mxu1 }
 0x10f   : > { %843 = vst [vmem:[%s1297_s30 + $0xd8] sm:$0xff] %v669_v16  ;;  %875 = vst [vmem:[%s1297_s30 + $0x1d8] sm:$0xff] %v797_v17  ;;  %v661_v20 = vadd.f32 %v1292_v36, %v660_v18  ;;  %v789_v21 = vadd.f32 %v1292_v36, %v788_v19 }
 0x110   : > { %v1086_v22 = vpop.f32.mrf.mxu0  ;;  %v1118_v23 = vpop.f32.mrf.mxu1 }
 0x111   : > { %841 = vst [vmem:[%s1297_s30 + $0xc8] sm:$0xff] %v661_v20  ;;  %873 = vst [vmem:[%s1297_s30 + $0x1c8] sm:$0xff] %v789_v21  ;;  %v682_v24 = vadd.f32 %v1086_v22, %v1292_v36  ;;  %v810_v25 = vadd.f32 %v1118_v23, %v1292_v36 }
 0x112   : > { %v673_v26 = vpop.f32.mrf.mxu0  ;;  %v801_v27 = vpop.f32.mrf.mxu1 }
 0x113   : > { %846 = vst [vmem:[%s1297_s30 + $0xf0] sm:$0xff] %v682_v24  ;;  %878 = vst [vmem:[%s1297_s30 + $0x1f0] sm:$0xff] %v810_v25  ;;  %v674_v28 = vadd.f32 %v1292_v36, %v673_v26  ;;  %v802_v29 = vadd.f32 %v1292_v36, %v801_v27 }
 0x114   : > { %v1087_v30 = vpop.f32.mrf.mxu0  ;;  %v1119_v31 = vpop.f32.mrf.mxu1 }
 0x115   : > { %844 = vst [vmem:[%s1297_s30 + $0xe0] sm:$0xff] %v674_v28  ;;  %876 = vst [vmem:[%s1297_s30 + $0x1e0] sm:$0xff] %v802_v29  ;;  %v685_v32 = vadd.f32 %v1087_v30, %v1292_v36  ;;  %v813_v33 = vadd.f32 %v1119_v31, %v1292_v36 }
 0x116   : > { %v676_v34 = vpop.f32.mrf.mxu0  ;;  %v804_v35 = vpop.f32.mrf.mxu1 }
 0x117   : > { %847 = vst [vmem:[%s1297_s30 + $0xf8] sm:$0xff] %v685_v32  ;;  %879 = vst [vmem:[%s1297_s30 + $0x1f8] sm:$0xff] %v813_v33  ;;  %v677_v37 = vadd.f32 %v1292_v36, %v676_v34  ;;  %v805_v38 = vadd.f32 %v1292_v36, %v804_v35 }
 0x119   : > { %845 = vst [vmem:[%s1297_s30 + $0xe8] sm:$0xff] %v677_v37  ;;  %877 = vst [vmem:[%s1297_s30 + $0x1e8] sm:$0xff] %v805_v38 }
 0x11a PF: > { %s13_s12 = sadd.s32 1, %s1177_s12  }
 0x11b   : > { %p10_p4 = scmp.ge.s32.totalorder %s13_s12, 10  }
 0x11d   :  { %12 = sbr.rel (!%p10_p4) target bundleno = 1 (0x1), region = 62 }

// kernel: _lstm_event_forward_impl.3
= control target key start
LH: loop header
LB: loop body
LE: loop exit
PB: predicated region body
PF: predicated region fallthrough
CT: control target
= control target key end

     0   :  { %9 = vsyncpa [#allocation5], 0  ;;  %s8697_s15 = smov 0   ;;  %s8699_s16 = smov 0   ;;  %s13766_s0 = inlined_call_operand.vmem [shape: f32[8,2,256,128], index: 0, kind: input, shape index: {}]   ;;  %s13767_s1 = inlined_call_operand.vmem [shape: bf16[288,128], index: 1, kind: input, shape index: {}]   ;;  %s13768_s2 = inlined_call_operand.vmem [shape: f32[128,128], index: 2, kind: input, shape index: {}]   ;;  %s13769_s3 = inlined_call_operand.vmem [shape: f32[8,128], index: 3, kind: input, shape index: {}]   ;;  %s13770_s4 = inlined_call_operand.hbm [shape: f32[2,16,16,32], index: 4, kind: output, shape index: {}]  }
   0x1   :  { %s8701_s17 = smov 0  }
   0x2 LB: > { %s7000_s18 = sadd.s32 4294967295, %s8660_s17   ;;  %s24_s19 = sadd.s32 1, %s8656_s16  ;;  %s8660_s17 = sphi %s8701_s17, %s15_s17   ;;  %s8656_s16 = sphi %s8699_s16, %s14539_s16   ;;  %s8652_s15 = sphi %s8697_s15, %s14538_s15  }
   0x3   : > { %p25_p0 = scmp.ge.s32.totalorder %s24_s19, 8  ;;  %p7003_p1 = scmp.ge.s32.totalorder %s8660_s17, 1 }
   0x4   : > { %p183_p2 = scmp.lt.s32.totalorder %s8660_s17, 9 }
   0x5   : > { %s14541_s19 = smov (%p25_p0, %s24_s19), 0 }
   0x6   : > { %p184_p3 = pnand %p7003_p1, %p183_p2 }
   0x8   : > { %187 = sbr.rel (%p184_p3) target bundleno = 2007 (0x7d7), region = 36 }
   0xd   : > { %p210_p4 = scmp.lt.s32.totalorder %s8652_s15, 7  ;;  %p7006_p5 = scmp.ne.s32.totalorder %s8652_s15, 0 }
   0xf   : > { %s211_s20 = scalar_select %p210_p4, %s8652_s15, 7 }
  0x10   : > { %225 = sbr.rel (%p7006_p5) target bundleno = 108 (0x6c), region = 40 }
  0x11   : > { %s7068_s21 = sshll.u32 %s211_s20, 9 }
  0x12   : > { %s8723_s24 = scalar_lea.vmem %s13766_s0, %s7068_s21 }
  0x15   : > { %vm226_vm0 = vcmask 261120   ;;  %vm229_vm1 = vcmask 254976   ;;  %v8662_v0 = vmov 0.0  }
  0x16   : > { %227 = vst.msk [vmem:[#allocation2] sm:$0xff] %vm226_vm0, %v8662_v0  ;;  %228 = vst.msk [vmem:[#allocation2 + $0x8] sm:$0xff] %vm226_vm0, %v8662_v0 }
  0x17   : > { %231 = vst.msk [vmem:[#allocation2 + $0x18] sm:$0xff] %vm226_vm0, %v8662_v0  ;;  %232 = vst.msk [vmem:[#allocation2 + $0x20] sm:$0xff] %vm226_vm0, %v8662_v0 }
  0x18   : > { %234 = vst.msk [vmem:[#allocation2 + $0x30] sm:$0xff] %vm226_vm0, %v8662_v0  ;;  %235 = vst.msk [vmem:[#allocation2 + $0x38] sm:$0xff] %vm226_vm0, %v8662_v0 }
  0x19   : > { %237 = vst.msk [vmem:[#allocation2 + $0x48] sm:$0xff] %vm226_vm0, %v8662_v0  ;;  %238 = vst.msk [vmem:[#allocation2 + $0x50] sm:$0xff] %vm226_vm0, %v8662_v0 }
  0x1a   : > { %240 = vst.msk [vmem:[#allocation2 + $0x60] sm:$0xff] %vm226_vm0, %v8662_v0  ;;  %241 = vst.msk [vmem:[#allocation2 + $0x68] sm:$0xff] %vm226_vm0, %v8662_v0 }
  0x1b   : > { %243 = vst.msk [vmem:[#allocation2 + $0x78] sm:$0xff] %vm226_vm0, %v8662_v0  ;;  %244 = vst.msk [vmem:[#allocation2 + $0x80] sm:$0xff] %vm226_vm0, %v8662_v0 }
  0x1c   : > { %246 = vst.msk [vmem:[#allocation2 + $0x90] sm:$0xff] %vm226_vm0, %v8662_v0  ;;  %247 = vst.msk [vmem:[#allocation2 + $0x98] sm:$0xff] %vm226_vm0, %v8662_v0 }
  0x1d   : > { %249 = vst.msk [vmem:[#allocation2 + $0xa8] sm:$0xff] %vm226_vm0, %v8662_v0  ;;  %250 = vst.msk [vmem:[#allocation2 + $0xb0] sm:$0xff] %vm226_vm0, %v8662_v0 }
  0x1e   : > { %252 = vst.msk [vmem:[#allocation2 + $0xc0] sm:$0xff] %vm226_vm0, %v8662_v0  ;;  %253 = vst.msk [vmem:[#allocation2 + $0xc8] sm:$0xff] %vm226_vm0, %v8662_v0 }
  0x1f   : > { %255 = vst.msk [vmem:[#allocation2 + $0xd8] sm:$0xff] %vm226_vm0, %v8662_v0  ;;  %256 = vst.msk [vmem:[#allocation2 + $0xe0] sm:$0xff] %vm226_vm0, %v8662_v0 }
  0x20   : > { %258 = vst.msk [vmem:[#allocation2 + $0xf0] sm:$0xff] %vm226_vm0, %v8662_v0  ;;  %259 = vst.msk [vmem:[#allocation2 + $0xf8] sm:$0xff] %vm226_vm0, %v8662_v0 }
  0x21   : > { %261 = vst.msk [vmem:[#allocation2 + $0x108] sm:$0xff] %vm226_vm0, %v8662_v0  ;;  %262 = vst.msk [vmem:[#allocation2 + $0x110] sm:$0xff] %vm226_vm0, %v8662_v0 }
  0x22   : > { %264 = vst.msk [vmem:[#allocation2 + $0x120] sm:$0xff] %vm226_vm0, %v8662_v0  ;;  %265 = vst.msk [vmem:[#allocation2 + $0x128] sm:$0xff] %vm226_vm0, %v8662_v0 }
  0x23   : > { %267 = vst.msk [vmem:[#allocation2 + $0x138] sm:$0xff] %vm226_vm0, %v8662_v0  ;;  %268 = vst.msk [vmem:[#allocation2 + $0x140] sm:$0xff] %vm226_vm0, %v8662_v0 }
  0x24   : > { %270 = vst.msk [vmem:[#allocation2 + $0x150] sm:$0xff] %vm226_vm0, %v8662_v0  ;;  %271 = vst.msk [vmem:[#allocation2 + $0x158] sm:$0xff] %vm226_vm0, %v8662_v0 }
  0x25   : > { %273 = vst.msk [vmem:[#allocation2 + $0x168] sm:$0xff] %vm226_vm0, %v8662_v0  ;;  %274 = vst.msk [vmem:[#allocation2 + $0x170] sm:$0xff] %vm226_vm0, %v8662_v0 }
  0x26   : > { %276 = vst.msk [vmem:[#allocation2 + $0x180] sm:$0xff] %vm226_vm0, %v8662_v0  ;;  %277 = vst.msk [vmem:[#allocation2 + $0x188] sm:$0xff] %vm226_vm0, %v8662_v0 }
  0x27   : > { %279 = vst.msk [vmem:[#allocation2 + $0x198] sm:$0xff] %vm226_vm0, %v8662_v0  ;;  %280 = vst.msk [vmem:[#allocation2 + $0x1a0] sm:$0xff] %vm226_vm0, %v8662_v0 }
  0x28   : > { %282 = vst.msk [vmem:[#allocation2 + $0x1b0] sm:$0xff] %vm226_vm0, %v8662_v0  ;;  %283 = vst.msk [vmem:[#allocation2 + $0x1b8] sm:$0xff] %vm226_vm0, %v8662_v0 }
  0x29   : > { %285 = vst.msk [vmem:[#allocation2 + $0x1c8] sm:$0xff] %vm226_vm0, %v8662_v0  ;;  %286 = vst.msk [vmem:[#allocation2 + $0x1d0] sm:$0xff] %vm226_vm0, %v8662_v0 }
  0x2a   : > { %288 = vst.msk [vmem:[#allocation2 + $0x1e0] sm:$0xff] %vm226_vm0, %v8662_v0  ;;  %289 = vst.msk [vmem:[#allocation2 + $0x1e8] sm:$0xff] %vm226_vm0, %v8662_v0 }
  0x2b   : > { %291 = vst.msk [vmem:[#allocation2 + $0x1f8] sm:$0xff] %vm226_vm0, %v8662_v0  ;;  %292 = vst.msk [vmem:[#allocation2 + $0x200] sm:$0xff] %vm226_vm0, %v8662_v0 }
  0x2c   : > { %294 = vst.msk [vmem:[#allocation2 + $0x210] sm:$0xff] %vm226_vm0, %v8662_v0  ;;  %295 = vst.msk [vmem:[#allocation2 + $0x218] sm:$0xff] %vm226_vm0, %v8662_v0 }
  0x2d   : > { %297 = vst.msk [vmem:[#allocation2 + $0x228] sm:$0xff] %vm226_vm0, %v8662_v0  ;;  %298 = vst.msk [vmem:[#allocation2 + $0x230] sm:$0xff] %vm226_vm0, %v8662_v0 }
  0x2e   : > { %300 = vst.msk [vmem:[#allocation2 + $0x240] sm:$0xff] %vm226_vm0, %v8662_v0  ;;  %301 = vst.msk [vmem:[#allocation2 + $0x248] sm:$0xff] %vm226_vm0, %v8662_v0 }
  0x2f   : > { %303 = vst.msk [vmem:[#allocation2 + $0x258] sm:$0xff] %vm226_vm0, %v8662_v0  ;;  %304 = vst.msk [vmem:[#allocation2 + $0x260] sm:$0xff] %vm226_vm0, %v8662_v0 }
  0x30   : > { %306 = vst.msk [vmem:[#allocation2 + $0x270] sm:$0xff] %vm226_vm0, %v8662_v0  ;;  %307 = vst.msk [vmem:[#allocation2 + $0x278] sm:$0xff] %vm226_vm0, %v8662_v0 }
  0x31   : > { %309 = vst.msk [vmem:[#allocation2 + $0x288] sm:$0xff] %vm226_vm0, %v8662_v0  ;;  %310 = vst.msk [vmem:[#allocation2 + $0x290] sm:$0xff] %vm226_vm0, %v8662_v0 }
  0x32   : > { %312 = vst.msk [vmem:[#allocation2 + $0x2a0] sm:$0xff] %vm226_vm0, %v8662_v0  ;;  %313 = vst.msk [vmem:[#allocation2 + $0x2a8] sm:$0xff] %vm226_vm0, %v8662_v0 }
  0x33   : > { %315 = vst.msk [vmem:[#allocation2 + $0x2b8] sm:$0xff] %vm226_vm0, %v8662_v0  ;;  %316 = vst.msk [vmem:[#allocation2 + $0x2c0] sm:$0xff] %vm226_vm0, %v8662_v0 }
  0x34   : > { %318 = vst.msk [vmem:[#allocation2 + $0x2d0] sm:$0xff] %vm226_vm0, %v8662_v0  ;;  %319 = vst.msk [vmem:[#allocation2 + $0x2d8] sm:$0xff] %vm226_vm0, %v8662_v0 }
  0x35   : > { %321 = vst.msk [vmem:[#allocation2 + $0x2e8] sm:$0xff] %vm226_vm0, %v8662_v0  ;;  %322 = vst.msk [vmem:[#allocation2 + $0x2f0] sm:$0xff] %vm226_vm0, %v8662_v0 }
  0x36   : > { %324 = vst.msk [vmem:[#allocation2 + $0x300] sm:$0xff] %vm226_vm0, %v8662_v0  ;;  %325 = vst.msk [vmem:[#allocation2 + $0x308] sm:$0xff] %vm226_vm0, %v8662_v0 }
  0x37   : > { %327 = vst.msk [vmem:[#allocation2 + $0x318] sm:$0xff] %vm226_vm0, %v8662_v0  ;;  %328 = vst.msk [vmem:[#allocation2 + $0x320] sm:$0xff] %vm226_vm0, %v8662_v0 }
  0x38   : > { %330 = vst.msk [vmem:[#allocation2 + $0x330] sm:$0xff] %vm226_vm0, %v8662_v0  ;;  %331 = vst.msk [vmem:[#allocation2 + $0x338] sm:$0xff] %vm226_vm0, %v8662_v0 }
  0x39   : > { %333 = vst.msk [vmem:[#allocation2 + $0x348] sm:$0xff] %vm226_vm0, %v8662_v0  ;;  %334 = vst.msk [vmem:[#allocation2 + $0x350] sm:$0xff] %vm226_vm0, %v8662_v0 }
  0x3a   : > { %336 = vst.msk [vmem:[#allocation3] sm:$0xff] %vm226_vm0, %v8662_v0  ;;  %337 = vst.msk [vmem:[#allocation3 + $0x8] sm:$0xff] %vm226_vm0, %v8662_v0 }
  0x3b   : > { %338 = vst.msk [vmem:[#allocation3 + $0x10] sm:$0xff] %vm226_vm0, %v8662_v0  ;;  %339 = vst.msk [vmem:[#allocation3 + $0x18] sm:$0xff] %vm226_vm0, %v8662_v0 }
  0x3c   : > { %340 = vst.msk [vmem:[#allocation3 + $0x20] sm:$0xff] %vm226_vm0, %v8662_v0  ;;  %341 = vst.msk [vmem:[#allocation3 + $0x28] sm:$0xff] %vm226_vm0, %v8662_v0 }
  0x3d   : > { %342 = vst.msk [vmem:[#allocation3 + $0x30] sm:$0xff] %vm226_vm0, %v8662_v0  ;;  %343 = vst.msk [vmem:[#allocation3 + $0x38] sm:$0xff] %vm226_vm0, %v8662_v0 }
  0x3e   : > { %344 = vst.msk [vmem:[#allocation3 + $0x40] sm:$0xff] %vm226_vm0, %v8662_v0  ;;  %345 = vst.msk [vmem:[#allocation3 + $0x48] sm:$0xff] %vm226_vm0, %v8662_v0 }
  0x3f   : > { %346 = vst.msk [vmem:[#allocation3 + $0x50] sm:$0xff] %vm226_vm0, %v8662_v0  ;;  %347 = vst.msk [vmem:[#allocation3 + $0x58] sm:$0xff] %vm226_vm0, %v8662_v0 }
  0x40   : > { %348 = vst.msk [vmem:[#allocation3 + $0x60] sm:$0xff] %vm226_vm0, %v8662_v0  ;;  %349 = vst.msk [vmem:[#allocation3 + $0x68] sm:$0xff] %vm226_vm0, %v8662_v0 }
  0x41   : > { %350 = vst.msk [vmem:[#allocation3 + $0x70] sm:$0xff] %vm226_vm0, %v8662_v0  ;;  %351 = vst.msk [vmem:[#allocation3 + $0x78] sm:$0xff] %vm226_vm0, %v8662_v0 }
  0x42   : > { %352 = vst.msk [vmem:[#allocation3 + $0x80] sm:$0xff] %vm226_vm0, %v8662_v0  ;;  %353 = vst.msk [vmem:[#allocation3 + $0x88] sm:$0xff] %vm226_vm0, %v8662_v0 }
  0x43   : > { %354 = vst.msk [vmem:[#allocation3 + $0x90] sm:$0xff] %vm226_vm0, %v8662_v0  ;;  %355 = vst.msk [vmem:[#allocation3 + $0x98] sm:$0xff] %vm226_vm0, %v8662_v0 }
  0x44   : > { %356 = vst.msk [vmem:[#allocation3 + $0xa0] sm:$0xff] %vm226_vm0, %v8662_v0  ;;  %357 = vst.msk [vmem:[#allocation3 + $0xa8] sm:$0xff] %vm226_vm0, %v8662_v0 }
  0x45   : > { %358 = vst.msk [vmem:[#allocation3 + $0xb0] sm:$0xff] %vm226_vm0, %v8662_v0  ;;  %359 = vst.msk [vmem:[#allocation3 + $0xb8] sm:$0xff] %vm226_vm0, %v8662_v0 }
  0x46   : > { %360 = vst.msk [vmem:[#allocation3 + $0xc0] sm:$0xff] %vm226_vm0, %v8662_v0  ;;  %361 = vst.msk [vmem:[#allocation3 + $0xc8] sm:$0xff] %vm226_vm0, %v8662_v0 }
  0x47   : > { %362 = vst.msk [vmem:[#allocation3 + $0xd0] sm:$0xff] %vm226_vm0, %v8662_v0  ;;  %363 = vst.msk [vmem:[#allocation3 + $0xd8] sm:$0xff] %vm226_vm0, %v8662_v0 }
  0x48   : > { %364 = vst.msk [vmem:[#allocation3 + $0xe0] sm:$0xff] %vm226_vm0, %v8662_v0  ;;  %365 = vst.msk [vmem:[#allocation3 + $0xe8] sm:$0xff] %vm226_vm0, %v8662_v0 }
  0x49   : > { %366 = vst.msk [vmem:[#allocation3 + $0xf0] sm:$0xff] %vm226_vm0, %v8662_v0  ;;  %367 = vst.msk [vmem:[#allocation3 + $0xf8] sm:$0xff] %vm226_vm0, %v8662_v0 }
  0x4a   : > { %368 = vst.msk [vmem:[#allocation3 + $0x100] sm:$0xff] %vm226_vm0, %v8662_v0  ;;  %369 = vst.msk [vmem:[#allocation3 + $0x108] sm:$0xff] %vm226_vm0, %v8662_v0 }
  0x4b   : > { %370 = vst.msk [vmem:[#allocation3 + $0x110] sm:$0xff] %vm226_vm0, %v8662_v0  ;;  %371 = vst.msk [vmem:[#allocation3 + $0x118] sm:$0xff] %vm226_vm0, %v8662_v0 }
  0x4c   : > { %372 = vst.msk [vmem:[#allocation3 + $0x120] sm:$0xff] %vm226_vm0, %v8662_v0  ;;  %373 = vst.msk [vmem:[#allocation3 + $0x128] sm:$0xff] %vm226_vm0, %v8662_v0 }
  0x4d   : > { %374 = vst.msk [vmem:[#allocation3 + $0x130] sm:$0xff] %vm226_vm0, %v8662_v0  ;;  %375 = vst.msk [vmem:[#allocation3 + $0x138] sm:$0xff] %vm226_vm0, %v8662_v0 }
  0x4e   : > { %376 = vst.msk [vmem:[#allocation3 + $0x140] sm:$0xff] %vm226_vm0, %v8662_v0  ;;  %377 = vst.msk [vmem:[#allocation3 + $0x148] sm:$0xff] %vm226_vm0, %v8662_v0 }
  0x4f   : > { %378 = vst.msk [vmem:[#allocation3 + $0x150] sm:$0xff] %vm226_vm0, %v8662_v0  ;;  %379 = vst.msk [vmem:[#allocation3 + $0x158] sm:$0xff] %vm226_vm0, %v8662_v0 }
  0x50   : > { %380 = vst.msk [vmem:[#allocation3 + $0x160] sm:$0xff] %vm226_vm0, %v8662_v0  ;;  %381 = vst.msk [vmem:[#allocation3 + $0x168] sm:$0xff] %vm226_vm0, %v8662_v0 }
  0x51   : > { %382 = vst.msk [vmem:[#allocation3 + $0x170] sm:$0xff] %vm226_vm0, %v8662_v0  ;;  %383 = vst.msk [vmem:[#allocation3 + $0x178] sm:$0xff] %vm226_vm0, %v8662_v0 }
  0x52   : > { %384 = vst.msk [vmem:[#allocation3 + $0x180] sm:$0xff] %vm226_vm0, %v8662_v0  ;;  %385 = vst.msk [vmem:[#allocation3 + $0x188] sm:$0xff] %vm226_vm0, %v8662_v0 }
  0x53   : > { %386 = vst.msk [vmem:[#allocation3 + $0x190] sm:$0xff] %vm226_vm0, %v8662_v0  ;;  %387 = vst.msk [vmem:[#allocation3 + $0x198] sm:$0xff] %vm226_vm0, %v8662_v0 }
  0x54   : > { %388 = vst.msk [vmem:[#allocation3 + $0x1a0] sm:$0xff] %vm226_vm0, %v8662_v0  ;;  %389 = vst.msk [vmem:[#allocation3 + $0x1a8] sm:$0xff] %vm226_vm0, %v8662_v0 }
  0x55   : > { %390 = vst.msk [vmem:[#allocation3 + $0x1b0] sm:$0xff] %vm226_vm0, %v8662_v0  ;;  %391 = vst.msk [vmem:[#allocation3 + $0x1b8] sm:$0xff] %vm226_vm0, %v8662_v0 }
  0x56   : > { %392 = vst.msk [vmem:[#allocation3 + $0x1c0] sm:$0xff] %vm226_vm0, %v8662_v0  ;;  %393 = vst.msk [vmem:[#allocation3 + $0x1c8] sm:$0xff] %vm226_vm0, %v8662_v0 }
  0x57   : > { %394 = vst.msk [vmem:[#allocation3 + $0x1d0] sm:$0xff] %vm226_vm0, %v8662_v0  ;;  %395 = vst.msk [vmem:[#allocation3 + $0x1d8] sm:$0xff] %vm226_vm0, %v8662_v0 }
  0x58   : > { %396 = vst.msk [vmem:[#allocation3 + $0x1e0] sm:$0xff] %vm226_vm0, %v8662_v0  ;;  %397 = vst.msk [vmem:[#allocation3 + $0x1e8] sm:$0xff] %vm226_vm0, %v8662_v0 }
  0x59   : > { %398 = vst.msk [vmem:[#allocation3 + $0x1f0] sm:$0xff] %vm226_vm0, %v8662_v0  ;;  %399 = vst.msk [vmem:[#allocation3 + $0x1f8] sm:$0xff] %vm226_vm0, %v8662_v0 }
  0x5a   : > { %230 = vst.msk [vmem:[#allocation2 + $0x10] sm:$0x3] %vm229_vm1, %v8662_v0  ;;  %233 = vst.msk [vmem:[#allocation2 + $0x28] sm:$0x3] %vm229_vm1, %v8662_v0 }
  0x5b   : > { %236 = vst.msk [vmem:[#allocation2 + $0x40] sm:$0x3] %vm229_vm1, %v8662_v0  ;;  %239 = vst.msk [vmem:[#allocation2 + $0x58] sm:$0x3] %vm229_vm1, %v8662_v0 }
  0x5c   : > { %242 = vst.msk [vmem:[#allocation2 + $0x70] sm:$0x3] %vm229_vm1, %v8662_v0  ;;  %245 = vst.msk [vmem:[#allocation2 + $0x88] sm:$0x3] %vm229_vm1, %v8662_v0 }
  0x5d   : > { %248 = vst.msk [vmem:[#allocation2 + $0xa0] sm:$0x3] %vm229_vm1, %v8662_v0  ;;  %251 = vst.msk [vmem:[#allocation2 + $0xb8] sm:$0x3] %vm229_vm1, %v8662_v0 }
  0x5e   : > { %254 = vst.msk [vmem:[#allocation2 + $0xd0] sm:$0x3] %vm229_vm1, %v8662_v0  ;;  %257 = vst.msk [vmem:[#allocation2 + $0xe8] sm:$0x3] %vm229_vm1, %v8662_v0 }
  0x5f   : > { %260 = vst.msk [vmem:[#allocation2 + $0x100] sm:$0x3] %vm229_vm1, %v8662_v0  ;;  %263 = vst.msk [vmem:[#allocation2 + $0x118] sm:$0x3] %vm229_vm1, %v8662_v0 }
  0x60   : > { %266 = vst.msk [vmem:[#allocation2 + $0x130] sm:$0x3] %vm229_vm1, %v8662_v0  ;;  %269 = vst.msk [vmem:[#allocation2 + $0x148] sm:$0x3] %vm229_vm1, %v8662_v0 }
  0x61   : > { %272 = vst.msk [vmem:[#allocation2 + $0x160] sm:$0x3] %vm229_vm1, %v8662_v0  ;;  %275 = vst.msk [vmem:[#allocation2 + $0x178] sm:$0x3] %vm229_vm1, %v8662_v0 }
  0x62   : > { %278 = vst.msk [vmem:[#allocation2 + $0x190] sm:$0x3] %vm229_vm1, %v8662_v0  ;;  %281 = vst.msk [vmem:[#allocation2 + $0x1a8] sm:$0x3] %vm229_vm1, %v8662_v0 }
  0x63   : > { %284 = vst.msk [vmem:[#allocation2 + $0x1c0] sm:$0x3] %vm229_vm1, %v8662_v0  ;;  %287 = vst.msk [vmem:[#allocation2 + $0x1d8] sm:$0x3] %vm229_vm1, %v8662_v0 }
  0x64   : > { %290 = vst.msk [vmem:[#allocation2 + $0x1f0] sm:$0x3] %vm229_vm1, %v8662_v0  ;;  %293 = vst.msk [vmem:[#allocation2 + $0x208] sm:$0x3] %vm229_vm1, %v8662_v0 }
  0x65   : > { %296 = vst.msk [vmem:[#allocation2 + $0x220] sm:$0x3] %vm229_vm1, %v8662_v0  ;;  %299 = vst.msk [vmem:[#allocation2 + $0x238] sm:$0x3] %vm229_vm1, %v8662_v0 }
  0x66   : > { %302 = vst.msk [vmem:[#allocation2 + $0x250] sm:$0x3] %vm229_vm1, %v8662_v0  ;;  %305 = vst.msk [vmem:[#allocation2 + $0x268] sm:$0x3] %vm229_vm1, %v8662_v0 }
  0x67   : > { %308 = vst.msk [vmem:[#allocation2 + $0x280] sm:$0x3] %vm229_vm1, %v8662_v0  ;;  %311 = vst.msk [vmem:[#allocation2 + $0x298] sm:$0x3] %vm229_vm1, %v8662_v0 }
  0x68   : > { %314 = vst.msk [vmem:[#allocation2 + $0x2b0] sm:$0x3] %vm229_vm1, %v8662_v0  ;;  %317 = vst.msk [vmem:[#allocation2 + $0x2c8] sm:$0x3] %vm229_vm1, %v8662_v0 }
  0x69   : > { %320 = vst.msk [vmem:[#allocation2 + $0x2e0] sm:$0x3] %vm229_vm1, %v8662_v0  ;;  %323 = vst.msk [vmem:[#allocation2 + $0x2f8] sm:$0x3] %vm229_vm1, %v8662_v0 }
  0x6a   : > { %326 = vst.msk [vmem:[#allocation2 + $0x310] sm:$0x3] %vm229_vm1, %v8662_v0  ;;  %329 = vst.msk [vmem:[#allocation2 + $0x328] sm:$0x3] %vm229_vm1, %v8662_v0 }
  0x6b   : > { %332 = vst.msk [vmem:[#allocation2 + $0x340] sm:$0x3] %vm229_vm1, %v8662_v0  ;;  %335 = vst.msk [vmem:[#allocation2 + $0x358] sm:$0x3] %vm229_vm1, %v8662_v0 }
  0x6c PF: > { %v441_v1 = vld [vmem:[#allocation2 + $0x31] sm:$0xff]  ;;  %v442_v2 = vld [vmem:[#allocation2 + $0x39] sm:$0xff]  ;;  %v437_v3 = vld [vmem:[#allocation2 + $0x1] sm:$0xff]  ;;  %s8663_s25 = smov 32   ;;  %s8664_s26 = smov 64   ;;  %vm1463_vm2 = vcmask 261120  }
  0x6d   : > { %v9070_v4 = vpack.i.bf16 %v442_v2, %v441_v1  ;;  %v438_v5 = vld [vmem:[#allocation2 + $0x9] sm:$0xff]  ;;  %v444_v7 = vld [vmem:[#allocation2 + $0x51] sm:$0xff]  ;;  %v439_v9 = vld [vmem:[#allocation2 + $0x19] sm:$0xff]  ;;  %s8665_s27 = smov 96   ;;  %vm1496_vm3 = vcmask 523264   ;;  %vm1529_vm4 = vcmask 785408  }
  0x6e   : > { %v443_v6 = vld [vmem:[#allocation2 + $0x49] sm:$0xff]  ;;  %v7295_v8 = vpack.i.bf16 %v438_v5, %v437_v3  ;;  %v440_v10 = vld [vmem:[#allocation2 + $0x21] sm:$0xff]  ;;  %v447_v13 = vld [vmem:[#allocation2 + $0x79] sm:$0xff]  ;;  %vm8668_vm5 = vmmov 0   ;;  %vm4163_vm6 = vcmask 1040384   ;;  %vm4165_vm7 = vcmask 1041408  }
  0x6f   : > { %7306 = vrot.lane.b32.xlu1 %v9070_v4, %s8663_s25  ;;  %v9074_v11 = vpack.i.bf16 %v444_v7, %v443_v6  ;;  %v7300_v12 = vpack.i.bf16 %v440_v10, %v439_v9  ;;  %v448_v14 = vld [vmem:[#allocation2 + $0x81] sm:$0xff]  ;;  %v446_v16 = vld [vmem:[#allocation2 + $0x69] sm:$0xff]  ;;  %v452_v20 = vld [vmem:[#allocation2 + $0xb1] sm:$0xff]  ;;  %vm4167_vm8 = vcmask 1042432   ;;  %vm4169_vm9 = vcmask 1043456   ;;  %p7063_p6 = scmp.ne.s32.totalorder %s8652_s15, 7 }
  0x70   : > { %7296 = vrot.lane.b32.xlu0 %v7295_v8, %s8663_s25  ;;  %v445_v15 = vld [vmem:[#allocation2 + $0x61] sm:$0xff]  ;;  %v9079_v17 = vpack.i.bf16 %v448_v14, %v447_v13  ;;  %v451_v19 = vld [vmem:[#allocation2 + $0xa9] sm:$0xff]  ;;  %v449_v21 = vld [vmem:[#allocation2 + $0x91] sm:$0xff] }
  0x71   : > { %v9082_v18 = vpack.i.bf16 %v446_v16, %v445_v15  ;;  %v450_v22 = vld [vmem:[#allocation2 + $0x99] sm:$0xff]  ;;  %v9086_v23 = vpack.i.bf16 %v452_v20, %v451_v19  ;;  %v456_v26 = vld [vmem:[#allocation2 + $0xe1] sm:$0xff]  ;;  %v454_v28 = vld [vmem:[#allocation2 + $0xc9] sm:$0xff] }
  0x72   : > { %v9090_v24 = vpack.i.bf16 %v450_v22, %v449_v21  ;;  %v455_v25 = vld [vmem:[#allocation2 + $0xd9] sm:$0xff]  ;;  %v453_v27 = vld [vmem:[#allocation2 + $0xc1] sm:$0xff]  ;;  %v459_v31 = vld [vmem:[#allocation2 + $0x109] sm:$0xff] }
  0x73   : > { %7311 = vrot.lane.b32.xlu1 %v9074_v11, %s8663_s25  ;;  %v9094_v29 = vpack.i.bf16 %v456_v26, %v455_v25  ;;  %v9098_v30 = vpack.i.bf16 %v454_v28, %v453_v27  ;;  %v460_v32 = vld [vmem:[#allocation2 + $0x111] sm:$0xff]  ;;  %v458_v34 = vld [vmem:[#allocation2 + $0xf9] sm:$0xff]  ;;  %v464_v38 = vld [vmem:[#allocation2 + $0x141] sm:$0xff] }
  0x74   : > { %7301 = vrot.lane.b32.xlu0 %v7300_v12, %s8663_s25  ;;  %v457_v33 = vld [vmem:[#allocation2 + $0xf1] sm:$0xff]  ;;  %v9102_v35 = vpack.i.bf16 %v460_v32, %v459_v31  ;;  %v463_v37 = vld [vmem:[#allocation2 + $0x139] sm:$0xff]  ;;  %v461_v39 = vld [vmem:[#allocation2 + $0x121] sm:$0xff] }
  0x75   : > { %v9106_v36 = vpack.i.bf16 %v458_v34, %v457_v33  ;;  %v462_v40 = vld [vmem:[#allocation2 + $0x129] sm:$0xff]  ;;  %v9110_v41 = vpack.i.bf16 %v464_v38, %v463_v37  ;;  %v468_v44 = vld [vmem:[#allocation2 + $0x171] sm:$0xff]  ;;  %v466_v46 = vld [vmem:[#allocation2 + $0x159] sm:$0xff] }
  0x76   : > { %v9114_v42 = vpack.i.bf16 %v462_v40, %v461_v39  ;;  %v467_v43 = vld [vmem:[#allocation2 + $0x169] sm:$0xff]  ;;  %v465_v45 = vld [vmem:[#allocation2 + $0x151] sm:$0xff]  ;;  %v471_v49 = vld [vmem:[#allocation2 + $0x1a] sm:$0xff] }
  0x77   : > { %7321 = vrot.lane.b32.xlu1 %v9079_v17, %s8663_s25  ;;  %v9118_v47 = vpack.i.bf16 %v468_v44, %v467_v43  ;;  %v9122_v48 = vpack.i.bf16 %v466_v46, %v465_v45  ;;  %v472_v50 = vld [vmem:[#allocation2 + $0x22] sm:$0xff]  ;;  %v470_v52 = vld [vmem:[#allocation2 + $0xa] sm:$0xff]  ;;  %v476_v56 = vld [vmem:[#allocation2 + $0x52] sm:$0xff] }
  0x78   : > { %7316 = vrot.lane.b32.xlu0 %v9082_v18, %s8663_s25  ;;  %v469_v51 = vld [vmem:[#allocation2 + $0x2] sm:$0xff]  ;;  %v9126_v53 = vpack.i.bf16 %v472_v50, %v471_v49  ;;  %v475_v55 = vld [vmem:[#allocation2 + $0x4a] sm:$0xff]  ;;  %v473_v57 = vld [vmem:[#allocation2 + $0x32] sm:$0xff] }
  0x79   : > { %v7375_v54 = vpack.i.bf16 %v470_v52, %v469_v51  ;;  %v474_v58 = vld [vmem:[#allocation2 + $0x3a] sm:$0xff]  ;;  %v480_v60 = vld [vmem:[#allocation2 + $0x82] sm:$0xff]  ;;  %v9132_v61 = vpack.i.bf16 %v476_v56, %v475_v55  ;;  %v478_v63 = vld [vmem:[#allocation2 + $0x6a] sm:$0xff] }
  0x7a   : > { %v479_v59 = vld [vmem:[#allocation2 + $0x7a] sm:$0xff]  ;;  %v477_v62 = vld [vmem:[#allocation2 + $0x62] sm:$0xff]  ;;  %v9135_v0 = vpack.i.bf16 %v474_v58, %v473_v57  ;;  %v483_v1 = vld [vmem:[#allocation2 + $0xaa] sm:$0xff] }
  0x7b   : > { %7331 = vrot.lane.b32.xlu1 %v9086_v23, %s8663_s25  ;;  %v484_v2 = vld [vmem:[#allocation2 + $0xb2] sm:$0xff]  ;;  %v9139_v3 = vpack.i.bf16 %v480_v60, %v479_v59  ;;  %v482_v6 = vld [vmem:[#allocation2 + $0x9a] sm:$0xff]  ;;  %v9143_v7 = vpack.i.bf16 %v478_v63, %v477_v62  ;;  %v488_v9 = vld [vmem:[#allocation2 + $0xe2] sm:$0xff] }
  0x7c   : > { %7326 = vrot.lane.b32.xlu0 %v9090_v24, %s8663_s25  ;;  %v481_v5 = vld [vmem:[#allocation2 + $0x92] sm:$0xff]  ;;  %v487_v8 = vld [vmem:[#allocation2 + $0xda] sm:$0xff]  ;;  %v9147_v10 = vpack.i.bf16 %v484_v2, %v483_v1  ;;  %v485_v12 = vld [vmem:[#allocation2 + $0xc2] sm:$0xff] }
  0x7d   : > { %v486_v13 = vld [vmem:[#allocation2 + $0xca] sm:$0xff]  ;;  %v9151_v14 = vpack.i.bf16 %v482_v6, %v481_v5  ;;  %v9155_v15 = vpack.i.bf16 %v488_v9, %v487_v8  ;;  %v492_v20 = vld [vmem:[#allocation2 + $0x112] sm:$0xff]  ;;  %v490_v22 = vld [vmem:[#allocation2 + $0xfa] sm:$0xff] }
  0x7e   : > { %v9159_v16 = vpack.i.bf16 %v486_v13, %v485_v12  ;;  %v491_v19 = vld [vmem:[#allocation2 + $0x10a] sm:$0xff]  ;;  %v489_v21 = vld [vmem:[#allocation2 + $0xf2] sm:$0xff]  ;;  %v495_v27 = vld [vmem:[#allocation2 + $0x13a] sm:$0xff] }
  0x7f   : > { %7341 = vrot.lane.b32.xlu1 %v9094_v29, %s8663_s25  ;;  %v9163_v25 = vpack.i.bf16 %v492_v20, %v491_v19  ;;  %v9167_v26 = vpack.i.bf16 %v490_v22, %v489_v21  ;;  %v496_v28 = vld [vmem:[#allocation2 + $0x142] sm:$0xff]  ;;  %v494_v32 = vld [vmem:[#allocation2 + $0x12a] sm:$0xff]  ;;  %v500_v38 = vld [vmem:[#allocation2 + $0x172] sm:$0xff] }
  0x80   : > { %7336 = vrot.lane.b32.xlu0 %v9098_v30, %s8663_s25  ;;  %v493_v31 = vld [vmem:[#allocation2 + $0x122] sm:$0xff]  ;;  %v9171_v33 = vpack.i.bf16 %v496_v28, %v495_v27  ;;  %v499_v37 = vld [vmem:[#allocation2 + $0x16a] sm:$0xff]  ;;  %v497_v39 = vld [vmem:[#allocation2 + $0x152] sm:$0xff] }
  0x81   : > { %v9175_v34 = vpack.i.bf16 %v494_v32, %v493_v31  ;;  %v498_v40 = vld [vmem:[#allocation2 + $0x15a] sm:$0xff]  ;;  %v9179_v43 = vpack.i.bf16 %v500_v38, %v499_v37  ;;  %v504_v45 = vld [vmem:[#allocation2 + $0x30] sm:$0xff]  ;;  %v509_v55 = vld [vmem:[#allocation2 + $0x68] sm:$0xff] }
  0x82   : > { %v9183_v44 = vpack.i.bf16 %v498_v40, %v497_v39  ;;  %v505_v46 = vld [vmem:[#allocation2 + $0x38] sm:$0xff]  ;;  %v503_v50 = vld [vmem:[#allocation2 + $0x20] sm:$0xff]  ;;  %v506_v56 = vld [vmem:[#allocation2 + $0x48] sm:$0xff] }
  0x83   : > { %7351 = vrot.lane.b32.xlu1 %v9102_v35, %s8663_s25  ;;  %v502_v49 = vld [vmem:[#allocation2 + $0x18] sm:$0xff]  ;;  %v9187_v51 = vpack.i.bf16 %v505_v46, %v504_v45  ;;  %v507_v57 = vld [vmem:[#allocation2 + $0x50] sm:$0xff]  ;;  %v511_v1 = vld [vmem:[#allocation2 + $0x80] sm:$0xff] }
  0x84   : > { %7346 = vrot.lane.b32.xlu0 %v9106_v36, %s8663_s25  ;;  %v7455_v52 = vpack.i.bf16 %v503_v50, %v502_v49  ;;  %v9196_v59 = vpack.i.bf16 %v507_v57, %v506_v56  ;;  %v512_v60 = vld [vmem:[#allocation2 + $0x90] sm:$0xff]  ;;  %v513_v62 = vld [vmem:[#allocation2 + $0x98] sm:$0xff]  ;;  %v516_v6 = vld [vmem:[#allocation2 + $0xc0] sm:$0xff] }
  0x85   : > { %v510_v63 = vld [vmem:[#allocation2 + $0x78] sm:$0xff]  ;;  %v9200_v2 = vpack.i.bf16 %v513_v62, %v512_v60  ;;  %v517_v8 = vld [vmem:[#allocation2 + $0xc8] sm:$0xff]  ;;  %v515_v12 = vld [vmem:[#allocation2 + $0xb0] sm:$0xff] }
  0x86   : > { %v9204_v5 = vpack.i.bf16 %v511_v1, %v510_v63  ;;  %v514_v9 = vld [vmem:[#allocation2 + $0xa8] sm:$0xff]  ;;  %v9208_v13 = vpack.i.bf16 %v517_v8, %v516_v6  ;;  %v520_v20 = vld [vmem:[#allocation2 + $0xf0] sm:$0xff]  ;;  %v521_v21 = vld [vmem:[#allocation2 + $0xf8] sm:$0xff]  ;;  %v8666_v8 = vmov 0  }
  0x87   : > { %7361 = vrot.lane.b32.xlu1 %v9110_v41, %s8663_s25  ;;  %v9212_v19 = vpack.i.bf16 %v515_v12, %v514_v9  ;;  %v518_v22 = vld [vmem:[#allocation2 + $0xd8] sm:$0xff]  ;;  %v519_v27 = vld [vmem:[#allocation2 + $0xe0] sm:$0xff]  ;;  %v9216_v28 = vpack.i.bf16 %v521_v21, %v520_v20  ;;  %v525_v37 = vld [vmem:[#allocation2 + $0x128] sm:$0xff]  ;;  %3309 = vmatprep.subr.bf16.mxu0 %v8666_v8 }
  0x88   : > { %7356 = vrot.lane.b32.xlu0 %v9114_v42, %s8663_s25  ;;  %v9220_v31 = vpack.i.bf16 %v519_v27, %v518_v22  ;;  %v524_v32 = vld [vmem:[#allocation2 + $0x120] sm:$0xff]  ;;  %v522_v38 = vld [vmem:[#allocation2 + $0x108] sm:$0xff]  ;;  %v523_v39 = vld [vmem:[#allocation2 + $0x110] sm:$0xff]  ;;  %7223 = vmatprep.subr.bf16.mxu1 %v8666_v8 }
  0x89   : > { %v9224_v40 = vpack.i.bf16 %v525_v37, %v524_v32  ;;  %v9228_v45 = vpack.i.bf16 %v523_v39, %v522_v38  ;;  %v528_v46 = vld [vmem:[#allocation2 + $0x150] sm:$0xff]  ;;  %v529_v49 = vld [vmem:[#allocation2 + $0x158] sm:$0xff]  ;;  %v532_v56 = vld [vmem:[#allocation2 + $0x180] sm:$0xff] }
  0x8a   : > { %v526_v50 = vld [vmem:[#allocation2 + $0x138] sm:$0xff]  ;;  %v533_v57 = vld [vmem:[#allocation2 + $0x188] sm:$0xff]  ;;  %v531_v62 = vld [vmem:[#allocation2 + $0x170] sm:$0xff] }
  0x8b   : > { %7371 = vrot.lane.b32.xlu1 %v9118_v47, %s8663_s25  ;;  %v530_v60 = vld [vmem:[#allocation2 + $0x168] sm:$0xff]  ;;  %v9240_v63 = vpack.i.bf16 %v533_v57, %v532_v56  ;;  %v8255_v6 = vld [vmem:[%s13767_s1 + $0x38] sm:$0xff]   ;;  %v8256_v9 = vld [vmem:[%s13767_s1 + $0x30] sm:$0xff]  }
  0x8c   : > { %7366 = vrot.lane.b32.xlu0 %v9122_v48, %s8663_s25  ;;  %v9244_v1 = vpack.i.bf16 %v531_v62, %v530_v60  ;;  %3310 = vmatpush1.bf16.msra.mxu0 %v8255_v6  ;;  %v8257_v12 = vld [vmem:[%s13767_s1 + $0x28] sm:$0xff]  }
  0x8d   : > { %7239 = vmatpush1.bf16.msra.mxu1 %v8255_v6  ;;  %3311 = vmatprep.subr.bf16.mxu0 %v8666_v8 }
  0x8e   : > { %7224 = vmatprep.subr.bf16.mxu1 %v8666_v8 }
  0x8f   : > { %7381 = vrot.lane.b32.xlu1 %v9126_v53, %s8664_s26 }
  0x90   : > { %7376 = vrot.lane.b32.xlu0 %v7375_v54, %s8664_s26  ;;  %v508_v54 = vld [vmem:[#allocation2 + $0x60] sm:$0xff]  ;;  %3312 = vmatpush1.bf16.msra.mxu0 %v8256_v9 }
  0x91   : > { %v9193_v58 = vpack.i.bf16 %v509_v55, %v508_v54  ;;  %v9232_v54 = vpack.i.bf16 %v529_v49, %v528_v46  ;;  %7240 = vmatpush1.bf16.msra.mxu1 %v8256_v9  ;;  %3313 = vmatprep.subr.bf16.mxu0 %v8666_v8  ;;  %v659_v9 = vld [vmem:[#allocation2 + $0x181] sm:$0xff] }
  0x92   : > { %7225 = vmatprep.subr.bf16.mxu1 %v8666_v8 }
  0x93   : > { %7391 = vrot.lane.b32.xlu1 %v9132_v61, %s8664_s26 }
  0x94   : > { %7386 = vrot.lane.b32.xlu0 %v9135_v0, %s8664_s26  ;;  %3314 = vmatpush1.bf16.msra.mxu0 %v8257_v12 }
  0x95   : > { %7241 = vmatpush1.bf16.msra.mxu1 %v8257_v12  ;;  %3315 = vmatprep.subr.bf16.mxu0 %v8666_v8  ;;  %v660_v12 = vld [vmem:[#allocation2 + $0x189] sm:$0xff] }
  0x96   : > { %7226 = vmatprep.subr.bf16.mxu1 %v8666_v8 }
  0x97   : > { %7401 = vrot.lane.b32.xlu1 %v9139_v3, %s8664_s26 }
  0x98   : > { %7396 = vrot.lane.b32.xlu0 %v9143_v7, %s8664_s26 }
  0x9b   : > { %7411 = vrot.lane.b32.xlu1 %v9147_v10, %s8664_s26 }
  0x9c   : > { %7406 = vrot.lane.b32.xlu0 %v9151_v14, %s8664_s26 }
  0x9f   : > { %7421 = vrot.lane.b32.xlu1 %v9155_v15, %s8664_s26 }
  0xa0   : > { %7416 = vrot.lane.b32.xlu0 %v9159_v16, %s8664_s26 }
  0xa3   : > { %7431 = vrot.lane.b32.xlu1 %v9163_v25, %s8664_s26 }
  0xa4   : > { %7426 = vrot.lane.b32.xlu0 %v9167_v26, %s8664_s26 }
  0xa7   : > { %7441 = vrot.lane.b32.xlu1 %v9171_v33, %s8664_s26 }
  0xa8   : > { %7436 = vrot.lane.b32.xlu0 %v9175_v34, %s8664_s26 }
  0xab   : > { %7451 = vrot.lane.b32.xlu1 %v9179_v43, %s8664_s26 }
  0xac   : > { %7446 = vrot.lane.b32.xlu0 %v9183_v44, %s8664_s26 }
  0xaf   : > { %7461 = vrot.lane.b32.xlu1 %v9187_v51, %s8665_s27 }
  0xb0   : > { %7456 = vrot.lane.b32.xlu0 %v7455_v52, %s8665_s27  ;;  %v527_v52 = vld [vmem:[#allocation2 + $0x140] sm:$0xff] }
  0xb1   : > { %v9236_v55 = vpack.i.bf16 %v527_v52, %v526_v50  ;;  %v8270_v50 = vld [vmem:[%s13767_s1 + $0x40] sm:$0xff]  }
  0xb3   : > { %7471 = vrot.lane.b32.xlu1 %v9193_v58, %s8665_s27 }
  0xb4   : > { %7466 = vrot.lane.b32.xlu0 %v9196_v59, %s8665_s27 }
  0xb7   : > { %7481 = vrot.lane.b32.xlu1 %v9200_v2, %s8665_s27 }
  0xb8   : > { %7476 = vrot.lane.b32.xlu0 %v9204_v5, %s8665_s27 }
  0xbb   : > { %7491 = vrot.lane.b32.xlu1 %v9208_v13, %s8665_s27 }
  0xbc   : > { %7486 = vrot.lane.b32.xlu0 %v9212_v19, %s8665_s27 }
  0xbf   : > { %7501 = vrot.lane.b32.xlu1 %v9216_v28, %s8665_s27 }
  0xc0   : > { %7496 = vrot.lane.b32.xlu0 %v9220_v31, %s8665_s27 }
  0xc3   : > { %7511 = vrot.lane.b32.xlu1 %v9224_v40, %s8665_s27 }
  0xc4   : > { %7506 = vrot.lane.b32.xlu0 %v9228_v45, %s8665_s27 }
  0xc7   : > { %7521 = vrot.lane.b32.xlu1 %v9232_v54, %s8665_s27 }
  0xc8   : > { %7516 = vrot.lane.b32.xlu0 %v9236_v55, %s8665_s27 }
  0xcb   : > { %7531 = vrot.lane.b32.xlu1 %v9240_v63, %s8665_s27 }
  0xcc   : > { %7526 = vrot.lane.b32.xlu0 %v9244_v1, %s8665_s27 }
  0xcf   : > { %7541 = vrot.lane.b32.xlu1 %v9135_v0, %s8663_s25  ;;  %v8260_v0 = vld [vmem:[%s13767_s1 + $0x10] sm:$0xff]  }
  0xd0   : > { %7536 = vrot.lane.b32.xlu0 %v9126_v53, %s8663_s25  ;;  %v8258_v53 = vld [vmem:[%s13767_s1 + $0x20] sm:$0xff]  }
  0xd1   : > { %3316 = vmatpush1.bf16.msra.mxu0 %v8258_v53  ;;  %7242 = vmatpush1.bf16.msra.mxu1 %v8258_v53  ;;  %v7765_v53 = vpack.i.bf16 %v660_v12, %v659_v9  ;;  %v1705_v9 = vld [vmem:[#allocation2 + $0x259] sm:$0xff]  ;;  %v1706_v12 = vld [vmem:[#allocation2 + $0x261] sm:$0xff] }
  0xd2   : > { %3317 = vmatprep.subr.bf16.mxu0 %v8666_v8  ;;  %7227 = vmatprep.subr.bf16.mxu1 %v8666_v8 }
  0xd3   : > { %7551 = vrot.lane.b32.xlu1 %v9143_v7, %s8663_s25 }
  0xd4   : > { %7546 = vrot.lane.b32.xlu0 %v9132_v61, %s8663_s25  ;;  %v8259_v61 = vld [vmem:[%s13767_s1 + $0x18] sm:$0xff]  }
  0xd5   : > { %3318 = vmatpush1.bf16.msra.mxu0 %v8259_v61  ;;  %7243 = vmatpush1.bf16.msra.mxu1 %v8259_v61  ;;  %v1694_v61 = vld [vmem:[#allocation2 + $0x1d1] sm:$0xff] }
  0xd6   : > { %3319 = vmatprep.subr.bf16.mxu0 %v8666_v8  ;;  %7228 = vmatprep.subr.bf16.mxu1 %v8666_v8 }
  0xd7   : > { %7561 = vrot.lane.b32.xlu1 %v9151_v14, %s8663_s25  ;;  %v596_v14 = vld [vmem:[#allocation2 + $0x182] sm:$0xff] }
  0xd8   : > { %7556 = vrot.lane.b32.xlu0 %v9139_v3, %s8663_s25  ;;  %v8261_v3 = vld [vmem:[%s13767_s1 + $0x8] sm:$0xff]  }
  0xd9   : > { %3320 = vmatpush1.bf16.msra.mxu0 %v8260_v0  ;;  %7244 = vmatpush1.bf16.msra.mxu1 %v8260_v0 }
  0xda   : > { %3321 = vmatprep.subr.bf16.mxu0 %v8666_v8  ;;  %7229 = vmatprep.subr.bf16.mxu1 %v8666_v8 }
  0xdb   : > { %7571 = vrot.lane.b32.xlu1 %v9159_v16, %s8663_s25  ;;  %v8262_v16 = vld [vmem:[%s13767_s1] sm:$0xff]  }
  0xdc   : > { %7566 = vrot.lane.b32.xlu0 %v9147_v10, %s8663_s25 }
  0xdd   : > { %3322 = vmatpush1.bf16.msra.mxu0 %v8261_v3  ;;  %7245 = vmatpush1.bf16.msra.mxu1 %v8261_v3  ;;  %v1692_v3 = vld [vmem:[#allocation2 + $0x1b9] sm:$0xff] }
  0xde   : > { %3323 = vmatprep.subr.bf16.mxu0 %v8666_v8  ;;  %7230 = vmatprep.subr.bf16.mxu1 %v8666_v8 }
  0xdf   : > { %7581 = vrot.lane.b32.xlu1 %v9167_v26, %s8663_s25 }
  0xe0   : > { %7576 = vrot.lane.b32.xlu0 %v9155_v15, %s8663_s25  ;;  %v597_v15 = vld [vmem:[#allocation2 + $0x18a] sm:$0xff] }
  0xe1   : > { %v9305_v7 = vpop.permute.xlu1 %7306  ;;  %3324 = vmatpush1.bf16.msra.mxu0 %v8262_v16  ;;  %7246 = vmatpush1.bf16.msra.mxu1 %v8262_v16 }
  0xe2   : > { %v9307_v10 = vpop.permute.xlu0 %7296  ;;  %3325 = vmatprep.subr.bf16.mxu0 %v8666_v8  ;;  %7231 = vmatprep.subr.bf16.mxu1 %v8666_v8 }
  0xe3   : > { %7591 = vrot.lane.b32.xlu1 %v9175_v34, %s8663_s25  ;;  %v7610_v34 = vpack.i.bf16 %v597_v15, %v596_v14 }
  0xe4   : > { %7586 = vrot.lane.b32.xlu0 %v9163_v25, %s8663_s25  ;;  %v8263_v25 = vld [vmem:[%s13767_s1 + $0x78] sm:$0xff]  }
  0xe5   : > { %v9318_v26 = vpop.permute.xlu1 %7311  ;;  %3326 = vmatpush2.bf16.msra.mxu0 %v8263_v25  ;;  %7247 = vmatpush2.bf16.msra.mxu1 %v8263_v25 }
  0xe6   : > { %v9320_v20 = vpop.permute.xlu0 %7301  ;;  %3327 = vmatprep.subr.bf16.mxu0 %v8666_v8  ;;  %7232 = vmatprep.subr.bf16.mxu1 %v8666_v8 }
  0xe7   : > { %7601 = vrot.lane.b32.xlu1 %v9183_v44, %s8663_s25 }
  0xe8   : > { %7596 = vrot.lane.b32.xlu0 %v9171_v33, %s8663_s25  ;;  %v8264_v33 = vld [vmem:[%s13767_s1 + $0x70] sm:$0xff]  }
  0xe9   : > { %v9331_v21 = vpop.permute.xlu1 %7321  ;;  %3328 = vmatpush2.bf16.msra.mxu0 %v8264_v33  ;;  %7248 = vmatpush2.bf16.msra.mxu1 %v8264_v33  ;;  %v1696_v33 = vld [vmem:[#allocation2 + $0x1e9] sm:$0xff] }
  0xea   : > { %13982 = vst [vmem:[#allocation7_spill] sm:$0xff] %v9331_v21  ;;  %v9333_v22 = vpop.permute.xlu0 %7316  ;;  %3329 = vmatprep.subr.bf16.mxu0 %v8666_v8  ;;  %7233 = vmatprep.subr.bf16.mxu1 %v8666_v8  ;;  %v1782_v21 = vld [vmem:[#allocation2 + $0x300] sm:$0xff] }
  0xeb   : > { %7611 = vrot.lane.b32.xlu1 %v7610_v34, %s8663_s25  ;;  %v1698_v34 = vld [vmem:[#allocation2 + $0x201] sm:$0xff] }
  0xec   : > { %7606 = vrot.lane.b32.xlu0 %v9179_v43, %s8663_s25  ;;  %v8265_v43 = vld [vmem:[%s13767_s1 + $0x68] sm:$0xff]  }
  0xed   : > { %v9343_v44 = vpop.permute.xlu1 %7331  ;;  %3330 = vmatpush2.bf16.msra.mxu0 %v8265_v43  ;;  %7249 = vmatpush2.bf16.msra.mxu1 %v8265_v43 }
  0xee   : > { %13983 = vst [vmem:[#allocation8_spill] sm:$0xff] %v9343_v44  ;;  %v9345_v27 = vpop.permute.xlu0 %7326  ;;  %3331 = vmatprep.subr.bf16.mxu0 %v8666_v8  ;;  %7234 = vmatprep.subr.bf16.mxu1 %v8666_v8  ;;  %v1761_v44 = vld [vmem:[#allocation2 + $0x200] sm:$0xff] }
  0xef   : > { %13984 = vst [vmem:[#allocation9_spill] sm:$0xff] %v9345_v27  ;;  %7621 = vrot.lane.b32.xlu1 %v9196_v59, %s8664_s26 }
  0xf0   : > { %7616 = vrot.lane.b32.xlu0 %v9187_v51, %s8664_s26  ;;  %v8266_v51 = vld [vmem:[%s13767_s1 + $0x60] sm:$0xff]  }
  0xf1   : > { %v9356_v32 = vpop.permute.xlu1 %7341  ;;  %3332 = vmatpush2.bf16.msra.mxu0 %v8266_v51  ;;  %7250 = vmatpush2.bf16.msra.mxu1 %v8266_v51 }
  0xf2   : > { %13985 = vst [vmem:[#allocation10_spill] sm:$0xff] %v9356_v32  ;;  %v9358_v37 = vpop.permute.xlu0 %7336  ;;  %3333 = vmatprep.subr.bf16.mxu0 %v8666_v8  ;;  %7235 = vmatprep.subr.bf16.mxu1 %v8666_v8 }
  0xf3   : > { %13986 = vst [vmem:[#allocation11_spill] sm:$0xff] %v9358_v37  ;;  %7631 = vrot.lane.b32.xlu1 %v9204_v5, %s8664_s26 }
  0xf4   : > { %7626 = vrot.lane.b32.xlu0 %v9193_v58, %s8664_s26  ;;  %v8267_v58 = vld [vmem:[%s13767_s1 + $0x58] sm:$0xff]  }
  0xf5   : > { %v9369_v59 = vpop.permute.xlu1 %7351  ;;  %3334 = vmatpush2.bf16.msra.mxu0 %v8267_v58  ;;  %7251 = vmatpush2.bf16.msra.mxu1 %v8267_v58 }
  0xf6   : > { %13987 = vst [vmem:[#allocation12_spill] sm:$0xff] %v9369_v59  ;;  %v9371_v38 = vpop.permute.xlu0 %7346  ;;  %3335 = vmatprep.subr.bf16.mxu0 %v8666_v8  ;;  %7236 = vmatprep.subr.bf16.mxu1 %v8666_v8  ;;  %v1741_v59 = vld [vmem:[#allocation2 + $0x28a] sm:$0xff] }
  0xf7   : > { %13988 = vst [vmem:[#allocation13_spill] sm:$0xff] %v9371_v38  ;;  %7641 = vrot.lane.b32.xlu1 %v9212_v19, %s8664_s26  ;;  %v9626_v38 = vld [vmem:[#allocation2 + $0x30a] sm:$0xff] }
  0xf8   : > { %7636 = vrot.lane.b32.xlu0 %v9200_v2, %s8664_s26  ;;  %v8268_v2 = vld [vmem:[%s13767_s1 + $0x50] sm:$0xff]   ;;  %14030 = vst [vmem:[#allocation55_spill] sm:$0xff] %v9626_v38 }
  0xf9   : > { %v9382_v5 = vpop.permute.xlu1 %7361  ;;  %3336 = vmatpush2.bf16.msra.mxu0 %v8268_v2  ;;  %7252 = vmatpush2.bf16.msra.mxu1 %v8268_v2  ;;  %v1701_v2 = vld [vmem:[#allocation2 + $0x229] sm:$0xff] }
  0xfa   : > { %13989 = vst [vmem:[#allocation14_spill] sm:$0xff] %v9382_v5  ;;  %v9384_v39 = vpop.permute.xlu0 %7356  ;;  %3337 = vmatprep.subr.bf16.mxu0 %v8666_v8  ;;  %7237 = vmatprep.subr.bf16.mxu1 %v8666_v8 }
  0xfb   : > { %13990 = vst [vmem:[#allocation15_spill] sm:$0xff] %v9384_v39  ;;  %7651 = vrot.lane.b32.xlu1 %v9220_v31, %s8664_s26 }
  0xfc   : > { %7646 = vrot.lane.b32.xlu0 %v9208_v13, %s8664_s26  ;;  %v8269_v13 = vld [vmem:[%s13767_s1 + $0x48] sm:$0xff]  }
  0xfd   : > { %v9395_v19 = vpop.permute.xlu1 %7371  ;;  %3338 = vmatpush2.bf16.msra.mxu0 %v8269_v13  ;;  %7253 = vmatpush2.bf16.msra.mxu1 %v8269_v13  ;;  %v1702_v13 = vld [vmem:[#allocation2 + $0x231] sm:$0xff] }
  0xfe   : > { %13991 = vst [vmem:[#allocation16_spill] sm:$0xff] %v9395_v19  ;;  %v9397_v46 = vpop.permute.xlu0 %7366  ;;  %3339 = vmatprep.subr.bf16.mxu0 %v8666_v8  ;;  %7238 = vmatprep.subr.bf16.mxu1 %v8666_v8 }
  0xff   : > { %13992 = vst [vmem:[#allocation17_spill] sm:$0xff] %v9397_v46  ;;  %7661 = vrot.lane.b32.xlu1 %v9228_v45, %s8664_s26  ;;  %v630_v45 = vld [vmem:[#allocation2 + $0x1a0] sm:$0xff] }
 0x100   : > { %7656 = vrot.lane.b32.xlu0 %v9216_v28, %s8664_s26  ;;  %v629_v28 = vld [vmem:[#allocation2 + $0x198] sm:$0xff] }
 0x101   : > { %v9408_v31 = vpop.permute.xlu1 %7381  ;;  %3340 = vmatpush2.bf16.msra.mxu0 %v8270_v50  ;;  %7254 = vmatpush2.bf16.msra.mxu1 %v8270_v50  ;;  %v1700_v50 = vld [vmem:[#allocation2 + $0x219] sm:$0xff] }
 0x102   : > { %v9410_v49 = vpop.permute.xlu0 %7376 }
 0x103   : > { %7671 = vrot.lane.b32.xlu1 %v9236_v55, %s8664_s26  ;;  %v7690_v55 = vpack.i.bf16 %v630_v45, %v629_v28  ;;  %v1699_v45 = vld [vmem:[#allocation2 + $0x211] sm:$0xff] }
 0x104   : > { %7666 = vrot.lane.b32.xlu0 %v9224_v40, %s8664_s26 }
 0x105   : > { %v9421_v52 = vpop.permute.xlu1 %7391 }
 0x106   : > { %v9423_v56 = vpop.permute.xlu0 %7386 }
 0x107   : > { %7681 = vrot.lane.b32.xlu1 %v9244_v1, %s8664_s26 }
 0x108   : > { %7676 = vrot.lane.b32.xlu0 %v9232_v54, %s8664_s26 }
 0x109   : > { %v9429_v40 = vpop.permute.xlu1 %7401 }
 0x10a   : > { %13993 = vst [vmem:[#allocation18_spill] sm:$0xff] %v9429_v40  ;;  %v9431_v57 = vpop.permute.xlu0 %7396  ;;  %v537_v40 = vld [vmem:[#allocation2 + $0x39] sm:$0xff] }
 0x10b   : > { %7691 = vrot.lane.b32.xlu1 %v7690_v55, %s8664_s26 }
 0x10c   : > { %7686 = vrot.lane.b32.xlu0 %v9240_v63, %s8664_s26 }
 0x10d   : > { %v9436_v60 = vpop.permute.xlu1 %7411 }
 0x10e   : > { %13994 = vst [vmem:[#allocation19_spill] sm:$0xff] %v9436_v60  ;;  %v9438_v62 = vpop.permute.xlu0 %7406  ;;  %v1760_v60 = vld [vmem:[#allocation2 + $0x1f8] sm:$0xff] }
 0x10f   : > { %13995 = vst [vmem:[#allocation20_spill] sm:$0xff] %v9438_v62  ;;  %7701 = vrot.lane.b32.xlu1 %v9074_v11, %s8665_s27 }
 0x110   : > { %7696 = vrot.lane.b32.xlu0 %v9070_v4, %s8665_s27 }
 0x111   : > { %v9444_v54 = vpop.permute.xlu1 %7421 }
 0x112   : > { %13996 = vst [vmem:[#allocation21_spill] sm:$0xff] %v9444_v54  ;;  %v9446_v1 = vpop.permute.xlu0 %7416  ;;  %v1759_v54 = vld [vmem:[#allocation2 + $0x1e8] sm:$0xff] }
 0x113   : > { %13997 = vst [vmem:[#allocation22_spill] sm:$0xff] %v9446_v1  ;;  %7711 = vrot.lane.b32.xlu1 %v9079_v17, %s8665_s27 }
 0x114   : > { %7706 = vrot.lane.b32.xlu0 %v9082_v18, %s8665_s27 }
 0x115   : > { %v9452_v63 = vpop.permute.xlu1 %7431 }
 0x116   : > { %13998 = vst [vmem:[#allocation23_spill] sm:$0xff] %v9452_v63  ;;  %v9454_v6 = vpop.permute.xlu0 %7426 }
 0x117   : > { %13999 = vst [vmem:[#allocation24_spill] sm:$0xff] %v9454_v6  ;;  %7721 = vrot.lane.b32.xlu1 %v9086_v23, %s8665_s27  ;;  %v9624_v6 = vld [vmem:[#allocation2 + $0x302] sm:$0xff] }
 0x118   : > { %7716 = vrot.lane.b32.xlu0 %v9090_v24, %s8665_s27 }
 0x119   : > { %v9460_v4 = vpop.permute.xlu1 %7441 }
 0x11a   : > { %14000 = vst [vmem:[#allocation25_spill] sm:$0xff] %v9460_v4  ;;  %v9462_v11 = vpop.permute.xlu0 %7436 }
 0x11b   : > { %14001 = vst [vmem:[#allocation26_spill] sm:$0xff] %v9462_v11  ;;  %7731 = vrot.lane.b32.xlu1 %v9094_v29, %s8665_s27  ;;  %v661_v29 = vld [vmem:[#allocation2 + $0x199] sm:$0xff] }
 0x11c   : > { %7726 = vrot.lane.b32.xlu0 %v9098_v30, %s8665_s27  ;;  %v662_v30 = vld [vmem:[#allocation2 + $0x1a1] sm:$0xff] }
 0x11d   : > { %v9468_v17 = vpop.permute.xlu1 %7451 }
 0x11e   : > { %14002 = vst [vmem:[#allocation27_spill] sm:$0xff] %v9468_v17  ;;  %v9470_v18 = vpop.permute.xlu0 %7446  ;;  %v1724_v17 = vld [vmem:[#allocation2 + $0x1ba] sm:$0xff] }
 0x11f   : > { %14003 = vst [vmem:[#allocation28_spill] sm:$0xff] %v9470_v18  ;;  %7741 = vrot.lane.b32.xlu1 %v9102_v35, %s8665_s27  ;;  %v1730_v18 = vld [vmem:[#allocation2 + $0x202] sm:$0xff] }
 0x120   : > { %7736 = vrot.lane.b32.xlu0 %v9106_v36, %s8665_s27  ;;  %v7770_v36 = vpack.i.bf16 %v662_v30, %v661_v29  ;;  %v7800_v29 = vpack.i.bf16 %v1702_v13, %v1701_v2  ;;  %v7795_v30 = vpack.i.bf16 %v1700_v50, %v1699_v45  ;;  %v1713_v2 = vld [vmem:[#allocation2 + $0x2b9] sm:$0xff]  ;;  %v1714_v13 = vld [vmem:[#allocation2 + $0x2c1] sm:$0xff] }
 0x121   : > { %v9476_v23 = vpop.permute.xlu1 %7461  ;;  %v1711_v50 = vld [vmem:[#allocation2 + $0x2a1] sm:$0xff] }
 0x122   : > { %v9478_v24 = vpop.permute.xlu0 %7456 }
 0x123   : > { %7751 = vrot.lane.b32.xlu1 %v9110_v41, %s8665_s27  ;;  %v1693_v41 = vld [vmem:[#allocation2 + $0x1c9] sm:$0xff] }
 0x124   : > { %7746 = vrot.lane.b32.xlu0 %v9114_v42, %s8665_s27  ;;  %v1691_v42 = vld [vmem:[#allocation2 + $0x1b1] sm:$0xff]  ;;  %v7780_v15 = vpack.i.bf16 %v1694_v61, %v1693_v41  ;;  %v1704_v41 = vld [vmem:[#allocation2 + $0x249] sm:$0xff] }
 0x125   : > { %v9484_v8 = vpop.permute.xlu1 %7471  ;;  %v7775_v16 = vpack.i.bf16 %v1692_v3, %v1691_v42  ;;  %v7810_v42 = vpack.i.bf16 %v1706_v12, %v1705_v9  ;;  %v9527_v9 = vpack.i.bf16 %v1714_v13, %v1713_v2  ;;  %v1719_v13 = vld [vmem:[#allocation2 + $0x301] sm:$0xff] }
 0x126   : > { %v9486_v35 = vpop.permute.xlu0 %7466 }
 0x127   : > { %7761 = vrot.lane.b32.xlu1 %v9118_v47, %s8665_s27  ;;  %v1697_v47 = vld [vmem:[#allocation2 + $0x1f9] sm:$0xff] }
 0x128   : > { %7756 = vrot.lane.b32.xlu0 %v9122_v48, %s8665_s27  ;;  %v1695_v48 = vld [vmem:[#allocation2 + $0x1e1] sm:$0xff]  ;;  %v7790_v51 = vpack.i.bf16 %v1698_v34, %v1697_v47  ;;  %v1707_v34 = vld [vmem:[#allocation2 + $0x271] sm:$0xff] }
 0x129   : > { %v9492_v0 = vpop.permute.xlu1 %7481  ;;  %v7785_v58 = vpack.i.bf16 %v1696_v33, %v1695_v48  ;;  %v1708_v48 = vld [vmem:[#allocation2 + $0x279] sm:$0xff] }
 0x12a   : > { %14004 = vst [vmem:[#allocation29_spill] sm:$0xff] %v9492_v0  ;;  %v9494_v14 = vpop.permute.xlu0 %7476  ;;  %v536_v0 = vld [vmem:[#allocation2 + $0x31] sm:$0xff] }
 0x12b   : > { %14005 = vst [vmem:[#allocation30_spill] sm:$0xff] %v9494_v14  ;;  %7771 = vrot.lane.b32.xlu1 %v7770_v36, %s8665_s27 }
 0x12c   : > { %7766 = vrot.lane.b32.xlu0 %v7765_v53, %s8665_s27  ;;  %v1703_v53 = vld [vmem:[#allocation2 + $0x241] sm:$0xff] }
 0x12d   : > { %v9498_v25 = vpop.permute.xlu1 %7491  ;;  %v7805_v3 = vpack.i.bf16 %v1704_v41, %v1703_v53  ;;  %v1717_v53 = vld [vmem:[#allocation2 + $0x2e9] sm:$0xff]  ;;  %v1718_v41 = vld [vmem:[#allocation2 + $0x2f1] sm:$0xff] }
 0x12e   : > { %14006 = vst [vmem:[#allocation31_spill] sm:$0xff] %v9498_v25  ;;  %v9500_v43 = vpop.permute.xlu0 %7486 }
 0x12f   : > { %14007 = vst [vmem:[#allocation32_spill] sm:$0xff] %v9500_v43  ;;  %7781 = vrot.lane.b32.xlu1 %v7780_v15, %s8663_s25  ;;  %v1709_v15 = vld [vmem:[#allocation2 + $0x289] sm:$0xff] }
 0x130   : > { %7776 = vrot.lane.b32.xlu0 %v7775_v16, %s8663_s25  ;;  %v1710_v16 = vld [vmem:[#allocation2 + $0x291] sm:$0xff] }
 0x131   : > { %v9504_v28 = vpop.permute.xlu1 %7501 }
 0x132   : > { %14008 = vst [vmem:[#allocation33_spill] sm:$0xff] %v9504_v28  ;;  %v9506_v55 = vpop.permute.xlu0 %7496  ;;  %v1758_v28 = vld [vmem:[#allocation2 + $0x1e0] sm:$0xff] }
 0x133   : > { %14009 = vst [vmem:[#allocation34_spill] sm:$0xff] %v9506_v55  ;;  %7791 = vrot.lane.b32.xlu1 %v7790_v51, %s8663_s25  ;;  %v7820_v51 = vpack.i.bf16 %v1710_v16, %v1709_v15  ;;  %v1716_v15 = vld [vmem:[#allocation2 + $0x2d9] sm:$0xff]  ;;  %v1757_v55 = vld [vmem:[#allocation2 + $0x1d0] sm:$0xff]  ;;  %v9641_v37 = vpack.i.bf16 %v1759_v54, %v1758_v28  ;;  %v1767_v28 = vld [vmem:[#allocation2 + $0x248] sm:$0xff] }
 0x134   : > { %7786 = vrot.lane.b32.xlu0 %v7785_v58, %s8663_s25  ;;  %v7815_v58 = vpack.i.bf16 %v1708_v48, %v1707_v34  ;;  %v9536_v34 = vpack.i.bf16 %v1718_v41, %v1717_v53  ;;  %v9549_v41 = vld [vmem:[#allocation2 + $0x1ca] sm:$0xff]  ;;  %v1766_v54 = vld [vmem:[#allocation2 + $0x240] sm:$0xff] }
 0x135   : > { %v9510_v36 = vpop.permute.xlu1 %7511  ;;  %14032 = vst [vmem:[#allocation57_spill] sm:$0xff] %v9641_v37 }
 0x136   : > { %14010 = vst [vmem:[#allocation35_spill] sm:$0xff] %v9510_v36  ;;  %v9512_v61 = vpop.permute.xlu0 %7506  ;;  %14016 = vst [vmem:[#allocation41_spill] sm:$0xff] %v9536_v34  ;;  %v1737_v36 = vld [vmem:[#allocation2 + $0x25a] sm:$0xff] }
 0x137   : > { %14011 = vst [vmem:[#allocation36_spill] sm:$0xff] %v9512_v61  ;;  %7801 = vrot.lane.b32.xlu1 %v7800_v29, %s8663_s25  ;;  %v1712_v29 = vld [vmem:[#allocation2 + $0x2a9] sm:$0xff]  ;;  %v9582_v61 = vld [vmem:[#allocation2 + $0x2ba] sm:$0xff] }
 0x138   : > { %7796 = vrot.lane.b32.xlu0 %v7795_v30, %s8663_s25  ;;  %v7825_v12 = vpack.i.bf16 %v1712_v29, %v1711_v50  ;;  %v1720_v50 = vld [vmem:[#allocation2 + $0x309] sm:$0xff] }
 0x139   : > { %v9516_v47 = vpop.permute.xlu1 %7521  ;;  %v7845_v53 = vpack.i.bf16 %v1720_v50, %v1719_v13  ;;  %v1727_v13 = vld [vmem:[#allocation2 + $0x1e2] sm:$0xff]  ;;  %v1728_v50 = vld [vmem:[#allocation2 + $0x1ea] sm:$0xff] }
 0x13a   : > { %14012 = vst [vmem:[#allocation37_spill] sm:$0xff] %v9516_v47  ;;  %v9518_v33 = vpop.permute.xlu0 %7516  ;;  %v7865_v5 = vpack.i.bf16 %v1728_v50, %v1727_v13 }
 0x13b   : > { %14013 = vst [vmem:[#allocation38_spill] sm:$0xff] %v9518_v33  ;;  %7811 = vrot.lane.b32.xlu1 %v7810_v42, %s8663_s25  ;;  %v1734_v33 = vld [vmem:[#allocation2 + $0x232] sm:$0xff] }
 0x13c   : > { %7806 = vrot.lane.b32.xlu0 %v7805_v3, %s8663_s25  ;;  %v1715_v3 = vld [vmem:[#allocation2 + $0x2d1] sm:$0xff] }
 0x13d   : > { %v9522_v45 = vpop.permute.xlu1 %7531  ;;  %v9539_v48 = vpack.i.bf16 %v1716_v15, %v1715_v3  ;;  %v1723_v15 = vld [vmem:[#allocation2 + $0x1b2] sm:$0xff] }
 0x13e   : > { %14014 = vst [vmem:[#allocation39_spill] sm:$0xff] %v9522_v45  ;;  %v9524_v30 = vpop.permute.xlu0 %7526 }
 0x13f   : > { %14015 = vst [vmem:[#allocation40_spill] sm:$0xff] %v9524_v30  ;;  %7821 = vrot.lane.b32.xlu1 %v7820_v51, %s8663_s25  ;;  %v1721_v51 = vld [vmem:[#allocation2 + $0x319] sm:$0xff] }
 0x140   : > { %7816 = vrot.lane.b32.xlu0 %v7815_v58, %s8663_s25  ;;  %v1722_v58 = vld [vmem:[#allocation2 + $0x321] sm:$0xff] }
 0x141   : > { %v9530_v42 = vpop.permute.xlu1 %7541  ;;  %v7850_v45 = vpack.i.bf16 %v1722_v58, %v1721_v51  ;;  %v7855_v51 = vpack.i.bf16 %v1724_v17, %v1723_v15  ;;  %v1729_v58 = vld [vmem:[#allocation2 + $0x1fa] sm:$0xff] }
 0x142   : > { %v9532_v16 = vpop.permute.xlu0 %7536  ;;  %v7870_v4 = vpack.i.bf16 %v1730_v18, %v1729_v58  ;;  %v1732_v17 = vld [vmem:[#allocation2 + $0x21a] sm:$0xff]  ;;  %v1736_v58 = vld [vmem:[#allocation2 + $0x24a] sm:$0xff] }
 0x143   : > { %7831 = vrot.lane.b32.xlu1 %v9527_v9, %s8663_s25 }
 0x144   : > { %7826 = vrot.lane.b32.xlu0 %v7825_v12, %s8663_s25  ;;  %v1726_v12 = vld [vmem:[#allocation2 + $0x1d2] sm:$0xff] }
 0x145   : > { %v9541_v2 = vpop.permute.xlu1 %7551  ;;  %v7860_v30 = vpack.i.bf16 %v1726_v12, %v9549_v41 }
 0x146   : > { %v9543_v29 = vpop.permute.xlu0 %7546 }
 0x147   : > { %7841 = vrot.lane.b32.xlu1 %v9536_v34, %s8663_s25 }
 0x148   : > { %7836 = vrot.lane.b32.xlu0 %v9539_v48, %s8663_s25 }
 0x149   : > { %v9551_v3 = vpop.permute.xlu1 %7561 }
 0x14a   : > { %14017 = vst [vmem:[#allocation42_spill] sm:$0xff] %v9551_v3  ;;  %v9553_v19 = vpop.permute.xlu0 %7556  ;;  %v1786_v3 = vld [vmem:[#allocation2 + $0x330] sm:$0xff] }
 0x14b   : > { %7851 = vrot.lane.b32.xlu1 %v7850_v45, %s8663_s25  ;;  %v1733_v45 = vld [vmem:[#allocation2 + $0x22a] sm:$0xff] }
 0x14c   : > { %7846 = vrot.lane.b32.xlu0 %v7845_v53, %s8663_s25  ;;  %v1731_v53 = vld [vmem:[#allocation2 + $0x212] sm:$0xff]  ;;  %v7880_v11 = vpack.i.bf16 %v1734_v33, %v1733_v45  ;;  %v1740_v45 = vld [vmem:[#allocation2 + $0x27a] sm:$0xff] }
 0x14d   : > { %v9558_v46 = vpop.permute.xlu1 %7571  ;;  %v7875_v39 = vpack.i.bf16 %v1732_v17, %v1731_v53 }
 0x14e   : > { %14018 = vst [vmem:[#allocation43_spill] sm:$0xff] %v9558_v46  ;;  %v9560_v47 = vpop.permute.xlu0 %7566 }
 0x14f   : > { %14019 = vst [vmem:[#allocation44_spill] sm:$0xff] %v9560_v47  ;;  %7861 = vrot.lane.b32.xlu1 %v7860_v30, %s8664_s26  ;;  %v1738_v30 = vld [vmem:[#allocation2 + $0x262] sm:$0xff] }
 0x150   : > { %7856 = vrot.lane.b32.xlu0 %v7855_v51, %s8664_s26  ;;  %v1735_v51 = vld [vmem:[#allocation2 + $0x242] sm:$0xff]  ;;  %v7890_v50 = vpack.i.bf16 %v1738_v30, %v1737_v36  ;;  %v9590_v30 = vld [vmem:[#allocation2 + $0x2aa] sm:$0xff] }
 0x151   : > { %v9564_v12 = vpop.permute.xlu1 %7581  ;;  %v7885_v63 = vpack.i.bf16 %v1736_v58, %v1735_v51  ;;  %v9588_v36 = vld [vmem:[#allocation2 + $0x2a2] sm:$0xff]  ;;  %v9600_v58 = vld [vmem:[#allocation2 + $0x2ea] sm:$0xff] }
 0x152   : > { %14020 = vst [vmem:[#allocation45_spill] sm:$0xff] %v9564_v12  ;;  %v9566_v15 = vpop.permute.xlu0 %7576  ;;  %v1756_v12 = vld [vmem:[#allocation2 + $0x1c8] sm:$0xff] }
 0x153   : > { %14021 = vst [vmem:[#allocation46_spill] sm:$0xff] %v9566_v15  ;;  %7871 = vrot.lane.b32.xlu1 %v7870_v4, %s8664_s26  ;;  %v1742_v4 = vld [vmem:[#allocation2 + $0x292] sm:$0xff] }
 0x154   : > { %7866 = vrot.lane.b32.xlu0 %v7865_v5, %s8664_s26  ;;  %v1739_v5 = vld [vmem:[#allocation2 + $0x272] sm:$0xff]  ;;  %v7900_v17 = vpack.i.bf16 %v1742_v4, %v1741_v59 }
 0x155   : > { %v9570_v18 = vpop.permute.xlu1 %7591  ;;  %v1762_v15 = vld [vmem:[#allocation2 + $0x210] sm:$0xff] }
 0x156   : > { %14022 = vst [vmem:[#allocation47_spill] sm:$0xff] %v9570_v18  ;;  %v9572_v13 = vpop.permute.xlu0 %7586  ;;  %v7895_v18 = vpack.i.bf16 %v1740_v45, %v1739_v5  ;;  %v9606_v5 = vld [vmem:[#allocation2 + $0x2d2] sm:$0xff]  ;;  %v9608_v45 = vld [vmem:[#allocation2 + $0x2da] sm:$0xff] }
 0x157   : > { %14023 = vst [vmem:[#allocation48_spill] sm:$0xff] %v9572_v13  ;;  %7881 = vrot.lane.b32.xlu1 %v7880_v11, %s8664_s26  ;;  %v9584_v11 = vld [vmem:[#allocation2 + $0x2c2] sm:$0xff] }
 0x158   : > { %7876 = vrot.lane.b32.xlu0 %v7875_v39, %s8664_s26  ;;  %v7910_v59 = vpack.i.bf16 %v9584_v11, %v9582_v61 }
 0x159   : > { %v9576_v33 = vpop.permute.xlu1 %7601 }
 0x15a   : > { %14024 = vst [vmem:[#allocation49_spill] sm:$0xff] %v9576_v33  ;;  %v9578_v53 = vpop.permute.xlu0 %7596  ;;  %v9620_v33 = vld [vmem:[#allocation2 + $0x322] sm:$0xff] }
 0x15b   : > { %14025 = vst [vmem:[#allocation50_spill] sm:$0xff] %v9578_v53  ;;  %7891 = vrot.lane.b32.xlu1 %v7890_v50, %s8664_s26  ;;  %v9602_v50 = vld [vmem:[#allocation2 + $0x2f2] sm:$0xff]  ;;  %14029 = vst [vmem:[#allocation54_spill] sm:$0xff] %v9620_v33 }
 0x15c   : > { %7886 = vrot.lane.b32.xlu0 %v7885_v63, %s8664_s26  ;;  %v7905_v63 = vpack.i.bf16 %v9590_v30, %v9588_v36 }
 0x15d   : > { %v9586_v39 = vpop.permute.xlu1 %7611 }
 0x15e   : > { %14026 = vst [vmem:[#allocation51_spill] sm:$0xff] %v9586_v39  ;;  %v9592_v51 = vpop.permute.xlu0 %7606 }
 0x15f   : > { %14027 = vst [vmem:[#allocation52_spill] sm:$0xff] %v9592_v51  ;;  %7901 = vrot.lane.b32.xlu1 %v7900_v17, %s8664_s26  ;;  %v7915_v17 = vpack.i.bf16 %v9608_v45, %v9606_v5  ;;  %v9618_v51 = vld [vmem:[#allocation2 + $0x31a] sm:$0xff] }
 0x160   : > { %7896 = vrot.lane.b32.xlu0 %v7895_v18, %s8664_s26  ;;  %v7920_v18 = vpack.i.bf16 %v9602_v50, %v9600_v58  ;;  %14028 = vst [vmem:[#allocation53_spill] sm:$0xff] %v9618_v51 }
 0x161   : > { %v9604_v4 = vpop.permute.xlu1 %7621 }
 0x162   : > { %v9610_v39 = vpop.permute.xlu0 %7616 }
 0x163   : > { %7911 = vrot.lane.b32.xlu1 %v7910_v59, %s8664_s26  ;;  %v7930_v59 = vpack.i.bf16 %v9620_v33, %v9618_v51  ;;  %v1772_v33 = vld [vmem:[#allocation2 + $0x288] sm:$0xff] }
 0x164   : > { %7906 = vrot.lane.b32.xlu0 %v7905_v63, %s8664_s26  ;;  %v7925_v63 = vpack.i.bf16 %v9626_v38, %v9624_v6  ;;  %v535_v38 = vld [vmem:[#allocation2 + $0x21] sm:$0xff] }
 0x165   : > { %v9622_v53 = vpop.permute.xlu1 %7631 }
 0x166   : > { %v9628_v13 = vpop.permute.xlu0 %7626 }
 0x167   : > { %7921 = vrot.lane.b32.xlu1 %v7920_v18, %s8664_s26  ;;  %v7935_v18 = vpack.i.bf16 %v1757_v55, %v1756_v12  ;;  %v1764_v55 = vld [vmem:[#allocation2 + $0x228] sm:$0xff]  ;;  %v1765_v12 = vld [vmem:[#allocation2 + $0x230] sm:$0xff] }
 0x168   : > { %7916 = vrot.lane.b32.xlu0 %v7915_v17, %s8664_s26  ;;  %v1763_v17 = vld [vmem:[#allocation2 + $0x218] sm:$0xff] }
 0x169   : > { %v9636_v32 = vpop.permute.xlu1 %7641  ;;  %v7950_v43 = vpack.i.bf16 %v1763_v17, %v1762_v15  ;;  %v1770_v15 = vld [vmem:[#allocation2 + $0x270] sm:$0xff]  ;;  %v1771_v17 = vld [vmem:[#allocation2 + $0x278] sm:$0xff] }
 0x16a   : > { %14031 = vst [vmem:[#allocation56_spill] sm:$0xff] %v9636_v32  ;;  %v9638_v1 = vpop.permute.xlu0 %7636 }
 0x16b   : > { %7931 = vrot.lane.b32.xlu1 %v7930_v59, %s8664_s26  ;;  %v9651_v59 = vpack.i.bf16 %v1761_v44, %v1760_v60  ;;  %v1768_v44 = vld [vmem:[#allocation2 + $0x258] sm:$0xff]  ;;  %v1769_v60 = vld [vmem:[#allocation2 + $0x260] sm:$0xff] }
 0x16c   : > { %7926 = vrot.lane.b32.xlu0 %v7925_v63, %s8664_s26 }
 0x16d   : > { %v9644_v25 = vpop.permute.xlu1 %7651  ;;  %14035 = vst [vmem:[#allocation60_spill] sm:$0xff] %v9651_v59 }
 0x16e   : > { %14033 = vst [vmem:[#allocation58_spill] sm:$0xff] %v9644_v25  ;;  %v9646_v46 = vpop.permute.xlu0 %7646  ;;  %v7960_v25 = vpack.i.bf16 %v1767_v28, %v1766_v54  ;;  %v405_v54 = vld [vmem:[#allocation2] sm:$0xff]  ;;  %v7965_v28 = vpack.i.bf16 %v1769_v60, %v1768_v44  ;;  %v1776_v44 = vld [vmem:[#allocation2 + $0x2b8] sm:$0xff] }
 0x16f   : > { %14034 = vst [vmem:[#allocation59_spill] sm:$0xff] %v9646_v46  ;;  %7941 = vrot.lane.b32.xlu1 %v9641_v37, %s8665_s27  ;;  %v7955_v37 = vpack.i.bf16 %v1765_v12, %v1764_v55  ;;  %v1774_v55 = vld [vmem:[#allocation2 + $0x2a0] sm:$0xff]  ;;  %v1775_v12 = vld [vmem:[#allocation2 + $0x2a8] sm:$0xff]  ;;  %v1773_v46 = vld [vmem:[#allocation2 + $0x290] sm:$0xff] }
 0x170   : > { %7936 = vrot.lane.b32.xlu0 %v7935_v18, %s8665_s27  ;;  %v1777_v60 = vld [vmem:[#allocation2 + $0x2c0] sm:$0xff] }
 0x171   : > { %v9653_v63 = vpop.permute.xlu1 %7661 }
 0x172   : > { %14036 = vst [vmem:[#allocation61_spill] sm:$0xff] %v9653_v63  ;;  %v9655_v62 = vpop.permute.xlu0 %7656  ;;  %v7970_v63 = vpack.i.bf16 %v1771_v17, %v1770_v15  ;;  %v7379_v15 = vunpack.i.h.bf16 %v9410_v49  ;;  %v1779_v17 = vld [vmem:[#allocation2 + $0x2d8] sm:$0xff] }
 0x173   : > { %14037 = vst [vmem:[#allocation62_spill] sm:$0xff] %v9655_v62  ;;  %7951 = vrot.lane.b32.xlu1 %v7950_v43, %s8665_s27  ;;  %v7299_v62 = vunpack.i.h.bf16 %v9307_v10  ;;  %v7298_v43 = vunpack.i.l.bf16 %v9307_v10  ;;  %v7378_v10 = vunpack.i.l.bf16 %v9410_v49  ;;  %v1781_v49 = vld [vmem:[#allocation2 + $0x2f0] sm:$0xff] }
 0x174   : > { %7946 = vrot.lane.b32.xlu0 %v9651_v59, %s8665_s27  ;;  %v406_v59 = vld [vmem:[#allocation2 + $0x8] sm:$0xff] }
 0x175   : > { %v9660_v18 = vpop.permute.xlu1 %7671  ;;  %v1464_v47 = vsel %vm1463_vm2, %v405_v54, %v7298_v43  ;;  %v7544_v43 = vunpack.i.h.bf16 %v9530_v42 }
 0x176   : > { %14038 = vst [vmem:[#allocation63_spill] sm:$0xff] %v9660_v18  ;;  %v9662_v27 = vpop.permute.xlu0 %7666  ;;  %v1497_v51 = vsel %vm1496_vm3, %v1464_v47, %v7378_v10 }
 0x177   : > { %14039 = vst [vmem:[#allocation64_spill] sm:$0xff] %v9662_v27  ;;  %7961 = vrot.lane.b32.xlu1 %v7960_v25, %s8665_s27  ;;  %v1778_v25 = vld [vmem:[#allocation2 + $0x2d0] sm:$0xff] }
 0x178   : > { %7956 = vrot.lane.b32.xlu0 %v7955_v37, %s8665_s27  ;;  %v7980_v37 = vpack.i.bf16 %v1775_v12, %v1774_v55  ;;  %v7458_v55 = vunpack.i.l.bf16 %v9478_v24  ;;  %v9689_v54 = vpack.i.bf16 %v1779_v17, %v1778_v25  ;;  %v7624_v25 = vunpack.i.h.bf16 %v9604_v4 }
 0x179   : > { %v9668_v18 = vpop.permute.xlu1 %7681  ;;  %v7623_v17 = vunpack.i.l.bf16 %v9604_v4 }
 0x17a   : > { %14040 = vst [vmem:[#allocation65_spill] sm:$0xff] %v9668_v18  ;;  %v9670_v27 = vpop.permute.xlu0 %7676  ;;  %v1465_v18 = vsel %vm1463_vm2, %v406_v59, %v7299_v62  ;;  %v7543_v62 = vunpack.i.l.bf16 %v9530_v42  ;;  %v1530_v47 = vsel %vm1529_vm4, %v1497_v51, %v7458_v55  ;;  %v1787_v51 = vld [vmem:[#allocation2 + $0x338] sm:$0xff] }
 0x17b   : > { %14041 = vst [vmem:[#allocation66_spill] sm:$0xff] %v9670_v27  ;;  %7971 = vrot.lane.b32.xlu1 %v7970_v63, %s8665_s27  ;;  %v7975_v27 = vpack.i.bf16 %v1773_v46, %v1772_v33  ;;  %v7459_v63 = vunpack.i.h.bf16 %v9478_v24  ;;  %v9691_v46 = vpack.i.bf16 %v1777_v60, %v1776_v44  ;;  %v1783_v33 = vld [vmem:[#allocation2 + $0x308] sm:$0xff]  ;;  %v7539_v24 = vunpack.i.h.bf16 %v9532_v16  ;;  %v1784_v55 = vld [vmem:[#allocation2 + $0x318] sm:$0xff] }
 0x17c   : > { %7966 = vrot.lane.b32.xlu0 %v7965_v28, %s8665_s27  ;;  %v1780_v28 = vld [vmem:[#allocation2 + $0x2e8] sm:$0xff]  ;;  %v1498_v42 = vsel %vm1496_vm3, %v1465_v18, %v7379_v15  ;;  %v7619_v44 = vunpack.i.h.bf16 %v9610_v39  ;;  %v7618_v60 = vunpack.i.l.bf16 %v9610_v39  ;;  %v1565_v15 = vsel %vm1463_vm2, %v537_v40, %v7544_v43 }
 0x17d   : > { %v9683_v12 = vpop.permute.xlu1 %7691  ;;  %v1531_v18 = vsel %vm1529_vm4, %v1498_v42, %v7459_v63  ;;  %v1564_v4 = vsel %vm1463_vm2, %v536_v0, %v7543_v62  ;;  %v1785_v63 = vld [vmem:[#allocation2 + $0x320] sm:$0xff]  ;;  %v1597_v43 = vsel %vm1496_vm3, %v1565_v15, %v7624_v25  ;;  %v7464_v25 = vunpack.i.h.bf16 %v9476_v23 }
 0x17e   : > { %14042 = vst [vmem:[#allocation67_spill] sm:$0xff] %v9683_v12  ;;  %v9687_v59 = vpop.permute.xlu0 %7686  ;;  %v7538_v12 = vunpack.i.l.bf16 %v9532_v16  ;;  %v9703_v16 = vpack.i.bf16 %v1783_v33, %v1782_v21  ;;  %v1596_v0 = vsel %vm1496_vm3, %v1564_v4, %v7623_v17  ;;  %v7549_v17 = vunpack.i.h.bf16 %v9543_v29  ;;  %v538_v4 = vld [vmem:[#allocation2 + $0x49] sm:$0xff] }
 0x17f   : > { %14043 = vst [vmem:[#allocation68_spill] sm:$0xff] %v9687_v59  ;;  %7981 = vrot.lane.b32.xlu1 %v7980_v37, %s8665_s27  ;;  %v534_v59 = vld [vmem:[#allocation2 + $0x19] sm:$0xff]  ;;  %v9705_v37 = vpack.i.bf16 %v1781_v49, %v1780_v28  ;;  %v1563_v49 = vsel %vm1463_vm2, %v535_v38, %v7539_v24  ;;  %v7383_v28 = vunpack.i.l.bf16 %v9408_v31  ;;  %v7463_v15 = vunpack.i.l.bf16 %v9476_v23 }
 0x180   : > { %7976 = vrot.lane.b32.xlu0 %v7975_v27, %s8665_s27  ;;  %v1562_v21 = vsel %vm1463_vm2, %v534_v59, %v7538_v12 }
 0x181   : > { %v7702_v32 = vpop.permute.xlu1 %7701  ;;  %v1594_v40 = vsel %vm1496_vm3, %v1562_v21, %v7618_v60  ;;  %v9728_v60 = vpack.i.bf16 %v1787_v51, %v1786_v3  ;;  %v7628_v3 = vunpack.i.l.bf16 %v9628_v13  ;;  %v8531_v21 = vld [vmem:[#allocation2 + $0x18] sm:$0xff]  ;;  %v8532_v51 = vld [vmem:[#allocation2 + $0x20] sm:$0xff] }
 0x182   : > { %v7704_v10 = vunpack.i.h.bf16 %v7702_v32  ;;  %v7703_v34 = vunpack.i.l.bf16 %v7702_v32  ;;  %v7697_v39 = vpop.permute.xlu0 %7696  ;;  %v1595_v32 = vsel %vm1496_vm3, %v1563_v49, %v7619_v44  ;;  %v9730_v44 = vpack.i.bf16 %v1785_v63, %v1784_v55 }
 0x183   : > { %v7699_v27 = vunpack.i.h.bf16 %v7697_v39  ;;  %v7698_v14 = vunpack.i.l.bf16 %v7697_v39  ;;  %7991 = vrot.lane.b32.xlu1 %v9689_v54, %s8665_s27  ;;  %v7629_v39 = vunpack.i.h.bf16 %v9628_v13 }
 0x184   : > { %7986 = vrot.lane.b32.xlu0 %v9691_v46, %s8665_s27  ;;  %v1628_v59 = vsel %vm1529_vm4, %v1596_v0, %v7703_v34  ;;  %v1629_v33 = vsel %vm1529_vm4, %v1597_v43, %v7704_v10  ;;  %v2973_v34 = vpack.c.bf16 %v1531_v18, %v1530_v47  ;;  %v539_v10 = vld [vmem:[#allocation2 + $0x51] sm:$0xff]  ;;  %v14045_v47 = vunpack.i.h.bf16 %v9320_v20 }
 0x185   : > { %v9721_v62 = vpop.permute.xlu1 %7711  ;;  %v1626_v12 = vsel %vm1529_vm4, %v1594_v40, %v7698_v14  ;;  %v1627_v38 = vsel %vm1529_vm4, %v1595_v32, %v7699_v27  ;;  %v7548_v14 = vunpack.i.l.bf16 %v9543_v29  ;;  %v2977_v27 = vpack.c.bf16 %v1629_v33, %v1628_v59 }
 0x186   : > { %v7707_v24 = vpop.permute.xlu0 %7706  ;;  %v2974_v42 = vpack.c.bf16 %v1627_v38, %v1626_v12  ;;  %v14044_v29 = vunpack.i.l.bf16 %v9320_v20  ;;  %v1467_v23 = vsel %vm1463_vm2, %v8532_v51, %v14045_v47  ;;  %v14046_v32 = vunpack.i.h.bf16 %v9408_v31 }
 0x187   : > { %8001 = vrot.lane.b32.xlu1 %v9703_v16, %s8665_s27  ;;  %v7709_v18 = vunpack.i.h.bf16 %v7707_v24  ;;  %v7708_v55 = vunpack.i.l.bf16 %v7707_v24  ;;  %v1567_v43 = vsel %vm1463_vm2, %v539_v10, %v7549_v17  ;;  %v1566_v20 = vsel %vm1463_vm2, %v538_v4, %v7548_v14 }
 0x188   : > { %7996 = vrot.lane.b32.xlu0 %v9705_v37, %s8665_s27  ;;  %3341 = vmatprep.mubr.bf16.mxu0 %v2974_v42  ;;  %v1466_v49 = vsel %vm1463_vm2, %v8531_v21, %v14044_v29  ;;  %v1500_v0 = vsel %vm1496_vm3, %v1467_v23, %v14046_v32  ;;  %v8020_v12 = vpack.i.bf16 %v9582_v61, %v9590_v30  ;;  %v7308_v24 = vunpack.i.l.bf16 %v9305_v7  ;;  %v8533_v29 = vld [vmem:[#allocation2 + $0x30] sm:$0xff] }
 0x189   : > { %3342 = vmatmul.mubr.bf16.vlgmr.msra.gmra.mxu0 %v2973_v34  ;;  %v9748_v63 = vpop.permute.xlu1 %7721  ;;  %v1499_v40 = vsel %vm1496_vm3, %v1466_v49, %v7383_v28  ;;  %v8015_v38 = vpack.i.bf16 %v9588_v36, %v9549_v41  ;;  %v1533_v59 = vsel %vm1529_vm4, %v1500_v0, %v7464_v25  ;;  %v1598_v33 = vsel %vm1496_vm3, %v1566_v20, %v7628_v3  ;;  %v8271_v41 = vld [vmem:[%s13767_s1 + $0x88] sm:$0xff]  }
 0x18a   : > { %v9750_v13 = vpop.permute.xlu0 %7716  ;;  %3349 = vmatprep.mubr.bf16.mxu0 %v2977_v27  ;;  %v1532_v31 = vsel %vm1529_vm4, %v1499_v40, %v7463_v15  ;;  %v1599_v28 = vsel %vm1496_vm3, %v1567_v43, %v7629_v39  ;;  %v1630_v61 = vsel %vm1529_vm4, %v1598_v33, %v7708_v55  ;;  %v7309_v36 = vunpack.i.h.bf16 %v9305_v7  ;;  %7120 = vmatprep.subr.bf16.mxu1 %v8271_v41  ;;  %v540_v3 = vld [vmem:[#allocation2 + $0x61] sm:$0xff]  ;;  %v541_v7 = vld [vmem:[#allocation2 + $0x69] sm:$0xff] }
 0x18b   : > { %8011 = vrot.lane.b32.xlu1 %v9728_v60, %s8665_s27  ;;  %v1631_v30 = vsel %vm1529_vm4, %v1599_v28, %v7709_v18  ;;  %v7389_v25 = vunpack.i.h.bf16 %v9423_v56  ;;  %v7388_v17 = vunpack.i.l.bf16 %v9423_v56  ;;  %v7469_v34 = vunpack.i.h.bf16 %v9486_v35 }
 0x18c   : > { %8006 = vrot.lane.b32.xlu0 %v9730_v44, %s8665_s27  ;;  %v7554_v15 = vunpack.i.h.bf16 %v9541_v2  ;;  %v7553_v4 = vunpack.i.l.bf16 %v9541_v2  ;;  %v2976_v10 = vpack.c.bf16 %v1533_v59, %v1532_v31  ;;  %v7468_v39 = vunpack.i.l.bf16 %v9486_v35  ;;  %v8534_v35 = vld [vmem:[#allocation2 + $0x38] sm:$0xff] }
 0x18d   : > { %v9771_v42 = vpop.permute.xlu1 %7731  ;;  %v7634_v27 = vunpack.i.h.bf16 %v9622_v53  ;;  %v7633_v56 = vunpack.i.l.bf16 %v9622_v53  ;;  %v2980_v21 = vpack.c.bf16 %v1631_v30, %v1630_v61  ;;  %v1468_v49 = vsel %vm1463_vm2, %v8533_v29, %v7308_v24 }
 0x18e   : > { %v9781_v14 = vpop.permute.xlu0 %7726  ;;  %v7714_v2 = vunpack.i.h.bf16 %v9721_v62  ;;  %v7713_v51 = vunpack.i.l.bf16 %v9721_v62  ;;  %v1469_v23 = vsel %vm1463_vm2, %v8534_v35, %v7309_v36  ;;  %v1501_v53 = vsel %vm1496_vm3, %v1468_v49, %v7388_v17  ;;  %v542_v36 = vld [vmem:[#allocation2 + $0x79] sm:$0xff] }
 0x18f   : > { %8021 = vrot.lane.b32.xlu1 %v8020_v12, %s8663_s25  ;;  %v1569_v55 = vsel %vm1463_vm2, %v541_v7, %v7554_v15  ;;  %v1568_v40 = vsel %vm1463_vm2, %v540_v3, %v7553_v4  ;;  %v8035_v62 = vpack.i.bf16 %v9606_v5, %v9584_v11  ;;  %v1502_v32 = vsel %vm1496_vm3, %v1469_v23, %v7389_v25  ;;  %v543_v25 = vld [vmem:[#allocation2 + $0x81] sm:$0xff] }
 0x190   : > { %8016 = vrot.lane.b32.xlu0 %v8015_v38, %s8663_s25  ;;  %v1534_v0 = vsel %vm1529_vm4, %v1501_v53, %v7468_v39  ;;  %v1535_v43 = vsel %vm1529_vm4, %v1502_v32, %v7469_v34  ;;  %v1600_v20 = vsel %vm1496_vm3, %v1568_v40, %v7633_v56  ;;  %v1601_v12 = vsel %vm1496_vm3, %v1569_v55, %v7634_v27  ;;  %v14047_v40 = vld [vmem:[#allocation30_spill] sm:$0xff] }
 0x191   : > { %3350 = vmatmul.mubr.bf16.gmra.mxu0 %v2976_v10  ;;  %v9794_v47 = vpop.permute.xlu1 %7741  ;;  %v7314_v38 = vunpack.i.h.bf16 %v9318_v26  ;;  %v1633_v11 = vsel %vm1529_vm4, %v1601_v12, %v7714_v2  ;;  %v7313_v5 = vunpack.i.l.bf16 %v9318_v26  ;;  %v7393_v59 = vunpack.i.l.bf16 %v9421_v52  ;;  %v544_v32 = vld [vmem:[#allocation2 + $0x91] sm:$0xff] }
 0x192   : > { %v9797_v18 = vpop.permute.xlu0 %7736  ;;  %3357 = vmatprep.mubr.bf16.mxu0 %v2980_v21  ;;  %v8050_v28 = vpack.i.bf16 %v9600_v58, %v9608_v45  ;;  %v7474_v24 = vunpack.i.h.bf16 %v9484_v8  ;;  %v7559_v61 = vunpack.i.h.bf16 %v9553_v19  ;;  %v7558_v30 = vunpack.i.l.bf16 %v9553_v19 }
 0x193   : > { %8031 = vrot.lane.b32.xlu1 %v9527_v9, %s8665_s27  ;;  %v1632_v9 = vsel %vm1529_vm4, %v1600_v20, %v7713_v51  ;;  %v2979_v41 = vpack.c.bf16 %v1535_v43, %v1534_v0  ;;  %v7473_v26 = vunpack.i.l.bf16 %v9484_v8  ;;  %v7638_v17 = vunpack.i.l.bf16 %v9638_v1  ;;  %v8536_v8 = vld [vmem:[#allocation2 + $0x50] sm:$0xff]  ;;  %v14048_v0 = vld [vmem:[#allocation42_spill] sm:$0xff] }
 0x194   : > { %8026 = vrot.lane.b32.xlu0 %v9691_v46, %s8664_s26  ;;  %v7394_v46 = vunpack.i.h.bf16 %v9421_v52  ;;  %v7639_v52 = vunpack.i.h.bf16 %v9638_v1  ;;  %v2983_v58 = vpack.c.bf16 %v1633_v11, %v1632_v9  ;;  %v7719_v45 = vunpack.i.h.bf16 %v9750_v13  ;;  %v14049_v20 = vld [vmem:[#allocation41_spill] sm:$0xff]  ;;  %v545_v9 = vld [vmem:[#allocation2 + $0x99] sm:$0xff] }
 0x195   : > { %v9814_v31 = vpop.permute.xlu1 %7751  ;;  %v7718_v34 = vunpack.i.l.bf16 %v9750_v13  ;;  %v1471_v4 = vsel %vm1463_vm2, %v8536_v8, %v7314_v38  ;;  %v1571_v1 = vsel %vm1463_vm2, %v543_v25, %v7559_v61  ;;  %v1570_v39 = vsel %vm1463_vm2, %v542_v36, %v7558_v30 }
 0x196   : > { %v9821_v33 = vpop.permute.xlu0 %7746  ;;  %v1504_v3 = vsel %vm1496_vm3, %v1471_v4, %v7394_v46  ;;  %v1602_v56 = vsel %vm1496_vm3, %v1570_v39, %v7638_v17  ;;  %v1603_v21 = vsel %vm1496_vm3, %v1571_v1, %v7639_v52  ;;  %v7319_v29 = vunpack.i.h.bf16 %v9333_v22  ;;  %v1910_v46 = vld [vmem:[#allocation2 + $0x309] sm:$0xff]  ;;  %v1911_v1 = vld [vmem:[#allocation2 + $0x319] sm:$0xff]  ;;  %v1912_v39 = vld [vmem:[#allocation2 + $0x321] sm:$0xff] }
 0x197   : > { %8041 = vrot.lane.b32.xlu1 %v9689_v54, %s8664_s26  ;;  %v8535_v54 = vld [vmem:[#allocation2 + $0x48] sm:$0xff]  ;;  %v1537_v27 = vsel %vm1529_vm4, %v1504_v3, %v7474_v24  ;;  %v7318_v49 = vunpack.i.l.bf16 %v9333_v22  ;;  %v1634_v51 = vsel %vm1529_vm4, %v1602_v56, %v7718_v34  ;;  %v1635_v35 = vsel %vm1529_vm4, %v1603_v21, %v7719_v45  ;;  %v14052_v45 = vld [vmem:[#allocation53_spill] sm:$0xff]  ;;  %v14054_v21 = vld [vmem:[#allocation18_spill] sm:$0xff] }
 0x198   : > { %8036 = vrot.lane.b32.xlu0 %v8035_v62, %s8663_s25  ;;  %v1470_v15 = vsel %vm1463_vm2, %v8535_v54, %v7313_v5  ;;  %v7398_v23 = vunpack.i.l.bf16 %v9431_v57  ;;  %v8065_v55 = vpack.i.bf16 %v9624_v6, %v9602_v50  ;;  %v7479_v62 = vunpack.i.h.bf16 %v14047_v40  ;;  %v1909_v50 = vld [vmem:[#allocation2 + $0x301] sm:$0xff] }
 0x199   : > { %3358 = vmatmul.mubr.bf16.gmra.mxu0 %v2979_v41  ;;  %v9836_v19 = vpop.permute.xlu1 %7761  ;;  %v1503_v13 = vsel %vm1496_vm3, %v1470_v15, %v7393_v59  ;;  %v7564_v22 = vunpack.i.h.bf16 %v14048_v0  ;;  %v7563_v43 = vunpack.i.l.bf16 %v14048_v0  ;;  %v7478_v38 = vunpack.i.l.bf16 %v14047_v40  ;;  %v8537_v59 = vld [vmem:[#allocation2 + $0x60] sm:$0xff]  ;;  %v8538_v24 = vld [vmem:[#allocation2 + $0x68] sm:$0xff] }
 0x19a   : > { %v9840_v10 = vpop.permute.xlu0 %7756  ;;  %3365 = vmatprep.mubr.bf16.mxu0 %v2983_v58  ;;  %v1536_v7 = vsel %vm1529_vm4, %v1503_v13, %v7473_v26  ;;  %v2986_v6 = vpack.c.bf16 %v1635_v35, %v1634_v51  ;;  %v1473_v61 = vsel %vm1463_vm2, %v8538_v24, %v7319_v29  ;;  %v7724_v30 = vunpack.i.h.bf16 %v9748_v63  ;;  %v14051_v58 = vld [vmem:[#allocation55_spill] sm:$0xff]  ;;  %v14055_v51 = vld [vmem:[#allocation29_spill] sm:$0xff] }
 0x19b   : > { %8051 = vrot.lane.b32.xlu1 %v8050_v28, %s8663_s25  ;;  %v2982_v12 = vpack.c.bf16 %v1537_v27, %v1536_v7  ;;  %v1472_v28 = vsel %vm1463_vm2, %v8537_v59, %v7318_v49  ;;  %v7723_v41 = vunpack.i.l.bf16 %v9748_v63  ;;  %v1573_v52 = vsel %vm1463_vm2, %v545_v9, %v7564_v22  ;;  %v14053_v13 = vld [vmem:[#allocation7_spill] sm:$0xff]  ;;  %v546_v22 = vld [vmem:[#allocation2 + $0xa9] sm:$0xff] }
 0x19c   : > { %8046 = vrot.lane.b32.xlu0 %v9539_v48, %s8665_s27  ;;  %v7399_v48 = vunpack.i.h.bf16 %v9431_v57  ;;  %v14050_v57 = vld [vmem:[#allocation56_spill] sm:$0xff]  ;;  %v1572_v17 = vsel %vm1463_vm2, %v544_v32, %v7563_v43  ;;  %v8080_v63 = vpack.i.bf16 %v14052_v45, %v14051_v58  ;;  %v8075_v34 = vpack.i.bf16 %v1910_v46, %v1909_v50  ;;  %v547_v43 = vld [vmem:[#allocation2 + $0xb1] sm:$0xff] }
 0x19d   : > { %v9855_v2 = vpop.permute.xlu1 %7771  ;;  %v7644_v11 = vunpack.i.h.bf16 %v14050_v57  ;;  %v7643_v5 = vunpack.i.l.bf16 %v14050_v57  ;;  %v7324_v3 = vunpack.i.h.bf16 %v14053_v13  ;;  %v7404_v29 = vunpack.i.h.bf16 %v14054_v21  ;;  %v8539_v57 = vld [vmem:[#allocation2 + $0x78] sm:$0xff] }
 0x19e   : > { %v9861_v53 = vpop.permute.xlu0 %7766  ;;  %v1506_v25 = vsel %vm1496_vm3, %v1473_v61, %v7399_v48  ;;  %v7403_v49 = vunpack.i.l.bf16 %v14054_v21  ;;  %v7484_v35 = vunpack.i.h.bf16 %v14055_v51  ;;  %v7483_v48 = vunpack.i.l.bf16 %v14055_v51 }
 0x19f   : > { %8061 = vrot.lane.b32.xlu1 %v14049_v20, %s8665_s27  ;;  %v1539_v15 = vsel %vm1529_vm4, %v1506_v25, %v7479_v62  ;;  %v1604_v8 = vsel %vm1496_vm3, %v1572_v17, %v7643_v5  ;;  %v1605_v4 = vsel %vm1496_vm3, %v1573_v52, %v7644_v11  ;;  %v8090_v0 = vpack.i.bf16 %v1912_v39, %v1911_v1  ;;  %v14057_v20 = vld [vmem:[#allocation59_spill] sm:$0xff]  ;;  %v14059_v52 = vld [vmem:[#allocation54_spill] sm:$0xff] }
 0x1a0   : > { %8056 = vrot.lane.b32.xlu0 %v9705_v37, %s8664_s26  ;;  %v1505_v37 = vsel %vm1496_vm3, %v1472_v28, %v7398_v23  ;;  %v1636_v27 = vsel %vm1529_vm4, %v1604_v8, %v7723_v41  ;;  %v1637_v56 = vsel %vm1529_vm4, %v1605_v4, %v7724_v30  ;;  %v8540_v5 = vld [vmem:[#allocation2 + $0x80] sm:$0xff]  ;;  %v7729_v50 = vunpack.i.h.bf16 %v9781_v14  ;;  %v1850_v28 = vld [vmem:[#allocation2 + $0x332] sm:$0xff] }
 0x1a1   : > { %3366 = vmatmul.mubr.bf16.gmra.mxu0 %v2982_v12  ;;  %v9879_v26 = vpop.permute.xlu1 %7781  ;;  %v1538_v54 = vsel %vm1529_vm4, %v1505_v37, %v7478_v38  ;;  %v7649_v12 = vunpack.i.h.bf16 %v14057_v20  ;;  %v7648_v38 = vunpack.i.l.bf16 %v14057_v20  ;;  %v2989_v9 = vpack.c.bf16 %v1637_v56, %v1636_v27  ;;  %v14063_v56 = vld [vmem:[#allocation32_spill] sm:$0xff] }
 0x1a2   : > { %v9881_v36 = vpop.permute.xlu0 %7776  ;;  %3373 = vmatprep.mubr.bf16.mxu0 %v2986_v6  ;;  %v2985_v32 = vpack.c.bf16 %v1539_v15, %v1538_v54  ;;  %v1475_v6 = vsel %vm1463_vm2, %v8540_v5, %v7324_v3  ;;  %v7728_v46 = vunpack.i.l.bf16 %v9781_v14  ;;  %v8095_v17 = vpack.i.bf16 %v1850_v28, %v14059_v52  ;;  %v14060_v54 = vld [vmem:[#allocation9_spill] sm:$0xff]  ;;  %v14062_v3 = vld [vmem:[#allocation20_spill] sm:$0xff]  ;;  %v8542_v5 = vld [vmem:[#allocation2 + $0x98] sm:$0xff] }
 0x1a3   : > { %8071 = vrot.lane.b32.xlu1 %v9703_v16, %s8664_s26  ;;  %v7323_v16 = vunpack.i.l.bf16 %v14053_v13  ;;  %v1508_v30 = vsel %vm1496_vm3, %v1475_v6, %v7404_v29  ;;  %v7329_v15 = vunpack.i.h.bf16 %v14060_v54  ;;  %v7328_v8 = vunpack.i.l.bf16 %v14060_v54  ;;  %v1913_v13 = vld [vmem:[#allocation2 + $0x331] sm:$0xff]  ;;  %v1883_v28 = vld [vmem:[#allocation2 + $0x348] sm:$0xff] }
 0x1a4   : > { %8066 = vrot.lane.b32.xlu0 %v8065_v55, %s8663_s25  ;;  %v14056_v55 = vld [vmem:[#allocation44_spill] sm:$0xff]  ;;  %v1541_v14 = vsel %vm1529_vm4, %v1508_v30, %v7484_v35  ;;  %v7408_v27 = vunpack.i.l.bf16 %v14062_v3  ;;  %v7489_v21 = vunpack.i.h.bf16 %v14063_v56  ;;  %v7488_v51 = vunpack.i.l.bf16 %v14063_v56  ;;  %v14070_v56 = vld [vmem:[#allocation31_spill] sm:$0xff] }
 0x1a5   : > { %v9898_v7 = vpop.permute.xlu1 %7791  ;;  %v7569_v40 = vunpack.i.h.bf16 %v14056_v55  ;;  %v7568_v62 = vunpack.i.l.bf16 %v14056_v55  ;;  %v1474_v11 = vsel %vm1463_vm2, %v8539_v57, %v7323_v16  ;;  %v7409_v16 = vunpack.i.h.bf16 %v14062_v3  ;;  %v548_v35 = vld [vmem:[#allocation2 + $0xc1] sm:$0xff]  ;;  %v8541_v57 = vld [vmem:[#allocation2 + $0x90] sm:$0xff] }
 0x1a6   : > { %v9906_v23 = vpop.permute.xlu0 %7786  ;;  %v1507_v61 = vsel %vm1496_vm3, %v1474_v11, %v7403_v49  ;;  %v1476_v11 = vsel %vm1463_vm2, %v8541_v57, %v7328_v8  ;;  %v1477_v6 = vsel %vm1463_vm2, %v8542_v5, %v7329_v15  ;;  %v14069_v3 = vld [vmem:[#allocation19_spill] sm:$0xff]  ;;  %v8544_v57 = vld [vmem:[#allocation2 + $0xb0] sm:$0xff]  ;;  %v7739_v5 = vunpack.i.h.bf16 %v9797_v18 }
 0x1a7   : > { %8081 = vrot.lane.b32.xlu1 %v8080_v63, %s8663_s25  ;;  %v1575_v41 = vsel %vm1463_vm2, %v547_v43, %v7569_v40  ;;  %v1574_v37 = vsel %vm1463_vm2, %v546_v22, %v7568_v62  ;;  %v1540_v25 = vsel %vm1529_vm4, %v1507_v61, %v7483_v48  ;;  %v1821_v63 = vld [vmem:[#allocation2 + $0x1d2] sm:$0xff]  ;;  %v14065_v48 = vld [vmem:[#allocation43_spill] sm:$0xff] }
 0x1a8   : > { %8076 = vrot.lane.b32.xlu0 %v8075_v34, %s8665_s27  ;;  %v1606_v58 = vsel %vm1496_vm3, %v1574_v37, %v7648_v38  ;;  %v1607_v45 = vsel %vm1496_vm3, %v1575_v41, %v7649_v12  ;;  %v1851_v34 = vld [vmem:[#allocation2 + $0x33a] sm:$0xff]  ;;  %v2988_v49 = vpack.c.bf16 %v1541_v14, %v1540_v25  ;;  %v7574_v55 = vunpack.i.h.bf16 %v14065_v48  ;;  %v1915_v38 = vld [vmem:[#allocation2 + $0x349] sm:$0xff] }
 0x1a9   : > { %3374 = vmatmul.mubr.bf16.gmra.mxu0 %v2985_v32  ;;  %v9918_v59 = vpop.permute.xlu1 %7801  ;;  %v1638_v1 = vsel %vm1529_vm4, %v1606_v58, %v7728_v46  ;;  %v1639_v39 = vsel %vm1529_vm4, %v1607_v45, %v7729_v50  ;;  %v7573_v40 = vunpack.i.l.bf16 %v14065_v48  ;;  %v8110_v62 = vpack.i.bf16 %v1821_v63, %v1851_v34  ;;  %v549_v32 = vld [vmem:[#allocation2 + $0xc9] sm:$0xff] }
 0x1aa   : > { %14058 = vst [vmem:[#allocation30_spill] sm:$0xff] %v9918_v59  ;;  %v9920_v24 = vpop.permute.xlu0 %7796  ;;  %3381 = vmatprep.mubr.bf16.mxu0 %v2989_v9  ;;  %v2992_v20 = vpack.c.bf16 %v1639_v39, %v1638_v1  ;;  %v1916_v9 = vld [vmem:[#allocation2 + $0x351] sm:$0xff]  ;;  %v7733_v50 = vunpack.i.l.bf16 %v9771_v42  ;;  %v1509_v41 = vsel %vm1496_vm3, %v1476_v11, %v7408_v27  ;;  %v1510_v37 = vsel %vm1496_vm3, %v1477_v6, %v7409_v16  ;;  %v14068_v34 = vld [vmem:[#allocation8_spill] sm:$0xff] }
 0x1ab   : > { %8091 = vrot.lane.b32.xlu1 %v8090_v0, %s8665_s27  ;;  %v14066_v0 = vld [vmem:[#allocation58_spill] sm:$0xff]  ;;  %v1884_v61 = vld [vmem:[#allocation2 + $0x350] sm:$0xff]  ;;  %v1577_v25 = vsel %vm1463_vm2, %v549_v32, %v7574_v55  ;;  %v1576_v14 = vsel %vm1463_vm2, %v548_v35, %v7573_v40  ;;  %v8120_v52 = vpack.i.bf16 %v1916_v9, %v1915_v38  ;;  %v1543_v58 = vsel %vm1529_vm4, %v1510_v37, %v7489_v21  ;;  %v551_v32 = vld [vmem:[#allocation2 + $0xe1] sm:$0xff] }
 0x1ac   : > { %8086 = vrot.lane.b32.xlu0 %v9730_v44, %s8664_s26  ;;  %v1914_v44 = vld [vmem:[#allocation2 + $0x339] sm:$0xff]  ;;  %v7654_v22 = vunpack.i.h.bf16 %v14066_v0  ;;  %v7653_v43 = vunpack.i.l.bf16 %v14066_v0  ;;  %v7334_v54 = vunpack.i.h.bf16 %v14068_v34  ;;  %v7333_v15 = vunpack.i.l.bf16 %v14068_v34  ;;  %v8543_v38 = vld [vmem:[#allocation2 + $0xa8] sm:$0xff] }
 0x1ad   : > { %v9936_v4 = vpop.permute.xlu1 %7811  ;;  %v8105_v12 = vpack.i.bf16 %v1914_v44, %v1913_v13  ;;  %v1822_v13 = vld [vmem:[#allocation2 + $0x1e2] sm:$0xff]  ;;  %v1823_v44 = vld [vmem:[#allocation2 + $0x1ea] sm:$0xff]  ;;  %v7414_v16 = vunpack.i.h.bf16 %v14069_v3  ;;  %v7413_v27 = vunpack.i.l.bf16 %v14069_v3  ;;  %v7494_v21 = vunpack.i.h.bf16 %v14070_v56  ;;  %v14071_v35 = vld [vmem:[#allocation46_spill] sm:$0xff] }
 0x1ae   : > { %14061 = vst [vmem:[#allocation42_spill] sm:$0xff] %v9936_v4  ;;  %v9943_v29 = vpop.permute.xlu0 %7806  ;;  %v1608_v45 = vsel %vm1496_vm3, %v1576_v14, %v7653_v43  ;;  %v1609_v63 = vsel %vm1496_vm3, %v1577_v25, %v7654_v22  ;;  %v7579_v48 = vunpack.i.h.bf16 %v14071_v35  ;;  %v7578_v55 = vunpack.i.l.bf16 %v14071_v35  ;;  %v14072_v0 = vld [vmem:[#allocation62_spill] sm:$0xff]  ;;  %v1825_v34 = vld [vmem:[#allocation2 + $0x202] sm:$0xff] }
 0x1af   : > { %14064 = vst [vmem:[#allocation41_spill] sm:$0xff] %v9943_v29  ;;  %8101 = vrot.lane.b32.xlu1 %v9728_v60, %s8664_s26  ;;  %v7734_v60 = vunpack.i.h.bf16 %v9771_v42  ;;  %v1542_v42 = vsel %vm1529_vm4, %v1509_v41, %v7488_v51  ;;  %v1640_v1 = vsel %vm1529_vm4, %v1608_v45, %v7733_v50  ;;  %v7493_v51 = vunpack.i.l.bf16 %v14070_v56  ;;  %v1885_v50 = vld [vmem:[#allocation2 + $0x1e1] sm:$0xff]  ;;  %v1887_v3 = vld [vmem:[#allocation2 + $0x1f9] sm:$0xff] }
 0x1b0   : > { %8096 = vrot.lane.b32.xlu0 %v8095_v17, %s8663_s25  ;;  %v8115_v17 = vpack.i.bf16 %v1884_v61, %v1883_v28  ;;  %v2991_v40 = vpack.c.bf16 %v1543_v58, %v1542_v42  ;;  %v7659_v22 = vunpack.i.h.bf16 %v14072_v0  ;;  %v7658_v43 = vunpack.i.l.bf16 %v14072_v0  ;;  %v1886_v28 = vld [vmem:[#allocation2 + $0x1e9] sm:$0xff]  ;;  %v8556_v4 = vld [vmem:[#allocation2 + $0x140] sm:$0xff] }
 0x1b1   : > { %3382 = vmatmul.mubr.bf16.gmra.mxu0 %v2988_v49  ;;  %v9957_v46 = vpop.permute.xlu1 %7821  ;;  %v1641_v39 = vsel %vm1529_vm4, %v1609_v63, %v7734_v60  ;;  %v1478_v9 = vsel %vm1463_vm2, %v8543_v38, %v7333_v15  ;;  %v1479_v11 = vsel %vm1463_vm2, %v8544_v57, %v7334_v54  ;;  %v7738_v6 = vunpack.i.l.bf16 %v9797_v18  ;;  %v1824_v63 = vld [vmem:[#allocation2 + $0x1fa] sm:$0xff]  ;;  %v14079_v38 = vld [vmem:[#allocation61_spill] sm:$0xff] }
 0x1b2   : > { %v9959_v30 = vpop.permute.xlu0 %7816  ;;  %3389 = vmatprep.mubr.bf16.mxu0 %v2992_v20  ;;  %v2995_v20 = vpack.c.bf16 %v1641_v39, %v1640_v1  ;;  %v1511_v41 = vsel %vm1496_vm3, %v1478_v9, %v7413_v27  ;;  %v1512_v37 = vsel %vm1496_vm3, %v1479_v11, %v7414_v16  ;;  %v1579_v25 = vsel %vm1463_vm2, %v551_v32, %v7579_v48  ;;  %v14074_v54 = vld [vmem:[#allocation11_spill] sm:$0xff]  ;;  %v14075_v27 = vld [vmem:[#allocation22_spill] sm:$0xff]  ;;  %v14077_v32 = vld [vmem:[#allocation45_spill] sm:$0xff] }
 0x1b3   : > { %14067 = vst [vmem:[#allocation56_spill] sm:$0xff] %v9959_v30  ;;  %8111 = vrot.lane.b32.xlu1 %v8110_v62, %s8663_s25  ;;  %v550_v62 = vld [vmem:[#allocation2 + $0xd9] sm:$0xff]  ;;  %v1544_v18 = vsel %vm1529_vm4, %v1511_v41, %v7493_v51  ;;  %v1545_v42 = vsel %vm1529_vm4, %v1512_v37, %v7494_v21  ;;  %v1611_v45 = vsel %vm1496_vm3, %v1579_v25, %v7659_v22  ;;  %v7339_v15 = vunpack.i.h.bf16 %v14074_v54  ;;  %v1888_v16 = vld [vmem:[#allocation2 + $0x201] sm:$0xff] }
 0x1b4   : > { %8106 = vrot.lane.b32.xlu0 %v8105_v12, %s8665_s27  ;;  %v8125_v12 = vpack.i.bf16 %v1823_v44, %v1822_v13  ;;  %v1578_v14 = vsel %vm1463_vm2, %v550_v62, %v7578_v55  ;;  %v7338_v1 = vunpack.i.l.bf16 %v14074_v54  ;;  %v1643_v44 = vsel %vm1529_vm4, %v1611_v45, %v7739_v5  ;;  %v14076_v51 = vld [vmem:[#allocation34_spill] sm:$0xff]  ;;  %v8546_v37 = vld [vmem:[#allocation2 + $0xc8] sm:$0xff] }
 0x1b5   : > { %v9973_v8 = vpop.permute.xlu1 %7831  ;;  %v1610_v58 = vsel %vm1496_vm3, %v1578_v14, %v7658_v43  ;;  %v7419_v56 = vunpack.i.h.bf16 %v14075_v27  ;;  %v7418_v21 = vunpack.i.l.bf16 %v14075_v27  ;;  %v7499_v35 = vunpack.i.h.bf16 %v14076_v51  ;;  %v552_v62 = vld [vmem:[#allocation2 + $0xf1] sm:$0xff]  ;;  %v14078_v43 = vld [vmem:[#allocation60_spill] sm:$0xff] }
 0x1b6   : > { %v9980_v49 = vpop.permute.xlu0 %7826  ;;  %v1642_v13 = vsel %vm1529_vm4, %v1610_v58, %v7738_v6  ;;  %v2994_v55 = vpack.c.bf16 %v1545_v42, %v1544_v18  ;;  %v7584_v0 = vunpack.i.h.bf16 %v14077_v32  ;;  %v7583_v22 = vunpack.i.l.bf16 %v14077_v32  ;;  %v1889_v6 = vld [vmem:[#allocation2 + $0x211] sm:$0xff]  ;;  %v8554_v30 = vld [vmem:[#allocation2 + $0x128] sm:$0xff] }
 0x1b7   : > { %8121 = vrot.lane.b32.xlu1 %v8120_v52, %s8665_s27  ;;  %v14073_v52 = vld [vmem:[#allocation57_spill] sm:$0xff]  ;;  %v7664_v9 = vunpack.i.h.bf16 %v14079_v38  ;;  %v7663_v57 = vunpack.i.l.bf16 %v14079_v38  ;;  %v2998_v11 = vpack.c.bf16 %v1643_v44, %v1642_v13  ;;  %v8145_v5 = vpack.i.bf16 %v1888_v16, %v1887_v3  ;;  %v1858_v58 = vld [vmem:[#allocation2 + $0x218] sm:$0xff] }
 0x1b8   : > { %8116 = vrot.lane.b32.xlu0 %v8115_v17, %s8664_s26  ;;  %v8135_v17 = vpack.i.bf16 %v1886_v28, %v1885_v50  ;;  %v1890_v50 = vld [vmem:[#allocation2 + $0x219] sm:$0xff]  ;;  %v1481_v25 = vsel %vm1463_vm2, %v8546_v37, %v7339_v15  ;;  %v7744_v14 = vunpack.i.h.bf16 %v9794_v47  ;;  %v1857_v42 = vld [vmem:[#allocation2 + $0x210] sm:$0xff] }
 0x1b9   : > { %3390 = vmatmul.mubr.bf16.gmra.mxu0 %v2991_v40  ;;  %v9993_v60 = vpop.permute.xlu1 %7841  ;;  %v7498_v40 = vunpack.i.l.bf16 %v14076_v51  ;;  %v8545_v28 = vld [vmem:[#allocation2 + $0xc0] sm:$0xff]  ;;  %v1514_v54 = vsel %vm1496_vm3, %v1481_v25, %v7419_v56  ;;  %v8160_v13 = vpack.i.bf16 %v1890_v50, %v1889_v6  ;;  %v8155_v27 = vpack.i.bf16 %v1858_v58, %v1857_v42  ;;  %v1860_v56 = vld [vmem:[#allocation2 + $0x230] sm:$0xff]  ;;  %v14083_v6 = vld [vmem:[#allocation48_spill] sm:$0xff] }
 0x1ba   : > { %v9995_v61 = vpop.permute.xlu0 %7836  ;;  %3397 = vmatprep.mubr.bf16.mxu0 %v2995_v20  ;;  %v8150_v20 = vpack.i.bf16 %v1825_v34, %v1824_v63  ;;  %v1480_v41 = vsel %vm1463_vm2, %v8545_v28, %v7338_v1  ;;  %v1580_v1 = vsel %vm1463_vm2, %v552_v62, %v7583_v22  ;;  %v1547_v44 = vsel %vm1529_vm4, %v1514_v54, %v7499_v35  ;;  %v1826_v22 = vld [vmem:[#allocation2 + $0x212] sm:$0xff]  ;;  %v8548_v54 = vld [vmem:[#allocation2 + $0xe0] sm:$0xff] }
 0x1bb   : > { %8131 = vrot.lane.b32.xlu1 %v14073_v52, %s8664_s26  ;;  %v7743_v52 = vunpack.i.l.bf16 %v9794_v47  ;;  %v1513_v34 = vsel %vm1496_vm3, %v1480_v41, %v7418_v21  ;;  %v1612_v3 = vsel %vm1496_vm3, %v1580_v1, %v7663_v57  ;;  %v1859_v21 = vld [vmem:[#allocation2 + $0x228] sm:$0xff]  ;;  %v8547_v35 = vld [vmem:[#allocation2 + $0xd8] sm:$0xff]  ;;  %v14082_v38 = vld [vmem:[#allocation33_spill] sm:$0xff]  ;;  %v7589_v50 = vunpack.i.h.bf16 %v14083_v6 }
 0x1bc   : > { %8126 = vrot.lane.b32.xlu0 %v8125_v12, %s8663_s25  ;;  %v553_v12 = vld [vmem:[#allocation2 + $0xf9] sm:$0xff]  ;;  %v1546_v47 = vsel %vm1529_vm4, %v1513_v34, %v7498_v40  ;;  %v7503_v57 = vunpack.i.l.bf16 %v14082_v38  ;;  %v7588_v28 = vunpack.i.l.bf16 %v14083_v6  ;;  %v8170_v37 = vpack.i.bf16 %v1860_v56, %v1859_v21  ;;  %v555_v25 = vld [vmem:[#allocation2 + $0x111] sm:$0xff] }
 0x1bd   : > { %v10010_v39 = vpop.permute.xlu1 %7851  ;;  %v1581_v15 = vsel %vm1463_vm2, %v553_v12, %v7584_v0  ;;  %v1644_v40 = vsel %vm1529_vm4, %v1612_v3, %v7743_v52  ;;  %v2997_v41 = vpack.c.bf16 %v1547_v44, %v1546_v47  ;;  %v1829_v34 = vld [vmem:[#allocation2 + $0x232] sm:$0xff]  ;;  %v7749_v1 = vunpack.i.h.bf16 %v9821_v33  ;;  %v1891_v3 = vld [vmem:[#allocation2 + $0x229] sm:$0xff]  ;;  %v1861_v6 = vld [vmem:[#allocation2 + $0x240] sm:$0xff] }
 0x1be   : > { %v10017_v48 = vpop.permute.xlu0 %7846  ;;  %v1613_v16 = vsel %vm1496_vm3, %v1581_v15, %v7664_v9  ;;  %v7504_v9 = vunpack.i.h.bf16 %v14082_v38  ;;  %v7748_v47 = vunpack.i.l.bf16 %v9821_v33 }
 0x1bf   : > { %8141 = vrot.lane.b32.xlu1 %v14078_v43, %s8664_s26  ;;  %v1645_v0 = vsel %vm1529_vm4, %v1613_v16, %v7744_v14  ;;  %v1827_v43 = vld [vmem:[#allocation2 + $0x21a] sm:$0xff]  ;;  %v14084_v14 = vld [vmem:[#allocation64_spill] sm:$0xff]  ;;  %v1892_v16 = vld [vmem:[#allocation2 + $0x231] sm:$0xff] }
 0x1c0   : > { %8136 = vrot.lane.b32.xlu0 %v8135_v17, %s8665_s27  ;;  %v14080_v17 = vld [vmem:[#allocation10_spill] sm:$0xff]  ;;  %v7669_v52 = vunpack.i.h.bf16 %v14084_v14  ;;  %v7668_v42 = vunpack.i.l.bf16 %v14084_v14  ;;  %v3001_v58 = vpack.c.bf16 %v1645_v0, %v1644_v40 }
 0x1c1   : > { %3398 = vmatmul.mubr.bf16.gmra.mxu0 %v2994_v55  ;;  %v10031_v18 = vpop.permute.xlu1 %7861  ;;  %v7343_v45 = vunpack.i.l.bf16 %v14080_v17  ;;  %v7344_v51 = vunpack.i.h.bf16 %v14080_v17  ;;  %v14081_v55 = vld [vmem:[#allocation21_spill] sm:$0xff]  ;;  %v8165_v17 = vpack.i.bf16 %v1827_v43, %v1826_v22  ;;  %v8175_v22 = vpack.i.bf16 %v1892_v16, %v1891_v3  ;;  %v1893_v43 = vld [vmem:[#allocation2 + $0x241] sm:$0xff] }
 0x1c2   : > { %v10034_v63 = vpop.permute.xlu0 %7856  ;;  %3405 = vmatprep.mubr.bf16.mxu0 %v2998_v11  ;;  %v7423_v62 = vunpack.i.l.bf16 %v14081_v55  ;;  %v7424_v12 = vunpack.i.h.bf16 %v14081_v55 }
 0x1c3   : > { %8151 = vrot.lane.b32.xlu1 %v8150_v20, %s8663_s25  ;;  %v1482_v20 = vsel %vm1463_vm2, %v8547_v35, %v7343_v45  ;;  %v1828_v45 = vld [vmem:[#allocation2 + $0x22a] sm:$0xff]  ;;  %v1483_v15 = vsel %vm1463_vm2, %v8548_v54, %v7344_v51  ;;  %v1583_v51 = vsel %vm1463_vm2, %v555_v25, %v7589_v50 }
 0x1c4   : > { %8146 = vrot.lane.b32.xlu0 %v8145_v5, %s8665_s27  ;;  %v554_v5 = vld [vmem:[#allocation2 + $0x109] sm:$0xff]  ;;  %v1515_v44 = vsel %vm1496_vm3, %v1482_v20, %v7423_v62  ;;  %v8180_v40 = vpack.i.bf16 %v1829_v34, %v1828_v45  ;;  %v1615_v0 = vsel %vm1496_vm3, %v1583_v51, %v7669_v52  ;;  %v14092_v45 = vld [vmem:[#allocation47_spill] sm:$0xff] }
 0x1c5   : > { %v10048_v32 = vpop.permute.xlu1 %7871  ;;  %v1548_v56 = vsel %vm1529_vm4, %v1515_v44, %v7503_v57  ;;  %v1582_v55 = vsel %vm1463_vm2, %v554_v5, %v7588_v28  ;;  %v1894_v35 = vld [vmem:[#allocation2 + $0x249] sm:$0xff]  ;;  %v1647_v5 = vsel %vm1529_vm4, %v1615_v0, %v7749_v1  ;;  %v7594_v34 = vunpack.i.h.bf16 %v14092_v45  ;;  %v1864_v51 = vld [vmem:[#allocation2 + $0x260] sm:$0xff] }
 0x1c6   : > { %v10056_v11 = vpop.permute.xlu0 %7866  ;;  %v1614_v62 = vsel %vm1496_vm3, %v1582_v55, %v7668_v42  ;;  %v14087_v20 = vld [vmem:[#allocation13_spill] sm:$0xff]  ;;  %v1862_v50 = vld [vmem:[#allocation2 + $0x248] sm:$0xff]  ;;  %v7593_v54 = vunpack.i.l.bf16 %v14092_v45 }
 0x1c7   : > { %8161 = vrot.lane.b32.xlu1 %v8160_v13, %s8665_s27  ;;  %v7348_v38 = vunpack.i.l.bf16 %v14087_v20  ;;  %v14089_v28 = vld [vmem:[#allocation24_spill] sm:$0xff]  ;;  %v8549_v55 = vld [vmem:[#allocation2 + $0xf0] sm:$0xff] }
 0x1c8   : > { %8156 = vrot.lane.b32.xlu0 %v8155_v27, %s8664_s26  ;;  %v1516_v27 = vsel %vm1496_vm3, %v1483_v15, %v7424_v12  ;;  %v7349_v12 = vunpack.i.h.bf16 %v14087_v20  ;;  %v14090_v25 = vld [vmem:[#allocation36_spill] sm:$0xff]  ;;  %v8190_v15 = vpack.i.bf16 %v1894_v35, %v1893_v43  ;;  %v7753_v43 = vunpack.i.l.bf16 %v9814_v31 }
 0x1c9   : > { %3406 = vmatmul.mubr.bf16.gmra.mxu0 %v2997_v41  ;;  %v10067_v13 = vpop.permute.xlu1 %7881  ;;  %v1549_v33 = vsel %vm1529_vm4, %v1516_v27, %v7504_v9  ;;  %v1646_v9 = vsel %vm1529_vm4, %v1614_v62, %v7748_v47  ;;  %v7429_v41 = vunpack.i.h.bf16 %v14089_v28  ;;  %v7509_v14 = vunpack.i.h.bf16 %v14090_v25  ;;  %v557_v1 = vld [vmem:[#allocation2 + $0x129] sm:$0xff]  ;;  %v14093_v47 = vld [vmem:[#allocation63_spill] sm:$0xff]  ;;  %v8550_v62 = vld [vmem:[#allocation2 + $0xf8] sm:$0xff] }
 0x1ca   : > { %14085 = vst [vmem:[#allocation55_spill] sm:$0xff] %v10067_v13  ;;  %v10070_v21 = vpop.permute.xlu0 %7876  ;;  %3413 = vmatprep.mubr.bf16.mxu0 %v3001_v58  ;;  %v3000_v42 = vpack.c.bf16 %v1549_v33, %v1548_v56  ;;  %v7508_v58 = vunpack.i.l.bf16 %v14090_v25  ;;  %v7674_v44 = vunpack.i.h.bf16 %v14093_v47  ;;  %v7673_v3 = vunpack.i.l.bf16 %v14093_v47  ;;  %v1863_v56 = vld [vmem:[#allocation2 + $0x258] sm:$0xff]  ;;  %v1830_v20 = vld [vmem:[#allocation2 + $0x242] sm:$0xff] }
 0x1cb   : > { %14086 = vst [vmem:[#allocation53_spill] sm:$0xff] %v10070_v21  ;;  %8171 = vrot.lane.b32.xlu1 %v8170_v37, %s8664_s26  ;;  %v7428_v37 = vunpack.i.l.bf16 %v14089_v28  ;;  %v3004_v16 = vpack.c.bf16 %v1647_v5, %v1646_v9  ;;  %v8185_v27 = vpack.i.bf16 %v1862_v50, %v1861_v6  ;;  %v1484_v33 = vsel %vm1463_vm2, %v8549_v55, %v7348_v38  ;;  %v1831_v9 = vld [vmem:[#allocation2 + $0x24a] sm:$0xff] }
 0x1cc   : > { %8166 = vrot.lane.b32.xlu0 %v8165_v17, %s8663_s25  ;;  %v556_v17 = vld [vmem:[#allocation2 + $0x121] sm:$0xff]  ;;  %v1485_v0 = vsel %vm1463_vm2, %v8550_v62, %v7349_v12  ;;  %v1585_v12 = vsel %vm1463_vm2, %v557_v1, %v7594_v34  ;;  %v8200_v25 = vpack.i.bf16 %v1864_v51, %v1863_v56 }
 0x1cd   : > { %v10083_v57 = vpop.permute.xlu1 %7891  ;;  %v14094_v5 = vld [vmem:[#allocation12_spill] sm:$0xff]  ;;  %v1517_v50 = vsel %vm1496_vm3, %v1484_v33, %v7428_v37  ;;  %v1518_v38 = vsel %vm1496_vm3, %v1485_v0, %v7429_v41  ;;  %v1584_v28 = vsel %vm1463_vm2, %v556_v17, %v7593_v54  ;;  %v1617_v47 = vsel %vm1496_vm3, %v1585_v12, %v7674_v44  ;;  %v14096_v1 = vld [vmem:[#allocation23_spill] sm:$0xff] }
 0x1ce   : > { %14088 = vst [vmem:[#allocation7_spill] sm:$0xff] %v10083_v57  ;;  %v10090_v52 = vpop.permute.xlu0 %7886  ;;  %v1616_v45 = vsel %vm1496_vm3, %v1584_v28, %v7673_v3  ;;  %v8195_v37 = vpack.i.bf16 %v1831_v9, %v1830_v20  ;;  %v1833_v41 = vld [vmem:[#allocation2 + $0x262] sm:$0xff]  ;;  %v7354_v34 = vunpack.i.h.bf16 %v14094_v5  ;;  %v7433_v17 = vunpack.i.l.bf16 %v14096_v1  ;;  %v558_v0 = vld [vmem:[#allocation2 + $0x139] sm:$0xff] }
 0x1cf   : > { %14091 = vst [vmem:[#allocation18_spill] sm:$0xff] %v10090_v52  ;;  %8181 = vrot.lane.b32.xlu1 %v8180_v40, %s8663_s25  ;;  %v7754_v40 = vunpack.i.h.bf16 %v9814_v31  ;;  %v1550_v31 = vsel %vm1529_vm4, %v1517_v50, %v7508_v58  ;;  %v1648_v58 = vsel %vm1529_vm4, %v1616_v45, %v7753_v43  ;;  %v1896_v56 = vld [vmem:[#allocation2 + $0x261] sm:$0xff]  ;;  %v14098_v20 = vld [vmem:[#allocation50_spill] sm:$0xff]  ;;  %v7769_v57 = vunpack.i.h.bf16 %v9861_v53 }
 0x1d0   : > { %8176 = vrot.lane.b32.xlu0 %v8175_v22, %s8665_s27  ;;  %v7353_v22 = vunpack.i.l.bf16 %v14094_v5  ;;  %v8551_v3 = vld [vmem:[#allocation2 + $0x108] sm:$0xff]  ;;  %v14097_v51 = vld [vmem:[#allocation35_spill] sm:$0xff]  ;;  %v7599_v9 = vunpack.i.h.bf16 %v14098_v20  ;;  %v7598_v43 = vunpack.i.l.bf16 %v14098_v20  ;;  %v7759_v20 = vunpack.i.h.bf16 %v9840_v10 }
 0x1d1   : > { %3414 = vmatmul.mubr.bf16.gmra.mxu0 %v3000_v42  ;;  %v10103_v35 = vpop.permute.xlu1 %7901  ;;  %v1551_v42 = vsel %vm1529_vm4, %v1518_v38, %v7509_v14  ;;  %v1895_v14 = vld [vmem:[#allocation2 + $0x259] sm:$0xff]  ;;  %v7514_v55 = vunpack.i.h.bf16 %v14097_v51  ;;  %v7513_v33 = vunpack.i.l.bf16 %v14097_v51  ;;  %v559_v50 = vld [vmem:[#allocation2 + $0x141] sm:$0xff] }
 0x1d2   : > { %v10106_v6 = vpop.permute.xlu0 %7896  ;;  %3421 = vmatprep.mubr.bf16.mxu0 %v3004_v16  ;;  %v1832_v16 = vld [vmem:[#allocation2 + $0x25a] sm:$0xff]  ;;  %v1486_v44 = vsel %vm1463_vm2, %v8551_v3, %v7353_v22  ;;  %v3003_v5 = vpack.c.bf16 %v1551_v42, %v1550_v31  ;;  %v8205_v45 = vpack.i.bf16 %v1896_v56, %v1895_v14  ;;  %v8552_v3 = vld [vmem:[#allocation2 + $0x110] sm:$0xff]  ;;  %v7758_v31 = vunpack.i.l.bf16 %v9840_v10 }
 0x1d3   : > { %14095 = vst [vmem:[#allocation29_spill] sm:$0xff] %v10106_v6  ;;  %8191 = vrot.lane.b32.xlu1 %v8190_v15, %s8665_s27  ;;  %v1649_v15 = vsel %vm1529_vm4, %v1617_v47, %v7754_v40  ;;  %v8210_v40 = vpack.i.bf16 %v1833_v41, %v1832_v16  ;;  %v14099_v38 = vld [vmem:[#allocation66_spill] sm:$0xff]  ;;  %v1487_v51 = vsel %vm1463_vm2, %v8552_v3, %v7354_v34  ;;  %v1865_v16 = vld [vmem:[#allocation2 + $0x270] sm:$0xff] }
 0x1d4   : > { %8186 = vrot.lane.b32.xlu0 %v8185_v27, %s8664_s26  ;;  %v7434_v27 = vunpack.i.h.bf16 %v14096_v1  ;;  %v7679_v22 = vunpack.i.h.bf16 %v14099_v38  ;;  %v7678_v12 = vunpack.i.l.bf16 %v14099_v38  ;;  %v3007_v28 = vpack.c.bf16 %v1649_v15, %v1648_v58  ;;  %v1897_v47 = vld [vmem:[#allocation2 + $0x271] sm:$0xff]  ;;  %v1898_v1 = vld [vmem:[#allocation2 + $0x279] sm:$0xff]  ;;  %v1867_v38 = vld [vmem:[#allocation2 + $0x288] sm:$0xff] }
 0x1d5   : > { %v10120_v54 = vpop.permute.xlu1 %7911  ;;  %v1519_v42 = vsel %vm1496_vm3, %v1486_v44, %v7433_v17  ;;  %v1866_v41 = vld [vmem:[#allocation2 + $0x278] sm:$0xff]  ;;  %v1587_v34 = vsel %vm1463_vm2, %v559_v50, %v7599_v9  ;;  %v1586_v14 = vsel %vm1463_vm2, %v558_v0, %v7598_v43  ;;  %v8220_v56 = vpack.i.bf16 %v1898_v1, %v1897_v47 }
 0x1d6   : > { %v10128_v62 = vpop.permute.xlu0 %7906  ;;  %v1552_v15 = vsel %vm1529_vm4, %v1519_v42, %v7513_v33  ;;  %v1618_v17 = vsel %vm1496_vm3, %v1586_v14, %v7678_v12  ;;  %v1619_v44 = vsel %vm1496_vm3, %v1587_v34, %v7679_v22  ;;  %v1834_v43 = vld [vmem:[#allocation2 + $0x272] sm:$0xff] }
 0x1d7   : > { %8201 = vrot.lane.b32.xlu1 %v8200_v25, %s8664_s26  ;;  %v1651_v0 = vsel %vm1529_vm4, %v1619_v44, %v7759_v20  ;;  %v14101_v12 = vld [vmem:[#allocation26_spill] sm:$0xff]  ;;  %v14104_v14 = vld [vmem:[#allocation65_spill] sm:$0xff] }
 0x1d8   : > { %8196 = vrot.lane.b32.xlu0 %v8195_v37, %s8663_s25  ;;  %v1520_v37 = vsel %vm1496_vm3, %v1487_v51, %v7434_v27  ;;  %v1868_v27 = vld [vmem:[#allocation2 + $0x290] sm:$0xff]  ;;  %v7439_v47 = vunpack.i.h.bf16 %v14101_v12  ;;  %v7438_v22 = vunpack.i.l.bf16 %v14101_v12  ;;  %v561_v34 = vld [vmem:[#allocation2 + $0x159] sm:$0xff]  ;;  %v7683_v44 = vunpack.i.l.bf16 %v14104_v14 }
 0x1d9   : > { %3422 = vmatmul.mubr.bf16.gmra.mxu0 %v3003_v5  ;;  %v10139_v25 = vpop.permute.xlu1 %7921  ;;  %v1553_v10 = vsel %vm1529_vm4, %v1520_v37, %v7514_v55  ;;  %v8215_v5 = vpack.i.bf16 %v1866_v41, %v1865_v16  ;;  %v1650_v55 = vsel %vm1529_vm4, %v1618_v17, %v7758_v31  ;;  %v560_v16 = vld [vmem:[#allocation2 + $0x151] sm:$0xff]  ;;  %v8230_v20 = vpack.i.bf16 %v1868_v27, %v1867_v38 }
 0x1da   : > { %v10142_v58 = vpop.permute.xlu0 %7916  ;;  %3429 = vmatprep.mubr.bf16.mxu0 %v3007_v28  ;;  %v14100_v28 = vld [vmem:[#allocation15_spill] sm:$0xff]  ;;  %v3006_v51 = vpack.c.bf16 %v1553_v10, %v1552_v15  ;;  %v14103_v41 = vld [vmem:[#allocation49_spill] sm:$0xff]  ;;  %v7684_v17 = vunpack.i.h.bf16 %v14104_v14  ;;  %v7763_v38 = vunpack.i.l.bf16 %v9836_v19 }
 0x1db   : > { %8211 = vrot.lane.b32.xlu1 %v8210_v40, %s8663_s25  ;;  %v7359_v33 = vunpack.i.h.bf16 %v14100_v28  ;;  %v7358_v9 = vunpack.i.l.bf16 %v14100_v28  ;;  %v1835_v40 = vld [vmem:[#allocation2 + $0x27a] sm:$0xff]  ;;  %v7604_v37 = vunpack.i.h.bf16 %v14103_v41  ;;  %v7603_v31 = vunpack.i.l.bf16 %v14103_v41  ;;  %v1836_v15 = vld [vmem:[#allocation2 + $0x28a] sm:$0xff]  ;;  %v1837_v10 = vld [vmem:[#allocation2 + $0x292] sm:$0xff] }
 0x1dc   : > { %8206 = vrot.lane.b32.xlu0 %v8205_v45, %s8665_s27  ;;  %v14102_v45 = vld [vmem:[#allocation38_spill] sm:$0xff]  ;;  %v3010_v28 = vpack.c.bf16 %v1651_v0, %v1650_v55  ;;  %v8225_v12 = vpack.i.bf16 %v1835_v40, %v1834_v43  ;;  %v1899_v14 = vld [vmem:[#allocation2 + $0x289] sm:$0xff] }
 0x1dd   : > { %v10155_v50 = vpop.permute.xlu1 %7931  ;;  %v7519_v1 = vunpack.i.h.bf16 %v14102_v45  ;;  %v7518_v42 = vunpack.i.l.bf16 %v14102_v45  ;;  %v8553_v45 = vld [vmem:[#allocation2 + $0x120] sm:$0xff]  ;;  %v1489_v41 = vsel %vm1463_vm2, %v8554_v30, %v7359_v33  ;;  %v1900_v55 = vld [vmem:[#allocation2 + $0x291] sm:$0xff]  ;;  %v1588_v30 = vsel %vm1463_vm2, %v560_v16, %v7603_v31 }
 0x1de   : > { %v10162_v3 = vpop.permute.xlu0 %7926  ;;  %v1488_v6 = vsel %vm1463_vm2, %v8553_v45, %v7358_v9  ;;  %v1522_v43 = vsel %vm1496_vm3, %v1489_v41, %v7439_v47  ;;  %v1589_v9 = vsel %vm1463_vm2, %v561_v34, %v7604_v37  ;;  %v10191_v47 = vld [vmem:[#allocation2 + $0x2a9] sm:$0xff]  ;;  %v14105_v37 = vld [vmem:[#allocation14_spill] sm:$0xff]  ;;  %v1869_v34 = vld [vmem:[#allocation2 + $0x2a0] sm:$0xff] }
 0x1df   : > { %8221 = vrot.lane.b32.xlu1 %v8220_v56, %s8665_s27  ;;  %v7764_v56 = vunpack.i.h.bf16 %v9836_v19  ;;  %v8240_v19 = vpack.i.bf16 %v1837_v10, %v1836_v15  ;;  %v1555_v40 = vsel %vm1529_vm4, %v1522_v43, %v7519_v1  ;;  %v1621_v45 = vsel %vm1496_vm3, %v1589_v9, %v7684_v17  ;;  %v14106_v17 = vld [vmem:[#allocation25_spill] sm:$0xff] }
 0x1e0   : > { %8216 = vrot.lane.b32.xlu0 %v8215_v5, %s8664_s26  ;;  %v1521_v5 = vsel %vm1496_vm3, %v1488_v6, %v7438_v22  ;;  %v8235_v6 = vpack.i.bf16 %v1900_v55, %v1899_v14  ;;  %v10189_v22 = vld [vmem:[#allocation2 + $0x2a1] sm:$0xff]  ;;  %v7364_v16 = vunpack.i.h.bf16 %v14105_v37  ;;  %v14107_v15 = vld [vmem:[#allocation37_spill] sm:$0xff] }
 0x1e1   : > { %3430 = vmatmul.mubr.bf16.gmra.mxu0 %v3006_v51  ;;  %v10175_v27 = vpop.permute.xlu1 %7941  ;;  %v1554_v33 = vsel %vm1529_vm4, %v1521_v5, %v7518_v42  ;;  %v1620_v51 = vsel %vm1496_vm3, %v1588_v30, %v7683_v44  ;;  %v7363_v42 = vunpack.i.l.bf16 %v14105_v37  ;;  %v1653_v1 = vsel %vm1529_vm4, %v1621_v45, %v7764_v56  ;;  %v1870_v44 = vld [vmem:[#allocation2 + $0x2a8] sm:$0xff]  ;;  %v563_v30 = vld [vmem:[#allocation2 + $0x171] sm:$0xff] }
 0x1e2   : > { %v10177_v0 = vpop.permute.xlu0 %7936  ;;  %3437 = vmatprep.mubr.bf16.mxu0 %v3010_v28  ;;  %v7444_v28 = vunpack.i.h.bf16 %v14106_v17  ;;  %v7524_v10 = vunpack.i.h.bf16 %v14107_v15  ;;  %v7523_v41 = vunpack.i.l.bf16 %v14107_v15  ;;  %v14108_v55 = vld [vmem:[#allocation52_spill] sm:$0xff]  ;;  %v3009_v9 = vpack.c.bf16 %v1555_v40, %v1554_v33 }
 0x1e3   : > { %8231 = vrot.lane.b32.xlu1 %v8230_v20, %s8664_s26  ;;  %v1652_v20 = vsel %vm1529_vm4, %v1620_v51, %v7763_v38  ;;  %v7609_v5 = vunpack.i.h.bf16 %v14108_v55  ;;  %v7608_v43 = vunpack.i.l.bf16 %v14108_v55  ;;  %v8250_v56 = vpack.i.bf16 %v10191_v47, %v10189_v22  ;;  %v562_v38 = vld [vmem:[#allocation2 + $0x169] sm:$0xff] }
 0x1e4   : > { %8226 = vrot.lane.b32.xlu0 %v8225_v12, %s8663_s25  ;;  %v7443_v12 = vunpack.i.l.bf16 %v14106_v17  ;;  %v14109_v51 = vld [vmem:[#allocation68_spill] sm:$0xff]  ;;  %v3013_v17 = vpack.c.bf16 %v1653_v1, %v1652_v20  ;;  %v8245_v15 = vpack.i.bf16 %v1870_v44, %v1869_v34  ;;  %v7768_v55 = vunpack.i.l.bf16 %v9861_v53 }
 0x1e5   : > { %v10195_v31 = vpop.permute.xlu1 %7951  ;;  %v7689_v45 = vunpack.i.h.bf16 %v14109_v51  ;;  %v7688_v37 = vunpack.i.l.bf16 %v14109_v51  ;;  %v1491_v52 = vsel %vm1463_vm2, %v8556_v4, %v7364_v16  ;;  %v1591_v20 = vsel %vm1463_vm2, %v563_v30, %v7609_v5  ;;  %v14117_v51 = vld [vmem:[#allocation51_spill] sm:$0xff] }
 0x1e6   : > { %v10203_v14 = vpop.permute.xlu0 %7946  ;;  %v1524_v53 = vsel %vm1496_vm3, %v1491_v52, %v7444_v28 }
 0x1e7   : > { %8241 = vrot.lane.b32.xlu1 %v8240_v19, %s8663_s25  ;;  %v8555_v19 = vld [vmem:[#allocation2 + $0x138] sm:$0xff]  ;;  %v1623_v4 = vsel %vm1496_vm3, %v1591_v20, %v7689_v45  ;;  %v7614_v45 = vunpack.i.h.bf16 %v14117_v51  ;;  %v7774_v20 = vunpack.i.h.bf16 %v9855_v2 }
 0x1e8   : > { %8236 = vrot.lane.b32.xlu0 %v8235_v6, %s8665_s27  ;;  %v1490_v40 = vsel %vm1463_vm2, %v8555_v19, %v7363_v42  ;;  %v1590_v6 = vsel %vm1463_vm2, %v562_v38, %v7608_v43  ;;  %v1557_v42 = vsel %vm1529_vm4, %v1524_v53, %v7524_v10  ;;  %v14113_v43 = vld [vmem:[#allocation17_spill] sm:$0xff]  ;;  %v14116_v38 = vld [vmem:[#allocation40_spill] sm:$0xff] }
 0x1e9   : > { %3438 = vmatmul.mubr.bf16.gmra.mxu0 %v3009_v9  ;;  %v10215_v33 = vpop.permute.xlu1 %7961  ;;  %v1523_v1 = vsel %vm1496_vm3, %v1490_v40, %v7443_v12  ;;  %v1622_v44 = vsel %vm1496_vm3, %v1590_v6, %v7688_v37  ;;  %v1655_v12 = vsel %vm1529_vm4, %v1623_v4, %v7769_v57  ;;  %v7369_v52 = vunpack.i.h.bf16 %v14113_v43  ;;  %v14114_v9 = vld [vmem:[#allocation28_spill] sm:$0xff]  ;;  %v14118_v57 = vld [vmem:[#allocation67_spill] sm:$0xff]  ;;  %v8557_v53 = vld [vmem:[#allocation2 + $0x150] sm:$0xff] }
 0x1ea   : > { %14110 = vst [vmem:[#allocation44_spill] sm:$0xff] %v10215_v33  ;;  %v10219_v29 = vpop.permute.xlu0 %7956  ;;  %3445 = vmatprep.mubr.bf16.mxu0 %v3013_v17  ;;  %v1556_v34 = vsel %vm1529_vm4, %v1523_v1, %v7523_v41  ;;  %v1654_v5 = vsel %vm1529_vm4, %v1622_v44, %v7768_v55  ;;  %v7368_v28 = vunpack.i.l.bf16 %v14113_v43  ;;  %v7449_v41 = vunpack.i.h.bf16 %v14114_v9  ;;  %v8558_v4 = vld [vmem:[#allocation2 + $0x158] sm:$0xff]  ;;  %v8559_v43 = vld [vmem:[#allocation2 + $0x189] sm:$0xff] }
 0x1eb   : > { %14111 = vst [vmem:[#allocation59_spill] sm:$0xff] %v10219_v29  ;;  %8251 = vrot.lane.b32.xlu1 %v8250_v56, %s8665_s27  ;;  %v7448_v10 = vunpack.i.l.bf16 %v14114_v9  ;;  %v7529_v30 = vunpack.i.h.bf16 %v14116_v38  ;;  %v7613_v37 = vunpack.i.l.bf16 %v14117_v51  ;;  %v3012_v17 = vpack.c.bf16 %v1557_v42, %v1556_v34 }
 0x1ec   : > { %8246 = vrot.lane.b32.xlu0 %v8245_v15, %s8664_s26  ;;  %v7528_v15 = vunpack.i.l.bf16 %v14116_v38  ;;  %v7694_v55 = vunpack.i.h.bf16 %v14118_v57  ;;  %v7693_v19 = vunpack.i.l.bf16 %v14118_v57  ;;  %v3016_v40 = vpack.c.bf16 %v1655_v12, %v1654_v5  ;;  %v8560_v5 = vld [vmem:[#allocation2 + $0x181] sm:$0xff] }
 0x1ed   : > { %v10231_v16 = vpop.permute.xlu1 %7971  ;;  %v7773_v6 = vunpack.i.l.bf16 %v9855_v2  ;;  %v1492_v44 = vsel %vm1463_vm2, %v8557_v53, %v7368_v28  ;;  %v1493_v34 = vsel %vm1463_vm2, %v8558_v4, %v7369_v52  ;;  %v1593_v9 = vsel %vm1463_vm2, %v8559_v43, %v7614_v45  ;;  %v14120_v57 = vld [vmem:[#allocation16_spill] sm:$0xff] }
 0x1ee   : > { %14112 = vst [vmem:[#allocation54_spill] sm:$0xff] %v10231_v16  ;;  %v10239_v56 = vpop.permute.xlu0 %7966  ;;  %v1592_v12 = vsel %vm1463_vm2, %v8560_v5, %v7613_v37  ;;  %v1525_v2 = vsel %vm1496_vm3, %v1492_v44, %v7448_v10  ;;  %v1526_v38 = vsel %vm1496_vm3, %v1493_v34, %v7449_v41  ;;  %v1625_v52 = vsel %vm1496_vm3, %v1593_v9, %v7694_v55  ;;  %v14121_v44 = vld [vmem:[#allocation27_spill] sm:$0xff]  ;;  %v8561_v9 = vld [vmem:[#allocation2 + $0x168] sm:$0xff] }
 0x1ef   : > { %14115 = vst [vmem:[#allocation9_spill] sm:$0xff] %v10239_v56  ;;  %v1558_v51 = vsel %vm1529_vm4, %v1525_v2, %v7528_v15  ;;  %v1559_v28 = vsel %vm1529_vm4, %v1526_v38, %v7529_v30  ;;  %v7373_v53 = vunpack.i.l.bf16 %v14120_v57  ;;  %v1657_v10 = vsel %vm1529_vm4, %v1625_v52, %v7774_v20  ;;  %v14122_v30 = vld [vmem:[#allocation39_spill] sm:$0xff] }
 0x1f0   : > { %v7454_v41 = vunpack.i.h.bf16 %v14121_v44  ;;  %v7453_v15 = vunpack.i.l.bf16 %v14121_v44  ;;  %v7533_v55 = vunpack.i.l.bf16 %v14122_v30  ;;  %v3015_v34 = vpack.c.bf16 %v1559_v28, %v1558_v51 }
 0x1f1   : > { %3446 = vmatmul.mubr.bf16.gmra.mxu0 %v3012_v17  ;;  %v10249_v1 = vpop.permute.xlu1 %7981  ;;  %v1624_v17 = vsel %vm1496_vm3, %v1592_v12, %v7693_v19  ;;  %v7534_v19 = vunpack.i.h.bf16 %v14122_v30  ;;  %v1494_v5 = vsel %vm1463_vm2, %v8561_v9, %v7373_v53  ;;  %v8562_v12 = vld [vmem:[#allocation2 + $0x170] sm:$0xff]  ;;  %v7784_v28 = vunpack.i.h.bf16 %v9879_v26  ;;  %v1660_v30 = vld [vmem:[#allocation2 + $0x1b8] sm:$0xff] }
 0x1f2   : > { %v10253_v42 = vpop.permute.xlu0 %7976  ;;  %3453 = vmatprep.mubr.bf16.mxu0 %v3016_v40  ;;  %v7374_v40 = vunpack.i.h.bf16 %v14120_v57  ;;  %v1656_v37 = vsel %vm1529_vm4, %v1624_v17, %v7773_v6  ;;  %v1527_v38 = vsel %vm1496_vm3, %v1494_v5, %v7453_v15  ;;  %v7779_v53 = vunpack.i.h.bf16 %v9881_v36  ;;  %v1659_v15 = vld [vmem:[#allocation2 + $0x1b0] sm:$0xff] }
 0x1f3   : > { %14119 = vst [vmem:[#allocation20_spill] sm:$0xff] %v10253_v42  ;;  %v3019_v43 = vpack.c.bf16 %v1657_v10, %v1656_v37  ;;  %v1560_v52 = vsel %vm1529_vm4, %v1527_v38, %v7533_v55  ;;  %v7778_v37 = vunpack.i.l.bf16 %v9881_v36  ;;  %v7823_v55 = vunpack.i.l.bf16 %v9957_v46 }
 0x1f4   : > { %v1495_v6 = vsel %vm1463_vm2, %v8562_v12, %v7374_v40  ;;  %v7783_v40 = vunpack.i.l.bf16 %v9879_v26  ;;  %v7829_v9 = vunpack.i.h.bf16 %v9980_v49  ;;  %v7828_v36 = vunpack.i.l.bf16 %v9980_v49  ;;  %v8564_v12 = vld [vmem:[#allocation2 + $0x1c8] sm:$0xff] }
 0x1f5   : > { %v10265_v45 = vpop.permute.xlu1 %7991  ;;  %v1528_v17 = vsel %vm1496_vm3, %v1495_v6, %v7454_v41  ;;  %v7824_v41 = vunpack.i.h.bf16 %v9957_v46  ;;  %v10308_v46 = vsel %vm1463_vm2, %v1660_v30, %v7779_v53  ;;  %v7839_v56 = vunpack.i.h.bf16 %v9995_v61 }
 0x1f6   : > { %v10271_v4 = vpop.permute.xlu0 %7986  ;;  %v1561_v51 = vsel %vm1529_vm4, %v1528_v17, %v7534_v19  ;;  %v7834_v19 = vunpack.i.h.bf16 %v9973_v8  ;;  %v10305_v6 = vsel %vm1463_vm2, %v8564_v12, %v7783_v40 }
 0x1f7   : > { %v3018_v44 = vpack.c.bf16 %v1561_v51, %v1560_v52  ;;  %v8565_v52 = vld [vmem:[#allocation2 + $0x290] sm:$0xff]  ;;  %v8566_v51 = vld [vmem:[#allocation2 + $0x288] sm:$0xff] }
 0x1f8   : > { %v2736_v49 = vsel %vm1463_vm2, %v8565_v52, %v7824_v41  ;;  %v8569_v41 = vld [vmem:[#allocation2 + $0x2a8] sm:$0xff] }
 0x1f9   : > { %3454 = vmatmul.mubr.bf16.gmra.mxu0 %v3015_v34  ;;  %v10277_v20 = vpop.permute.xlu1 %8001  ;;  %v7833_v34 = vunpack.i.l.bf16 %v9973_v8  ;;  %v10311_v8 = vsel %vm1463_vm2, %v1659_v15, %v7778_v37  ;;  %v7904_v37 = vunpack.i.h.bf16 %v10103_v35  ;;  %v7903_v15 = vunpack.i.l.bf16 %v10103_v35 }
 0x1fa   : > { %v10279_v2 = vpop.permute.xlu0 %7996  ;;  %3461 = vmatprep.mubr.bf16.mxu0 %v3019_v43  ;;  %v8563_v43 = vld [vmem:[#allocation2 + $0x1d0] sm:$0xff]  ;;  %v10329_v52 = vsel %vm1463_vm2, %v8569_v41, %v7829_v9  ;;  %v7843_v35 = vunpack.i.l.bf16 %v9993_v60  ;;  %v7838_v9 = vunpack.i.l.bf16 %v9995_v61 }
 0x1fb   : > { %v10298_v26 = vsel %vm1463_vm2, %v8563_v43, %v7784_v28  ;;  %v2735_v28 = vsel %vm1463_vm2, %v8566_v51, %v7823_v55  ;;  %v8568_v43 = vld [vmem:[#allocation2 + $0x2b8] sm:$0xff]  ;;  %v8570_v55 = vld [vmem:[#allocation2 + $0x2a0] sm:$0xff]  ;;  %v7984_v51 = vunpack.i.h.bf16 %v10249_v1  ;;  %v2768_v13 = vsel %vm1496_vm3, %v2736_v49, %v7904_v37  ;;  %v8572_v37 = vld [vmem:[#allocation2 + $0x2e8] sm:$0xff] }
 0x1fc   : > { %v10322_v53 = vsel %vm1463_vm2, %v8568_v43, %v7833_v34  ;;  %v7983_v34 = vunpack.i.l.bf16 %v10249_v1  ;;  %v7844_v43 = vunpack.i.h.bf16 %v9993_v60 }
 0x1fd   : > { %v10286_v57 = vpop.permute.xlu1 %8011  ;;  %v2800_v61 = vsel %vm1529_vm4, %v2768_v13, %v7984_v51  ;;  %v7909_v13 = vunpack.i.h.bf16 %v10128_v62  ;;  %v7908_v51 = vunpack.i.l.bf16 %v10128_v62  ;;  %v8574_v62 = vld [vmem:[#allocation2 + $0x2d0] sm:$0xff] }
 0x1fe   : > { %v10291_v10 = vpop.permute.xlu0 %8006 }
 0x201   : > { %3462 = vmatmul.mubr.bf16.gmra.mxu0 %v3018_v44  ;;  %v10302_v5 = vpop.permute.xlu1 %8021  ;;  %v8567_v44 = vld [vmem:[#allocation2 + $0x2c0] sm:$0xff] }
 0x202   : > { %v10314_v17 = vpop.permute.xlu0 %8016  ;;  %v10319_v40 = vsel %vm1463_vm2, %v8567_v44, %v7834_v19  ;;  %v8023_v30 = vunpack.i.l.bf16 %v10302_v5  ;;  %v10332_v19 = vsel %vm1463_vm2, %v8570_v55, %v7828_v36  ;;  %v2767_v55 = vsel %vm1496_vm3, %v2735_v28, %v7903_v15 }
 0x203   : > { %v8019_v12 = vunpack.i.h.bf16 %v10314_v17  ;;  %v2799_v29 = vsel %vm1529_vm4, %v2767_v55, %v7983_v34  ;;  %v8024_v15 = vunpack.i.h.bf16 %v10302_v5  ;;  %v7988_v5 = vunpack.i.l.bf16 %v10271_v4 }
 0x204   : > { %v2832_v1 = vsel %vm1463_vm2, %v10191_v47, %v8023_v30 }
 0x205   : > { %v8032_v44 = vpop.permute.xlu1 %8031  ;;  %v2831_v36 = vsel %vm1463_vm2, %v10189_v22, %v8019_v12  ;;  %v1809_v12 = vld [vmem:[#allocation2 + $0x2c1] sm:$0xff] }
 0x206   : > { %v8034_v38 = vunpack.i.h.bf16 %v8032_v44  ;;  %v8033_v42 = vunpack.i.l.bf16 %v8032_v44  ;;  %v8027_v16 = vpop.permute.xlu0 %8026 }
 0x207   : > { %v8029_v41 = vunpack.i.h.bf16 %v8027_v16  ;;  %v8028_v33 = vunpack.i.l.bf16 %v8027_v16  ;;  %v8571_v16 = vld [vmem:[#allocation2 + $0x2f0] sm:$0xff] }
 0x208   : > { %v10351_v21 = vsel %vm1463_vm2, %v8571_v16, %v7844_v43  ;;  %v1808_v43 = vld [vmem:[#allocation2 + $0x2b9] sm:$0xff]  ;;  %v7853_v16 = vunpack.i.l.bf16 %v10010_v39 }
 0x209   : > { %v8042_v60 = vpop.permute.xlu1 %8041  ;;  %v2863_v44 = vsel %vm1496_vm3, %v2831_v36, %v8028_v33  ;;  %v2864_v59 = vsel %vm1496_vm3, %v2832_v1, %v8029_v41  ;;  %v10356_v33 = vsel %vm1463_vm2, %v8572_v37, %v7843_v35  ;;  %v3048_v36 = vpack.c.bf16 %v2800_v61, %v2799_v29 }
 0x20a   : > { %v8044_v22 = vunpack.i.h.bf16 %v8042_v60  ;;  %v8037_v47 = vpop.permute.xlu0 %8036  ;;  %v2895_v28 = vsel %vm1529_vm4, %v2863_v44, %v8033_v42  ;;  %v2896_v49 = vsel %vm1529_vm4, %v2864_v59, %v8034_v38  ;;  %v8043_v41 = vunpack.i.l.bf16 %v8042_v60  ;;  %v8272_v42 = vld [vmem:[%s13767_s1 + $0x80] sm:$0xff]   ;;  %v8573_v59 = vld [vmem:[#allocation2 + $0x2d8] sm:$0xff] }
 0x20b   : > { %v8038_v30 = vunpack.i.l.bf16 %v8037_v47  ;;  %v3049_v34 = vpack.c.bf16 %v2896_v49, %v2895_v28  ;;  %v10365_v38 = vsel %vm1463_vm2, %v8573_v59, %v7839_v56  ;;  %v7989_v35 = vunpack.i.h.bf16 %v10271_v4 }
 0x20c   : > { %v10373_v29 = vsel %vm1463_vm2, %v8574_v62, %v7838_v9  ;;  %v7854_v60 = vunpack.i.h.bf16 %v10010_v39  ;;  %v2833_v4 = vsel %vm1463_vm2, %v1808_v43, %v8024_v15  ;;  %v8575_v9 = vld [vmem:[%s13767_s1 + $0x88] sm:$0xff]   ;;  %v8039_v37 = vunpack.i.h.bf16 %v8037_v47  ;;  %v1810_v39 = vld [vmem:[#allocation2 + $0x2d1] sm:$0xff] }
 0x20d   : > { %v2834_v1 = vsel %vm1463_vm2, %v1809_v12, %v8038_v30  ;;  %3541 = vmatprep.mubr.bf16.mxu1 %v3049_v34  ;;  %v10370_v55 = vpop.permute.xlu1 %8051  ;;  %v1811_v12 = vld [vmem:[#allocation2 + $0x2d9] sm:$0xff]  ;;  %v2865_v30 = vsel %vm1496_vm3, %v2833_v4, %v8043_v41  ;;  %v2769_v34 = vsel %vm1496_vm3, %v10332_v19, %v7908_v51  ;;  %v7849_v51 = vunpack.i.h.bf16 %v10017_v48 }
 0x20e   : > { %v8053_v44 = vunpack.i.l.bf16 %v10370_v55  ;;  %v8047_v61 = vpop.permute.xlu0 %8046  ;;  %3542 = vmatmul.mubr.bf16.vlgmr.msra.gmra.mxu1 %v3048_v36  ;;  %v2866_v56 = vsel %vm1496_vm3, %v2834_v1, %v8044_v22  ;;  %v2770_v22 = vsel %vm1496_vm3, %v10329_v52, %v7909_v13  ;;  %v2801_v59 = vsel %vm1529_vm4, %v2769_v34, %v7988_v5 }
 0x20f   : > { %v8049_v28 = vunpack.i.h.bf16 %v8047_v61  ;;  %v8048_v49 = vunpack.i.l.bf16 %v8047_v61  ;;  %7121 = vmatpush3.bf16.msra.mxu1 %v8575_v9  ;;  %v2802_v1 = vsel %vm1529_vm4, %v2770_v22, %v7989_v35  ;;  %v7848_v52 = vunpack.i.l.bf16 %v10017_v48  ;;  %v1813_v22 = vld [vmem:[#allocation2 + $0x2f1] sm:$0xff] }
 0x210   : > { %7122 = vmatprep.subr.bf16.mxu1 %v8272_v42  ;;  %v2836_v47 = vsel %vm1463_vm2, %v1811_v12, %v8053_v44  ;;  %v2835_v5 = vsel %vm1463_vm2, %v1810_v39, %v8039_v37  ;;  %v3051_v35 = vpack.c.bf16 %v2802_v1, %v2801_v59  ;;  %v7994_v44 = vunpack.i.h.bf16 %v10265_v45  ;;  %v8578_v1 = vld [vmem:[#allocation2 + $0x308] sm:$0xff] }
 0x211   : > { %v8062_v15 = vpop.permute.xlu1 %8061  ;;  %v2897_v43 = vsel %vm1529_vm4, %v2865_v30, %v8048_v49  ;;  %v2898_v36 = vsel %vm1529_vm4, %v2866_v56, %v8049_v28  ;;  %v7914_v49 = vunpack.i.h.bf16 %v10120_v54  ;;  %v7913_v56 = vunpack.i.l.bf16 %v10120_v54  ;;  %v8576_v30 = vld [vmem:[#allocation2 + $0x320] sm:$0xff] }
 0x212   : > { %v8064_v41 = vunpack.i.h.bf16 %v8062_v15  ;;  %v8063_v62 = vunpack.i.l.bf16 %v8062_v15  ;;  %v8057_v61 = vpop.permute.xlu0 %8056  ;;  %v3052_v19 = vpack.c.bf16 %v2898_v36, %v2897_v43  ;;  %v7993_v12 = vunpack.i.l.bf16 %v10265_v45  ;;  %v8577_v15 = vld [vmem:[#allocation2 + $0x318] sm:$0xff] }
 0x213   : > { %v8059_v13 = vunpack.i.h.bf16 %v8057_v61  ;;  %v8058_v4 = vunpack.i.l.bf16 %v8057_v61  ;;  %7123 = vmatpush3.bf16.msra.mxu1 %v8272_v42  ;;  %v10403_v42 = vsel %vm1463_vm2, %v8576_v30, %v7854_v60  ;;  %v10408_v45 = vsel %vm1463_vm2, %v8577_v15, %v7853_v16 }
 0x214   : > { %3549 = vmatprep.mubr.bf16.mxu1 %v3052_v19  ;;  %v8054_v43 = vunpack.i.h.bf16 %v10370_v55  ;;  %v10412_v60 = vsel %vm1463_vm2, %v8578_v1, %v7849_v51  ;;  %v2771_v19 = vsel %vm1496_vm3, %v10322_v53, %v7913_v56  ;;  %v7918_v30 = vunpack.i.l.bf16 %v10142_v58 }
 0x215   : > { %v8072_v28 = vpop.permute.xlu1 %8071  ;;  %v2867_v9 = vsel %vm1496_vm3, %v2835_v5, %v8058_v4  ;;  %v2868_v48 = vsel %vm1496_vm3, %v2836_v47, %v8059_v13  ;;  %v1812_v47 = vld [vmem:[#allocation2 + $0x2e9] sm:$0xff]  ;;  %v2803_v4 = vsel %vm1529_vm4, %v2771_v19, %v7993_v12  ;;  %v7864_v5 = vunpack.i.h.bf16 %v10031_v18 }
 0x216   : > { %v8074_v34 = vunpack.i.h.bf16 %v8072_v28  ;;  %v8067_v54 = vpop.permute.xlu0 %8066  ;;  %3550 = vmatmul.mubr.bf16.gmra.mxu1 %v3051_v35  ;;  %v2899_v37 = vsel %vm1529_vm4, %v2867_v9, %v8063_v62  ;;  %v2900_v39 = vsel %vm1529_vm4, %v2868_v48, %v8064_v41  ;;  %v8073_v61 = vunpack.i.l.bf16 %v8072_v28  ;;  %v8579_v62 = vld [vmem:[#allocation2 + $0x300] sm:$0xff]  ;;  %v1815_v28 = vld [vmem:[#allocation2 + $0x309] sm:$0xff] }
 0x217   : > { %v8068_v36 = vunpack.i.l.bf16 %v8067_v54  ;;  %v3055_v59 = vpack.c.bf16 %v2900_v39, %v2899_v37  ;;  %v2772_v41 = vsel %vm1496_vm3, %v10319_v40, %v7914_v49  ;;  %v10419_v16 = vsel %vm1463_vm2, %v8579_v62, %v7848_v52  ;;  %v1814_v39 = vld [vmem:[#allocation2 + $0x301] sm:$0xff] }
 0x218   : > { %v2804_v51 = vsel %vm1529_vm4, %v2772_v41, %v7994_v44  ;;  %v7863_v35 = vunpack.i.l.bf16 %v10031_v18  ;;  %v7919_v49 = vunpack.i.h.bf16 %v10142_v58  ;;  %v2837_v52 = vsel %vm1463_vm2, %v1812_v47, %v8054_v43 }
 0x219   : > { %v2838_v55 = vsel %vm1463_vm2, %v1813_v22, %v8068_v36  ;;  %3557 = vmatprep.mubr.bf16.mxu1 %v3055_v59  ;;  %v8082_v13 = vpop.permute.xlu1 %8081  ;;  %v8069_v12 = vunpack.i.h.bf16 %v8067_v54  ;;  %v3054_v22 = vpack.c.bf16 %v2804_v51, %v2803_v4  ;;  %v2869_v44 = vsel %vm1496_vm3, %v2837_v52, %v8073_v61 }
 0x21a   : > { %v8083_v53 = vunpack.i.l.bf16 %v8082_v13  ;;  %v8077_v56 = vpop.permute.xlu0 %8076  ;;  %v2870_v40 = vsel %vm1496_vm3, %v2838_v55, %v8074_v34  ;;  %v7999_v37 = vunpack.i.h.bf16 %v10279_v2  ;;  %v7998_v18 = vunpack.i.l.bf16 %v10279_v2  ;;  %v1816_v55 = vld [vmem:[#allocation2 + $0x319] sm:$0xff] }
 0x21b   : > { %v8079_v9 = vunpack.i.h.bf16 %v8077_v56  ;;  %v8078_v48 = vunpack.i.l.bf16 %v8077_v56  ;;  %v7859_v54 = vunpack.i.h.bf16 %v10034_v63  ;;  %v8084_v61 = vunpack.i.h.bf16 %v8082_v13 }
 0x21c   : > { %v2840_v43 = vsel %vm1463_vm2, %v1815_v28, %v8083_v53  ;;  %v7858_v2 = vunpack.i.l.bf16 %v10034_v63  ;;  %v2839_v62 = vsel %vm1463_vm2, %v1814_v39, %v8069_v12  ;;  %v2773_v4 = vsel %vm1496_vm3, %v10373_v29, %v7918_v30  ;;  %v1817_v28 = vld [vmem:[#allocation2 + $0x321] sm:$0xff] }
 0x21d   : > { %v8092_v15 = vpop.permute.xlu1 %8091  ;;  %v2901_v34 = vsel %vm1529_vm4, %v2869_v44, %v8078_v48  ;;  %v2902_v36 = vsel %vm1529_vm4, %v2870_v40, %v8079_v9  ;;  %v2774_v51 = vsel %vm1496_vm3, %v10365_v38, %v7919_v49  ;;  %v2805_v56 = vsel %vm1529_vm4, %v2773_v4, %v7998_v18 }
 0x21e   : > { %v8094_v59 = vunpack.i.h.bf16 %v8092_v15  ;;  %v8093_v1 = vunpack.i.l.bf16 %v8092_v15  ;;  %v8087_v47 = vpop.permute.xlu0 %8086  ;;  %3558 = vmatmul.mubr.bf16.gmra.mxu1 %v3054_v22  ;;  %v3058_v58 = vpack.c.bf16 %v2902_v36, %v2901_v34  ;;  %v2806_v40 = vsel %vm1529_vm4, %v2774_v51, %v7999_v37 }
 0x21f   : > { %v8089_v19 = vunpack.i.h.bf16 %v8087_v47  ;;  %v8088_v41 = vunpack.i.l.bf16 %v8087_v47  ;;  %v10451_v29 = vsel %vm1496_vm3, %v10305_v6, %v7863_v35  ;;  %v2841_v38 = vsel %vm1463_vm2, %v1816_v55, %v8084_v61 }
 0x220   : > { %3565 = vmatprep.mubr.bf16.mxu1 %v3058_v58  ;;  %v10456_v22 = vsel %vm1496_vm3, %v10298_v26, %v7864_v5  ;;  %v7924_v44 = vunpack.i.h.bf16 %v10139_v25  ;;  %v7923_v37 = vunpack.i.l.bf16 %v10139_v25  ;;  %v7928_v18 = vunpack.i.l.bf16 %v10162_v3 }
 0x221   : > { %v8102_v53 = vpop.permute.xlu1 %8101  ;;  %v2871_v13 = vsel %vm1496_vm3, %v2839_v62, %v8088_v41  ;;  %v2872_v52 = vsel %vm1496_vm3, %v2840_v43, %v8089_v19  ;;  %v3057_v39 = vpack.c.bf16 %v2806_v40, %v2805_v56  ;;  %v8004_v15 = vunpack.i.h.bf16 %v10277_v20  ;;  %v1819_v41 = vld [vmem:[#allocation2 + $0x339] sm:$0xff] }
 0x222   : > { %v8103_v63 = vunpack.i.l.bf16 %v8102_v53  ;;  %v8097_v9 = vpop.permute.xlu0 %8096  ;;  %v2903_v48 = vsel %vm1529_vm4, %v2871_v13, %v8093_v1  ;;  %v2904_v12 = vsel %vm1529_vm4, %v2872_v52, %v8094_v59  ;;  %v8104_v49 = vunpack.i.h.bf16 %v8102_v53  ;;  %v1818_v1 = vld [vmem:[#allocation2 + $0x331] sm:$0xff] }
 0x223   : > { %v8098_v30 = vunpack.i.l.bf16 %v8097_v9  ;;  %v8003_v6 = vunpack.i.l.bf16 %v10277_v20  ;;  %v3061_v36 = vpack.c.bf16 %v2904_v12, %v2903_v48  ;;  %v7929_v43 = vunpack.i.h.bf16 %v10162_v3  ;;  %v1789_v48 = vld [vmem:[#allocation2 + $0x1d1] sm:$0xff] }
 0x224   : > { %v8099_v59 = vunpack.i.h.bf16 %v8097_v9  ;;  %v2873_v5 = vsel %vm1496_vm3, %v2841_v38, %v8103_v63  ;;  %v2749_v25 = vsel %vm1496_vm3, %v10311_v8, %v7858_v2  ;;  %v7934_v19 = vunpack.i.h.bf16 %v10155_v50 }
 0x225   : > { %v2842_v35 = vsel %vm1463_vm2, %v1817_v28, %v8098_v30  ;;  %v8112_v34 = vpop.permute.xlu1 %8111  ;;  %v2775_v3 = vsel %vm1496_vm3, %v10356_v33, %v7923_v37  ;;  %v2776_v62 = vsel %vm1496_vm3, %v10351_v21, %v7924_v44  ;;  %v2750_v55 = vsel %vm1496_vm3, %v10308_v46, %v7859_v54 }
 0x226   : > { %v8107_v26 = vpop.permute.xlu0 %8106  ;;  %3566 = vmatmul.mubr.bf16.gmra.mxu1 %v3057_v39  ;;  %v8113_v47 = vunpack.i.l.bf16 %v8112_v34  ;;  %v2874_v20 = vsel %vm1496_vm3, %v2842_v35, %v8104_v49  ;;  %v7933_v8 = vunpack.i.l.bf16 %v10155_v50  ;;  %v2807_v4 = vsel %vm1529_vm4, %v2775_v3, %v8003_v6 }
 0x227   : > { %v8109_v58 = vunpack.i.h.bf16 %v8107_v26  ;;  %v8108_v61 = vunpack.i.l.bf16 %v8107_v26  ;;  %3573 = vmatprep.mubr.bf16.mxu1 %v3061_v36  ;;  %v2808_v51 = vsel %vm1529_vm4, %v2776_v62, %v8004_v15  ;;  %v2777_v53 = vsel %vm1496_vm3, %v10419_v16, %v7928_v18 }
 0x228   : > { %v2843_v56 = vsel %vm1463_vm2, %v1818_v1, %v8099_v59  ;;  %v2778_v46 = vsel %vm1496_vm3, %v10412_v60, %v7929_v43  ;;  %v8114_v54 = vunpack.i.h.bf16 %v8112_v34  ;;  %v2844_v13 = vsel %vm1463_vm2, %v1819_v41, %v8113_v47  ;;  %v1788_v43 = vld [vmem:[#allocation2 + $0x1c9] sm:$0xff] }
 0x229   : > { %v8122_v2 = vpop.permute.xlu1 %8121  ;;  %v2905_v33 = vsel %vm1529_vm4, %v2873_v5, %v8108_v61  ;;  %v2906_v21 = vsel %vm1529_vm4, %v2874_v20, %v8109_v58  ;;  %v7939_v28 = vunpack.i.h.bf16 %v10177_v0  ;;  %v7938_v9 = vunpack.i.l.bf16 %v10177_v0  ;;  %v8580_v20 = vld [vmem:[#allocation2 + $0x1e1] sm:$0xff] }
 0x22a   : > { %v8117_v40 = vpop.permute.xlu0 %8116  ;;  %v8009_v16 = vunpack.i.h.bf16 %v10291_v10  ;;  %v3060_v12 = vpack.c.bf16 %v2808_v51, %v2807_v4  ;;  %v8008_v38 = vunpack.i.l.bf16 %v10291_v10  ;;  %v8124_v49 = vunpack.i.h.bf16 %v8122_v2 }
 0x22b   : > { %v8119_v52 = vunpack.i.h.bf16 %v8117_v40  ;;  %v8118_v63 = vunpack.i.l.bf16 %v8117_v40  ;;  %v8123_v30 = vunpack.i.l.bf16 %v8122_v2  ;;  %v3064_v37 = vpack.c.bf16 %v2906_v21, %v2905_v33 }
 0x22c   : > { %v7944_v60 = vunpack.i.h.bf16 %v10175_v27  ;;  %v8018_v0 = vunpack.i.l.bf16 %v10314_v17  ;;  %v2814_v35 = vsel %vm1463_vm2, %v1789_v48, %v8114_v54  ;;  %v7943_v10 = vunpack.i.l.bf16 %v10175_v27 }
 0x22d   : > { %v8132_v44 = vpop.permute.xlu1 %8131  ;;  %v2875_v15 = vsel %vm1496_vm3, %v2843_v56, %v8118_v63  ;;  %v2876_v6 = vsel %vm1496_vm3, %v2844_v13, %v8119_v52  ;;  %v2781_v26 = vsel %vm1529_vm4, %v2749_v25, %v7938_v9  ;;  %v2782_v5 = vsel %vm1529_vm4, %v2750_v55, %v7939_v28  ;;  %v8581_v55 = vld [vmem:[#allocation2 + $0x1e9] sm:$0xff] }
 0x22e   : > { %v8134_v18 = vunpack.i.h.bf16 %v8132_v44  ;;  %v8127_v39 = vpop.permute.xlu0 %8126  ;;  %3574 = vmatmul.mubr.bf16.gmra.mxu1 %v3060_v12  ;;  %v8133_v59 = vunpack.i.l.bf16 %v8132_v44  ;;  %v2809_v1 = vsel %vm1529_vm4, %v2777_v53, %v8008_v38  ;;  %v2810_v47 = vsel %vm1529_vm4, %v2778_v46, %v8009_v16 }
 0x22f   : > { %v8129_v34 = vunpack.i.h.bf16 %v8127_v39  ;;  %v8128_v36 = vunpack.i.l.bf16 %v8127_v39  ;;  %3581 = vmatprep.mubr.bf16.mxu1 %v3064_v37  ;;  %v2907_v58 = vsel %vm1529_vm4, %v2875_v15, %v8123_v30  ;;  %v2908_v17 = vsel %vm1529_vm4, %v2876_v6, %v8124_v49  ;;  %v663_v15 = vld [vmem:[#allocation2 + $0x32] sm:$0xff]  ;;  %v664_v6 = vld [vmem:[#allocation2 + $0x3a] sm:$0xff] }
 0x230   : > { %v2846_v27 = vsel %vm1496_vm3, %v2814_v35, %v8134_v18  ;;  %v2813_v25 = vsel %vm1463_vm2, %v1788_v43, %v8018_v0  ;;  %v8014_v56 = vunpack.i.h.bf16 %v10286_v57  ;;  %v8013_v40 = vunpack.i.l.bf16 %v10286_v57  ;;  %v8582_v0 = vld [vmem:[#allocation2 + $0x201] sm:$0xff]  ;;  %v8583_v35 = vld [vmem:[#allocation2 + $0x1f9] sm:$0xff] }
 0x231   : > { %v8142_v61 = vpop.permute.xlu1 %8141  ;;  %v2815_v41 = vsel %vm1463_vm2, %v8580_v20, %v8128_v36  ;;  %v2816_v4 = vsel %vm1463_vm2, %v8581_v55, %v8129_v34  ;;  %v3063_v33 = vpack.c.bf16 %v2810_v47, %v2809_v1  ;;  %v2845_v21 = vsel %vm1496_vm3, %v2813_v25, %v8133_v59 }
 0x232   : > { %v8137_v3 = vpop.permute.xlu0 %8136  ;;  %v8144_v62 = vunpack.i.h.bf16 %v8142_v61  ;;  %v8143_v2 = vunpack.i.l.bf16 %v8142_v61  ;;  %v3067_v46 = vpack.c.bf16 %v2908_v17, %v2907_v58  ;;  %v3021_v57 = vpack.c.bf16 %v2782_v5, %v2781_v26  ;;  %v8584_v5 = vld [vmem:[#allocation2 + $0x1e0] sm:$0xff] }
 0x233   : > { %v8139_v51 = vunpack.i.h.bf16 %v8137_v3  ;;  %v8138_v53 = vunpack.i.l.bf16 %v8137_v3  ;;  %v2779_v30 = vsel %vm1496_vm3, %v10408_v45, %v7933_v8  ;;  %v2780_v44 = vsel %vm1496_vm3, %v10403_v42, %v7934_v19  ;;  %v665_v3 = vld [vmem:[#allocation2 + $0x4a] sm:$0xff] }
 0x234   : > { %v2847_v63 = vsel %vm1496_vm3, %v2815_v41, %v8143_v2  ;;  %v2848_v12 = vsel %vm1496_vm3, %v2816_v4, %v8144_v62  ;;  %v2811_v37 = vsel %vm1529_vm4, %v2779_v30, %v8013_v40  ;;  %v2783_v18 = vsel %vm1529_vm4, %v10451_v29, %v7943_v10 }
 0x235   : > { %v2877_v54 = vsel %vm1529_vm4, %v2845_v21, %v8138_v53  ;;  %v2878_v13 = vsel %vm1529_vm4, %v2846_v27, %v8139_v51  ;;  %v8152_v52 = vpop.permute.xlu1 %8151  ;;  %v2784_v39 = vsel %vm1529_vm4, %v10456_v22, %v7944_v60  ;;  %v2812_v8 = vsel %vm1529_vm4, %v2780_v44, %v8014_v56  ;;  %v666_v27 = vld [vmem:[#allocation2 + $0x52] sm:$0xff]  ;;  %v667_v53 = vld [vmem:[#allocation2 + $0x62] sm:$0xff]  ;;  %v668_v56 = vld [vmem:[#allocation2 + $0x6a] sm:$0xff] }
 0x236   : > { %3582 = vmatmul.mubr.bf16.gmra.mxu1 %v3063_v33  ;;  %v3022_v28 = vpack.c.bf16 %v2878_v13, %v2877_v54  ;;  %v8147_v9 = vpop.permute.xlu0 %8146  ;;  %v8154_v16 = vunpack.i.h.bf16 %v8152_v52  ;;  %v8153_v48 = vunpack.i.l.bf16 %v8152_v52  ;;  %v7789_v60 = vunpack.i.h.bf16 %v9906_v23  ;;  %v8585_v54 = vld [vmem:[#allocation2 + $0x1e8] sm:$0xff] }
 0x237   : > { %3589 = vmatprep.mubr.bf16.mxu1 %v3067_v46  ;;  %v8149_v38 = vunpack.i.h.bf16 %v8147_v9  ;;  %v8148_v49 = vunpack.i.l.bf16 %v8147_v9  ;;  %v2975_v26 = vpack.c.bf16 %v664_v6, %v663_v15  ;;  %v14123_v1 = vunpack.i.l.bf16 %v9906_v23 }
 0x238   : > { %3469 = vmatprep.mubr.bf16.mxu0 %v3022_v28  ;;  %v2818_v45 = vsel %vm1463_vm2, %v8582_v0, %v8154_v16  ;;  %v2817_v34 = vsel %vm1463_vm2, %v8583_v35, %v8153_v48  ;;  %v7869_v58 = vunpack.i.h.bf16 %v10056_v11  ;;  %v7868_v17 = vunpack.i.l.bf16 %v10056_v11  ;;  %v8586_v28 = vld [vmem:[#allocation2 + $0x219] sm:$0xff]  ;;  %v8587_v16 = vld [vmem:[#allocation2 + $0x211] sm:$0xff] }
 0x239   : > { %3470 = vmatmul.mubr.bf16.gmra.mxu0 %v3021_v57  ;;  %v2879_v50 = vsel %vm1529_vm4, %v2847_v63, %v8148_v49  ;;  %v2880_v42 = vsel %vm1529_vm4, %v2848_v12, %v8149_v38  ;;  %v8162_v19 = vpop.permute.xlu1 %8161  ;;  %v2721_v47 = vsel %vm1463_vm2, %v8584_v5, %v14123_v1  ;;  %v3066_v61 = vpack.c.bf16 %v2812_v8, %v2811_v37 }
 0x23a   : > { %v3025_v29 = vpack.c.bf16 %v2880_v42, %v2879_v50  ;;  %v8157_v36 = vpop.permute.xlu0 %8156  ;;  %v8164_v10 = vunpack.i.h.bf16 %v8162_v19  ;;  %v8163_v22 = vunpack.i.l.bf16 %v8162_v19  ;;  %v7949_v20 = vunpack.i.h.bf16 %v10203_v14 }
 0x23b   : > { %v8159_v43 = vunpack.i.h.bf16 %v8157_v36  ;;  %v8158_v59 = vunpack.i.l.bf16 %v8157_v36  ;;  %v3024_v41 = vpack.c.bf16 %v2784_v39, %v2783_v18  ;;  %v7948_v40 = vunpack.i.l.bf16 %v10203_v14 }
 0x23c   : > { %3477 = vmatprep.mubr.bf16.mxu0 %v3025_v29  ;;  %v2722_v13 = vsel %vm1463_vm2, %v8585_v54, %v7789_v60  ;;  %v2978_v52 = vpack.c.bf16 %v666_v27, %v665_v3  ;;  %v2753_v63 = vsel %vm1496_vm3, %v2721_v47, %v7868_v17  ;;  %v2981_v12 = vpack.c.bf16 %v668_v56, %v667_v53  ;;  %v8588_v29 = vld [vmem:[#allocation2 + $0x231] sm:$0xff]  ;;  %v669_v60 = vld [vmem:[#allocation2 + $0x7a] sm:$0xff] }
 0x23d   : > { %v2849_v62 = vsel %vm1496_vm3, %v2817_v34, %v8158_v59  ;;  %v2850_v2 = vsel %vm1496_vm3, %v2818_v45, %v8159_v43  ;;  %v8172_v25 = vpop.permute.xlu1 %8171  ;;  %v2754_v14 = vsel %vm1496_vm3, %v2722_v13, %v7869_v58  ;;  %v2785_v18 = vsel %vm1529_vm4, %v2753_v63, %v7948_v40  ;;  %v671_v47 = vld [vmem:[#allocation2 + $0x92] sm:$0xff]  ;;  %v672_v58 = vld [vmem:[#allocation2 + $0x9a] sm:$0xff] }
 0x23e   : > { %3590 = vmatmul.mubr.bf16.gmra.mxu1 %v3066_v61  ;;  %v8167_v23 = vpop.permute.xlu0 %8166  ;;  %v2881_v55 = vsel %vm1529_vm4, %v2849_v62, %v8163_v22  ;;  %v2882_v4 = vsel %vm1529_vm4, %v2850_v2, %v8164_v10  ;;  %v8174_v51 = vunpack.i.h.bf16 %v8172_v25  ;;  %v8173_v11 = vunpack.i.l.bf16 %v8172_v25  ;;  %v8589_v10 = vld [vmem:[#allocation2 + $0x229] sm:$0xff]  ;;  %v8591_v3 = vld [vmem:[#allocation2 + $0x1f8] sm:$0xff] }
 0x23f   : > { %7124 = vmatprep.mubr.msk.bf16.mxu1 %vm1463_vm2, %v2975_v26  ;;  %v8169_v33 = vunpack.i.h.bf16 %v8167_v23  ;;  %v8168_v21 = vunpack.i.l.bf16 %v8167_v23  ;;  %v3028_v46 = vpack.c.bf16 %v2882_v4, %v2881_v55  ;;  %v2786_v39 = vsel %vm1529_vm4, %v2754_v14, %v7949_v20  ;;  %v8590_v20 = vld [vmem:[#allocation2 + $0x200] sm:$0xff] }
 0x240   : > { %v7794_v0 = vunpack.i.h.bf16 %v9898_v7  ;;  %v7793_v45 = vunpack.i.l.bf16 %v9898_v7  ;;  %v7874_v8 = vunpack.i.h.bf16 %v10048_v32  ;;  %v7873_v50 = vunpack.i.l.bf16 %v10048_v32  ;;  %v670_v32 = vld [vmem:[#allocation2 + $0x82] sm:$0xff] }
 0x241   : > { %3478 = vmatmul.mubr.bf16.gmra.mxu0 %v3024_v41  ;;  %v2820_v9 = vsel %vm1463_vm2, %v8586_v28, %v8169_v33  ;;  %v2819_v48 = vsel %vm1463_vm2, %v8587_v16, %v8168_v21  ;;  %v8182_v57 = vpop.permute.xlu1 %8181  ;;  %v3027_v34 = vpack.c.bf16 %v2786_v39, %v2785_v18  ;;  %v7954_v17 = vunpack.i.h.bf16 %v10195_v31 }
 0x242   : > { %3485 = vmatprep.mubr.bf16.mxu0 %v3028_v46  ;;  %v8177_v38 = vpop.permute.xlu0 %8176  ;;  %v8184_v49 = vunpack.i.h.bf16 %v8182_v57  ;;  %v8183_v30 = vunpack.i.l.bf16 %v8182_v57  ;;  %v2851_v44 = vsel %vm1496_vm3, %v2819_v48, %v8173_v11  ;;  %v2852_v37 = vsel %vm1496_vm3, %v2820_v9, %v8174_v51  ;;  %v8592_v9 = vld [vmem:[#allocation2 + $0x249] sm:$0xff]  ;;  %v8593_v48 = vld [vmem:[#allocation2 + $0x241] sm:$0xff] }
 0x243   : > { %v8179_v15 = vunpack.i.h.bf16 %v8177_v38  ;;  %v8178_v6 = vunpack.i.l.bf16 %v8177_v38  ;;  %v7953_v61 = vunpack.i.l.bf16 %v10195_v31  ;;  %v2724_v41 = vsel %vm1463_vm2, %v8590_v20, %v7794_v0  ;;  %v14124_v57 = vld [vmem:[#allocation53_spill] sm:$0xff] }
 0x244   : > { %v2822_v36 = vsel %vm1463_vm2, %v8588_v29, %v8184_v49  ;;  %v2821_v22 = vsel %vm1463_vm2, %v8589_v10, %v8183_v30  ;;  %v2723_v27 = vsel %vm1463_vm2, %v8591_v3, %v7793_v45  ;;  %v2984_v55 = vpack.c.bf16 %v670_v32, %v669_v60  ;;  %v8594_v29 = vld [vmem:[#allocation2 + $0x210] sm:$0xff] }
 0x245   : > { %v2883_v42 = vsel %vm1529_vm4, %v2851_v44, %v8178_v6  ;;  %v2884_v19 = vsel %vm1529_vm4, %v2852_v37, %v8179_v15  ;;  %v8192_v35 = vpop.permute.xlu1 %8191  ;;  %v2755_v4 = vsel %vm1496_vm3, %v2723_v27, %v7873_v50  ;;  %v2756_v31 = vsel %vm1496_vm3, %v2724_v41, %v7874_v8  ;;  %v673_v15 = vld [vmem:[#allocation2 + $0xaa] sm:$0xff]  ;;  %v674_v6 = vld [vmem:[#allocation2 + $0xb2] sm:$0xff]  ;;  %v14125_v8 = vld [vmem:[#allocation59_spill] sm:$0xff] }
 0x246   : > { %7125 = vmatmul.mubr.msk.bf16.vlgmr.msra.gmra.mxu1 %vm1463_vm2, %v2978_v52  ;;  %v3031_v7 = vpack.c.bf16 %v2884_v19, %v2883_v42  ;;  %v8187_v43 = vpop.permute.xlu0 %8186  ;;  %v8194_v5 = vunpack.i.h.bf16 %v8192_v35  ;;  %v8193_v1 = vunpack.i.l.bf16 %v8192_v35  ;;  %v2987_v51 = vpack.c.bf16 %v672_v58, %v671_v47  ;;  %v675_v42 = vld [vmem:[#allocation2 + $0xc2] sm:$0xff]  ;;  %v676_v19 = vld [vmem:[#allocation2 + $0xca] sm:$0xff] }
 0x247   : > { %7128 = vmatprep.mubr.msk.bf16.mxu1 %vm1463_vm2, %v2981_v12  ;;  %v8189_v59 = vunpack.i.h.bf16 %v8187_v43  ;;  %v8188_v26 = vunpack.i.l.bf16 %v8187_v43  ;;  %v2787_v46 = vsel %vm1529_vm4, %v2755_v4, %v7953_v61  ;;  %v2788_v54 = vsel %vm1529_vm4, %v2756_v31, %v7954_v17  ;;  %v8597_v31 = vld [vmem:[#allocation2 + $0x259] sm:$0xff] }
 0x248   : > { %v7798_v63 = vunpack.i.l.bf16 %v9920_v24  ;;  %v7799_v12 = vunpack.i.h.bf16 %v9920_v24  ;;  %v7878_v38 = vunpack.i.l.bf16 %v14124_v57  ;;  %v7879_v37 = vunpack.i.h.bf16 %v14124_v57  ;;  %v680_v57 = vld [vmem:[#allocation2 + $0xfa] sm:$0xff] }
 0x249   : > { %v10568_v62 = vpop.f32.mrf.mxu0  ;;  %3486 = vmatmul.mubr.bf16.gmra.mxu0 %v3027_v34  ;;  %v2853_v2 = vsel %vm1496_vm3, %v2821_v22, %v8188_v26  ;;  %v2854_v25 = vsel %vm1496_vm3, %v2822_v36, %v8189_v59  ;;  %v8202_v23 = vpop.permute.xlu1 %8201  ;;  %v3030_v39 = vpack.c.bf16 %v2788_v54, %v2787_v46  ;;  %v7959_v50 = vunpack.i.h.bf16 %v14125_v8 }
 0x24a   : > { %3493 = vmatprep.mubr.bf16.mxu0 %v3031_v7  ;;  %v8197_v11 = vpop.permute.xlu0 %8196  ;;  %v2885_v33 = vsel %vm1529_vm4, %v2853_v2, %v8193_v1  ;;  %v2886_v21 = vsel %vm1529_vm4, %v2854_v25, %v8194_v5  ;;  %v8204_v13 = vunpack.i.h.bf16 %v8202_v23  ;;  %v8203_v52 = vunpack.i.l.bf16 %v8202_v23  ;;  %v8595_v7 = vld [vmem:[#allocation2 + $0x218] sm:$0xff] }
 0x24b   : > { %v3345_v53 = vpop.f32.mrf.mxu0  ;;  %v8199_v56 = vunpack.i.h.bf16 %v8197_v11  ;;  %v8198_v40 = vunpack.i.l.bf16 %v8197_v11  ;;  %v3034_v49 = vpack.c.bf16 %v2886_v21, %v2885_v33  ;;  %v7958_v24 = vunpack.i.l.bf16 %v14125_v8  ;;  %v14126_v2 = vld [vmem:[#allocation30_spill] sm:$0xff] }
 0x24c   : > { %v2725_v36 = vsel %vm1463_vm2, %v8594_v29, %v7798_v63  ;;  %v2726_v43 = vsel %vm1463_vm2, %v8595_v7, %v7799_v12  ;;  %v2990_v32 = vpack.c.bf16 %v674_v6, %v673_v15  ;;  %v2993_v47 = vpack.c.bf16 %v676_v19, %v675_v42  ;;  %v14127_v53 = vld [vmem:[#allocation55_spill] sm:$0xff]  ;;  %v679_v12 = vld [vmem:[#allocation2 + $0xf2] sm:$0xff] }
 0x24d   : > { %v10579_v28 = vpop.f32.mrf.mxu0  ;;  %v2824_v16 = vsel %vm1463_vm2, %v8592_v9, %v8199_v56  ;;  %v2823_v14 = vsel %vm1463_vm2, %v8593_v48, %v8198_v40  ;;  %v8212_v44 = vpop.permute.xlu1 %8211  ;;  %v2757_v59 = vsel %vm1496_vm3, %v2725_v36, %v7878_v38  ;;  %v2758_v1 = vsel %vm1496_vm3, %v2726_v43, %v7879_v37  ;;  %v8599_v6 = vld [vmem:[#allocation2 + $0x230] sm:$0xff] }
 0x24e   : > { %7129 = vmatmul.mubr.msk.bf16.gmra.mxu1 %vm1463_vm2, %v2984_v55  ;;  %v8207_v30 = vpop.permute.xlu0 %8206  ;;  %v2855_v35 = vsel %vm1496_vm3, %v2823_v14, %v8203_v52  ;;  %v2856_v34 = vsel %vm1496_vm3, %v2824_v16, %v8204_v13  ;;  %v8214_v22 = vunpack.i.h.bf16 %v8212_v44  ;;  %v8213_v60 = vunpack.i.l.bf16 %v8212_v44  ;;  %v8596_v55 = vld [vmem:[#allocation2 + $0x261] sm:$0xff]  ;;  %v14129_v7 = vld [vmem:[#allocation41_spill] sm:$0xff] }
 0x24f   : > { %v3348_v18 = vpop.f32.mrf.mxu0  ;;  %7132 = vmatprep.mubr.msk.bf16.mxu1 %vm1463_vm2, %v2987_v51  ;;  %v8209_v0 = vunpack.i.h.bf16 %v8207_v30  ;;  %v8208_v45 = vunpack.i.l.bf16 %v8207_v30  ;;  %v2789_v61 = vsel %vm1529_vm4, %v2757_v59, %v7958_v24  ;;  %v2790_v20 = vsel %vm1529_vm4, %v2758_v1, %v7959_v50  ;;  %v677_v13 = vld [vmem:[#allocation2 + $0xda] sm:$0xff]  ;;  %v678_v52 = vld [vmem:[#allocation2 + $0xe2] sm:$0xff] }
 0x250   : > { %v7803_v25 = vunpack.i.l.bf16 %v14126_v2  ;;  %v2826_v4 = vsel %vm1463_vm2, %v8596_v55, %v8214_v22  ;;  %v2825_v51 = vsel %vm1463_vm2, %v8597_v31, %v8213_v60  ;;  %v7804_v11 = vunpack.i.h.bf16 %v14126_v2  ;;  %v14128_v16 = vld [vmem:[#allocation44_spill] sm:$0xff]  ;;  %v8600_v59 = vld [vmem:[#allocation2 + $0x279] sm:$0xff]  ;;  %v14131_v31 = vld [vmem:[#allocation9_spill] sm:$0xff] }
 0x251   : > { %v10593_v10 = vpop.f32.mrf.mxu0  ;;  %3494 = vmatmul.mubr.bf16.gmra.mxu0 %v3030_v39  ;;  %v2887_v58 = vsel %vm1529_vm4, %v2855_v35, %v8208_v45  ;;  %v2888_v17 = vsel %vm1529_vm4, %v2856_v34, %v8209_v0  ;;  %v8222_v27 = vpop.permute.xlu1 %8221  ;;  %v7883_v56 = vunpack.i.l.bf16 %v14127_v53  ;;  %v7884_v21 = vunpack.i.h.bf16 %v14127_v53  ;;  %v8598_v44 = vld [vmem:[#allocation2 + $0x228] sm:$0xff] }
 0x252   : > { %3501 = vmatprep.mubr.bf16.mxu0 %v3034_v49  ;;  %v8217_v26 = vpop.permute.xlu0 %8216  ;;  %v3037_v40 = vpack.c.bf16 %v2888_v17, %v2887_v58  ;;  %v3033_v54 = vpack.c.bf16 %v2790_v20, %v2789_v61  ;;  %v8224_v63 = vunpack.i.h.bf16 %v8222_v27  ;;  %v8223_v9 = vunpack.i.l.bf16 %v8222_v27  ;;  %v14130_v58 = vld [vmem:[#allocation18_spill] sm:$0xff]  ;;  %v681_v2 = vld [vmem:[#allocation2 + $0x10a] sm:$0xff]  ;;  %v683_v53 = vld [vmem:[#allocation2 + $0x122] sm:$0xff] }
 0x253   : > { %v3353_v5 = vpop.f32.mrf.mxu0  ;;  %v8219_v41 = vunpack.i.h.bf16 %v8217_v26  ;;  %v8218_v3 = vunpack.i.l.bf16 %v8217_v26  ;;  %v7964_v48 = vunpack.i.h.bf16 %v14128_v16  ;;  %v7963_v14 = vunpack.i.l.bf16 %v14128_v16 }
 0x254   : > { %v2727_v37 = vsel %vm1463_vm2, %v8598_v44, %v7803_v25  ;;  %v2728_v0 = vsel %vm1463_vm2, %v8599_v6, %v7804_v11  ;;  %v2996_v45 = vpack.c.bf16 %v678_v52, %v677_v13  ;;  %v2999_v42 = vpack.c.bf16 %v680_v57, %v679_v12  ;;  %v8601_v5 = vld [vmem:[#allocation2 + $0x271] sm:$0xff] }
 0x255   : > { %v10603_v23 = vpop.f32.mrf.mxu0  ;;  %v2857_v38 = vsel %vm1496_vm3, %v2825_v51, %v8218_v3  ;;  %v2858_v49 = vsel %vm1496_vm3, %v2826_v4, %v8219_v41  ;;  %v8232_v30 = vpop.permute.xlu1 %8231  ;;  %v2759_v8 = vsel %vm1496_vm3, %v2727_v37, %v7883_v56  ;;  %v2760_v24 = vsel %vm1496_vm3, %v2728_v0, %v7884_v21  ;;  %v682_v25 = vld [vmem:[#allocation2 + $0x112] sm:$0xff]  ;;  %v684_v56 = vld [vmem:[#allocation2 + $0x12a] sm:$0xff]  ;;  %v8602_v21 = vld [vmem:[#allocation2 + $0x240] sm:$0xff] }
 0x256   : > { %7133 = vmatmul.mubr.msk.bf16.gmra.mxu1 %vm1463_vm2, %v2990_v32  ;;  %v8227_v33 = vpop.permute.xlu0 %8226  ;;  %v2889_v19 = vsel %vm1529_vm4, %v2857_v38, %v8223_v9  ;;  %v2890_v35 = vsel %vm1529_vm4, %v2858_v49, %v8224_v63  ;;  %v2791_v34 = vsel %vm1529_vm4, %v2759_v8, %v7963_v14  ;;  %v2792_v29 = vsel %vm1529_vm4, %v2760_v24, %v7964_v48  ;;  %v8603_v9 = vld [vmem:[#allocation2 + $0x248] sm:$0xff]  ;;  %v14132_v0 = vld [vmem:[#allocation42_spill] sm:$0xff] }
 0x257   : > { %v3356_v46 = vpop.f32.mrf.mxu0  ;;  %7136 = vmatprep.mubr.msk.bf16.mxu1 %vm1463_vm2, %v2993_v47  ;;  %v8229_v39 = vunpack.i.h.bf16 %v8227_v33  ;;  %v8228_v15 = vunpack.i.l.bf16 %v8227_v33  ;;  %v8234_v36 = vunpack.i.h.bf16 %v8232_v30  ;;  %v8233_v22 = vunpack.i.l.bf16 %v8232_v30 }
 0x258   : > { %v7808_v43 = vunpack.i.l.bf16 %v14129_v7  ;;  %v7809_v47 = vunpack.i.h.bf16 %v14129_v7  ;;  %v7888_v17 = vunpack.i.l.bf16 %v14130_v58  ;;  %v3040_v61 = vpack.c.bf16 %v2890_v35, %v2889_v19 }
 0x259   : > { %v10617_v18 = vpop.f32.mrf.mxu0  ;;  %3502 = vmatmul.mubr.bf16.gmra.mxu0 %v3033_v54  ;;  %v2828_v26 = vsel %vm1463_vm2, %v8600_v59, %v8229_v39  ;;  %v2827_v1 = vsel %vm1463_vm2, %v8601_v5, %v8228_v15  ;;  %v8242_v20 = vpop.permute.xlu1 %8241  ;;  %v7889_v41 = vunpack.i.h.bf16 %v14130_v58  ;;  %v3036_v27 = vpack.c.bf16 %v2792_v29, %v2791_v34  ;;  %v14133_v34 = vld [vmem:[#allocation7_spill] sm:$0xff] }
 0x25a   : > { %3509 = vmatprep.mubr.bf16.mxu0 %v3037_v40  ;;  %v8237_v60 = vpop.permute.xlu0 %8236  ;;  %v7969_v51 = vunpack.i.h.bf16 %v14131_v31  ;;  %v7968_v11 = vunpack.i.l.bf16 %v14131_v31  ;;  %v2859_v40 = vsel %vm1496_vm3, %v2827_v1, %v8233_v22  ;;  %v2860_v33 = vsel %vm1496_vm3, %v2828_v26, %v8234_v36  ;;  %v686_v59 = vld [vmem:[#allocation2 + $0x142] sm:$0xff]  ;;  %v14134_v1 = vld [vmem:[#allocation54_spill] sm:$0xff] }
 0x25b   : > { %v3361_v50 = vpop.f32.mrf.mxu0  ;;  %v8239_v55 = vunpack.i.h.bf16 %v8237_v60  ;;  %v8238_v4 = vunpack.i.l.bf16 %v8237_v60  ;;  %v2729_v46 = vsel %vm1463_vm2, %v8602_v21, %v7808_v43  ;;  %v8244_v13 = vunpack.i.h.bf16 %v8242_v20  ;;  %v685_v43 = vld [vmem:[#allocation2 + $0x13a] sm:$0xff] }
 0x25c   : > { %v8243_v52 = vunpack.i.l.bf16 %v8242_v20  ;;  %v2730_v16 = vsel %vm1463_vm2, %v8603_v9, %v7809_v47  ;;  %v3002_v48 = vpack.c.bf16 %v682_v25, %v681_v2  ;;  %v2761_v14 = vsel %vm1496_vm3, %v2729_v46, %v7888_v17  ;;  %v8604_v50 = vld [vmem:[#allocation2 + $0x291] sm:$0xff]  ;;  %v8607_v25 = vld [vmem:[#allocation2 + $0x260] sm:$0xff] }
 0x25d   : > { %v10627_v32 = vpop.f32.mrf.mxu0  ;;  %v2762_v57 = vsel %vm1496_vm3, %v2730_v16, %v7889_v41  ;;  %v3005_v38 = vpack.c.bf16 %v684_v56, %v683_v53  ;;  %v2891_v49 = vsel %vm1529_vm4, %v2859_v40, %v8238_v4  ;;  %v2892_v30 = vsel %vm1529_vm4, %v2860_v33, %v8239_v55  ;;  %v8252_v6 = vpop.permute.xlu1 %8251  ;;  %v687_v17 = vld [vmem:[#allocation2 + $0x152] sm:$0xff] }
 0x25e   : > { %7137 = vmatmul.mubr.msk.bf16.gmra.mxu1 %vm1463_vm2, %v2996_v45  ;;  %v8247_v63 = vpop.permute.xlu0 %8246  ;;  %v2793_v44 = vsel %vm1529_vm4, %v2761_v14, %v7968_v11  ;;  %v2794_v37 = vsel %vm1529_vm4, %v2762_v57, %v7969_v51  ;;  %v7813_v45 = vunpack.i.l.bf16 %v14132_v0  ;;  %v2830_v24 = vsel %vm1463_vm2, %v8604_v50, %v8244_v13  ;;  %v14135_v13 = vld [vmem:[#allocation56_spill] sm:$0xff]  ;;  %v14136_v16 = vld [vmem:[#allocation29_spill] sm:$0xff] }
 0x25f   : > { %v3364_v3 = vpop.f32.mrf.mxu0  ;;  %7140 = vmatprep.mubr.msk.bf16.mxu1 %vm1463_vm2, %v2999_v42  ;;  %v8249_v39 = vunpack.i.h.bf16 %v8247_v63  ;;  %v8248_v15 = vunpack.i.l.bf16 %v8247_v63  ;;  %v8605_v42 = vld [vmem:[#allocation2 + $0x289] sm:$0xff]  ;;  %v7814_v35 = vunpack.i.h.bf16 %v14132_v0  ;;  %v7893_v29 = vunpack.i.l.bf16 %v14133_v34  ;;  %v8608_v0 = vld [vmem:[#allocation2 + $0x278] sm:$0xff] }
 0x260   : > { %v2829_v19 = vsel %vm1463_vm2, %v8605_v42, %v8243_v52  ;;  %v3043_v36 = vpack.c.bf16 %v2892_v30, %v2891_v49  ;;  %v7894_v22 = vunpack.i.h.bf16 %v14133_v34  ;;  %v3039_v7 = vpack.c.bf16 %v2794_v37, %v2793_v44  ;;  %v8606_v3 = vld [vmem:[#allocation2 + $0x258] sm:$0xff]  ;;  %v14137_v30 = vld [vmem:[#allocation20_spill] sm:$0xff]  ;;  %v8609_v50 = vld [vmem:[#allocation2 + $0x270] sm:$0xff] }
 0x261   : > { %v10641_v54 = vpop.f32.mrf.mxu0  ;;  %3510 = vmatmul.mubr.bf16.gmra.mxu0 %v3036_v27  ;;  %v8254_v26 = vunpack.i.h.bf16 %v8252_v6  ;;  %v8253_v5 = vunpack.i.l.bf16 %v8252_v6  ;;  %v7974_v47 = vunpack.i.h.bf16 %v14134_v1  ;;  %v7973_v58 = vunpack.i.l.bf16 %v14134_v1  ;;  %v690_v49 = vld [vmem:[#allocation2 + $0x172] sm:$0xff]  ;;  %v1918_v1 = vld [vmem:[#allocation2 + $0x1ea] sm:$0xff] }
 0x262   : > { %3517 = vmatprep.mubr.bf16.mxu0 %v3040_v61  ;;  %v688_v61 = vld [vmem:[#allocation2 + $0x15a] sm:$0xff]  ;;  %v2861_v20 = vsel %vm1496_vm3, %v2829_v19, %v8248_v15  ;;  %v2862_v41 = vsel %vm1496_vm3, %v2830_v24, %v8249_v39  ;;  %v2731_v27 = vsel %vm1463_vm2, %v8606_v3, %v7813_v45  ;;  %v2732_v55 = vsel %vm1463_vm2, %v8607_v25, %v7814_v35  ;;  %v691_v39 = vld [vmem:[#allocation2 + $0x182] sm:$0xff]  ;;  %v692_v15 = vld [vmem:[#allocation2 + $0x18a] sm:$0xff] }
 0x263   : > { %v3369_v12 = vpop.f32.mrf.mxu0  ;;  %v3008_v4 = vpack.c.bf16 %v686_v59, %v685_v43  ;;  %v2763_v31 = vsel %vm1496_vm3, %v2731_v27, %v7893_v29  ;;  %v2764_v11 = vsel %vm1496_vm3, %v2732_v55, %v7894_v22  ;;  %v3011_v53 = vpack.c.bf16 %v688_v61, %v687_v17  ;;  %v693_v59 = vld [vmem:[#allocation2 + $0x19a] sm:$0xff]  ;;  %v1920_v27 = vld [vmem:[#allocation2 + $0x202] sm:$0xff]  ;;  %v1921_v25 = vld [vmem:[#allocation2 + $0x212] sm:$0xff] }
 0x264   : > { %v2893_v56 = vsel %vm1529_vm4, %v2861_v20, %v8253_v5  ;;  %v2894_v40 = vsel %vm1529_vm4, %v2862_v41, %v8254_v26  ;;  %v2795_v33 = vsel %vm1529_vm4, %v2763_v31, %v7973_v58  ;;  %v2796_v21 = vsel %vm1529_vm4, %v2764_v11, %v7974_v47  ;;  %v694_v26 = vld [vmem:[#allocation2 + $0x1a2] sm:$0xff]  ;;  %v1919_v3 = vld [vmem:[#allocation2 + $0x1fa] sm:$0xff] }
 0x265   : > { %v10651_v8 = vpop.f32.mrf.mxu0  ;;  %v7819_v52 = vunpack.i.h.bf16 %v14135_v13  ;;  %v7818_v63 = vunpack.i.l.bf16 %v14135_v13  ;;  %v3046_v9 = vpack.c.bf16 %v2894_v40, %v2893_v56  ;;  %v7898_v14 = vunpack.i.l.bf16 %v14136_v16  ;;  %v1917_v5 = vld [vmem:[#allocation2 + $0x1e2] sm:$0xff]  ;;  %v1922_v55 = vld [vmem:[#allocation2 + $0x21a] sm:$0xff]  ;;  %v1923_v40 = vld [vmem:[#allocation2 + $0x22a] sm:$0xff] }
 0x266   : > { %7141 = vmatmul.mubr.msk.bf16.gmra.mxu1 %vm1463_vm2, %v3002_v48  ;;  %v7899_v48 = vunpack.i.h.bf16 %v14136_v16  ;;  %v3042_v57 = vpack.c.bf16 %v2796_v21, %v2795_v33  ;;  %v7979_v44 = vunpack.i.h.bf16 %v14137_v30  ;;  %v7978_v37 = vunpack.i.l.bf16 %v14137_v30  ;;  %v1924_v33 = vld [vmem:[#allocation2 + $0x232] sm:$0xff]  ;;  %v1925_v21 = vld [vmem:[#allocation2 + $0x242] sm:$0xff]  ;;  %v1926_v13 = vld [vmem:[#allocation2 + $0x24a] sm:$0xff] }
 0x267   : > { %v3372_v60 = vpop.f32.mrf.mxu0  ;;  %7144 = vmatprep.mubr.msk.bf16.mxu1 %vm1463_vm2, %v3005_v38  ;;  %v689_v38 = vld [vmem:[#allocation2 + $0x16a] sm:$0xff]  ;;  %v2734_v45 = vsel %vm1463_vm2, %v8608_v0, %v7819_v52  ;;  %v2733_v24 = vsel %vm1463_vm2, %v8609_v50, %v7818_v63  ;;  %v3017_v29 = vpack.c.bf16 %v692_v15, %v691_v39  ;;  %v3020_v58 = vpack.c.bf16 %v694_v26, %v693_v59  ;;  %v1932_v50 = vld [vmem:[#allocation2 + $0x292] sm:$0xff]  ;;  %v1938_v26 = vld [vmem:[#allocation2 + $0x2da] sm:$0xff] }
 0x268   : > { %v3014_v42 = vpack.c.bf16 %v690_v49, %v689_v38  ;;  %v2765_v35 = vsel %vm1496_vm3, %v2733_v24, %v7898_v14  ;;  %v2766_v34 = vsel %vm1496_vm3, %v2734_v45, %v7899_v48  ;;  %v3023_v61 = vpack.c.bf16 %v1918_v1, %v1917_v5  ;;  %v1929_v38 = vld [vmem:[#allocation2 + $0x272] sm:$0xff]  ;;  %v1930_v49 = vld [vmem:[#allocation2 + $0x27a] sm:$0xff]  ;;  %v1931_v45 = vld [vmem:[#allocation2 + $0x28a] sm:$0xff] }
 0x269   : > { %v10665_v2 = vpop.f32.mrf.mxu0  ;;  %3518 = vmatmul.mubr.bf16.gmra.mxu0 %v3039_v7  ;;  %v2798_v22 = vsel %vm1529_vm4, %v2766_v34, %v7979_v44  ;;  %v3026_v31 = vpack.c.bf16 %v1920_v27, %v1919_v3  ;;  %v3029_v11 = vpack.c.bf16 %v1922_v55, %v1921_v25  ;;  %v3032_v63 = vpack.c.bf16 %v1924_v33, %v1923_v40  ;;  %v1933_v24 = vld [vmem:[#allocation2 + $0x2a2] sm:$0xff]  ;;  %v1937_v59 = vld [vmem:[#allocation2 + $0x2d2] sm:$0xff]  ;;  %v1939_v25 = vld [vmem:[#allocation2 + $0x2ea] sm:$0xff] }
 0x26a   : > { %3525 = vmatprep.mubr.bf16.mxu0 %v3043_v36  ;;  %v2797_v36 = vsel %vm1529_vm4, %v2765_v35, %v7978_v37  ;;  %v3035_v16 = vpack.c.bf16 %v1926_v13, %v1925_v21  ;;  %v3041_v39 = vpack.c.bf16 %v1930_v49, %v1929_v38  ;;  %v3044_v35 = vpack.c.bf16 %v1932_v50, %v1931_v45  ;;  %v1940_v55 = vld [vmem:[#allocation2 + $0x2f2] sm:$0xff]  ;;  %v1947_v45 = vld [vmem:[#allocation2 + $0x34a] sm:$0xff] }
 0x26b   : > { %v3377_v51 = vpop.f32.mrf.mxu0  ;;  %v3045_v43 = vpack.c.bf16 %v2798_v22, %v2797_v36  ;;  %v13847_v3 = vmov 0.0   ;;  %v4185_v13 = vld [vmem:[%s13768_s2 + $0x70] sm:$0xff] }
 0x26c   : > { %7188 = vmatprep.subr.mxu1 %v13847_v3  ;;  %v1948_v50 = vld [vmem:[#allocation2 + $0x352] sm:$0xff] }
 0x26d   : > { %v10674_v46 = vpop.f32.mrf.mxu0 }
 0x26e   : > { %7145 = vmatmul.mubr.msk.bf16.gmra.mxu1 %vm1463_vm2, %v3008_v4 }
 0x26f   : > { %v3380_v12 = vpop.f32.mrf.mxu0  ;;  %7148 = vmatprep.mubr.msk.bf16.mxu1 %vm1463_vm2, %v3011_v53 }
 0x270   : > { %v1927_v12 = vld [vmem:[#allocation2 + $0x25a] sm:$0xff] }
 0x271   : > { %v10684_v6 = vpop.f32.mrf.mxu0  ;;  %3526 = vmatmul.mubr.bf16.gmra.mxu0 %v3042_v57  ;;  %v1928_v57 = vld [vmem:[#allocation2 + $0x262] sm:$0xff] }
 0x272   : > { %3533 = vmatprep.mubr.bf16.mxu0 %v3046_v9  ;;  %v3038_v44 = vpack.c.bf16 %v1928_v57, %v1927_v12  ;;  %v1946_v12 = vld [vmem:[#allocation2 + $0x33a] sm:$0xff] }
 0x273   : > { %v3385_v19 = vpop.f32.mrf.mxu0 }
 0x275   : > { %v10692_v60 = vpop.f32.mrf.mxu0 }
 0x276   : > { %7149 = vmatmul.mubr.msk.bf16.gmra.mxu1 %vm1463_vm2, %v3014_v42  ;;  %v1934_v42 = vld [vmem:[#allocation2 + $0x2aa] sm:$0xff] }
 0x277   : > { %v3388_v7 = vpop.f32.mrf.mxu0  ;;  %7152 = vmatprep.mubr.msk.bf16.mxu1 %vm1463_vm2, %v3017_v29  ;;  %v3047_v29 = vpack.c.bf16 %v1934_v42, %v1933_v24  ;;  %v3068_v42 = vpack.c.bf16 %v1948_v50, %v1947_v45 }
 0x278   : > { %v1935_v7 = vld [vmem:[#allocation2 + $0x2ba] sm:$0xff] }
 0x279   : > { %v10696_v47 = vpop.f32.mrf.mxu0  ;;  %3534 = vmatmul.mubr.bf16.gmra.mxu0 %v3045_v43  ;;  %v1936_v43 = vld [vmem:[#allocation2 + $0x2c2] sm:$0xff] }
 0x27a   : > { %v3050_v1 = vpack.c.bf16 %v1936_v43, %v1935_v7 }
 0x27b   : > { %v3393_v17 = vpop.f32.mrf.mxu0 }
 0x27c   : > { %v3053_v17 = vpack.c.bf16 %v1938_v26, %v1937_v59  ;;  %v4182_v26 = vld [vmem:[%s13768_s2 + $0x58] sm:$0xff] }
 0x27d   : > { %v10698_v20 = vpop.f32.mrf.mxu0 }
 0x27e   : > { %7153 = vmatmul.mubr.msk.bf16.gmra.mxu1 %vm1463_vm2, %v3020_v58 }
 0x27f   : > { %v3396_v41 = vpop.f32.mrf.mxu0  ;;  %7156 = vmatprep.mubr.msk.bf16.mxu1 %vm1463_vm2, %v3023_v61 }
 0x280   : > { %v4186_v41 = vld [vmem:[%s13768_s2 + $0x78] sm:$0xff] }
 0x281   : > { %v10702_v4 = vpop.f32.mrf.mxu0  ;;  %7189 = vmatpush3.msra.mxu1 %v4186_v41 }
 0x282   : > { %7190 = vmatprep.subr.mxu1 %v13847_v3 }
 0x283   : > { %v3401_v51 = vpop.f32.mrf.mxu0  ;;  %7191 = vmatpush3.msra.mxu1 %v4185_v13 }
 0x284   : > { %v1942_v51 = vld [vmem:[#allocation2 + $0x30a] sm:$0xff]  ;;  %7192 = vmatprep.subr.mxu1 %v13847_v3 }
 0x285   : > { %v10704_v53 = vpop.f32.mrf.mxu0 }
 0x286   : > { %7157 = vmatmul.mubr.msk.bf16.gmra.mxu1 %vm1463_vm2, %v3026_v31  ;;  %v1941_v31 = vld [vmem:[#allocation2 + $0x302] sm:$0xff] }
 0x287   : > { %v3404_v56 = vpop.f32.mrf.mxu0  ;;  %7160 = vmatprep.mubr.msk.bf16.mxu1 %vm1463_vm2, %v3029_v11  ;;  %v3059_v33 = vpack.c.bf16 %v1942_v51, %v1941_v31  ;;  %v4181_v51 = vld [vmem:[%s13768_s2 + $0x50] sm:$0xff] }
 0x288   : > { %v3056_v56 = vpack.c.bf16 %v1940_v55, %v1939_v25 }
 0x289   : > { %v10708_v52 = vpop.f32.mrf.mxu0 }
 0x28b   : > { %v3409_v9 = vpop.f32.mrf.mxu0 }
 0x28c   : > { %v1943_v9 = vld [vmem:[#allocation2 + $0x31a] sm:$0xff] }
 0x28d   : > { %v10710_v48 = vpop.f32.mrf.mxu0 }
 0x28e   : > { %7161 = vmatmul.mubr.msk.bf16.gmra.mxu1 %vm1463_vm2, %v3032_v63 }
 0x28f   : > { %v3412_v14 = vpop.f32.mrf.mxu0  ;;  %7164 = vmatprep.mubr.msk.bf16.mxu1 %vm1463_vm2, %v3035_v16  ;;  %v1944_v16 = vld [vmem:[#allocation2 + $0x322] sm:$0xff] }
 0x290   : > { %v1945_v14 = vld [vmem:[#allocation2 + $0x332] sm:$0xff]  ;;  %v3062_v38 = vpack.c.bf16 %v1944_v16, %v1943_v9 }
 0x291   : > { %v10714_v30 = vpop.f32.mrf.mxu0 }
 0x293   : > { %v3417_v37 = vpop.f32.mrf.mxu0 }
 0x295   : > { %v10716_v15 = vpop.f32.mrf.mxu0 }
 0x296   : > { %7165 = vmatmul.mubr.msk.bf16.gmra.mxu1 %vm1463_vm2, %v3038_v44  ;;  %v3065_v44 = vpack.c.bf16 %v1946_v12, %v1945_v14  ;;  %v4178_v14 = vld [vmem:[%s13768_s2 + $0x38] sm:$0xff] }
 0x297   : > { %v3420_v0 = vpop.f32.mrf.mxu0  ;;  %7168 = vmatprep.mubr.msk.bf16.mxu1 %vm1463_vm2, %v3041_v39  ;;  %v4184_v39 = vld [vmem:[%s13768_s2 + $0x68] sm:$0xff] }
 0x298   : > { %7193 = vmatpush3.msra.mxu1 %v4184_v39 }
 0x299   : > { %v10720_v19 = vpop.f32.mrf.mxu0  ;;  %7194 = vmatprep.subr.mxu1 %v13847_v3 }
 0x29b   : > { %v3425_v34 = vpop.f32.mrf.mxu0 }
 0x29d   : > { %v10722_v36 = vpop.f32.mrf.mxu0 }
 0x29e   : > { %7169 = vmatmul.mubr.msk.bf16.gmra.mxu1 %vm1463_vm2, %v3044_v35 }
 0x29f   : > { %v3428_v22 = vpop.f32.mrf.mxu0  ;;  %7172 = vmatprep.mubr.msk.bf16.mxu1 %vm1463_vm2, %v3047_v29  ;;  %v4183_v29 = vld [vmem:[%s13768_s2 + $0x60] sm:$0xff] }
 0x2a0   : > { %7195 = vmatpush3.msra.mxu1 %v4183_v29  ;;  %v4176_v29 = vld [vmem:[%s13768_s2 + $0x28] sm:$0xff] }
 0x2a1   : > { %v10726_v5 = vpop.f32.mrf.mxu0  ;;  %7196 = vmatprep.subr.mxu1 %v13847_v3 }
 0x2a2   : > { %7197 = vmatpush3.msra.mxu1 %v4182_v26 }
 0x2a3   : > { %v3433_v58 = vpop.f32.mrf.mxu0  ;;  %7198 = vmatprep.subr.mxu1 %v13847_v3 }
 0x2a4   : > { %7199 = vmatpush3.msra.mxu1 %v4181_v51  ;;  %v4175_v51 = vld [vmem:[%s13768_s2 + $0x20] sm:$0xff] }
 0x2a5   : > { %v10728_v61 = vpop.f32.mrf.mxu0  ;;  %7200 = vmatprep.subr.mxu1 %v13847_v3 }
 0x2a6   : > { %7173 = vmatmul.mubr.msk.bf16.gmra.mxu1 %vm1463_vm2, %v3050_v1 }
 0x2a7   : > { %v3436_v27 = vpop.f32.mrf.mxu0  ;;  %7176 = vmatprep.mubr.msk.bf16.mxu1 %vm1463_vm2, %v3053_v17 }
 0x2a9   : > { %v10737_v11 = vpop.f32.mrf.mxu0 }
 0x2ab   : > { %v3441_v40 = vpop.f32.mrf.mxu0 }
 0x2ad   : > { %v10739_v21 = vpop.f32.mrf.mxu0 }
 0x2ae   : > { %7177 = vmatmul.mubr.msk.bf16.gmra.mxu1 %vm1463_vm2, %v3056_v56  ;;  %v4180_v56 = vld [vmem:[%s13768_s2 + $0x48] sm:$0xff] }
 0x2af   : > { %v3444_v63 = vpop.f32.mrf.mxu0  ;;  %7180 = vmatprep.mubr.msk.bf16.mxu1 %vm1463_vm2, %v3059_v33  ;;  %7201 = vmatpush3.msra.mxu1 %v4180_v56  ;;  %v4179_v33 = vld [vmem:[%s13768_s2 + $0x40] sm:$0xff] }
 0x2b0   : > { %7202 = vmatprep.subr.mxu1 %v13847_v3 }
 0x2b1   : > { %v10747_v57 = vpop.f32.mrf.mxu0  ;;  %7203 = vmatpush3.msra.mxu1 %v4179_v33 }
 0x2b2   : > { %7204 = vmatprep.subr.mxu1 %v13847_v3 }
 0x2b3   : > { %v3449_v49 = vpop.f32.mrf.mxu0  ;;  %7205 = vmatpush3.msra.mxu1 %v4178_v14 }
 0x2b4   : > { %7206 = vmatprep.subr.mxu1 %v13847_v3 }
 0x2b5   : > { %v10749_v37 = vpop.f32.mrf.mxu0 }
 0x2b6   : > { %7181 = vmatmul.mubr.msk.bf16.gmra.mxu1 %vm1463_vm2, %v3062_v38 }
 0x2b7   : > { %v3452_v0 = vpop.f32.mrf.mxu0  ;;  %7184 = vmatprep.mubr.msk.bf16.mxu1 %vm1463_vm2, %v3065_v44 }
 0x2b8   : > { %v4177_v0 = vld [vmem:[%s13768_s2 + $0x30] sm:$0xff] }
 0x2b9   : > { %v10757_v24 = vpop.f32.mrf.mxu0  ;;  %7207 = vmatpush3.msra.mxu1 %v4177_v0  ;;  %v4174_v0 = vld [vmem:[%s13768_s2 + $0x18] sm:$0xff] }
 0x2ba   : > { %7208 = vmatprep.subr.mxu1 %v13847_v3 }
 0x2bb   : > { %v3457_v35 = vpop.f32.mrf.mxu0  ;;  %7209 = vmatpush3.msra.mxu1 %v4176_v29 }
 0x2bc   : > { %7210 = vmatprep.subr.mxu1 %v13847_v3 }
 0x2bd   : > { %v10759_v34 = vpop.f32.mrf.mxu0  ;;  %7211 = vmatpush3.msra.mxu1 %v4175_v51 }
 0x2be   : > { %7185 = vmatmul.mubr.msk.bf16.gmra.mxu1 %vm1463_vm2, %v3068_v42  ;;  %7212 = vmatprep.subr.mxu1 %v13847_v3 }
 0x2bf   : > { %v3460_v22 = vpop.f32.mrf.mxu0  ;;  %7213 = vmatpush3.msra.mxu1 %v4174_v0  ;;  %v2912_v0 = vld [vmem:[%s8723_s24 + $0x18] sm:$0xff] }
 0x2c0   : > { %7214 = vmatprep.subr.mxu1 %v13847_v3 }
 0x2c1   : > { %v10766_v7 = vpop.f32.mrf.mxu0 }
 0x2c3   : > { %v3465_v43 = vpop.f32.mrf.mxu0 }
 0x2c5   : > { %v10768_v59 = vpop.f32.mrf.mxu0 }
 0x2c6   : > { %14138 = vst [vmem:[#allocation32_spill] sm:$0xff] %v10768_v59 }
 0x2c7   : > { %v3468_v1 = vpop.f32.mrf.mxu0 }
 0x2ce   : > { %v10774_v58 = vpop.f32.mrf.mxu1 }
 0x2d0   : > { %v3545_v17 = vpop.f32.mrf.mxu1 }
 0x2d2   : > { %v10776_v41 = vpop.f32.mrf.mxu1 }
 0x2d4   : > { %v3548_v27 = vpop.f32.mrf.mxu1 }
 0x2d6   : > { %v10778_v25 = vpop.f32.mrf.mxu1 }
 0x2d8   : > { %v3553_v55 = vpop.f32.mrf.mxu1 }
 0x2da   : > { %v10780_v31 = vpop.f32.mrf.mxu1 }
 0x2db   : > { %14139 = vst [vmem:[#allocation43_spill] sm:$0xff] %v10780_v31 }
 0x2dc   : > { %v3556_v40 = vpop.f32.mrf.mxu1 }
 0x2de   : > { %v10792_v13 = vpop.f32.mrf.mxu1 }
 0x2e0   : > { %v3561_v63 = vpop.f32.mrf.mxu1 }
 0x2e2   : > { %v10796_v9 = vpop.f32.mrf.mxu1 }
 0x2e3   : > { %14140 = vst [vmem:[#allocation58_spill] sm:$0xff] %v10796_v9 }
 0x2e4   : > { %v3564_v16 = vpop.f32.mrf.mxu1 }
 0x2e6   : > { %v10801_v12 = vpop.f32.mrf.mxu1 }
 0x2e7   : > { %14141 = vst [vmem:[#allocation8_spill] sm:$0xff] %v10801_v12 }
 0x2e8   : > { %v3569_v38 = vpop.f32.mrf.mxu1 }
 0x2ea   : > { %v10804_v49 = vpop.f32.mrf.mxu1 }
 0x2eb   : > { %14142 = vst [vmem:[#allocation19_spill] sm:$0xff] %v10804_v49 }
 0x2ec   : > { %v3572_v44 = vpop.f32.mrf.mxu1 }
 0x2ee   : > { %v10806_v39 = vpop.f32.mrf.mxu1 }
 0x2ef   : > { %14143 = vst [vmem:[#allocation31_spill] sm:$0xff] %v10806_v39 }
 0x2f0   : > { %v3577_v45 = vpop.f32.mrf.mxu1 }
 0x2f2   : > { %v10812_v50 = vpop.f32.mrf.mxu1 }
 0x2f3   : > { %14144 = vst [vmem:[#allocation46_spill] sm:$0xff] %v10812_v50 }
 0x2f4   : > { %v3580_v42 = vpop.f32.mrf.mxu1 }
 0x2f6   : > { %v10814_v35 = vpop.f32.mrf.mxu1 }
 0x2f7   : > { %14145 = vst [vmem:[#allocation62_spill] sm:$0xff] %v10814_v35 }
 0x2f8   : > { %v3585_v22 = vpop.f32.mrf.mxu1 }
 0x2f9   : > { %v10820_v43 = vpop.f32.mrf.mxu0 }
 0x2fa   : > { %v10822_v26 = vpop.f32.mrf.mxu1 }
 0x2fb   : > { %14146 = vst [vmem:[#allocation57_spill] sm:$0xff] %v10822_v26  ;;  %v3473_v1 = vpop.f32.mrf.mxu0 }
 0x2fc   : > { %v3588_v17 = vpop.f32.mrf.mxu1  ;;  %v2909_v1 = vld [vmem:[%s8723_s24] sm:$0xff] }
 0x2fd   : > { %v10824_v27 = vpop.f32.mrf.mxu0 }
 0x2fe   : > { %v10826_v55 = vpop.f32.mrf.mxu1 }
 0x2ff   : > { %14147 = vst [vmem:[#allocation11_spill] sm:$0xff] %v10826_v55  ;;  %v3476_v56 = vpop.f32.mrf.mxu0 }
 0x300   : > { %v3593_v40 = vpop.f32.mrf.mxu1 }
 0x301   : > { %v10832_v33 = vpop.f32.mrf.mxu0  ;;  %v2911_v40 = vld [vmem:[%s8723_s24 + $0x10] sm:$0xff] }
 0x302   : > { %v10834_v63 = vpop.f32.mrf.mxu1 }
 0x303   : > { %14148 = vst [vmem:[#allocation22_spill] sm:$0xff] %v10834_v63  ;;  %v3481_v16 = vpop.f32.mrf.mxu0 }
 0x304   : > { %v3596_v14 = vpop.f32.mrf.mxu1 }
 0x305   : > { %v10836_v38 = vpop.f32.mrf.mxu0  ;;  %v2910_v14 = vld [vmem:[%s8723_s24 + $0x8] sm:$0xff] }
 0x306   : > { %v7126_v44 = vpop.f32.mrf.mxu1 }
 0x307   : > { %v3484_v45 = vpop.f32.mrf.mxu0  ;;  %v3641_v51 = vadd.f32 %v7126_v44, %v10593_v10 }
 0x308   : > { %v3632_v42 = vpop.f32.mrf.mxu1 }
 0x309   : > { %v3633_v29 = vadd.f32 %v3632_v42, %v10568_v62  ;;  %v10843_v22 = vpop.f32.mrf.mxu0  ;;  %v10856_v42 = vadd.f32 %v3641_v51, %v2911_v40 }
 0x30a   : > { %v7127_v17 = vpop.f32.mrf.mxu1 }
 0x30b   : > { %v3489_v56 = vpop.f32.mrf.mxu0  ;;  %v3644_v16 = vadd.f32 %v7127_v17, %v10603_v23  ;;  %v10850_v45 = vadd.f32 %v3633_v29, %v2909_v1  ;;  %14150 = vst [vmem:[#allocation45_spill] sm:$0xff] %v10856_v42  ;;  %v3990_v40 = vmul.f32 %v10856_v42, %v10856_v42 }
 0x30c   : > { %v3635_v63 = vpop.f32.mrf.mxu1  ;;  %v2913_v56 = vld [vmem:[%s8723_s24 + $0x20] sm:$0xff] }
 0x30d   : > { %14149 = vst [vmem:[#allocation34_spill] sm:$0xff] %v10850_v45  ;;  %v3636_v3 = vadd.f32 %v3635_v63, %v10579_v28  ;;  %v10854_v26 = vpop.f32.mrf.mxu0  ;;  %v10860_v44 = vadd.f32 %v3644_v16, %v2912_v0  ;;  %v3988_v29 = vmul.f32 %v10850_v45, %v10850_v45  ;;  %v2915_v0 = vld [vmem:[%s8723_s24 + $0x30] sm:$0xff] }
 0x30e   : > { %v7130_v62 = vpop.f32.mrf.mxu1 }
 0x30f   : > { %v10858_v55 = vadd.f32 %v3636_v3, %v2910_v14  ;;  %v3492_v10 = vpop.f32.mrf.mxu0  ;;  %14152 = vst [vmem:[#allocation61_spill] sm:$0xff] %v10860_v44  ;;  %v3657_v3 = vadd.f32 %v7130_v62, %v10641_v54 }
 0x310   : > { %v3648_v23 = vpop.f32.mrf.mxu1 }
 0x311   : > { %14151 = vst [vmem:[#allocation60_spill] sm:$0xff] %v10858_v55  ;;  %v3951_v28 = vadd.f32 %v10858_v55, %v10850_v45  ;;  %v3989_v63 = vmul.f32 %v10858_v55, %v10858_v55  ;;  %v3649_v1 = vadd.f32 %v3648_v23, %v10617_v18  ;;  %v10870_v17 = vpop.f32.mrf.mxu0  ;;  %v3991_v55 = vmul.f32 %v10860_v44, %v10860_v44  ;;  %v2914_v18 = vld [vmem:[%s8723_s24 + $0x28] sm:$0xff] }
 0x312   : > { %v7131_v51 = vpop.f32.mrf.mxu1 }
 0x313   : > { %v3952_v16 = vadd.f32 %v3951_v28, %v10856_v42  ;;  %v4020_v14 = vadd.f32 %v3989_v63, %v3988_v29  ;;  %v10877_v10 = vadd.f32 %v3649_v1, %v2913_v56  ;;  %v3497_v45 = vpop.f32.mrf.mxu0  ;;  %v3660_v62 = vadd.f32 %v7131_v51, %v10651_v8  ;;  %v2916_v56 = vld [vmem:[%s8723_s24 + $0x38] sm:$0xff]  ;;  %v4172_v8 = vld [vmem:[%s13768_s2 + $0x8] sm:$0xff] }
 0x314   : > { %v3651_v23 = vpop.f32.mrf.mxu1  ;;  %v10887_v29 = vadd.f32 %v3657_v3, %v2915_v0 }
 0x315   : > { %14153 = vst [vmem:[#allocation10_spill] sm:$0xff] %v10877_v10  ;;  %v4021_v35 = vadd.f32 %v4020_v14, %v3990_v40  ;;  %v3953_v54 = vadd.f32 %v3952_v16, %v10860_v44  ;;  %v3652_v50 = vadd.f32 %v3651_v23, %v10627_v32  ;;  %v10885_v49 = vpop.f32.mrf.mxu0  ;;  %v3992_v63 = vmul.f32 %v10877_v10, %v10877_v10  ;;  %v4173_v32 = vld [vmem:[%s13768_s2 + $0x10] sm:$0xff] }
 0x316   : > { %14154 = vst [vmem:[#allocation21_spill] sm:$0xff] %v10887_v29  ;;  %v7134_v28 = vpop.f32.mrf.mxu1  ;;  %v10901_v51 = vadd.f32 %v3660_v62, %v2916_v56  ;;  %7215 = vmatpush3.msra.mxu1 %v4173_v32  ;;  %v4171_v62 = vld [vmem:[%s13768_s2] sm:$0xff]  ;;  %v3994_v56 = vmul.f32 %v10887_v29, %v10887_v29 }
 0x317   : > { %v3954_v45 = vadd.f32 %v3953_v54, %v10877_v10  ;;  %v4022_v1 = vadd.f32 %v4021_v35, %v3991_v55  ;;  %v10893_v40 = vadd.f32 %v3652_v50, %v2914_v18  ;;  %v3500_v16 = vpop.f32.mrf.mxu0  ;;  %v2917_v50 = vld [vmem:[%s8723_s24 + $0x40] sm:$0xff]  ;;  %v14157_v54 = vmov 0.0  }
 0x318   : > { %v3664_v14 = vpop.f32.mrf.mxu1  ;;  %14156 = vst [vmem:[#allocation48_spill] sm:$0xff] %v10901_v51  ;;  %7216 = vmatprep.subr.mxu1 %v14157_v54  ;;  %7220 = vmatprep.mubr.msk.f32.mxu1 %vm8668_vm5, %v14157_v54  ;;  %v3995_v32 = vmul.f32 %v10901_v51, %v10901_v51 }
 0x319   : > { %14155 = vst [vmem:[#allocation33_spill] sm:$0xff] %v10893_v40  ;;  %v4023_v3 = vadd.f32 %v4022_v1, %v3992_v63  ;;  %v3955_v0 = vadd.f32 %v3954_v45, %v10893_v40  ;;  %v3993_v35 = vmul.f32 %v10893_v40, %v10893_v40  ;;  %v10907_v55 = vpop.f32.mrf.mxu0  ;;  %v3665_v18 = vadd.f32 %v3664_v14, %v10665_v2  ;;  %v2918_v2 = vld [vmem:[%s8723_s24 + $0x48] sm:$0xff] }
 0x31a   : > { %v7135_v23 = vpop.f32.mrf.mxu1  ;;  %7217 = vmatpush3.msra.mxu1 %v4172_v8  ;;  %v3673_v8 = vadd.f32 %v7134_v28, %v10684_v6  ;;  %v4815_v6 = vld [vmem:[#allocation3 + $0x18] sm:$0xff] }
 0x31b   : > { %v4024_v45 = vadd.f32 %v4023_v3, %v3993_v35  ;;  %v3505_v63 = vpop.f32.mrf.mxu0  ;;  %v3956_v1 = vadd.f32 %v3955_v0, %v10887_v29  ;;  %v10918_v16 = vadd.f32 %v3665_v18, %v2917_v50  ;;  %7218 = vmatprep.subr.mxu1 %v14157_v54  ;;  %v4813_v18 = vld [vmem:[#allocation3 + $0x8] sm:$0xff]  ;;  %v2919_v29 = vld [vmem:[%s8723_s24 + $0x50] sm:$0xff] }
 0x31c   : > { %v3667_v14 = vpop.f32.mrf.mxu1  ;;  %7219 = vmatpush3.msra.mxu1 %v4171_v62  ;;  %v4812_v63 = vld [vmem:[#allocation3] sm:$0xff]  ;;  %4942 = vrot.lane.b32.xlu1 %v4813_v18, %s8663_s25  ;;  %v2920_v18 = vld [vmem:[%s8723_s24 + $0x58] sm:$0xff] }
 0x31d   : > { %14158 = vst [vmem:[#allocation64_spill] sm:$0xff] %v10918_v16  ;;  %v4025_v40 = vadd.f32 %v4024_v45, %v3994_v56  ;;  %v3668_v10 = vadd.f32 %v3667_v14, %v10674_v46  ;;  %v10925_v44 = vpop.f32.mrf.mxu0  ;;  %v3957_v54 = vadd.f32 %v3956_v1, %v10901_v51  ;;  %v3996_v56 = vmul.f32 %v10918_v16, %v10918_v16 }
 0x31e   : > { %v7138_v3 = vpop.f32.mrf.mxu1  ;;  %4940 = vrot.lane.b32.xlu0 %v4812_v63, %s8663_s25 }
 0x31f   : > { %v4026_v0 = vadd.f32 %v4025_v40, %v3995_v32  ;;  %v10928_v35 = vadd.f32 %v3668_v10, %v2918_v2  ;;  %v3508_v50 = vpop.f32.mrf.mxu0  ;;  %v4814_v10 = vld [vmem:[#allocation3 + $0x10] sm:$0xff]  ;;  %v10940_v2 = vadd.f32 %v3673_v8, %v2919_v29  ;;  %v3958_v14 = vadd.f32 %v3957_v54, %v10918_v16 }
 0x320   : > { %v3680_v45 = vpop.f32.mrf.mxu1  ;;  %v3676_v32 = vadd.f32 %v7135_v23, %v10692_v60  ;;  %4946 = vrot.lane.b32.xlu1 %v4815_v6, %s8663_s25 }
 0x321   : > { %14159 = vst [vmem:[#allocation13_spill] sm:$0xff] %v10928_v35  ;;  %v10936_v46 = vpop.f32.mrf.mxu0  ;;  %v4027_v28 = vadd.f32 %v4026_v0, %v3996_v56  ;;  %v3997_v40 = vmul.f32 %v10928_v35, %v10928_v35  ;;  %14160 = vst [vmem:[#allocation24_spill] sm:$0xff] %v10940_v2  ;;  %v4817_v0 = vld [vmem:[#allocation3 + $0x28] sm:$0xff]  ;;  %v4816_v56 = vld [vmem:[#allocation3 + $0x20] sm:$0xff]  ;;  %v3998_v29 = vmul.f32 %v10940_v2, %v10940_v2 }
 0x322   : > { %v7139_v62 = vpop.f32.mrf.mxu1  ;;  %4944 = vrot.lane.b32.xlu0 %v4814_v10, %s8663_s25  ;;  %v10953_v60 = vadd.f32 %v3676_v32, %v2920_v18  ;;  %v3959_v23 = vadd.f32 %v3958_v14, %v10928_v35  ;;  %v3681_v54 = vadd.f32 %v3680_v45, %v10696_v47  ;;  %v2921_v10 = vld [vmem:[%s8723_s24 + $0x60] sm:$0xff]  ;;  %v2922_v32 = vld [vmem:[%s8723_s24 + $0x68] sm:$0xff]  ;;  %v3689_v35 = vadd.f32 %v7138_v3, %v10702_v4 }
 0x323   : > { %v3513_v1 = vpop.f32.mrf.mxu0  ;;  %v4028_v51 = vadd.f32 %v4027_v28, %v3997_v40  ;;  %v4819_v40 = vld [vmem:[#allocation3 + $0x38] sm:$0xff] }
 0x324   : > { %v3683_v50 = vpop.f32.mrf.mxu1  ;;  %14161 = vst [vmem:[#allocation36_spill] sm:$0xff] %v10953_v60  ;;  %4950 = vrot.lane.b32.xlu1 %v4817_v0, %s8663_s25  ;;  %v4818_v1 = vld [vmem:[#allocation3 + $0x30] sm:$0xff]  ;;  %v3999_v47 = vmul.f32 %v10953_v60, %v10953_v60  ;;  %v3960_v45 = vadd.f32 %v3959_v23, %v10940_v2  ;;  %v10969_v18 = vadd.f32 %v3681_v54, %v2921_v10  ;;  %v4824_v2 = vld [vmem:[#allocation3 + $0x60] sm:$0xff] }
 0x325   : > { %v10947_v63 = vpop.f32.mrf.mxu0  ;;  %v4029_v16 = vadd.f32 %v4028_v51, %v3998_v29  ;;  %v3684_v39 = vadd.f32 %v3683_v50, %v10698_v20  ;;  %v4821_v20 = vld [vmem:[#allocation3 + $0x48] sm:$0xff]  ;;  %v4820_v50 = vld [vmem:[#allocation3 + $0x40] sm:$0xff]  ;;  %v2923_v23 = vld [vmem:[%s8723_s24 + $0x70] sm:$0xff] }
 0x326   : > { %v10949_v42 = vpop.f32.mrf.mxu1  ;;  %4948 = vrot.lane.b32.xlu0 %v4816_v56, %s8663_s25  ;;  %14162 = vst [vmem:[#allocation47_spill] sm:$0xff] %v10969_v18  ;;  %v3961_v54 = vadd.f32 %v3960_v45, %v10953_v60  ;;  %v4000_v10 = vmul.f32 %v10969_v18, %v10969_v18  ;;  %v10994_v3 = vadd.f32 %v3689_v35, %v2923_v23 }
 0x327   : > { %v3516_v8 = vpop.f32.mrf.mxu0  ;;  %v4030_v56 = vadd.f32 %v4029_v16, %v3999_v47  ;;  %v10975_v29 = vadd.f32 %v3684_v39, %v2922_v32  ;;  %v4823_v16 = vld [vmem:[#allocation3 + $0x58] sm:$0xff]  ;;  %v3692_v60 = vadd.f32 %v7139_v62, %v10704_v53 }
 0x328   : > { %v3696_v6 = vpop.f32.mrf.mxu1  ;;  %4954 = vrot.lane.b32.xlu1 %v4819_v40, %s8663_s25  ;;  %14164 = vst [vmem:[#allocation12_spill] sm:$0xff] %v10994_v3  ;;  %v3962_v45 = vadd.f32 %v3961_v54, %v10969_v18  ;;  %v4002_v23 = vmul.f32 %v10994_v3, %v10994_v3  ;;  %v4826_v18 = vld [vmem:[#allocation3 + $0x70] sm:$0xff] }
 0x329   : > { %v10960_v28 = vpop.f32.mrf.mxu0  ;;  %14163 = vst [vmem:[#allocation63_spill] sm:$0xff] %v10975_v29  ;;  %v4031_v32 = vadd.f32 %v4030_v56, %v4000_v10  ;;  %v4001_v4 = vmul.f32 %v10975_v29, %v10975_v29  ;;  %v4825_v10 = vld [vmem:[#allocation3 + $0x68] sm:$0xff] }
 0x32a   : > { %v10963_v8 = vpop.f32.mrf.mxu1  ;;  %4952 = vrot.lane.b32.xlu0 %v4818_v1, %s8663_s25  ;;  %v4822_v1 = vld [vmem:[#allocation3 + $0x50] sm:$0xff]  ;;  %v3963_v54 = vadd.f32 %v3962_v45, %v10975_v29 }
 0x32b   : > { %v3521_v14 = vpop.f32.mrf.mxu0  ;;  %v4032_v9 = vadd.f32 %v4031_v32, %v4001_v4  ;;  %v2925_v32 = vld [vmem:[%s8723_s24 + $0x80] sm:$0xff] }
 0x32c   : > { %v3699_v0 = vpop.f32.mrf.mxu1  ;;  %4958 = vrot.lane.b32.xlu1 %v4821_v20, %s8663_s25 }
 0x32d   : > { %v10973_v51 = vpop.f32.mrf.mxu0  ;;  %v4033_v31 = vadd.f32 %v4032_v9, %v4002_v23 }
 0x32e   : > { %v10977_v14 = vpop.f32.mrf.mxu1  ;;  %4956 = vrot.lane.b32.xlu0 %v4820_v50, %s8663_s25  ;;  %v2924_v50 = vld [vmem:[%s8723_s24 + $0x78] sm:$0xff] }
 0x32f   : > { %v3524_v12 = vpop.f32.mrf.mxu0  ;;  %v11009_v62 = vadd.f32 %v3692_v60, %v2924_v50  ;;  %v2926_v50 = vld [vmem:[%s8723_s24 + $0x88] sm:$0xff] }
 0x330   : > { %v10984_v40 = vpop.f32.mrf.mxu1  ;;  %4962 = vrot.lane.b32.xlu1 %v4823_v16, %s8663_s25  ;;  %v3697_v16 = vadd.f32 %v3696_v6, %v10708_v52  ;;  %v3964_v6 = vadd.f32 %v3963_v54, %v10994_v3  ;;  %v3705_v54 = vadd.f32 %v10949_v42, %v10714_v30  ;;  %v3708_v30 = vadd.f32 %v10963_v8, %v10716_v15 }
 0x331   : > { %v10988_v39 = vpop.f32.mrf.mxu0  ;;  %14165 = vst [vmem:[#allocation23_spill] sm:$0xff] %v11009_v62  ;;  %v4003_v52 = vmul.f32 %v11009_v62, %v11009_v62 }
 0x332   : > { %v10992_v12 = vpop.f32.mrf.mxu1  ;;  %4960 = vrot.lane.b32.xlu0 %v4822_v1, %s8663_s25 }
 0x333   : > { %v3529_v47 = vpop.f32.mrf.mxu0  ;;  %v4034_v23 = vadd.f32 %v4033_v31, %v4003_v52  ;;  %v2927_v31 = vld [vmem:[%s8723_s24 + $0x90] sm:$0xff] }
 0x334   : > { %v10998_v20 = vpop.f32.mrf.mxu1  ;;  %4966 = vrot.lane.b32.xlu1 %v4825_v10, %s8663_s25  ;;  %v4827_v47 = vld [vmem:[#allocation3 + $0x78] sm:$0xff]  ;;  %v11027_v10 = vadd.f32 %v3697_v16, %v2925_v32  ;;  %v3965_v16 = vadd.f32 %v3964_v6, %v11009_v62  ;;  %v11055_v42 = vadd.f32 %v3705_v54, %v2927_v31  ;;  %v3713_v54 = vadd.f32 %v10984_v40, %v10720_v19  ;;  %v2929_v31 = vld [vmem:[%s8723_s24 + $0xa0] sm:$0xff]  ;;  %v2930_v40 = vld [vmem:[%s8723_s24 + $0xa8] sm:$0xff] }
 0x335   : > { %v11003_v56 = vpop.f32.mrf.mxu0 }
 0x336   : > { %v11005_v35 = vpop.f32.mrf.mxu1  ;;  %4964 = vrot.lane.b32.xlu0 %v4824_v2, %s8663_s25  ;;  %v4004_v32 = vmul.f32 %v11027_v10, %v11027_v10  ;;  %14168 = vst [vmem:[#allocation66_spill] sm:$0xff] %v11055_v42  ;;  %v3966_v6 = vadd.f32 %v3965_v16, %v11027_v10  ;;  %v4006_v15 = vmul.f32 %v11055_v42, %v11055_v42 }
 0x337   : > { %v3532_v53 = vpop.f32.mrf.mxu0 }
 0x338   : > { %v11013_v1 = vpop.f32.mrf.mxu1  ;;  %v3700_v53 = vadd.f32 %v3699_v0, %v10710_v48  ;;  %4970 = vrot.lane.b32.xlu1 %v4827_v47, %s8663_s25  ;;  %v4829_v48 = vld [vmem:[#allocation3 + $0x88] sm:$0xff]  ;;  %v4828_v0 = vld [vmem:[#allocation3 + $0x80] sm:$0xff]  ;;  %v4831_v47 = vld [vmem:[#allocation3 + $0x98] sm:$0xff] }
 0x339   : > { %v11018_v4 = vpop.f32.mrf.mxu0 }
 0x33a   : > { %v11021_v60 = vpop.f32.mrf.mxu1  ;;  %4968 = vrot.lane.b32.xlu0 %v4826_v18, %s8663_s25 }
 0x33b   : > { %v3537_v45 = vpop.f32.mrf.mxu0 }
 0x33c   : > { %v11029_v2 = vpop.f32.mrf.mxu1  ;;  %v11035_v45 = vadd.f32 %v3700_v53, %v2926_v50  ;;  %4974 = vrot.lane.b32.xlu1 %v4829_v48, %s8663_s25  ;;  %v4830_v53 = vld [vmem:[#allocation3 + $0x90] sm:$0xff]  ;;  %v4035_v50 = vadd.f32 %v4034_v23, %v4004_v32  ;;  %v2928_v48 = vld [vmem:[%s8723_s24 + $0x98] sm:$0xff]  ;;  %v4832_v23 = vld [vmem:[#allocation3 + $0xa0] sm:$0xff] }
 0x33d   : > { %v11033_v9 = vpop.f32.mrf.mxu0 }
 0x33e   : > { %14166 = vst [vmem:[#allocation35_spill] sm:$0xff] %v11035_v45  ;;  %v11037_v29 = vpop.f32.mrf.mxu1  ;;  %4972 = vrot.lane.b32.xlu0 %v4828_v0, %s8663_s25  ;;  %v4833_v0 = vld [vmem:[#allocation3 + $0xa8] sm:$0xff]  ;;  %v3967_v8 = vadd.f32 %v3966_v6, %v11035_v45  ;;  %v2941_v6 = vld [vmem:[%s8723_s24 + $0x100] sm:$0xff] }
 0x33f   : > { %v3540_v59 = vpop.f32.mrf.mxu0 }
 0x340   : > { %v11044_v18 = vpop.f32.mrf.mxu1  ;;  %v4005_v59 = vmul.f32 %v11035_v45, %v11035_v45  ;;  %4978 = vrot.lane.b32.xlu1 %v4831_v47, %s8663_s25  ;;  %v11082_v45 = vadd.f32 %v3713_v54, %v2929_v31  ;;  %v3721_v54 = vadd.f32 %v10977_v14, %v10726_v5  ;;  %v2945_v5 = vld [vmem:[%s8723_s24 + $0x120] sm:$0xff] }
 0x342   : > { %v11051_v52 = vpop.f32.mrf.mxu1  ;;  %4976 = vrot.lane.b32.xlu0 %v4830_v53, %s8663_s25  ;;  %v4036_v32 = vadd.f32 %v4035_v50, %v4005_v59  ;;  %v4835_v53 = vld [vmem:[#allocation3 + $0xb8] sm:$0xff]  ;;  %v4834_v50 = vld [vmem:[#allocation3 + $0xb0] sm:$0xff] }
 0x343   : > { %14167 = vst [vmem:[#allocation50_spill] sm:$0xff] %v11051_v52  ;;  %v11063_v52 = vadd.f32 %v3708_v30, %v2928_v48  ;;  %v3716_v30 = vadd.f32 %v10998_v20, %v10722_v36  ;;  %v2944_v20 = vld [vmem:[%s8723_s24 + $0x118] sm:$0xff] }
 0x344   : > { %v11059_v62 = vpop.f32.mrf.mxu1  ;;  %4982 = vrot.lane.b32.xlu1 %v4833_v0, %s8663_s25  ;;  %v4037_v59 = vadd.f32 %v4036_v32, %v4006_v15  ;;  %v2942_v15 = vld [vmem:[%s8723_s24 + $0x108] sm:$0xff] }
 0x345   : > { %14169 = vst [vmem:[#allocation15_spill] sm:$0xff] %v11063_v52  ;;  %v4007_v19 = vmul.f32 %v11063_v52, %v11063_v52 }
 0x346   : > { %v7158_v3 = vpop.f32.mrf.mxu1  ;;  %4980 = vrot.lane.b32.xlu0 %v4832_v23, %s8663_s25  ;;  %v3968_v23 = vadd.f32 %v3967_v8, %v11055_v42  ;;  %v4836_v8 = vld [vmem:[#allocation3 + $0xc0] sm:$0xff]  ;;  %v2931_v42 = vld [vmem:[%s8723_s24 + $0xb0] sm:$0xff] }
 0x347   : > { %v3769_v0 = vadd.f32 %v7158_v3, %v10832_v33  ;;  %v4837_v3 = vld [vmem:[#allocation3 + $0xc8] sm:$0xff]  ;;  %v4038_v31 = vadd.f32 %v4037_v59, %v4007_v19  ;;  %v2932_v59 = vld [vmem:[%s8723_s24 + $0xb8] sm:$0xff] }
 0x348   : > { %v3760_v16 = vpop.f32.mrf.mxu1  ;;  %4986 = vrot.lane.b32.xlu1 %v4835_v53, %s8663_s25  ;;  %v3724_v53 = vadd.f32 %v10992_v12, %v10728_v61 }
 0x349   : > { %v3761_v47 = vadd.f32 %v3760_v16, %v10820_v43  ;;  %v2943_v43 = vld [vmem:[%s8723_s24 + $0x110] sm:$0xff] }
 0x34a   : > { %v7159_v48 = vpop.f32.mrf.mxu1  ;;  %4984 = vrot.lane.b32.xlu0 %v4834_v50, %s8663_s25 }
 0x34b   : > { %v3772_v32 = vadd.f32 %v7159_v48, %v10836_v38  ;;  %v11089_v36 = vadd.f32 %v3761_v47, %v2941_v6  ;;  %v11095_v38 = vadd.f32 %v3716_v30, %v2930_v40  ;;  %v11100_v47 = vadd.f32 %v3769_v0, %v2943_v43  ;;  %v4839_v40 = vld [vmem:[#allocation3 + $0xd8] sm:$0xff]  ;;  %v4838_v0 = vld [vmem:[#allocation3 + $0xd0] sm:$0xff] }
 0x34c   : > { %v3763_v16 = vpop.f32.mrf.mxu1  ;;  %v4008_v6 = vmul.f32 %v11082_v45, %v11082_v45  ;;  %4990 = vrot.lane.b32.xlu1 %v4837_v3, %s8663_s25 }
 0x34d   : > { %v3764_v33 = vadd.f32 %v3763_v16, %v10824_v27  ;;  %v3969_v27 = vadd.f32 %v3968_v23, %v11063_v52  ;;  %v11107_v16 = vadd.f32 %v3772_v32, %v2944_v20  ;;  %v4094_v61 = vmul.f32 %v11089_v36, %v11089_v36  ;;  %v2947_v52 = vld [vmem:[%s8723_s24 + $0x130] sm:$0xff] }
 0x34e   : > { %v7162_v48 = vpop.f32.mrf.mxu1  ;;  %4988 = vrot.lane.b32.xlu0 %v4836_v8, %s8663_s25  ;;  %v11120_v23 = vadd.f32 %v3721_v54, %v2931_v42  ;;  %v4039_v43 = vadd.f32 %v4038_v31, %v4008_v6  ;;  %v4009_v32 = vmul.f32 %v11095_v38, %v11095_v38  ;;  %v11132_v42 = vadd.f32 %v3724_v53, %v2932_v59  ;;  %v2946_v31 = vld [vmem:[%s8723_s24 + $0x128] sm:$0xff]  ;;  %v4840_v53 = vld [vmem:[#allocation3 + $0xe0] sm:$0xff] }
 0x34f   : > { %v11102_v50 = vadd.f32 %v3764_v33, %v2942_v15  ;;  %v3785_v15 = vadd.f32 %v7162_v48, %v10870_v17  ;;  %v4096_v33 = vmul.f32 %v11100_v47, %v11100_v47  ;;  %v4097_v54 = vmul.f32 %v11107_v16, %v11107_v16 }
 0x350   : > { %v3776_v14 = vpop.f32.mrf.mxu1  ;;  %4994 = vrot.lane.b32.xlu1 %v4839_v40, %s8663_s25  ;;  %v4040_v59 = vadd.f32 %v4039_v43, %v4009_v32  ;;  %v4011_v43 = vmul.f32 %v11132_v42, %v11132_v42 }
 0x351   : > { %v4057_v12 = vadd.f32 %v11102_v50, %v11089_v36  ;;  %v4095_v30 = vmul.f32 %v11102_v50, %v11102_v50  ;;  %v3777_v19 = vadd.f32 %v3776_v14, %v10843_v22  ;;  %v3970_v14 = vadd.f32 %v3969_v27, %v11082_v45 }
 0x352   : > { %v7163_v20 = vpop.f32.mrf.mxu1  ;;  %4992 = vrot.lane.b32.xlu0 %v4838_v0, %s8663_s25 }
 0x353   : > { %v4058_v3 = vadd.f32 %v4057_v12, %v11100_v47  ;;  %v4126_v8 = vadd.f32 %v4095_v30, %v4094_v61  ;;  %v11129_v22 = vadd.f32 %v3777_v19, %v2945_v5  ;;  %v3788_v5 = vadd.f32 %v7163_v20, %v10885_v49  ;;  %v4841_v61 = vld [vmem:[#allocation3 + $0xe8] sm:$0xff]  ;;  %v2948_v19 = vld [vmem:[%s8723_s24 + $0x138] sm:$0xff] }
 0x354   : > { %v3779_v17 = vpop.f32.mrf.mxu1  ;;  %v3729_v12 = vadd.f32 %v11013_v1, %v10737_v11  ;;  %v11144_v30 = vadd.f32 %v3785_v15, %v2947_v52  ;;  %v3971_v11 = vadd.f32 %v3970_v14, %v11095_v38  ;;  %v2933_v1 = vld [vmem:[%s8723_s24 + $0xc0] sm:$0xff]  ;;  %4998 = vrot.lane.b32.xlu1 %v4841_v61, %s8663_s25  ;;  %v4842_v14 = vld [vmem:[#allocation3 + $0xf0] sm:$0xff] }
 0x355   : > { %v4127_v48 = vadd.f32 %v4126_v8, %v4096_v33  ;;  %v4059_v6 = vadd.f32 %v4058_v3, %v11107_v16  ;;  %v3780_v27 = vadd.f32 %v3779_v17, %v10854_v26  ;;  %v4098_v33 = vmul.f32 %v11129_v22, %v11129_v22 }
 0x356   : > { %v7166_v40 = vpop.f32.mrf.mxu1  ;;  %v4010_v26 = vmul.f32 %v11120_v23, %v11120_v23  ;;  %4996 = vrot.lane.b32.xlu0 %v4840_v53, %s8663_s25  ;;  %v11160_v15 = vadd.f32 %v3788_v5, %v2948_v19  ;;  %v11170_v61 = vadd.f32 %v3729_v12, %v2933_v1  ;;  %v2934_v53 = vld [vmem:[%s8723_s24 + $0xc8] sm:$0xff]  ;;  %v4100_v19 = vmul.f32 %v11144_v30, %v11144_v30  ;;  %v2952_v1 = vld [vmem:[%s8723_s24 + $0x158] sm:$0xff] }
 0x357   : > { %v4060_v0 = vadd.f32 %v4059_v6, %v11129_v22  ;;  %v4128_v49 = vadd.f32 %v4127_v48, %v4097_v54  ;;  %v11150_v20 = vadd.f32 %v3780_v27, %v2946_v31  ;;  %v2949_v54 = vld [vmem:[%s8723_s24 + $0x140] sm:$0xff]  ;;  %v4843_v31 = vld [vmem:[#allocation3 + $0xf8] sm:$0xff]  ;;  %v3732_v48 = vadd.f32 %v11029_v2, %v10739_v21 }
 0x358   : > { %v3792_v52 = vpop.f32.mrf.mxu1  ;;  %v4041_v17 = vadd.f32 %v4040_v59, %v4010_v26  ;;  %v3801_v6 = vadd.f32 %v7166_v40, %v10936_v46  ;;  %v3972_v59 = vadd.f32 %v3971_v11, %v11120_v23  ;;  %v2950_v46 = vld [vmem:[%s8723_s24 + $0x148] sm:$0xff]  ;;  %5002 = vrot.lane.b32.xlu1 %v4843_v31, %s8663_s25  ;;  %v4101_v2 = vmul.f32 %v11160_v15, %v11160_v15 }
 0x359   : > { %v4129_v32 = vadd.f32 %v4128_v49, %v4098_v33  ;;  %v4061_v3 = vadd.f32 %v4060_v0, %v11150_v20  ;;  %v4099_v8 = vmul.f32 %v11150_v20, %v11150_v20  ;;  %v3793_v27 = vadd.f32 %v3792_v52, %v10907_v55  ;;  %v2951_v49 = vld [vmem:[%s8723_s24 + $0x150] sm:$0xff]  ;;  %v4845_v52 = vld [vmem:[#allocation3 + $0x108] sm:$0xff] }
 0x35a   : > { %v7167_v5 = vpop.f32.mrf.mxu1  ;;  %5000 = vrot.lane.b32.xlu0 %v4842_v14, %s8663_s25 }
 0x35b   : > { %v4062_v0 = vadd.f32 %v4061_v3, %v11144_v30  ;;  %v4130_v33 = vadd.f32 %v4129_v32, %v4099_v8  ;;  %v11178_v26 = vadd.f32 %v3793_v27, %v2949_v54  ;;  %v3804_v21 = vadd.f32 %v7167_v5, %v10947_v63  ;;  %v4844_v32 = vld [vmem:[#allocation3 + $0x100] sm:$0xff] }
 0x35c   : > { %v3795_v55 = vpop.f32.mrf.mxu1  ;;  %v3737_v63 = vadd.f32 %v11005_v35, %v10747_v57  ;;  %v4042_v3 = vadd.f32 %v4041_v17, %v4011_v43  ;;  %v11191_v8 = vadd.f32 %v3732_v48, %v2934_v53  ;;  %v11193_v54 = vadd.f32 %v3801_v6, %v2951_v49  ;;  %v2953_v43 = vld [vmem:[%s8723_s24 + $0x160] sm:$0xff]  ;;  %5006 = vrot.lane.b32.xlu1 %v4845_v52, %s8663_s25  ;;  %v2935_v48 = vld [vmem:[%s8723_s24 + $0xd0] sm:$0xff]  ;;  %v4847_v49 = vld [vmem:[#allocation3 + $0x118] sm:$0xff] }
 0x35d   : > { %v4131_v12 = vadd.f32 %v4130_v33, %v4100_v19  ;;  %v4063_v40 = vadd.f32 %v4062_v0, %v11160_v15  ;;  %v3796_v11 = vadd.f32 %v3795_v55, %v10925_v44  ;;  %v4102_v27 = vmul.f32 %v11178_v26, %v11178_v26 }
 0x35e   : > { %14170 = vst [vmem:[#allocation26_spill] sm:$0xff] %v11191_v8  ;;  %v7170_v31 = vpop.f32.mrf.mxu1  ;;  %v3973_v44 = vadd.f32 %v3972_v59, %v11132_v42  ;;  %v4012_v57 = vmul.f32 %v11170_v61, %v11170_v61  ;;  %v11203_v35 = vadd.f32 %v3804_v21, %v2952_v1  ;;  %5004 = vrot.lane.b32.xlu0 %v4844_v32, %s8663_s25  ;;  %v4846_v59 = vld [vmem:[#allocation3 + $0x110] sm:$0xff] }
 0x35f   : > { %v4064_v14 = vadd.f32 %v4063_v40, %v11178_v26  ;;  %v4132_v5 = vadd.f32 %v4131_v12, %v4101_v2  ;;  %v11198_v19 = vadd.f32 %v3796_v11, %v2950_v46  ;;  %v3740_v46 = vadd.f32 %v11021_v60, %v10749_v37  ;;  %v2936_v40 = vld [vmem:[%s8723_s24 + $0xd8] sm:$0xff] }
 0x360   : > { %v3808_v17 = vpop.f32.mrf.mxu1  ;;  %v4043_v21 = vadd.f32 %v4042_v3, %v4012_v57  ;;  %v4013_v55 = vmul.f32 %v11191_v8, %v11191_v8  ;;  %v4104_v2 = vmul.f32 %v11193_v54, %v11193_v54  ;;  %v11224_v32 = vadd.f32 %v3737_v63, %v2935_v48  ;;  %v2955_v3 = vld [vmem:[%s8723_s24 + $0x170] sm:$0xff]  ;;  %5010 = vrot.lane.b32.xlu1 %v4847_v49, %s8663_s25  ;;  %v4848_v57 = vld [vmem:[#allocation3 + $0x120] sm:$0xff]  ;;  %v2956_v49 = vld [vmem:[%s8723_s24 + $0x178] sm:$0xff] }
 0x361   : > { %v4133_v6 = vadd.f32 %v4132_v5, %v4102_v27  ;;  %v4065_v53 = vadd.f32 %v4064_v14, %v11198_v19  ;;  %v4103_v0 = vmul.f32 %v11198_v19, %v11198_v19  ;;  %v3809_v33 = vadd.f32 %v3808_v17, %v10960_v28 }
 0x362   : > { %v7171_v12 = vpop.f32.mrf.mxu1  ;;  %v3817_v28 = vadd.f32 %v7170_v31, %v10988_v39  ;;  %14171 = vst [vmem:[#allocation38_spill] sm:$0xff] %v11224_v32  ;;  %5008 = vrot.lane.b32.xlu0 %v4846_v59, %s8663_s25  ;;  %v3974_v60 = vadd.f32 %v3973_v44, %v11170_v61  ;;  %v4105_v14 = vmul.f32 %v11203_v35, %v11203_v35  ;;  %v2954_v39 = vld [vmem:[%s8723_s24 + $0x168] sm:$0xff] }
 0x363   : > { %v4066_v1 = vadd.f32 %v4065_v53, %v11193_v54  ;;  %v4134_v11 = vadd.f32 %v4133_v6, %v4103_v0  ;;  %v11222_v52 = vadd.f32 %v3809_v33, %v2953_v43  ;;  %v4849_v31 = vld [vmem:[#allocation3 + $0x128] sm:$0xff]  ;;  %v11234_v63 = vadd.f32 %v3740_v46, %v2936_v40  ;;  %v4851_v40 = vld [vmem:[#allocation3 + $0x138] sm:$0xff] }
 0x364   : > { %v3811_v37 = vpop.f32.mrf.mxu1  ;;  %v4044_v43 = vadd.f32 %v4043_v21, %v4013_v55  ;;  %v3820_v17 = vadd.f32 %v7171_v12, %v11003_v56  ;;  %v11238_v44 = vadd.f32 %v3817_v28, %v2955_v3  ;;  %v4014_v59 = vmul.f32 %v11224_v32, %v11224_v32  ;;  %5014 = vrot.lane.b32.xlu1 %v4849_v31, %s8663_s25  ;;  %v2937_v28 = vld [vmem:[%s8723_s24 + $0xe0] sm:$0xff] }
 0x365   : > { %v4135_v27 = vadd.f32 %v4134_v11, %v4104_v2  ;;  %v4067_v5 = vadd.f32 %v4066_v1, %v11203_v35  ;;  %14172 = vst [vmem:[#allocation49_spill] sm:$0xff] %v11234_v63  ;;  %v3812_v48 = vadd.f32 %v3811_v37, %v10973_v51  ;;  %v4106_v0 = vmul.f32 %v11222_v52, %v11222_v52  ;;  %v2957_v2 = vld [vmem:[%s8723_s24 + $0x180] sm:$0xff]  ;;  %v4850_v1 = vld [vmem:[#allocation3 + $0x130] sm:$0xff] }
 0x366   : > { %v7174_v6 = vpop.f32.mrf.mxu1  ;;  %5012 = vrot.lane.b32.xlu0 %v4848_v57, %s8663_s25  ;;  %v3975_v51 = vadd.f32 %v3974_v60, %v11191_v8  ;;  %v3745_v46 = vadd.f32 %v11044_v18, %v10757_v24  ;;  %v4015_v11 = vmul.f32 %v11234_v63, %v11234_v63  ;;  %v11258_v3 = vadd.f32 %v3820_v17, %v2956_v49  ;;  %v2959_v57 = vld [vmem:[%s8723_s24 + $0x190] sm:$0xff] }
 0x367   : > { %v4068_v53 = vadd.f32 %v4067_v5, %v11222_v52  ;;  %v4136_v33 = vadd.f32 %v4135_v27, %v4105_v14  ;;  %v11246_v21 = vadd.f32 %v3812_v48, %v2954_v39  ;;  %v4045_v18 = vadd.f32 %v4044_v43, %v4014_v59  ;;  %v2938_v14 = vld [vmem:[%s8723_s24 + $0xe8] sm:$0xff] }
 0x368   : > { %v3824_v56 = vpop.f32.mrf.mxu1  ;;  %v4108_v27 = vmul.f32 %v11238_v44, %v11238_v44  ;;  %v3833_v5 = vadd.f32 %v7174_v6, %v10774_v58  ;;  %v2958_v48 = vld [vmem:[%s8723_s24 + $0x188] sm:$0xff]  ;;  %5018 = vrot.lane.b32.xlu1 %v4851_v40, %s8663_s25  ;;  %v11279_v58 = vadd.f32 %v3745_v46, %v2937_v28 }
 0x369   : > { %v4137_v55 = vadd.f32 %v4136_v33, %v4106_v0  ;;  %v3825_v12 = vadd.f32 %v3824_v56, %v11018_v4  ;;  %v4069_v37 = vadd.f32 %v4068_v53, %v11246_v21  ;;  %v4107_v60 = vmul.f32 %v11246_v21, %v11246_v21  ;;  %v4853_v6 = vld [vmem:[#allocation3 + $0x148] sm:$0xff]  ;;  %v4852_v0 = vld [vmem:[#allocation3 + $0x140] sm:$0xff] }
 0x36a   : > { %v7175_v24 = vpop.f32.mrf.mxu1  ;;  %v3748_v4 = vadd.f32 %v11059_v62, %v10759_v34  ;;  %5016 = vrot.lane.b32.xlu0 %v4850_v1, %s8663_s25  ;;  %v3976_v34 = vadd.f32 %v3975_v51, %v11224_v32  ;;  %v3753_v62 = vadd.f32 %v11037_v29, %v10766_v7  ;;  %14173 = vst [vmem:[#allocation65_spill] sm:$0xff] %v11279_v58  ;;  %v2939_v51 = vld [vmem:[%s8723_s24 + $0xf0] sm:$0xff]  ;;  %v2960_v29 = vld [vmem:[%s8723_s24 + $0x198] sm:$0xff] }
 0x36b   : > { %v4070_v39 = vadd.f32 %v4069_v37, %v11238_v44  ;;  %v4138_v31 = vadd.f32 %v4137_v55, %v4107_v60  ;;  %v11271_v17 = vadd.f32 %v3825_v12, %v2957_v2  ;;  %v4109_v33 = vmul.f32 %v11258_v3, %v11258_v3  ;;  %v2961_v60 = vld [vmem:[%s8723_s24 + $0x1a0] sm:$0xff] }
 0x36c   : > { %v3827_v53 = vpop.f32.mrf.mxu1  ;;  %v3836_v56 = vadd.f32 %v7175_v24, %v10776_v41  ;;  %v4046_v2 = vadd.f32 %v4045_v18, %v4015_v11  ;;  %v11287_v12 = vadd.f32 %v3748_v4, %v2938_v14  ;;  %v11289_v7 = vadd.f32 %v3833_v5, %v2959_v57  ;;  %5022 = vrot.lane.b32.xlu1 %v4853_v6, %s8663_s25  ;;  %v4855_v18 = vld [vmem:[#allocation3 + $0x158] sm:$0xff]  ;;  %v4854_v14 = vld [vmem:[#allocation3 + $0x150] sm:$0xff] }
 0x36d   : > { %v3828_v43 = vadd.f32 %v3827_v53, %v11033_v9  ;;  %v4139_v49 = vadd.f32 %v4138_v31, %v4108_v27  ;;  %v4071_v59 = vadd.f32 %v4070_v39, %v11258_v3  ;;  %v4110_v40 = vmul.f32 %v11271_v17, %v11271_v17 }
 0x36e   : > { %v7178_v55 = vpop.f32.mrf.mxu1  ;;  %14174 = vst [vmem:[#allocation14_spill] sm:$0xff] %v11287_v12  ;;  %5020 = vrot.lane.b32.xlu0 %v4852_v0, %s8663_s25  ;;  %v3977_v41 = vadd.f32 %v3976_v34, %v11234_v63  ;;  %v4016_v11 = vmul.f32 %v11279_v58, %v11279_v58  ;;  %v11306_v4 = vadd.f32 %v3753_v62, %v2939_v51  ;;  %v2962_v0 = vld [vmem:[%s8723_s24 + $0x1a8] sm:$0xff] }
 0x36f   : > { %v11292_v9 = vadd.f32 %v3828_v43, %v2958_v48  ;;  %v4072_v46 = vadd.f32 %v4071_v59, %v11271_v17  ;;  %v4140_v1 = vadd.f32 %v4139_v49, %v4109_v33  ;;  %v11308_v5 = vadd.f32 %v3836_v56, %v2960_v29  ;;  %v2963_v43 = vld [vmem:[%s8723_s24 + $0x1b0] sm:$0xff]  ;;  %v14176_v59 = vld [vmem:[#allocation32_spill] sm:$0xff]  ;;  %v14177_v56 = vld [vmem:[#allocation50_spill] sm:$0xff] }
 0x370   : > { %v3840_v28 = vpop.f32.mrf.mxu1  ;;  %14175 = vst [vmem:[#allocation25_spill] sm:$0xff] %v11306_v4  ;;  %v4047_v57 = vadd.f32 %v4046_v2, %v4016_v11  ;;  %v4017_v48 = vmul.f32 %v11287_v12, %v11287_v12  ;;  %v4112_v53 = vmul.f32 %v11289_v7, %v11289_v7  ;;  %5026 = vrot.lane.b32.xlu1 %v4855_v18, %s8663_s25  ;;  %v14178_v2 = vld [vmem:[#allocation43_spill] sm:$0xff]  ;;  %v14179_v11 = vld [vmem:[#allocation58_spill] sm:$0xff] }
 0x371   : > { %v4111_v37 = vmul.f32 %v11292_v9, %v11292_v9  ;;  %v3841_v24 = vadd.f32 %v3840_v28, %v10778_v25  ;;  %v4141_v27 = vadd.f32 %v4140_v1, %v4110_v40  ;;  %v4073_v39 = vadd.f32 %v4072_v46, %v11292_v9  ;;  %v4856_v29 = vld [vmem:[#allocation3 + $0x160] sm:$0xff]  ;;  %v2940_v46 = vld [vmem:[%s8723_s24 + $0xf8] sm:$0xff] }
 0x372   : > { %v7179_v31 = vpop.f32.mrf.mxu1  ;;  %v3849_v25 = vadd.f32 %v7178_v55, %v10792_v13  ;;  %5024 = vrot.lane.b32.xlu0 %v4854_v14, %s8663_s25  ;;  %v3978_v49 = vadd.f32 %v3977_v41, %v11279_v58  ;;  %v3756_v51 = vadd.f32 %v14177_v56, %v14176_v59  ;;  %v4857_v55 = vld [vmem:[#allocation3 + $0x168] sm:$0xff]  ;;  %v4113_v40 = vmul.f32 %v11308_v5, %v11308_v5  ;;  %v2964_v14 = vld [vmem:[%s8723_s24 + $0x1b8] sm:$0xff]  ;;  %v4858_v59 = vld [vmem:[#allocation3 + $0x170] sm:$0xff] }
 0x373   : > { %v4074_v34 = vadd.f32 %v4073_v39, %v11289_v7  ;;  %v4142_v62 = vadd.f32 %v4141_v27, %v4111_v37  ;;  %v11318_v6 = vadd.f32 %v3841_v24, %v2961_v60  ;;  %v3852_v37 = vadd.f32 %v7179_v31, %v14179_v11  ;;  %v2972_v58 = vld [vmem:[%s8723_s24 + $0x1f8] sm:$0xff] }
 0x374   : > { %v3843_v33 = vpop.f32.mrf.mxu1  ;;  %v4018_v41 = vmul.f32 %v11306_v4, %v11306_v4  ;;  %v4048_v24 = vadd.f32 %v4047_v57, %v4017_v48  ;;  %v11334_v18 = vadd.f32 %v3849_v25, %v2963_v43  ;;  %5030 = vrot.lane.b32.xlu1 %v4857_v55, %s8663_s25  ;;  %v11344_v31 = vadd.f32 %v3756_v51, %v2940_v46  ;;  %v2965_v25 = vld [vmem:[%s8723_s24 + $0x1c0] sm:$0xff]  ;;  %v14181_v43 = vld [vmem:[#allocation8_spill] sm:$0xff] }
 0x375   : > { %v3844_v13 = vadd.f32 %v3843_v33, %v14178_v2  ;;  %v4143_v1 = vadd.f32 %v4142_v62, %v4112_v53  ;;  %v4075_v28 = vadd.f32 %v4074_v34, %v11308_v5  ;;  %v4114_v53 = vmul.f32 %v11318_v6, %v11318_v6  ;;  %v4859_v33 = vld [vmem:[#allocation3 + $0x178] sm:$0xff] }
 0x376   : > { %v7182_v60 = vpop.f32.mrf.mxu1  ;;  %5028 = vrot.lane.b32.xlu0 %v4856_v29, %s8663_s25  ;;  %14180 = vst [vmem:[#allocation37_spill] sm:$0xff] %v11344_v31  ;;  %v3979_v57 = vadd.f32 %v3978_v49, %v11287_v12  ;;  %v11351_v2 = vadd.f32 %v3852_v37, %v2964_v14  ;;  %v4049_v51 = vadd.f32 %v4048_v24, %v4018_v41  ;;  %v14182_v49 = vld [vmem:[#allocation31_spill] sm:$0xff]  ;;  %v4861_v14 = vld [vmem:[#allocation3 + $0x188] sm:$0xff] }
 0x377   : > { %v11337_v27 = vadd.f32 %v3844_v13, %v2962_v0  ;;  %v4076_v39 = vadd.f32 %v4075_v28, %v11318_v6  ;;  %v4144_v62 = vadd.f32 %v4143_v1, %v4113_v40  ;;  %v4116_v29 = vmul.f32 %v11334_v18, %v11334_v18  ;;  %v2967_v28 = vld [vmem:[%s8723_s24 + $0x1d0] sm:$0xff]  ;;  %v14183_v24 = vld [vmem:[#allocation19_spill] sm:$0xff] }
 0x378   : > { %v3856_v34 = vpop.f32.mrf.mxu1  ;;  %v3865_v46 = vadd.f32 %v7182_v60, %v14182_v49  ;;  %5034 = vrot.lane.b32.xlu1 %v4859_v33, %s8663_s25  ;;  %v4019_v37 = vmul.f32 %v11344_v31, %v11344_v31  ;;  %v3980_v41 = vadd.f32 %v3979_v57, %v11306_v4  ;;  %v4864_v12 = vld [vmem:[#allocation3 + $0x1a0] sm:$0xff] }
 0x379   : > { %v4115_v48 = vmul.f32 %v11337_v27, %v11337_v27  ;;  %v3857_v0 = vadd.f32 %v3856_v34, %v14181_v43  ;;  %v4145_v56 = vadd.f32 %v4144_v62, %v4114_v53  ;;  %v4077_v13 = vadd.f32 %v4076_v39, %v11337_v27  ;;  %v2966_v34 = vld [vmem:[%s8723_s24 + $0x1c8] sm:$0xff]  ;;  %v4860_v39 = vld [vmem:[#allocation3 + $0x180] sm:$0xff]  ;;  %v14184_v43 = vld [vmem:[#allocation46_spill] sm:$0xff] }
 0x37a   : > { %v7183_v55 = vpop.f32.mrf.mxu1  ;;  %5032 = vrot.lane.b32.xlu0 %v4858_v59, %s8663_s25  ;;  %v4117_v62 = vmul.f32 %v11351_v2, %v11351_v2  ;;  %v4050_v59 = vadd.f32 %v4049_v51, %v4019_v37 }
 0x37b   : > { %v4078_v40 = vadd.f32 %v4077_v13, %v11334_v18  ;;  %v4146_v1 = vadd.f32 %v4145_v56, %v4115_v48  ;;  %v11359_v11 = vadd.f32 %v3857_v0, %v2965_v25  ;;  %v3868_v0 = vadd.f32 %v7183_v55, %v14184_v43  ;;  %v2968_v13 = vld [vmem:[%s8723_s24 + $0x1d8] sm:$0xff] }
 0x37c   : > { %v3859_v53 = vpop.f32.mrf.mxu1  ;;  %v11372_v56 = vadd.f32 %v3865_v46, %v2967_v28  ;;  %5038 = vrot.lane.b32.xlu1 %v4861_v14, %s8663_s25  ;;  %v3981_v55 = vadd.f32 %v3980_v41, %v11344_v31  ;;  %v14185_v46 = vld [vmem:[#allocation62_spill] sm:$0xff]  ;;  %v4862_v28 = vld [vmem:[#allocation3 + $0x190] sm:$0xff]  ;;  %v14186_v41 = vld [vmem:[#allocation11_spill] sm:$0xff] }
 0x37d   : > { %v3860_v60 = vadd.f32 %v3859_v53, %v14183_v24  ;;  %v4147_v48 = vadd.f32 %v4146_v1, %v4116_v29  ;;  %v4079_v25 = vadd.f32 %v4078_v40, %v11351_v2  ;;  %v4118_v53 = vmul.f32 %v11359_v11, %v11359_v11  ;;  %v2969_v29 = vld [vmem:[%s8723_s24 + $0x1e0] sm:$0xff]  ;;  %v4863_v1 = vld [vmem:[#allocation3 + $0x198] sm:$0xff]  ;;  %v2971_v31 = vld [vmem:[%s8723_s24 + $0x1f0] sm:$0xff] }
 0x37e   : > { %v7186_v33 = vpop.f32.mrf.mxu1  ;;  %5036 = vrot.lane.b32.xlu0 %v4860_v39, %s8663_s25  ;;  %v11387_v37 = vadd.f32 %v3868_v0, %v2968_v13  ;;  %v4120_v39 = vmul.f32 %v11372_v56, %v11372_v56  ;;  %v3982_v0 = vrot.slane %v3981_v55, 4  ;;  %v14187_v13 = vld [vmem:[#allocation57_spill] sm:$0xff] }
 0x37f   : > { %v11375_v49 = vadd.f32 %v3860_v60, %v2966_v34  ;;  %v4080_v57 = vadd.f32 %v4079_v25, %v11359_v11  ;;  %v4148_v24 = vadd.f32 %v4147_v48, %v4117_v62  ;;  %v4051_v62 = vrot.slane %v4050_v59, 4 }
 0x380   : > { %v3872_v4 = vpop.f32.mrf.mxu1  ;;  %v3881_v48 = vadd.f32 %v7186_v33, %v14186_v41  ;;  %5042 = vrot.lane.b32.xlu1 %v4863_v1, %s8663_s25  ;;  %v4121_v33 = vmul.f32 %v11387_v37, %v11387_v37 }
 0x381   : > { %v4119_v51 = vmul.f32 %v11375_v49, %v11375_v49  ;;  %v3873_v40 = vadd.f32 %v3872_v4, %v14185_v46  ;;  %v4149_v34 = vadd.f32 %v4148_v24, %v4118_v53  ;;  %v4081_v60 = vadd.f32 %v4080_v57, %v11375_v49  ;;  %v2970_v46 = vld [vmem:[%s8723_s24 + $0x1e8] sm:$0xff] }
 0x382   : > { %v7187_v14 = vpop.f32.mrf.mxu1  ;;  %5040 = vrot.lane.b32.xlu0 %v4862_v28, %s8663_s25  ;;  %v4865_v24 = vld [vmem:[#allocation3 + $0x1a8] sm:$0xff]  ;;  %v11405_v41 = vadd.f32 %v3881_v48, %v2971_v31  ;;  %v4866_v31 = vld [vmem:[#allocation3 + $0x1b0] sm:$0xff] }
 0x383   : > { %v4082_v25 = vadd.f32 %v4081_v60, %v11372_v56  ;;  %v4150_v43 = vadd.f32 %v4149_v34, %v4119_v51  ;;  %v11395_v4 = vadd.f32 %v3873_v40, %v2969_v29  ;;  %v14188_v34 = vld [vmem:[#allocation22_spill] sm:$0xff]  ;;  %v4052_v40 = vadd.f32 %v4051_v62, %v4050_v59 }
 0x384   : > { %v3875_v53 = vpop.f32.mrf.mxu1  ;;  %v3884_v29 = vadd.f32 %v7187_v14, %v14188_v34  ;;  %5046 = vrot.lane.b32.xlu1 %v4865_v24, %s8663_s25  ;;  %v4867_v59 = vld [vmem:[#allocation3 + $0x1b8] sm:$0xff] }
 0x385   : > { %v3876_v57 = vadd.f32 %v3875_v53, %v14187_v13  ;;  %v4151_v60 = vadd.f32 %v4150_v43, %v4120_v39  ;;  %v4083_v51 = vadd.f32 %v4082_v25, %v11387_v37  ;;  %v4122_v53 = vmul.f32 %v11395_v4, %v11395_v4 }
 0x386   : > { %5044 = vrot.lane.b32.xlu0 %v4864_v12, %s8663_s25  ;;  %v3983_v39 = vadd.f32 %v3982_v0, %v3981_v55  ;;  %v11417_v48 = vadd.f32 %v3884_v29, %v2972_v58  ;;  %v4053_v43 = vrot.slane %v4052_v40, 2  ;;  %v4869_v55 = vld [vmem:[#allocation3 + $0x1c8] sm:$0xff]  ;;  %v4868_v0 = vld [vmem:[#allocation3 + $0x1c0] sm:$0xff] }
 0x387   : > { %v11408_v1 = vadd.f32 %v3876_v57, %v2970_v46  ;;  %v4084_v28 = vadd.f32 %v4083_v51, %v11395_v4  ;;  %v4152_v13 = vadd.f32 %v4151_v60, %v4121_v33  ;;  %v4124_v46 = vmul.f32 %v11405_v41, %v11405_v41 }
 0x388   : > { %5050 = vrot.lane.b32.xlu1 %v4867_v59, %s8663_s25  ;;  %v3984_v12 = vrot.slane %v3983_v39, 2  ;;  %v4125_v58 = vmul.f32 %v11417_v48, %v11417_v48  ;;  %v4054_v51 = vadd.f32 %v4053_v43, %v4052_v40  ;;  %v4873_v40 = vld [vmem:[#allocation3 + $0x1e8] sm:$0xff]  ;;  %v4872_v43 = vld [vmem:[#allocation3 + $0x1e0] sm:$0xff] }
 0x389   : > { %v4123_v14 = vmul.f32 %v11408_v1, %v11408_v1  ;;  %v4153_v62 = vadd.f32 %v4152_v13, %v4122_v53  ;;  %v4085_v25 = vadd.f32 %v4084_v28, %v11408_v1  ;;  %v4871_v53 = vld [vmem:[#allocation3 + $0x1d8] sm:$0xff]  ;;  %v4870_v13 = vld [vmem:[#allocation3 + $0x1d0] sm:$0xff] }
 0x38a   : > { %5048 = vrot.lane.b32.xlu0 %v4866_v31, %s8663_s25  ;;  %v3985_v28 = vadd.f32 %v3984_v12, %v3983_v39  ;;  %v4055_v31 = vrot.slane %v4054_v51, 1  ;;  %v4875_v12 = vld [vmem:[#allocation3 + $0x1f8] sm:$0xff] }
 0x38b   : > { %v4086_v57 = vadd.f32 %v4085_v25, %v11405_v41  ;;  %v4154_v24 = vadd.f32 %v4153_v62, %v4123_v14 }
 0x38c   : > { %5054 = vrot.lane.b32.xlu1 %v4869_v55, %s8663_s25  ;;  %v4056_v55 = vadd.f32 %v4055_v31, %v4054_v51 }
 0x38d   : > { %v4087_v33 = vadd.f32 %v4086_v57, %v11417_v48  ;;  %v4155_v60 = vadd.f32 %v4154_v24, %v4124_v46  ;;  %v3986_v46 = vrot.slane %v3985_v28, 1 }
 0x38e   : > { %5052 = vrot.lane.b32.xlu0 %v4868_v0, %s8663_s25 }
 0x38f   : > { %v4088_v34 = vrot.slane %v4087_v33, 4  ;;  %v4156_v29 = vadd.f32 %v4155_v60, %v4125_v58  ;;  %v3987_v39 = vadd.f32 %v3986_v46, %v3985_v28 }
 0x390   : > { %5058 = vrot.lane.b32.xlu1 %v4871_v53, %s8663_s25 }
 0x391   : > { %v4089_v14 = vadd.f32 %v4088_v34, %v4087_v33  ;;  %v4157_v59 = vrot.slane %v4156_v29, 4  ;;  %v4874_v33 = vld [vmem:[#allocation3 + $0x1f0] sm:$0xff] }
 0x392   : > { %5056 = vrot.lane.b32.xlu0 %v4870_v13, %s8663_s25 }
 0x393   : > { %v4090_v62 = vrot.slane %v4089_v14, 2  ;;  %v4158_v25 = vadd.f32 %v4157_v59, %v4156_v29  ;;  %v4164_v29 = vsel %vm4163_vm6, %v3987_v39, %v4056_v55  ;;  %v11458_v39 = vld [vmem:[%s13769_s3] ss:$0 sm:$0xff] }
 0x394   : > { %5062 = vrot.lane.b32.xlu1 %v4873_v40, %s8663_s25 }
 0x395   : > { %v4091_v57 = vadd.f32 %v4090_v62, %v4089_v14  ;;  %v4159_v24 = vrot.slane %v4158_v25, 2  ;;  %v4262_v14 = vlaneseq }
 0x396   : > { %5060 = vrot.lane.b32.xlu0 %v4872_v43, %s8663_s25 }
 0x397   : > { %v4092_v58 = vrot.slane %v4091_v57, 1  ;;  %v4160_v0 = vadd.f32 %v4159_v24, %v4158_v25  ;;  %v11436_v59 = vshrl.u32 %v4262_v14, 7 }
 0x398   : > { %5066 = vrot.lane.b32.xlu1 %v4875_v12, %s8663_s25 }
 0x399   : > { %v4093_v60 = vadd.f32 %v4092_v58, %v4091_v57  ;;  %v4161_v34 = vrot.slane %v4160_v0, 1  ;;  %v4338_v28 = vsub.s32 2, %v11436_v59  ;;  %v4374_v24 = vsub.s32 3, %v11436_v59 }
 0x39a   : > { %5064 = vrot.lane.b32.xlu0 %v4874_v33, %s8663_s25 }
 0x39b   : > { %v4162_v53 = vadd.f32 %v4161_v34, %v4160_v0  ;;  %v4166_v13 = vsel %vm4165_vm7, %v4164_v29, %v4093_v60  ;;  %v11466_v60 = vld [vmem:[%s13769_s3 + $0x1] ss:$0 sm:$0xff] }
 0x39d   : > { %v4168_v51 = vsel %vm4167_vm8, %v4166_v13, %v4162_v53 }
 0x39e   : > { %7221 = vmatmul.mubr.msk.f32.vlgmr.msra.gmra.mxu1 %vm4169_vm9, %v4168_v51 }
 0x45e   : > { %v11439_v31 = vpop.f32.mrf.mxu1 }
 0x45f   : > { %v4257_v62 = vmul.f32 %v11439_v31, %v11439_v31  ;;  %v11444_v25 = vrot.slane %v11439_v31, %v4338_v28 }
 0x460   : > { %v7222_v46 = vpop.f32.mrf.mxu1 }
 0x461   : > { %v4259_v40 = vrot.slane %v4257_v62, 7  ;;  %v4347_v0 = vsub.f32 %v11160_v15, %v11444_v25  ;;  %v4340_v12 = vsub.f32 %v11089_v36, %v11444_v25  ;;  %v4341_v34 = vsub.f32 %v11102_v50, %v11444_v25 }
 0x462   : > { %v4342_v15 = vsub.f32 %v11100_v47, %v11444_v25  ;;  %v4343_v29 = vsub.f32 %v11107_v16, %v11444_v25  ;;  %v4344_v53 = vsub.f32 %v11129_v22, %v11444_v25  ;;  %v4345_v36 = vsub.f32 %v11150_v20, %v11444_v25  ;;  %v11486_v47 = vld [vmem:[%s13769_s3 + $0x2] ss:$0 sm:$0xff] }
 0x463   : > { %v4261_v43 = vsub.f32 %v11439_v31, %v4259_v40  ;;  %v4346_v13 = vsub.f32 %v11144_v30, %v11444_v25  ;;  %v4348_v51 = vsub.f32 %v11178_v26, %v11444_v25  ;;  %v4349_v16 = vsub.f32 %v11198_v19, %v11444_v25  ;;  %v11536_v40 = vpop.permute.xlu0 %4940 }
 0x464   : > { %v4350_v22 = vsub.f32 %v11193_v54, %v11444_v25  ;;  %v4351_v20 = vsub.f32 %v11203_v35, %v11444_v25  ;;  %v4352_v30 = vsub.f32 %v11222_v52, %v11444_v25  ;;  %v4353_v26 = vsub.f32 %v11246_v21, %v11444_v25  ;;  %14190 = vst [vmem:[#allocation68_spill] sm:$0xff] %v11536_v40 }
 0x465   : > { %v4298_v57 = vadd.f32 1e-05, %v4261_v43  ;;  %v4354_v14 = vsub.f32 %v11238_v44, %v11444_v25  ;;  %v4355_v28 = vsub.f32 %v11258_v3, %v11444_v25  ;;  %v4356_v54 = vsub.f32 %v11271_v17, %v11444_v25  ;;  %v11543_v43 = vpop.permute.xlu1 %4942 }
 0x466   : > { %v4357_v35 = vsub.f32 %v11292_v9, %v11444_v25  ;;  %v4358_v52 = vsub.f32 %v11289_v7, %v11444_v25  ;;  %v4359_v21 = vsub.f32 %v11308_v5, %v11444_v25  ;;  %v4360_v44 = vsub.f32 %v11318_v6, %v11444_v25  ;;  %14191 = vst [vmem:[#allocation17_spill] sm:$0xff] %v11543_v43 }
 0x467   : > { %8273 = vrsqrt.f32 %v4298_v57  ;;  %v4361_v3 = vsub.f32 %v11337_v27, %v11444_v25  ;;  %v4362_v62 = vsub.f32 %v11334_v18, %v11444_v25  ;;  %v4363_v9 = vsub.f32 %v11351_v2, %v11444_v25 }
 0x468   : > { %v4364_v7 = vsub.f32 %v11359_v11, %v11444_v25  ;;  %v4365_v5 = vsub.f32 %v11375_v49, %v11444_v25  ;;  %v4366_v6 = vsub.f32 %v11372_v56, %v11444_v25  ;;  %v4367_v27 = vsub.f32 %v11387_v37, %v11444_v25 }
 0x469   : > { %v4368_v18 = vsub.f32 %v11395_v4, %v11444_v25  ;;  %v4369_v46 = vsub.f32 %v11408_v1, %v11444_v25  ;;  %v4370_v2 = vsub.f32 %v11405_v41, %v11444_v25  ;;  %v4371_v11 = vsub.f32 %v11417_v48, %v11444_v25 }
 0x474   : > { %v11448_v55 = vpop.eup %8273 }
 0x475   : > { %v11451_v58 = vrot.slane %v11448_v55, %v4374_v24 }
 0x477   : > { %v4383_v33 = vmul.f32 %v11451_v58, %v4347_v0  ;;  %v4376_v49 = vmul.f32 %v11451_v58, %v4340_v12  ;;  %v4377_v56 = vmul.f32 %v11451_v58, %v4341_v34  ;;  %v4378_v37 = vmul.f32 %v11451_v58, %v4342_v15 }
 0x478   : > { %v4379_v4 = vmul.f32 %v11451_v58, %v4343_v29  ;;  %v4380_v1 = vmul.f32 %v11451_v58, %v4344_v53  ;;  %v4381_v57 = vmul.f32 %v11451_v58, %v4345_v36  ;;  %v4382_v41 = vmul.f32 %v11451_v58, %v4346_v13 }
 0x479   : > { %v4451_v50 = vmul.f32 %v11458_v39, %v4383_v33  ;;  %v4384_v24 = vmul.f32 %v11451_v58, %v4348_v51  ;;  %v4385_v48 = vmul.f32 %v11451_v58, %v4349_v16  ;;  %v4386_v25 = vmul.f32 %v11451_v58, %v4350_v22 }
 0x47a   : > { %v4387_v0 = vmul.f32 %v11451_v58, %v4351_v20  ;;  %v4388_v12 = vmul.f32 %v11451_v58, %v4352_v30  ;;  %v4389_v33 = vmul.f32 %v11451_v58, %v4353_v26  ;;  %v4390_v34 = vmul.f32 %v11451_v58, %v4354_v14  ;;  %v11565_v20 = vpop.permute.xlu0 %4944 }
 0x47b   : > { %v4519_v19 = vadd.f32 %v11466_v60, %v4451_v50  ;;  %v4391_v15 = vmul.f32 %v11451_v58, %v4355_v28  ;;  %v4392_v29 = vmul.f32 %v11451_v58, %v4356_v54  ;;  %v4393_v53 = vmul.f32 %v11451_v58, %v4357_v35  ;;  %14192 = vst [vmem:[#allocation28_spill] sm:$0xff] %v11565_v20 }
 0x47c   : > { %v4394_v36 = vmul.f32 %v11451_v58, %v4358_v52  ;;  %v4395_v13 = vmul.f32 %v11451_v58, %v4359_v21  ;;  %v4396_v51 = vmul.f32 %v11451_v58, %v4360_v44  ;;  %v4397_v50 = vmul.f32 %v11451_v58, %v4361_v3 }
 0x47d   : > { %v11518_v17 = vmul.f32 %v11486_v47, %v4519_v19  ;;  %v4398_v16 = vmul.f32 %v11451_v58, %v4362_v62  ;;  %v4399_v22 = vmul.f32 %v11451_v58, %v4363_v9  ;;  %v4400_v30 = vmul.f32 %v11451_v58, %v4364_v7  ;;  %v11571_v19 = vpop.permute.xlu1 %4946 }
 0x47e   : > { %v4401_v26 = vmul.f32 %v11451_v58, %v4365_v5  ;;  %v4402_v14 = vmul.f32 %v11451_v58, %v4366_v6  ;;  %v4403_v28 = vmul.f32 %v11451_v58, %v4367_v27  ;;  %14193 = vst [vmem:[#allocation40_spill] sm:$0xff] %v11571_v19  ;;  %v4404_v54 = vmul.f32 %v11451_v58, %v4368_v18  ;;  %v11579_v62 = vpop.permute.xlu0 %4948 }
 0x47f   : > { %14189 = vst [vmem:[#allocation52_spill] sm:$0xff] %v11518_v17  ;;  %v4405_v35 = vmul.f32 %v11451_v58, %v4369_v46  ;;  %v4406_v52 = vmul.f32 %v11451_v58, %v4370_v2  ;;  %v4407_v21 = vmul.f32 %v11451_v58, %v4371_v11  ;;  %v4450_v44 = vmul.f32 %v11458_v39, %v4382_v41 }
 0x480   : > { %14194 = vst [vmem:[#allocation51_spill] sm:$0xff] %v11579_v62  ;;  %v4264_v5 = vsub.s32 0, %v11436_v59  ;;  %v4302_v27 = vsub.s32 1, %v11436_v59  ;;  %v4444_v58 = vmul.f32 %v11458_v39, %v4376_v49  ;;  %v4445_v46 = vmul.f32 %v11458_v39, %v4377_v56  ;;  %v14208_v62 = vld [vmem:[#allocation33_spill] sm:$0xff] }
 0x481   : > { %v4518_v3 = vadd.f32 %v11466_v60, %v4450_v44  ;;  %v11584_v7 = vpop.permute.xlu1 %4950  ;;  %v4446_v2 = vmul.f32 %v11458_v39, %v4378_v37  ;;  %v4447_v11 = vmul.f32 %v11458_v39, %v4379_v4  ;;  %v4448_v41 = vmul.f32 %v11458_v39, %v4380_v1 }
 0x482   : > { %14196 = vst [vmem:[#allocation16_spill] sm:$0xff] %v11584_v7  ;;  %v11588_v6 = vrot.slane %v11439_v31, %v4264_v5  ;;  %v11592_v18 = vpop.permute.xlu0 %4952  ;;  %v4452_v31 = vmul.f32 %v11458_v39, %v4384_v24  ;;  %v4453_v59 = vmul.f32 %v11458_v39, %v4385_v48  ;;  %v4454_v49 = vmul.f32 %v11458_v39, %v4386_v25 }
 0x483   : > { %v11582_v9 = vmul.f32 %v11486_v47, %v4518_v3  ;;  %14197 = vst [vmem:[#allocation27_spill] sm:$0xff] %v11592_v18  ;;  %v4449_v3 = vmul.f32 %v11458_v39, %v4381_v57  ;;  %v4455_v5 = vmul.f32 %v11458_v39, %v4387_v0  ;;  %v4456_v56 = vmul.f32 %v11458_v39, %v4388_v12 }
 0x484   : > { %v4457_v37 = vmul.f32 %v11458_v39, %v4389_v33  ;;  %v4458_v4 = vmul.f32 %v11458_v39, %v4390_v34  ;;  %v4459_v1 = vmul.f32 %v11458_v39, %v4391_v15  ;;  %v4461_v57 = vmul.f32 %v11458_v39, %v4393_v53 }
 0x485   : > { %14195 = vst [vmem:[#allocation67_spill] sm:$0xff] %v11582_v9  ;;  %v11598_v44 = vpop.permute.xlu1 %4954  ;;  %v4462_v24 = vmul.f32 %v11458_v39, %v4394_v36  ;;  %v4463_v48 = vmul.f32 %v11458_v39, %v4395_v13  ;;  %v4464_v25 = vmul.f32 %v11458_v39, %v4396_v51  ;;  %v4465_v0 = vmul.f32 %v11458_v39, %v4397_v50 }
 0x486   : > { %14198 = vst [vmem:[#allocation39_spill] sm:$0xff] %v11598_v44  ;;  %v4460_v44 = vmul.f32 %v11458_v39, %v4392_v29  ;;  %v4466_v12 = vmul.f32 %v11458_v39, %v4398_v16  ;;  %v4467_v33 = vmul.f32 %v11458_v39, %v4399_v22  ;;  %v4468_v34 = vmul.f32 %v11458_v39, %v4400_v30  ;;  %v11620_v18 = vpop.permute.xlu0 %4956  ;;  %v14201_v30 = vld [vmem:[#allocation34_spill] sm:$0xff] }
 0x487   : > { %v4469_v15 = vmul.f32 %v11458_v39, %v4401_v26  ;;  %v4470_v29 = vmul.f32 %v11458_v39, %v4402_v14  ;;  %14199 = vst [vmem:[#allocation53_spill] sm:$0xff] %v11620_v18  ;;  %v4471_v53 = vmul.f32 %v11458_v39, %v4403_v28  ;;  %v4472_v36 = vmul.f32 %v11458_v39, %v4404_v54  ;;  %v14202_v14 = vld [vmem:[#allocation60_spill] sm:$0xff] }
 0x488   : > { %v4473_v13 = vmul.f32 %v11458_v39, %v4405_v35  ;;  %v4474_v51 = vmul.f32 %v11458_v39, %v4406_v52  ;;  %v11629_v16 = vrot.slane %v11448_v55, %v4302_v27  ;;  %v4475_v22 = vmul.f32 %v11458_v39, %v4407_v21  ;;  %v14204_v52 = vld [vmem:[#allocation45_spill] sm:$0xff]  ;;  %v14207_v21 = vld [vmem:[#allocation10_spill] sm:$0xff] }
 0x489   : > { %v11626_v50 = vpop.permute.xlu1 %4958  ;;  %v4266_v26 = vsub.f32 %v14201_v30, %v11588_v6  ;;  %v4267_v18 = vsub.f32 %v14202_v14, %v11588_v6  ;;  %v14205_v55 = vld [vmem:[#allocation61_spill] sm:$0xff]  ;;  %v4270_v30 = vsub.f32 %v14207_v21, %v11588_v6  ;;  %v4271_v14 = vsub.f32 %v14208_v62, %v11588_v6 }
 0x48a   : > { %14200 = vst [vmem:[#allocation59_spill] sm:$0xff] %v11626_v50  ;;  %v11638_v35 = vpop.permute.xlu0 %4960  ;;  %v4268_v50 = vsub.f32 %v14204_v52, %v11588_v6  ;;  %v4269_v27 = vsub.f32 %v14205_v55, %v11588_v6  ;;  %v11660_v21 = vadd.f32 %v11466_v60, %v4445_v46  ;;  %v11663_v62 = vadd.f32 %v11466_v60, %v4446_v2 }
 0x48b   : > { %v4304_v28 = vmul.f32 %v11629_v16, %v4266_v26  ;;  %v4305_v54 = vmul.f32 %v11629_v16, %v4267_v18  ;;  %14203 = vst [vmem:[#allocation30_spill] sm:$0xff] %v11638_v35  ;;  %v4308_v35 = vmul.f32 %v11629_v16, %v4270_v30  ;;  %v4309_v19 = vmul.f32 %v11629_v16, %v4271_v14 }
 0x48c   : > { %v4306_v26 = vmul.f32 %v11629_v16, %v4268_v50  ;;  %v4307_v18 = vmul.f32 %v11629_v16, %v4269_v27  ;;  %v11666_v50 = vadd.f32 %v11466_v60, %v4447_v11  ;;  %v11669_v27 = vadd.f32 %v11466_v60, %v4448_v41 }
 0x48d   : > { %v11644_v7 = vpop.permute.xlu1 %4962  ;;  %v4412_v52 = vmul.f32 %v11458_v39, %v4304_v28  ;;  %v4413_v55 = vmul.f32 %v11458_v39, %v4305_v54  ;;  %v11672_v30 = vadd.f32 %v11466_v60, %v4449_v3  ;;  %v11675_v28 = vadd.f32 %v11466_v60, %v4452_v31 }
 0x48e   : > { %14206 = vst [vmem:[#allocation55_spill] sm:$0xff] %v11644_v7  ;;  %v11657_v7 = vadd.f32 %v11466_v60, %v4444_v58  ;;  %v4521_v58 = vadd.f32 %v11466_v60, %v4453_v59  ;;  %v11678_v54 = vpop.permute.xlu0 %4964  ;;  %v4522_v46 = vadd.f32 %v11466_v60, %v4454_v49  ;;  %v4523_v2 = vadd.f32 %v11466_v60, %v4455_v5 }
 0x48f   : > { %14209 = vst [vmem:[#allocation44_spill] sm:$0xff] %v11678_v54  ;;  %v4524_v11 = vadd.f32 %v11466_v60, %v4456_v56  ;;  %v4525_v14 = vadd.f32 %v11466_v60, %v4457_v37  ;;  %v4526_v3 = vadd.f32 %v11466_v60, %v4458_v4  ;;  %v4527_v20 = vadd.f32 %v11466_v60, %v4459_v1 }
 0x490   : > { %v4528_v31 = vadd.f32 %v11466_v60, %v4460_v44  ;;  %v4529_v59 = vadd.f32 %v11466_v60, %v4461_v57  ;;  %v4530_v54 = vadd.f32 %v11466_v60, %v4462_v24  ;;  %v4531_v49 = vadd.f32 %v11466_v60, %v4463_v48 }
 0x491   : > { %v11684_v41 = vpop.permute.xlu1 %4966  ;;  %v4532_v5 = vadd.f32 %v11466_v60, %v4464_v25  ;;  %v4533_v56 = vadd.f32 %v11466_v60, %v4465_v0  ;;  %v4534_v37 = vadd.f32 %v11466_v60, %v4466_v12  ;;  %v11699_v4 = vadd.f32 %v11466_v60, %v4468_v34 }
 0x492   : > { %14210 = vst [vmem:[#allocation41_spill] sm:$0xff] %v11684_v41  ;;  %v11696_v41 = vadd.f32 %v11466_v60, %v4467_v33  ;;  %v11702_v44 = vadd.f32 %v11466_v60, %v4469_v15  ;;  %v11705_v1 = vadd.f32 %v11466_v60, %v4470_v29  ;;  %v11708_v57 = vadd.f32 %v11466_v60, %v4471_v53  ;;  %v11724_v34 = vpop.permute.xlu0 %4968  ;;  %v14213_v15 = vld [vmem:[#allocation21_spill] sm:$0xff]  ;;  %v14214_v53 = vld [vmem:[#allocation48_spill] sm:$0xff] }
 0x493   : > { %v11711_v24 = vadd.f32 %v11466_v60, %v4472_v36  ;;  %v11714_v48 = vadd.f32 %v11466_v60, %v4473_v13  ;;  %v4414_v25 = vmul.f32 %v11458_v39, %v4306_v26  ;;  %v4542_v0 = vadd.f32 %v11466_v60, %v4474_v51  ;;  %14212 = vst [vmem:[#allocation9_spill] sm:$0xff] %v11724_v34  ;;  %v14216_v26 = vld [vmem:[#allocation64_spill] sm:$0xff]  ;;  %v14217_v51 = vld [vmem:[#allocation13_spill] sm:$0xff] }
 0x494   : > { %v11719_v12 = vadd.f32 %v11466_v60, %v4475_v22  ;;  %v11722_v33 = vmul.f32 %v11486_v47, %v4521_v58  ;;  %v4272_v29 = vsub.f32 %v14213_v15, %v11588_v6  ;;  %v4273_v36 = vsub.f32 %v14214_v53, %v11588_v6 }
 0x495   : > { %v11730_v13 = vpop.permute.xlu1 %4970  ;;  %v4274_v43 = vsub.f32 %v14216_v26, %v11588_v6  ;;  %v4275_v22 = vsub.f32 %v14217_v51, %v11588_v6  ;;  %v4415_v34 = vmul.f32 %v11458_v39, %v4307_v18  ;;  %v4417_v15 = vmul.f32 %v11458_v39, %v4309_v19  ;;  %v14218_v26 = vld [vmem:[#allocation24_spill] sm:$0xff]  ;;  %v14221_v18 = vld [vmem:[#allocation63_spill] sm:$0xff] }
 0x496   : > { %14211 = vst [vmem:[#allocation18_spill] sm:$0xff] %v11722_v33  ;;  %14215 = vst [vmem:[#allocation42_spill] sm:$0xff] %v11730_v13  ;;  %v4310_v40 = vmul.f32 %v11629_v16, %v4272_v29  ;;  %v4311_v58 = vmul.f32 %v11629_v16, %v4273_v36  ;;  %v4416_v33 = vmul.f32 %v11458_v39, %v4308_v35  ;;  %v14219_v51 = vld [vmem:[#allocation36_spill] sm:$0xff]  ;;  %v14220_v36 = vld [vmem:[#allocation47_spill] sm:$0xff]  ;;  %v11754_v32 = vpop.permute.xlu0 %4972 }
 0x497   : > { %v4480_v53 = vadd.f32 %v11466_v60, %v4412_v52  ;;  %v4481_v13 = vadd.f32 %v11466_v60, %v4413_v55  ;;  %v4482_v17 = vadd.f32 %v11466_v60, %v4414_v25  ;;  %v4276_v9 = vsub.f32 %v14218_v26, %v11588_v6  ;;  %14222 = vst [vmem:[#allocation7_spill] sm:$0xff] %v11754_v32 }
 0x498   : > { %v4277_v29 = vsub.f32 %v14219_v51, %v11588_v6  ;;  %v4278_v63 = vsub.f32 %v14220_v36, %v11588_v6  ;;  %v4279_v35 = vsub.f32 %v14221_v18, %v11588_v6  ;;  %v4312_v19 = vmul.f32 %v11629_v16, %v4274_v43 }
 0x499   : > { %v4313_v52 = vmul.f32 %v11629_v16, %v4275_v22  ;;  %v4418_v55 = vmul.f32 %v11458_v39, %v4310_v40  ;;  %v4419_v25 = vmul.f32 %v11458_v39, %v4311_v58  ;;  %v4483_v26 = vadd.f32 %v11466_v60, %v4415_v34  ;;  %v11760_v8 = vpop.permute.xlu1 %4974 }
 0x49a   : > { %v4484_v51 = vadd.f32 %v11466_v60, %v4416_v33  ;;  %14223 = vst [vmem:[#allocation54_spill] sm:$0xff] %v11760_v8  ;;  %v4485_v36 = vadd.f32 %v11466_v60, %v4417_v15  ;;  %v4548_v18 = vmul.f32 %v11486_v47, %v4480_v53  ;;  %v4549_v43 = vmul.f32 %v11486_v47, %v4481_v13 }
 0x49b   : > { %v4550_v22 = vmul.f32 %v11486_v47, %v4482_v17  ;;  %v11768_v32 = vmul.f32 %v11486_v47, %v11657_v7  ;;  %v11772_v40 = vmul.f32 %v11486_v47, %v11660_v21  ;;  %v11776_v33 = vmul.f32 %v11486_v47, %v11663_v62 }
 0x49c   : > { %v11780_v34 = vmul.f32 %v11486_v47, %v11666_v50  ;;  %v11784_v13 = vmul.f32 %v11486_v47, %v11669_v27  ;;  %v11788_v17 = vmul.f32 %v11486_v47, %v11672_v30  ;;  %v11792_v7 = vmul.f32 %v11486_v47, %v11675_v28 }
 0x49d   : > { %v11795_v21 = vmul.f32 %v11486_v47, %v4522_v46  ;;  %v11798_v62 = vmul.f32 %v11486_v47, %v4523_v2  ;;  %v11801_v50 = vmul.f32 %v11486_v47, %v4524_v11  ;;  %v11804_v27 = vmul.f32 %v11486_v47, %v4525_v14  ;;  %v11821_v11 = vpop.permute.xlu0 %4976  ;;  %v11835_v15 = vpop.permute.xlu1 %4978 }
 0x49e   : > { %v11807_v58 = vmul.f32 %v11486_v47, %v4526_v3  ;;  %v11810_v30 = vmul.f32 %v11486_v47, %v4527_v20  ;;  %v11813_v28 = vmul.f32 %v11486_v47, %v4528_v31  ;;  %v11816_v46 = vmul.f32 %v11486_v47, %v4529_v59  ;;  %14224 = vst [vmem:[#allocation56_spill] sm:$0xff] %v11821_v11 }
 0x49f   : > { %v11819_v2 = vmul.f32 %v11486_v47, %v4530_v54  ;;  %v11824_v14 = vmul.f32 %v11486_v47, %v4531_v49  ;;  %v11827_v3 = vmul.f32 %v11486_v47, %v4532_v5  ;;  %v11830_v20 = vmul.f32 %v11486_v47, %v4533_v56  ;;  %14225 = vst [vmem:[#allocation29_spill] sm:$0xff] %v11835_v15 }
 0x4a0   : > { %v11833_v31 = vmul.f32 %v11486_v47, %v4534_v37  ;;  %v11839_v54 = vmul.f32 %v11486_v47, %v11696_v41  ;;  %v11843_v59 = vmul.f32 %v11486_v47, %v11699_v4  ;;  %v11847_v49 = vmul.f32 %v11486_v47, %v11702_v44 }
 0x4a1   : > { %v11851_v5 = vmul.f32 %v11486_v47, %v11705_v1  ;;  %v11855_v56 = vmul.f32 %v11486_v47, %v11708_v57  ;;  %v11859_v41 = vmul.f32 %v11486_v47, %v11711_v24  ;;  %v11863_v37 = vmul.f32 %v11486_v47, %v11714_v48  ;;  %v11885_v8 = vpop.permute.xlu1 %4982 }
 0x4a2   : > { %v11866_v4 = vmul.f32 %v11486_v47, %v4542_v0  ;;  %v4314_v44 = vmul.f32 %v11629_v16, %v4276_v9  ;;  %v4315_v1 = vmul.f32 %v11629_v16, %v4277_v29  ;;  %v4551_v53 = vmul.f32 %v11486_v47, %v4483_v26  ;;  %v11881_v29 = vpop.permute.xlu0 %4980  ;;  %v14227_v26 = vld [vmem:[#allocation12_spill] sm:$0xff]  ;;  %14228 = vst [vmem:[#allocation32_spill] sm:$0xff] %v11885_v8 }
 0x4a3   : > { %v11873_v57 = vmul.f32 %v11486_v47, %v11719_v12  ;;  %v4420_v24 = vmul.f32 %v11458_v39, %v4312_v19  ;;  %v4486_v15 = vadd.f32 %v11466_v60, %v4418_v55  ;;  %v4552_v48 = vmul.f32 %v11486_v47, %v4484_v51  ;;  %14226 = vst [vmem:[#allocation20_spill] sm:$0xff] %v11881_v29  ;;  %v14229_v19 = vld [vmem:[#allocation23_spill] sm:$0xff] }
 0x4a4   : > { %8275 = vtanh.f32 %v4548_v18  ;;  %v4421_v0 = vmul.f32 %v11458_v39, %v4313_v52  ;;  %v4487_v11 = vadd.f32 %v11466_v60, %v4419_v25  ;;  %v4553_v9 = vmul.f32 %v11486_v47, %v4485_v36 }
 0x4a5   : > { %8277 = vtanh.f32 %v4549_v43  ;;  %v4280_v12 = vsub.f32 %v14227_v26, %v11588_v6  ;;  %v4281_v55 = vsub.f32 %v14229_v19, %v11588_v6  ;;  %v4316_v51 = vmul.f32 %v11629_v16, %v4278_v63 }
 0x4a6   : > { %8279 = vtanh.f32 %v4550_v22  ;;  %v4317_v52 = vmul.f32 %v11629_v16, %v4279_v35  ;;  %v4422_v25 = vmul.f32 %v11458_v39, %v4314_v44  ;;  %v4488_v36 = vadd.f32 %v11466_v60, %v4420_v24  ;;  %v14230_v35 = vld [vmem:[#allocation35_spill] sm:$0xff]  ;;  %v11903_v19 = vpop.permute.xlu0 %4984 }
 0x4a7   : > { %8281 = vtanh.f32 %v4551_v53  ;;  %v4554_v18 = vmul.f32 %v11486_v47, %v4486_v15  ;;  %v4423_v43 = vmul.f32 %v11458_v39, %v4315_v1  ;;  %v4489_v22 = vadd.f32 %v11466_v60, %v4421_v0  ;;  %14231 = vst [vmem:[#allocation50_spill] sm:$0xff] %v11903_v19 }
 0x4a8   : > { %8283 = vtanh.f32 %v4552_v48  ;;  %v4555_v26 = vmul.f32 %v11486_v47, %v4487_v11  ;;  %v4282_v63 = vsub.f32 %v11027_v10, %v11588_v6  ;;  %v4283_v53 = vsub.f32 %v14230_v35, %v11588_v6  ;;  %v11908_v11 = vpop.permute.xlu1 %4986 }
 0x4a9   : > { %8285 = vtanh.f32 %v4553_v9  ;;  %v4318_v44 = vmul.f32 %v11629_v16, %v4280_v12  ;;  %v4319_v24 = vmul.f32 %v11629_v16, %v4281_v55  ;;  %v4424_v15 = vmul.f32 %v11458_v39, %v4316_v51  ;;  %14232 = vst [vmem:[#allocation43_spill] sm:$0xff] %v11908_v11  ;;  %v14233_v12 = vld [vmem:[#allocation66_spill] sm:$0xff]  ;;  %v11919_v51 = vld [vmem:[%s13769_s3 + $0x3] ss:$0 sm:$0xff]  ;;  %v11933_v11 = vld [vmem:[%s13769_s3 + $0x4] ss:$0 sm:$0xff] }
 0x4aa   : > { %v4490_v1 = vadd.f32 %v11466_v60, %v4422_v25  ;;  %v4556_v48 = vmul.f32 %v11486_v47, %v4488_v36  ;;  %8287 = vtanh.f32 %v4554_v18  ;;  %v4425_v10 = vmul.f32 %v11458_v39, %v4317_v52  ;;  %v14234_v25 = vld [vmem:[#allocation15_spill] sm:$0xff] }
 0x4ab   : > { %v4491_v0 = vadd.f32 %v11466_v60, %v4423_v43  ;;  %v4557_v9 = vmul.f32 %v11486_v47, %v4489_v22  ;;  %8289 = vtanh.f32 %v4555_v26  ;;  %v4284_v55 = vsub.f32 %v14233_v12, %v11588_v6 }
 0x4ac   : > { %v4320_v35 = vmul.f32 %v11629_v16, %v4282_v63  ;;  %v4285_v36 = vsub.f32 %v14234_v25, %v11588_v6  ;;  %v4321_v52 = vmul.f32 %v11629_v16, %v4283_v53  ;;  %v4426_v18 = vmul.f32 %v11458_v39, %v4318_v44  ;;  %v11939_v25 = vpop.permute.xlu0 %4988  ;;  %v11945_v29 = vpop.permute.xlu1 %4990 }
 0x4ad   : > { %v4427_v43 = vmul.f32 %v11458_v39, %v4319_v24  ;;  %v4286_v22 = vsub.f32 %v11082_v45, %v11588_v6  ;;  %v4492_v26 = vadd.f32 %v11466_v60, %v4424_v15  ;;  %v4558_v63 = vmul.f32 %v11486_v47, %v4490_v1  ;;  %14235 = vst [vmem:[#allocation58_spill] sm:$0xff] %v11939_v25 }
 0x4ae   : > { %8291 = vtanh.f32 %v4556_v48  ;;  %v4287_v53 = vsub.f32 %v11095_v38, %v11588_v6  ;;  %v4493_v44 = vadd.f32 %v11466_v60, %v4425_v10  ;;  %v4559_v24 = vmul.f32 %v11486_v47, %v4491_v0  ;;  %14236 = vst [vmem:[#allocation8_spill] sm:$0xff] %v11945_v29 }
 0x4af   : > { %8293 = vtanh.f32 %v4557_v9  ;;  %v4322_v15 = vmul.f32 %v11629_v16, %v4284_v55  ;;  %v4323_v1 = vmul.f32 %v11629_v16, %v4285_v36  ;;  %v4428_v48 = vmul.f32 %v11458_v39, %v4320_v35 }
 0x4b0   : > { %v4429_v38 = vmul.f32 %v11458_v39, %v4321_v52  ;;  %v4494_v10 = vadd.f32 %v11466_v60, %v4426_v18  ;;  %v4495_v0 = vadd.f32 %v11466_v60, %v4427_v43  ;;  %v4560_v55 = vmul.f32 %v11486_v47, %v4492_v26 }
 0x4b1   : > { %v8276_v12 = vpop.eup %8275  ;;  %8295 = vtanh.f32 %v4558_v63  ;;  %v4561_v29 = vmul.f32 %v11486_v47, %v4493_v44  ;;  %v4289_v26 = vsub.f32 %v11132_v42, %v11588_v6  ;;  %v4430_v63 = vmul.f32 %v11458_v39, %v4322_v15 }
 0x4b2   : > { %v8278_v45 = vpop.eup %8277  ;;  %v4680_v19 = vmul.f32 %v8276_v12, %v11919_v51  ;;  %8297 = vtanh.f32 %v4559_v24  ;;  %v4431_v44 = vmul.f32 %v11458_v39, %v4323_v1  ;;  %v4496_v24 = vadd.f32 %v11466_v60, %v4428_v48 }
 0x4b3   : > { %v8280_v8 = vpop.eup %8279  ;;  %v4681_v9 = vmul.f32 %v8278_v45, %v11919_v51  ;;  %v4288_v45 = vsub.f32 %v11120_v23, %v11588_v6  ;;  %v11975_v23 = vpop.permute.xlu0 %4992  ;;  %v4562_v42 = vmul.f32 %v11486_v47, %v4494_v10  ;;  %8299 = vtanh.f32 %v4560_v55  ;;  %v14243_v55 = vld [vmem:[#allocation26_spill] sm:$0xff] }
 0x4b4   : > { %v8282_v25 = vpop.eup %8281  ;;  %v4682_v36 = vmul.f32 %v8280_v8, %v11919_v51  ;;  %v11954_v35 = vadd.f32 %v11933_v11, %v4680_v19  ;;  %v4324_v8 = vmul.f32 %v11629_v16, %v4286_v22  ;;  %v4325_v19 = vmul.f32 %v11629_v16, %v4287_v53  ;;  %14239 = vst [vmem:[#allocation46_spill] sm:$0xff] %v11975_v23 }
 0x4b5   : > { %v8284_v12 = vpop.eup %8283  ;;  %v4683_v52 = vmul.f32 %v8282_v25, %v11919_v51  ;;  %v11959_v18 = vadd.f32 %v11933_v11, %v4681_v9  ;;  %v4497_v25 = vadd.f32 %v11466_v60, %v4429_v38  ;;  %v11982_v9 = vpop.permute.xlu1 %4994  ;;  %v4563_v1 = vmul.f32 %v11486_v47, %v4495_v0 }
 0x4b6   : > { %14237 = vst [vmem:[#allocation31_spill] sm:$0xff] %v11954_v35  ;;  %v8286_v43 = vpop.eup %8285  ;;  %5260 = vrot.lane.b32.xlu0 %v11954_v35, %s8664_s26  ;;  %v4684_v22 = vmul.f32 %v8284_v12, %v11919_v51  ;;  %v11980_v53 = vadd.f32 %v11933_v11, %v4682_v36  ;;  %14241 = vst [vmem:[#allocation11_spill] sm:$0xff] %v11982_v9  ;;  %8301 = vtanh.f32 %v4561_v29 }
 0x4b7   : > { %14238 = vst [vmem:[#allocation19_spill] sm:$0xff] %v11959_v18  ;;  %5262 = vrot.lane.b32.xlu1 %v11959_v18, %s8664_s26  ;;  %v8288_v15 = vpop.eup %8287  ;;  %v4685_v48 = vmul.f32 %v8286_v43, %v11919_v51  ;;  %v11987_v38 = vadd.f32 %v11933_v11, %v4683_v52  ;;  %v4290_v10 = vsub.f32 %v11170_v61, %v11588_v6  ;;  %8303 = vtanh.f32 %v4562_v42  ;;  %v12013_v9 = vpop.permute.xlu0 %4996 }
 0x4b8   : > { %14240 = vst [vmem:[#allocation62_spill] sm:$0xff] %v11980_v53  ;;  %v8290_v23 = vpop.eup %8289  ;;  %v4291_v12 = vsub.f32 %v14243_v55, %v11588_v6  ;;  %v4326_v36 = vmul.f32 %v11629_v16, %v4288_v45  ;;  %v4327_v18 = vmul.f32 %v11629_v16, %v4289_v26  ;;  %v4432_v29 = vmul.f32 %v11458_v39, %v4324_v8 }
 0x4b9   : > { %14242 = vst [vmem:[#allocation57_spill] sm:$0xff] %v11987_v38  ;;  %v4433_v0 = vmul.f32 %v11458_v39, %v4325_v19  ;;  %v4498_v52 = vadd.f32 %v11466_v60, %v4430_v63  ;;  %v4499_v43 = vadd.f32 %v11466_v60, %v4431_v44  ;;  %v4564_v61 = vmul.f32 %v11486_v47, %v4496_v24  ;;  %v14247_v24 = vld [vmem:[#allocation38_spill] sm:$0xff] }
 0x4ba   : > { %5264 = vrot.lane.b32.xlu0 %v11980_v53, %s8664_s26  ;;  %v4686_v45 = vmul.f32 %v8288_v15, %v11919_v51  ;;  %v12006_v26 = vadd.f32 %v11933_v11, %v4684_v22  ;;  %v4565_v8 = vmul.f32 %v11486_v47, %v4497_v25  ;;  %8305 = vtanh.f32 %v4563_v1  ;;  %14246 = vst [vmem:[#allocation60_spill] sm:$0xff] %v12013_v9  ;;  %v14248_v15 = vld [vmem:[#allocation49_spill] sm:$0xff]  ;;  %v12023_v25 = vpop.permute.xlu1 %4998 }
 0x4bb   : > { %5266 = vrot.lane.b32.xlu1 %v11987_v38, %s8664_s26  ;;  %v8292_v55 = vpop.eup %8291  ;;  %v4687_v19 = vmul.f32 %v8290_v23, %v11919_v51  ;;  %v12011_v63 = vadd.f32 %v11933_v11, %v4685_v48  ;;  %v4292_v42 = vsub.f32 %v14247_v24, %v11588_v6  ;;  %v4293_v38 = vsub.f32 %v14248_v15, %v11588_v6  ;;  %v14252_v9 = vld [vmem:[#allocation65_spill] sm:$0xff] }
 0x4bc   : > { %14244 = vst [vmem:[#allocation22_spill] sm:$0xff] %v12006_v26  ;;  %v8294_v44 = vpop.eup %8293  ;;  %v4328_v22 = vmul.f32 %v11629_v16, %v4290_v10  ;;  %v4329_v53 = vmul.f32 %v11629_v16, %v4291_v12  ;;  %14249 = vst [vmem:[#allocation45_spill] sm:$0xff] %v12023_v25  ;;  %v4434_v23 = vmul.f32 %v11458_v39, %v4326_v36  ;;  %8307 = vtanh.f32 %v4564_v61 }
 0x4bd   : > { %14245 = vst [vmem:[#allocation34_spill] sm:$0xff] %v12011_v63  ;;  %v4435_v1 = vmul.f32 %v11458_v39, %v4327_v18  ;;  %v4500_v48 = vadd.f32 %v11466_v60, %v4432_v29  ;;  %v4501_v24 = vadd.f32 %v11466_v60, %v4433_v0  ;;  %v4566_v10 = vmul.f32 %v11486_v47, %v4498_v52  ;;  %v14253_v52 = vld [vmem:[#allocation14_spill] sm:$0xff] }
 0x4be   : > { %5268 = vrot.lane.b32.xlu0 %v12006_v26, %s8664_s26  ;;  %v4688_v12 = vmul.f32 %v8292_v55, %v11919_v51  ;;  %v12034_v15 = vadd.f32 %v11933_v11, %v4686_v45  ;;  %v8296_v25 = vpop.eup %8295  ;;  %v4567_v36 = vmul.f32 %v11486_v47, %v4499_v43  ;;  %8309 = vtanh.f32 %v4565_v8 }
 0x4bf   : > { %5270 = vrot.lane.b32.xlu1 %v12011_v63, %s8664_s26  ;;  %v4689_v18 = vmul.f32 %v8294_v44, %v11919_v51  ;;  %v12039_v29 = vadd.f32 %v11933_v11, %v4687_v19  ;;  %v8298_v0 = vpop.eup %8297  ;;  %v4294_v63 = vsub.f32 %v14252_v9, %v11588_v6  ;;  %v4295_v61 = vsub.f32 %v14253_v52, %v11588_v6  ;;  %v12055_v9 = vpop.permute.xlu0 %5000 }
 0x4c0   : > { %14250 = vst [vmem:[#allocation61_spill] sm:$0xff] %v12034_v15  ;;  %v4330_v55 = vmul.f32 %v11629_v16, %v4292_v42  ;;  %v4331_v45 = vmul.f32 %v11629_v16, %v4293_v38  ;;  %v4436_v43 = vmul.f32 %v11458_v39, %v4328_v22  ;;  %v4437_v8 = vmul.f32 %v11458_v39, %v4329_v53  ;;  %v8300_v22 = vpop.eup %8299 }
 0x4c1   : > { %14251 = vst [vmem:[#allocation10_spill] sm:$0xff] %v12039_v29  ;;  %v4502_v19 = vadd.f32 %v11466_v60, %v4434_v23  ;;  %v4503_v44 = vadd.f32 %v11466_v60, %v4435_v1  ;;  %14254 = vst [vmem:[#allocation33_spill] sm:$0xff] %v12055_v9  ;;  %v4568_v42 = vmul.f32 %v11486_v47, %v4500_v48  ;;  %8311 = vtanh.f32 %v4566_v10  ;;  %v14258_v48 = vld [vmem:[#allocation25_spill] sm:$0xff] }
 0x4c2   : > { %5272 = vrot.lane.b32.xlu0 %v12034_v15, %s8664_s26  ;;  %v4690_v38 = vmul.f32 %v8296_v25, %v11919_v51  ;;  %v12060_v52 = vadd.f32 %v11933_v11, %v4688_v12  ;;  %v12062_v15 = vpop.permute.xlu1 %5002  ;;  %v4569_v53 = vmul.f32 %v11486_v47, %v4501_v24  ;;  %8313 = vtanh.f32 %v4567_v36  ;;  %v14259_v25 = vld [vmem:[#allocation37_spill] sm:$0xff] }
 0x4c3   : > { %5274 = vrot.lane.b32.xlu1 %v12039_v29, %s8664_s26  ;;  %14256 = vst [vmem:[#allocation48_spill] sm:$0xff] %v12062_v15  ;;  %v4691_v23 = vmul.f32 %v8298_v0, %v11919_v51  ;;  %v12067_v1 = vadd.f32 %v11933_v11, %v4689_v18  ;;  %v8302_v9 = vpop.eup %8301  ;;  %v4296_v10 = vsub.f32 %v14258_v48, %v11588_v6  ;;  %8315 = vtanh.f32 %v4568_v42 }
 0x4c4   : > { %14255 = vst [vmem:[#allocation21_spill] sm:$0xff] %v12060_v52  ;;  %v4297_v29 = vsub.f32 %v14259_v25, %v11588_v6  ;;  %v4332_v12 = vmul.f32 %v11629_v16, %v4294_v63  ;;  %v4333_v26 = vmul.f32 %v11629_v16, %v4295_v61  ;;  %v4438_v24 = vmul.f32 %v11458_v39, %v4330_v55  ;;  %v8304_v48 = vpop.eup %8303  ;;  %v12093_v25 = vpop.permute.xlu0 %5004 }
 0x4c5   : > { %14257 = vst [vmem:[#allocation64_spill] sm:$0xff] %v12067_v1  ;;  %v4439_v36 = vmul.f32 %v11458_v39, %v4331_v45  ;;  %v4504_v18 = vadd.f32 %v11466_v60, %v4436_v43  ;;  %v4505_v0 = vadd.f32 %v11466_v60, %v4437_v8  ;;  %v4570_v6 = vmul.f32 %v11486_v47, %v4502_v19 }
 0x4c6   : > { %5276 = vrot.lane.b32.xlu0 %v12060_v52, %s8664_s26  ;;  %v4692_v63 = vmul.f32 %v8300_v22, %v11919_v51  ;;  %v12086_v61 = vadd.f32 %v11933_v11, %v4690_v38  ;;  %v4571_v55 = vmul.f32 %v11486_v47, %v4503_v44  ;;  %8317 = vtanh.f32 %v4569_v53  ;;  %14262 = vst [vmem:[#allocation36_spill] sm:$0xff] %v12093_v25  ;;  %v12099_v38 = vpop.permute.xlu1 %5006 }
 0x4c7   : > { %5278 = vrot.lane.b32.xlu1 %v12067_v1, %s8664_s26  ;;  %v4693_v45 = vmul.f32 %v8302_v9, %v11919_v51  ;;  %v12091_v43 = vadd.f32 %v11933_v11, %v4691_v23  ;;  %v8306_v8 = vpop.eup %8305  ;;  %v4334_v19 = vmul.f32 %v11629_v16, %v4296_v10  ;;  %v4335_v42 = vmul.f32 %v11629_v16, %v4297_v29 }
 0x4c8   : > { %14260 = vst [vmem:[#allocation13_spill] sm:$0xff] %v12086_v61  ;;  %14263 = vst [vmem:[#allocation47_spill] sm:$0xff] %v12099_v38  ;;  %v4440_v44 = vmul.f32 %v11458_v39, %v4332_v12  ;;  %v4441_v22 = vmul.f32 %v11458_v39, %v4333_v26  ;;  %v4506_v9 = vadd.f32 %v11466_v60, %v4438_v24  ;;  %8319 = vtanh.f32 %v4570_v6 }
 0x4c9   : > { %14261 = vst [vmem:[#allocation24_spill] sm:$0xff] %v12091_v43  ;;  %v4507_v53 = vadd.f32 %v11466_v60, %v4439_v36  ;;  %v4572_v23 = vmul.f32 %v11486_v47, %v4504_v18  ;;  %v4694_v16 = vmul.f32 %v8304_v48, %v11919_v51  ;;  %v12110_v29 = vadd.f32 %v11933_v11, %v4692_v63  ;;  %v8308_v10 = vpop.eup %8307 }
 0x4ca   : > { %5280 = vrot.lane.b32.xlu0 %v12086_v61, %s8664_s26  ;;  %v4573_v12 = vmul.f32 %v11486_v47, %v4505_v0  ;;  %8321 = vtanh.f32 %v4571_v55  ;;  %v4695_v26 = vmul.f32 %v8306_v8, %v11919_v51  ;;  %v12115_v24 = vadd.f32 %v11933_v11, %v4693_v45  ;;  %v12125_v0 = vpop.permute.xlu0 %5008  ;;  %v12132_v38 = vpop.permute.xlu1 %5010 }
 0x4cb   : > { %5282 = vrot.lane.b32.xlu1 %v12091_v43, %s8664_s26  ;;  %14264 = vst [vmem:[#allocation63_spill] sm:$0xff] %v12110_v29  ;;  %v8310_v36 = vpop.eup %8309  ;;  %v4442_v18 = vmul.f32 %v11458_v39, %v4334_v19  ;;  %v4443_v6 = vmul.f32 %v11458_v39, %v4335_v42  ;;  %v4508_v63 = vadd.f32 %v11466_v60, %v4440_v44  ;;  %14266 = vst [vmem:[#allocation23_spill] sm:$0xff] %v12125_v0 }
 0x4cc   : > { %14265 = vst [vmem:[#allocation12_spill] sm:$0xff] %v12115_v24  ;;  %v4509_v48 = vadd.f32 %v11466_v60, %v4441_v22  ;;  %v4574_v55 = vmul.f32 %v11486_v47, %v4506_v9  ;;  %8323 = vtanh.f32 %v4572_v23  ;;  %v4696_v45 = vmul.f32 %v8308_v10, %v11919_v51  ;;  %14268 = vst [vmem:[#allocation66_spill] sm:$0xff] %v12132_v38 }
 0x4cd   : > { %v12130_v8 = vadd.f32 %v11933_v11, %v4694_v16  ;;  %v4575_v39 = vmul.f32 %v11486_v47, %v4507_v53  ;;  %8325 = vtanh.f32 %v4573_v12  ;;  %v4697_v42 = vmul.f32 %v8310_v36, %v11919_v51 }
 0x4ce   : > { %5284 = vrot.lane.b32.xlu0 %v12110_v29, %s8664_s26  ;;  %v8312_v19 = vpop.eup %8311  ;;  %v12137_v44 = vadd.f32 %v11933_v11, %v4695_v26  ;;  %v4510_v9 = vadd.f32 %v11466_v60, %v4442_v18  ;;  %v4511_v23 = vadd.f32 %v11466_v60, %v4443_v6  ;;  %v4576_v16 = vmul.f32 %v11486_v47, %v4508_v63  ;;  %v12155_v6 = vpop.permute.xlu0 %5012 }
 0x4cf   : > { %5286 = vrot.lane.b32.xlu1 %v12115_v24, %s8664_s26  ;;  %14267 = vst [vmem:[#allocation35_spill] sm:$0xff] %v12130_v8  ;;  %v8314_v22 = vpop.eup %8313  ;;  %8327 = vtanh.f32 %v4574_v55  ;;  %v4698_v53 = vmul.f32 %v8312_v19, %v11919_v51  ;;  %v12148_v10 = vadd.f32 %v11933_v11, %v4696_v45  ;;  %v4577_v26 = vmul.f32 %v11486_v47, %v4509_v48  ;;  %v12159_v63 = vpop.permute.xlu1 %5014 }
 0x4d0   : > { %14269 = vst [vmem:[#allocation15_spill] sm:$0xff] %v12137_v44  ;;  %v8316_v12 = vpop.eup %8315  ;;  %8329 = vtanh.f32 %v4575_v39  ;;  %v4699_v36 = vmul.f32 %v8314_v22, %v11919_v51  ;;  %v12153_v18 = vadd.f32 %v11933_v11, %v4697_v42  ;;  %14272 = vst [vmem:[#allocation49_spill] sm:$0xff] %v12155_v6  ;;  %v4578_v55 = vmul.f32 %v11486_v47, %v4510_v9 }
 0x4d1   : > { %14270 = vst [vmem:[#allocation26_spill] sm:$0xff] %v12148_v10  ;;  %14273 = vst [vmem:[#allocation65_spill] sm:$0xff] %v12159_v63  ;;  %8331 = vtanh.f32 %v4576_v16  ;;  %v4700_v48 = vmul.f32 %v8316_v12, %v11919_v51  ;;  %v12166_v45 = vadd.f32 %v11933_v11, %v4698_v53  ;;  %v4579_v39 = vmul.f32 %v11486_v47, %v4511_v23 }
 0x4d2   : > { %5288 = vrot.lane.b32.xlu0 %v12130_v8, %s8664_s26  ;;  %14271 = vst [vmem:[#allocation38_spill] sm:$0xff] %v12153_v18  ;;  %8333 = vtanh.f32 %v4577_v26  ;;  %v12171_v22 = vadd.f32 %v11933_v11, %v4699_v36  ;;  %v12177_v9 = vpop.permute.xlu0 %5016 }
 0x4d3   : > { %5290 = vrot.lane.b32.xlu1 %v12137_v44, %s8664_s26  ;;  %v8318_v60 = vpop.eup %8317  ;;  %14274 = vst [vmem:[#allocation14_spill] sm:$0xff] %v12166_v45  ;;  %14276 = vst [vmem:[#allocation37_spill] sm:$0xff] %v12177_v9  ;;  %8335 = vtanh.f32 %v4578_v55  ;;  %v12181_v47 = vadd.f32 %v11933_v11, %v4700_v48  ;;  %v12183_v53 = vpop.permute.xlu1 %5018 }
 0x4d4   : > { %v4701_v42 = vmul.f32 %v8318_v60, %v11919_v51  ;;  %14275 = vst [vmem:[#allocation25_spill] sm:$0xff] %v12171_v22  ;;  %14278 = vst [vmem:[#allocation70_spill] sm:$0xff] %v12183_v53  ;;  %8337 = vtanh.f32 %v4579_v39 }
 0x4d5   : > { %v8320_v19 = vpop.eup %8319  ;;  %14277 = vst [vmem:[#allocation69_spill] sm:$0xff] %v12181_v47  ;;  %8339 = vtanh.f32 %v11768_v32 }
 0x4d6   : > { %5292 = vrot.lane.b32.xlu0 %v12148_v10, %s8664_s26  ;;  %v4702_v16 = vmul.f32 %v8320_v19, %v11919_v51  ;;  %v12187_v26 = vadd.f32 %v11933_v11, %v4701_v42  ;;  %8341 = vtanh.f32 %v11772_v40  ;;  %v12203_v42 = vpop.permute.xlu0 %5020 }
 0x4d7   : > { %5294 = vrot.lane.b32.xlu1 %v12153_v18, %s8664_s26  ;;  %v8322_v63 = vpop.eup %8321  ;;  %14282 = vst [vmem:[#allocation74_spill] sm:$0xff] %v12203_v42  ;;  %v12207_v32 = vpop.permute.xlu1 %5022  ;;  %8343 = vtanh.f32 %v11776_v33 }
 0x4d8   : > { %v4703_v12 = vmul.f32 %v8322_v63, %v11919_v51  ;;  %14279 = vst [vmem:[#allocation71_spill] sm:$0xff] %v12187_v26  ;;  %v12196_v55 = vadd.f32 %v11933_v11, %v4702_v16  ;;  %14283 = vst [vmem:[#allocation75_spill] sm:$0xff] %v12207_v32  ;;  %8345 = vtanh.f32 %v11780_v34 }
 0x4d9   : > { %v8324_v23 = vpop.eup %8323  ;;  %8347 = vtanh.f32 %v11784_v13  ;;  %v14290_v13 = vld [vmem:[#allocation67_spill] sm:$0xff] }
 0x4da   : > { %5296 = vrot.lane.b32.xlu0 %v12166_v45, %s8664_s26  ;;  %v8326_v36 = vpop.eup %8325  ;;  %v4704_v60 = vmul.f32 %v8324_v23, %v11919_v51  ;;  %14280 = vst [vmem:[#allocation72_spill] sm:$0xff] %v12196_v55  ;;  %v12201_v19 = vadd.f32 %v11933_v11, %v4703_v12  ;;  %8349 = vtanh.f32 %v11788_v17 }
 0x4db   : > { %5298 = vrot.lane.b32.xlu1 %v12171_v22, %s8664_s26  ;;  %v4705_v63 = vmul.f32 %v8326_v36, %v11919_v51  ;;  %8351 = vtanh.f32 %v14290_v13 }
 0x4dc   : > { %v8328_v48 = vpop.eup %8327  ;;  %14281 = vst [vmem:[#allocation73_spill] sm:$0xff] %v12201_v19  ;;  %v12214_v16 = vadd.f32 %v11933_v11, %v4704_v60  ;;  %v12227_v60 = vpop.permute.xlu0 %5024 }
 0x4dd   : > { %v8330_v39 = vpop.eup %8329  ;;  %v4706_v40 = vmul.f32 %v8328_v48, %v11919_v51  ;;  %v12219_v36 = vadd.f32 %v11933_v11, %v4705_v63  ;;  %14286 = vst [vmem:[#allocation78_spill] sm:$0xff] %v12227_v60  ;;  %v12233_v63 = vpop.permute.xlu1 %5026 }
 0x4de   : > { %5300 = vrot.lane.b32.xlu0 %v12181_v47, %s8664_s26  ;;  %14284 = vst [vmem:[#allocation76_spill] sm:$0xff] %v12214_v16  ;;  %v8332_v23 = vpop.eup %8331  ;;  %v4707_v12 = vmul.f32 %v8330_v39, %v11919_v51  ;;  %14288 = vst [vmem:[#allocation80_spill] sm:$0xff] %v12233_v63  ;;  %v14292_v63 = vld [vmem:[#allocation52_spill] sm:$0xff] }
 0x4df   : > { %5302 = vrot.lane.b32.xlu1 %v12187_v26, %s8664_s26  ;;  %14285 = vst [vmem:[#allocation77_spill] sm:$0xff] %v12219_v36  ;;  %v8334_v42 = vpop.eup %8333  ;;  %v4708_v33 = vmul.f32 %v8332_v23, %v11919_v51  ;;  %v12230_v34 = vadd.f32 %v11933_v11, %v4706_v40  ;;  %8353 = vtanh.f32 %v14292_v63  ;;  %v14297_v63 = vld [vmem:[#allocation18_spill] sm:$0xff] }
 0x4e0   : > { %v8336_v48 = vpop.eup %8335  ;;  %v4709_v39 = vmul.f32 %v8334_v42, %v11919_v51  ;;  %v12237_v32 = vadd.f32 %v11933_v11, %v4707_v12  ;;  %v12253_v9 = vpop.permute.xlu0 %5028  ;;  %8355 = vtanh.f32 %v11792_v7 }
 0x4e1   : > { %14287 = vst [vmem:[#allocation79_spill] sm:$0xff] %v12230_v34  ;;  %v8338_v53 = vpop.eup %8337  ;;  %v4710_v40 = vmul.f32 %v8336_v48, %v11919_v51  ;;  %v12246_v17 = vadd.f32 %v11933_v11, %v4708_v33  ;;  %14294 = vst [vmem:[#allocation82_spill] sm:$0xff] %v12253_v9  ;;  %v12257_v13 = vpop.permute.xlu1 %5030  ;;  %8357 = vtanh.f32 %v14297_v63 }
 0x4e2   : > { %5304 = vrot.lane.b32.xlu0 %v12196_v55, %s8664_s26  ;;  %14289 = vst [vmem:[#allocation81_spill] sm:$0xff] %v12237_v32  ;;  %v8340_v23 = vpop.eup %8339  ;;  %v4711_v42 = vmul.f32 %v8338_v53, %v11919_v51  ;;  %v12251_v12 = vadd.f32 %v11933_v11, %v4709_v39  ;;  %14295 = vst [vmem:[#allocation83_spill] sm:$0xff] %v12257_v13  ;;  %8359 = vtanh.f32 %v11795_v21 }
 0x4e3   : > { %5306 = vrot.lane.b32.xlu1 %v12201_v19, %s8664_s26  ;;  %14291 = vst [vmem:[#allocation67_spill] sm:$0xff] %v12246_v17  ;;  %v8342_v60 = vpop.eup %8341  ;;  %v4712_v33 = vmul.f32 %v8340_v23, %v11919_v51  ;;  %v12264_v53 = vadd.f32 %v11933_v11, %v4710_v40  ;;  %8361 = vtanh.f32 %v11798_v62 }
 0x4e4   : > { %14293 = vst [vmem:[#allocation52_spill] sm:$0xff] %v12251_v12  ;;  %v8344_v48 = vpop.eup %8343  ;;  %v4713_v39 = vmul.f32 %v8342_v60, %v11919_v51  ;;  %v12269_v9 = vadd.f32 %v11933_v11, %v4711_v42  ;;  %v12280_v23 = vpop.permute.xlu0 %5032  ;;  %8363 = vtanh.f32 %v11801_v50 }
 0x4e5   : > { %14296 = vst [vmem:[#allocation84_spill] sm:$0xff] %v12264_v53  ;;  %v8346_v6 = vpop.eup %8345  ;;  %v4714_v7 = vmul.f32 %v8344_v48, %v11919_v51  ;;  %v12278_v40 = vadd.f32 %v11933_v11, %v4712_v33  ;;  %14300 = vst [vmem:[#allocation86_spill] sm:$0xff] %v12280_v23  ;;  %v12287_v13 = vpop.permute.xlu1 %5034  ;;  %8365 = vtanh.f32 %v11804_v27 }
 0x4e6   : > { %5308 = vrot.lane.b32.xlu0 %v12214_v16, %s8664_s26  ;;  %14298 = vst [vmem:[#allocation18_spill] sm:$0xff] %v12269_v9  ;;  %v8348_v60 = vpop.eup %8347  ;;  %v4715_v42 = vmul.f32 %v8346_v6, %v11919_v51  ;;  %v12285_v63 = vadd.f32 %v11933_v11, %v4713_v39  ;;  %14302 = vst [vmem:[#allocation88_spill] sm:$0xff] %v12287_v13  ;;  %8367 = vtanh.f32 %v11807_v58 }
 0x4e7   : > { %5310 = vrot.lane.b32.xlu1 %v12219_v36, %s8664_s26  ;;  %14299 = vst [vmem:[#allocation85_spill] sm:$0xff] %v12278_v40  ;;  %v8350_v38 = vpop.eup %8349  ;;  %v4716_v21 = vmul.f32 %v8348_v60, %v11919_v51  ;;  %v12296_v62 = vadd.f32 %v11933_v11, %v4714_v7  ;;  %8369 = vtanh.f32 %v11810_v30 }
 0x4e8   : > { %14301 = vst [vmem:[#allocation87_spill] sm:$0xff] %v12285_v63  ;;  %v8352_v6 = vpop.eup %8351  ;;  %v4717_v33 = vmul.f32 %v8350_v38, %v11919_v51  ;;  %v12301_v48 = vadd.f32 %v11933_v11, %v4715_v42  ;;  %v12303_v13 = vpop.permute.xlu0 %5036  ;;  %8371 = vtanh.f32 %v11813_v28 }
 0x4e9   : > { %14303 = vst [vmem:[#allocation89_spill] sm:$0xff] %v12296_v62  ;;  %14305 = vst [vmem:[#allocation91_spill] sm:$0xff] %v12303_v13  ;;  %v12307_v50 = vpop.permute.xlu1 %5038  ;;  %v4718_v7 = vmul.f32 %v8352_v6, %v11919_v51  ;;  %v12314_v27 = vadd.f32 %v11933_v11, %v4716_v21  ;;  %8373 = vtanh.f32 %v11816_v46 }
 0x4ea   : > { %5312 = vrot.lane.b32.xlu0 %v12230_v34, %s8664_s26  ;;  %14304 = vst [vmem:[#allocation90_spill] sm:$0xff] %v12301_v48  ;;  %14306 = vst [vmem:[#allocation92_spill] sm:$0xff] %v12307_v50  ;;  %v12319_v42 = vadd.f32 %v11933_v11, %v4717_v33  ;;  %8375 = vtanh.f32 %v11819_v2 }
 0x4eb   : > { %5314 = vrot.lane.b32.xlu1 %v12237_v32, %s8664_s26  ;;  %14307 = vst [vmem:[#allocation93_spill] sm:$0xff] %v12314_v27  ;;  %v12326_v58 = vadd.f32 %v11933_v11, %v4718_v7  ;;  %8377 = vtanh.f32 %v11824_v14 }
 0x4ec   : > { %v8354_v39 = vpop.eup %8353  ;;  %14308 = vst [vmem:[#allocation94_spill] sm:$0xff] %v12319_v42  ;;  %v12330_v6 = vpop.permute.xlu0 %5040  ;;  %8379 = vtanh.f32 %v11827_v3 }
 0x4ed   : > { %v8356_v38 = vpop.eup %8355  ;;  %v4719_v60 = vmul.f32 %v8354_v39, %v11919_v51  ;;  %14309 = vst [vmem:[#allocation95_spill] sm:$0xff] %v12326_v58  ;;  %14310 = vst [vmem:[#allocation96_spill] sm:$0xff] %v12330_v6  ;;  %v12337_v50 = vpop.permute.xlu1 %5042  ;;  %8381 = vtanh.f32 %v11830_v20 }
 0x4ee   : > { %5316 = vrot.lane.b32.xlu0 %v12246_v17, %s8664_s26  ;;  %v8358_v13 = vpop.eup %8357  ;;  %v4720_v21 = vmul.f32 %v8356_v38, %v11919_v51  ;;  %14312 = vst [vmem:[#allocation98_spill] sm:$0xff] %v12337_v50  ;;  %8383 = vtanh.f32 %v11833_v31 }
 0x4ef   : > { %5318 = vrot.lane.b32.xlu1 %v12251_v12, %s8664_s26  ;;  %v8360_v30 = vpop.eup %8359  ;;  %v12333_v33 = vadd.f32 %v11933_v11, %v4719_v60  ;;  %v4721_v39 = vmul.f32 %v8358_v13, %v11919_v51  ;;  %8385 = vtanh.f32 %v11839_v54 }
 0x4f0   : > { %v8362_v23 = vpop.eup %8361  ;;  %v12344_v28 = vadd.f32 %v11933_v11, %v4720_v21  ;;  %v4722_v7 = vmul.f32 %v8360_v30, %v11919_v51  ;;  %v12353_v50 = vpop.permute.xlu0 %5044  ;;  %8387 = vtanh.f32 %v11843_v59 }
 0x4f1   : > { %14311 = vst [vmem:[#allocation97_spill] sm:$0xff] %v12333_v33  ;;  %v8364_v38 = vpop.eup %8363  ;;  %v12349_v13 = vadd.f32 %v11933_v11, %v4721_v39  ;;  %v4723_v46 = vmul.f32 %v8362_v23, %v11919_v51  ;;  %14315 = vst [vmem:[#allocation101_spill] sm:$0xff] %v12353_v50  ;;  %v12357_v21 = vpop.permute.xlu1 %5046  ;;  %8389 = vtanh.f32 %v11847_v49 }
 0x4f2   : > { %5320 = vrot.lane.b32.xlu0 %v12264_v53, %s8664_s26  ;;  %14313 = vst [vmem:[#allocation99_spill] sm:$0xff] %v12344_v28  ;;  %v8366_v60 = vpop.eup %8365  ;;  %14316 = vst [vmem:[#allocation102_spill] sm:$0xff] %v12357_v21  ;;  %v12363_v2 = vadd.f32 %v11933_v11, %v4722_v7  ;;  %v4724_v14 = vmul.f32 %v8364_v38, %v11919_v51  ;;  %8391 = vtanh.f32 %v11851_v5 }
 0x4f3   : > { %5322 = vrot.lane.b32.xlu1 %v12269_v9, %s8664_s26  ;;  %14314 = vst [vmem:[#allocation100_spill] sm:$0xff] %v12349_v13  ;;  %v8368_v30 = vpop.eup %8367  ;;  %v12368_v23 = vadd.f32 %v11933_v11, %v4723_v46  ;;  %v4725_v39 = vmul.f32 %v8366_v60, %v11919_v51  ;;  %8393 = vtanh.f32 %v11855_v56 }
 0x4f4   : > { %14317 = vst [vmem:[#allocation103_spill] sm:$0xff] %v12363_v2  ;;  %v8370_v50 = vpop.eup %8369  ;;  %v12377_v3 = vadd.f32 %v11933_v11, %v4724_v14  ;;  %v4726_v7 = vmul.f32 %v8368_v30, %v11919_v51  ;;  %v12380_v20 = vpop.permute.xlu0 %5048  ;;  %8395 = vtanh.f32 %v11859_v41 }
 0x4f5   : > { %14318 = vst [vmem:[#allocation104_spill] sm:$0xff] %v12368_v23  ;;  %14320 = vst [vmem:[#allocation106_spill] sm:$0xff] %v12380_v20  ;;  %v8372_v38 = vpop.eup %8371  ;;  %v12384_v46 = vadd.f32 %v11933_v11, %v4725_v39  ;;  %v4727_v60 = vmul.f32 %v8370_v50, %v11919_v51  ;;  %v12387_v21 = vpop.permute.xlu1 %5050  ;;  %8397 = vtanh.f32 %v11863_v37 }
 0x4f6   : > { %5324 = vrot.lane.b32.xlu0 %v12278_v40, %s8664_s26  ;;  %14319 = vst [vmem:[#allocation105_spill] sm:$0xff] %v12377_v3  ;;  %14322 = vst [vmem:[#allocation108_spill] sm:$0xff] %v12387_v21  ;;  %v8374_v6 = vpop.eup %8373  ;;  %v12395_v31 = vadd.f32 %v11933_v11, %v4726_v7  ;;  %v4728_v54 = vmul.f32 %v8372_v38, %v11919_v51  ;;  %8399 = vtanh.f32 %v11866_v4 }
 0x4f7   : > { %5326 = vrot.lane.b32.xlu1 %v12285_v63, %s8664_s26  ;;  %14321 = vst [vmem:[#allocation107_spill] sm:$0xff] %v12384_v46  ;;  %v8376_v14 = vpop.eup %8375  ;;  %v12400_v50 = vadd.f32 %v11933_v11, %v4727_v60  ;;  %v4729_v30 = vmul.f32 %v8374_v6, %v11919_v51  ;;  %8401 = vtanh.f32 %v11873_v57 }
 0x4f8   : > { %14323 = vst [vmem:[#allocation109_spill] sm:$0xff] %v12395_v31  ;;  %v8378_v39 = vpop.eup %8377  ;;  %v12403_v21 = vpop.permute.xlu0 %5052  ;;  %v12413_v49 = vadd.f32 %v11933_v11, %v4728_v54  ;;  %v4730_v7 = vmul.f32 %v8376_v14, %v11919_v51 }
 0x4f9   : > { %14324 = vst [vmem:[#allocation110_spill] sm:$0xff] %v12400_v50  ;;  %14325 = vst [vmem:[#allocation111_spill] sm:$0xff] %v12403_v21  ;;  %v12407_v59 = vpop.permute.xlu1 %5054  ;;  %v8380_v38 = vpop.eup %8379  ;;  %v12418_v6 = vadd.f32 %v11933_v11, %v4729_v30  ;;  %v4731_v60 = vmul.f32 %v8378_v39, %v11919_v51 }
 0x4fa   : > { %5328 = vrot.lane.b32.xlu0 %v12296_v62, %s8664_s26  ;;  %14326 = vst [vmem:[#allocation112_spill] sm:$0xff] %v12407_v59  ;;  %14327 = vst [vmem:[#allocation113_spill] sm:$0xff] %v12413_v49  ;;  %v8382_v21 = vpop.eup %8381  ;;  %v12427_v5 = vadd.f32 %v11933_v11, %v4730_v7  ;;  %v4732_v54 = vmul.f32 %v8380_v38, %v11919_v51 }
 0x4fb   : > { %5330 = vrot.lane.b32.xlu1 %v12301_v48, %s8664_s26  ;;  %14328 = vst [vmem:[#allocation114_spill] sm:$0xff] %v12418_v6  ;;  %v8384_v14 = vpop.eup %8383  ;;  %v12434_v30 = vadd.f32 %v11933_v11, %v4731_v60  ;;  %v4733_v39 = vmul.f32 %v8382_v21, %v11919_v51 }
 0x4fc   : > { %14329 = vst [vmem:[#allocation115_spill] sm:$0xff] %v12427_v5  ;;  %v12430_v56 = vpop.permute.xlu0 %5056  ;;  %v8386_v20 = vpop.eup %8385  ;;  %v12445_v41 = vadd.f32 %v11933_v11, %v4732_v54  ;;  %v4734_v37 = vmul.f32 %v8384_v14, %v11919_v51 }
 0x4fd   : > { %14330 = vst [vmem:[#allocation116_spill] sm:$0xff] %v12430_v56  ;;  %14331 = vst [vmem:[#allocation117_spill] sm:$0xff] %v12434_v30  ;;  %v12437_v59 = vpop.permute.xlu1 %5058  ;;  %v8388_v7 = vpop.eup %8387  ;;  %v12450_v21 = vadd.f32 %v11933_v11, %v4733_v39  ;;  %v4735_v38 = vmul.f32 %v8386_v20, %v11919_v51 }
 0x4fe   : > { %5332 = vrot.lane.b32.xlu0 %v12314_v27, %s8664_s26  ;;  %14332 = vst [vmem:[#allocation118_spill] sm:$0xff] %v12437_v59  ;;  %14333 = vst [vmem:[#allocation119_spill] sm:$0xff] %v12445_v41  ;;  %v8390_v60 = vpop.eup %8389  ;;  %v12462_v54 = vadd.f32 %v11933_v11, %v4734_v37  ;;  %v4736_v57 = vmul.f32 %v8388_v7, %v11919_v51 }
 0x4ff   : > { %5334 = vrot.lane.b32.xlu1 %v12319_v42, %s8664_s26  ;;  %14334 = vst [vmem:[#allocation120_spill] sm:$0xff] %v12450_v21  ;;  %v8392_v14 = vpop.eup %8391  ;;  %v12466_v39 = vadd.f32 %v11933_v11, %v4735_v38  ;;  %v4737_v20 = vmul.f32 %v8390_v60, %v11919_v51 }
 0x500   : > { %v12453_v59 = vpop.permute.xlu0 %5060  ;;  %14337 = vst [vmem:[#allocation123_spill] sm:$0xff] %v12462_v54  ;;  %v4738_v37 = vmul.f32 %v8392_v14, %v11919_v51 }
 0x501   : > { %14335 = vst [vmem:[#allocation121_spill] sm:$0xff] %v12453_v59  ;;  %v12457_v4 = vpop.permute.xlu1 %5062  ;;  %14338 = vst [vmem:[#allocation124_spill] sm:$0xff] %v12466_v39  ;;  %v8394_v59 = vpop.eup %8393  ;;  %v12480_v38 = vadd.f32 %v11933_v11, %v4737_v20 }
 0x502   : > { %5336 = vrot.lane.b32.xlu0 %v12326_v58, %s8664_s26  ;;  %14336 = vst [vmem:[#allocation122_spill] sm:$0xff] %v12457_v4  ;;  %v12474_v4 = vadd.f32 %v11933_v11, %v4736_v57  ;;  %v8396_v7 = vpop.eup %8395  ;;  %v4739_v60 = vmul.f32 %v8394_v59, %v11919_v51  ;;  %v12490_v57 = vadd.f32 %v11933_v11, %v4738_v37 }
 0x503   : > { %5338 = vrot.lane.b32.xlu1 %v12333_v33, %s8664_s26  ;;  %14341 = vst [vmem:[#allocation127_spill] sm:$0xff] %v12480_v38  ;;  %v8398_v25 = vpop.eup %8397  ;;  %v4740_v14 = vmul.f32 %v8396_v7, %v11919_v51 }
 0x504   : > { %14339 = vst [vmem:[#allocation125_spill] sm:$0xff] %v12474_v4  ;;  %v12477_v56 = vpop.permute.xlu0 %5064  ;;  %14343 = vst [vmem:[#allocation129_spill] sm:$0xff] %v12490_v57  ;;  %v8400_v15 = vpop.eup %8399  ;;  %v12494_v20 = vadd.f32 %v11933_v11, %v4739_v60  ;;  %v4741_v59 = vmul.f32 %v8398_v25, %v11919_v51 }
 0x505   : > { %14340 = vst [vmem:[#allocation126_spill] sm:$0xff] %v12477_v56  ;;  %v12483_v0 = vpop.permute.xlu1 %5066  ;;  %v12502_v37 = vadd.f32 %v11933_v11, %v4740_v14  ;;  %v4742_v7 = vmul.f32 %v8400_v15, %v11919_v51 }
 0x506   : > { %5340 = vrot.lane.b32.xlu0 %v12344_v28, %s8664_s26  ;;  %14342 = vst [vmem:[#allocation128_spill] sm:$0xff] %v12483_v0  ;;  %14344 = vst [vmem:[#allocation130_spill] sm:$0xff] %v12494_v20 }
 0x507   : > { %5342 = vrot.lane.b32.xlu1 %v12349_v13, %s8664_s26  ;;  %14345 = vst [vmem:[#allocation131_spill] sm:$0xff] %v12502_v37 }
 0x50a   : > { %5344 = vrot.lane.b32.xlu0 %v12363_v2, %s8664_s26 }
 0x50b   : > { %5346 = vrot.lane.b32.xlu1 %v12368_v23, %s8664_s26 }
 0x50e   : > { %5348 = vrot.lane.b32.xlu0 %v12377_v3, %s8664_s26 }
 0x50f   : > { %5350 = vrot.lane.b32.xlu1 %v12384_v46, %s8664_s26 }
 0x512   : > { %5352 = vrot.lane.b32.xlu0 %v12395_v31, %s8664_s26 }
 0x513   : > { %5354 = vrot.lane.b32.xlu1 %v12400_v50, %s8664_s26 }
 0x516   : > { %5356 = vrot.lane.b32.xlu0 %v12413_v49, %s8664_s26 }
 0x517   : > { %5358 = vrot.lane.b32.xlu1 %v12418_v6, %s8664_s26 }
 0x51a   : > { %5360 = vrot.lane.b32.xlu0 %v12427_v5, %s8664_s26 }
 0x51b   : > { %5362 = vrot.lane.b32.xlu1 %v12434_v30, %s8664_s26 }
 0x51e   : > { %5364 = vrot.lane.b32.xlu0 %v12445_v41, %s8664_s26 }
 0x51f   : > { %5366 = vrot.lane.b32.xlu1 %v12450_v21, %s8664_s26 }
 0x522   : > { %5368 = vrot.lane.b32.xlu0 %v12462_v54, %s8664_s26  ;;  %v14351_v54 = vld [vmem:[#allocation57_spill] sm:$0xff] }
 0x523   : > { %5370 = vrot.lane.b32.xlu1 %v12466_v39, %s8664_s26  ;;  %v8402_v39 = vpop.eup %8401 }
 0x524   : > { %v4743_v60 = vmul.f32 %v8402_v39, %v11919_v51 }
 0x526   : > { %5372 = vrot.lane.b32.xlu0 %v12474_v4, %s8664_s26  ;;  %v12506_v4 = vadd.f32 %v11933_v11, %v4741_v59  ;;  %v14349_v59 = vld [vmem:[#allocation19_spill] sm:$0xff] }
 0x527   : > { %5374 = vrot.lane.b32.xlu1 %v12480_v38, %s8664_s26 }
 0x528   : > { %v5261_v56 = vpop.permute.xlu0 %5260  ;;  %14346 = vst [vmem:[#allocation132_spill] sm:$0xff] %v12506_v4 }
 0x529   : > { %v5263_v0 = vpop.permute.xlu1 %5262  ;;  %v5452_v51 = vmul.f32 %v5261_v56, %v11954_v35 }
 0x52a   : > { %5376 = vrot.lane.b32.xlu0 %v12490_v57, %s8664_s26  ;;  %v12517_v57 = vadd.f32 %v11933_v11, %v4743_v60 }
 0x52b   : > { %5378 = vrot.lane.b32.xlu1 %v12494_v20, %s8664_s26  ;;  %v12514_v20 = vadd.f32 %v11933_v11, %v4742_v7  ;;  %v14350_v7 = vld [vmem:[#allocation62_spill] sm:$0xff] }
 0x52c   : > { %v5265_v38 = vpop.permute.xlu0 %5264  ;;  %14348 = vst [vmem:[#allocation134_spill] sm:$0xff] %v12517_v57 }
 0x52d   : > { %v5267_v25 = vpop.permute.xlu1 %5266  ;;  %14347 = vst [vmem:[#allocation133_spill] sm:$0xff] %v12514_v20  ;;  %v5454_v11 = vmul.f32 %v5265_v38, %v14350_v7  ;;  %v14355_v7 = vld [vmem:[#allocation10_spill] sm:$0xff] }
 0x52e   : > { %5380 = vrot.lane.b32.xlu0 %v12502_v37, %s8664_s26  ;;  %v5453_v37 = vmul.f32 %v5263_v0, %v14349_v59  ;;  %v5455_v21 = vmul.f32 %v5267_v25, %v14351_v54 }
 0x52f   : > { %5382 = vrot.lane.b32.xlu1 %v12506_v4, %s8664_s26 }
 0x530   : > { %v5269_v14 = vpop.permute.xlu0 %5268 }
 0x531   : > { %v5271_v15 = vpop.permute.xlu1 %5270 }
 0x532   : > { %5384 = vrot.lane.b32.xlu0 %v12514_v20, %s8664_s26  ;;  %v14353_v20 = vld [vmem:[#allocation34_spill] sm:$0xff] }
 0x533   : > { %5386 = vrot.lane.b32.xlu1 %v12517_v57, %s8664_s26  ;;  %v14352_v57 = vld [vmem:[#allocation22_spill] sm:$0xff]  ;;  %v5457_v0 = vmul.f32 %v5271_v15, %v14353_v20 }
 0x534   : > { %v5273_v39 = vpop.permute.xlu0 %5272  ;;  %v5456_v56 = vmul.f32 %v5269_v14, %v14352_v57 }
 0x535   : > { %v5275_v4 = vpop.permute.xlu1 %5274 }
 0x536   : > { %5580 = vrot.lane.b32.xlu0 %v5452_v51, %s8663_s25  ;;  %v5459_v25 = vmul.f32 %v5275_v4, %v14355_v7 }
 0x537   : > { %5582 = vrot.lane.b32.xlu1 %v5453_v37, %s8663_s25  ;;  %v14354_v37 = vld [vmem:[#allocation61_spill] sm:$0xff] }
 0x538   : > { %v5277_v60 = vpop.permute.xlu0 %5276  ;;  %v5458_v38 = vmul.f32 %v5273_v39, %v14354_v37 }
 0x539   : > { %v5279_v41 = vpop.permute.xlu1 %5278 }
 0x53a   : > { %5584 = vrot.lane.b32.xlu0 %v5454_v11, %s8663_s25  ;;  %v5461_v15 = vmul.f32 %v5279_v41, %v12067_v1 }
 0x53b   : > { %5586 = vrot.lane.b32.xlu1 %v5455_v21, %s8663_s25  ;;  %v5460_v21 = vmul.f32 %v5277_v60, %v12060_v52 }
 0x53c   : > { %v5281_v35 = vpop.permute.xlu0 %5280 }
 0x53d   : > { %v5283_v59 = vpop.permute.xlu1 %5282  ;;  %v5462_v39 = vmul.f32 %v5281_v35, %v12086_v61 }
 0x53e   : > { %5588 = vrot.lane.b32.xlu0 %v5456_v56, %s8663_s25  ;;  %v5463_v4 = vmul.f32 %v5283_v59, %v12091_v43 }
 0x53f   : > { %5590 = vrot.lane.b32.xlu1 %v5457_v0, %s8663_s25 }
 0x540   : > { %v5285_v51 = vpop.permute.xlu0 %5284 }
 0x541   : > { %v5287_v54 = vpop.permute.xlu1 %5286  ;;  %v5464_v60 = vmul.f32 %v5285_v51, %v12110_v29 }
 0x542   : > { %5592 = vrot.lane.b32.xlu0 %v5458_v38, %s8663_s25  ;;  %v5465_v41 = vmul.f32 %v5287_v54, %v12115_v24 }
 0x543   : > { %5594 = vrot.lane.b32.xlu1 %v5459_v25, %s8663_s25 }
 0x544   : > { %v5289_v14 = vpop.permute.xlu0 %5288 }
 0x545   : > { %v5291_v11 = vpop.permute.xlu1 %5290  ;;  %v5466_v35 = vmul.f32 %v5289_v14, %v12130_v8 }
 0x546   : > { %5596 = vrot.lane.b32.xlu0 %v5460_v21, %s8663_s25  ;;  %v5467_v59 = vmul.f32 %v5291_v11, %v12137_v44 }
 0x547   : > { %5598 = vrot.lane.b32.xlu1 %v5461_v15, %s8663_s25 }
 0x548   : > { %v5293_v56 = vpop.permute.xlu0 %5292 }
 0x549   : > { %v5295_v0 = vpop.permute.xlu1 %5294  ;;  %v5468_v51 = vmul.f32 %v5293_v56, %v12148_v10 }
 0x54a   : > { %5600 = vrot.lane.b32.xlu0 %v5462_v39, %s8663_s25  ;;  %v5469_v54 = vmul.f32 %v5295_v0, %v12153_v18 }
 0x54b   : > { %5602 = vrot.lane.b32.xlu1 %v5463_v4, %s8663_s25 }
 0x54c   : > { %v5297_v38 = vpop.permute.xlu0 %5296 }
 0x54d   : > { %v5299_v25 = vpop.permute.xlu1 %5298  ;;  %v5470_v14 = vmul.f32 %v5297_v38, %v12166_v45 }
 0x54e   : > { %5604 = vrot.lane.b32.xlu0 %v5464_v60, %s8663_s25  ;;  %v5471_v11 = vmul.f32 %v5299_v25, %v12171_v22 }
 0x54f   : > { %5606 = vrot.lane.b32.xlu1 %v5465_v41, %s8663_s25 }
 0x550   : > { %v5301_v21 = vpop.permute.xlu0 %5300 }
 0x551   : > { %v5303_v15 = vpop.permute.xlu1 %5302  ;;  %v5472_v56 = vmul.f32 %v5301_v21, %v12181_v47 }
 0x552   : > { %5608 = vrot.lane.b32.xlu0 %v5466_v35, %s8663_s25  ;;  %v5473_v0 = vmul.f32 %v5303_v15, %v12187_v26 }
 0x553   : > { %5610 = vrot.lane.b32.xlu1 %v5467_v59, %s8663_s25 }
 0x554   : > { %v5305_v39 = vpop.permute.xlu0 %5304 }
 0x555   : > { %v5307_v4 = vpop.permute.xlu1 %5306  ;;  %v5474_v38 = vmul.f32 %v5305_v39, %v12196_v55 }
 0x556   : > { %5612 = vrot.lane.b32.xlu0 %v5468_v51, %s8663_s25  ;;  %v5475_v25 = vmul.f32 %v5307_v4, %v12201_v19 }
 0x557   : > { %5614 = vrot.lane.b32.xlu1 %v5469_v54, %s8663_s25 }
 0x558   : > { %v5309_v60 = vpop.permute.xlu0 %5308 }
 0x559   : > { %v5311_v41 = vpop.permute.xlu1 %5310  ;;  %v5476_v21 = vmul.f32 %v5309_v60, %v12214_v16 }
 0x55a   : > { %5616 = vrot.lane.b32.xlu0 %v5470_v14, %s8663_s25  ;;  %v5477_v15 = vmul.f32 %v5311_v41, %v12219_v36 }
 0x55b   : > { %5618 = vrot.lane.b32.xlu1 %v5471_v11, %s8663_s25 }
 0x55c   : > { %v5313_v35 = vpop.permute.xlu0 %5312 }
 0x55d   : > { %v5315_v59 = vpop.permute.xlu1 %5314  ;;  %v5478_v39 = vmul.f32 %v5313_v35, %v12230_v34 }
 0x55e   : > { %5620 = vrot.lane.b32.xlu0 %v5472_v56, %s8663_s25  ;;  %v5479_v4 = vmul.f32 %v5315_v59, %v12237_v32 }
 0x55f   : > { %5622 = vrot.lane.b32.xlu1 %v5473_v0, %s8663_s25 }
 0x560   : > { %v5317_v51 = vpop.permute.xlu0 %5316 }
 0x561   : > { %v5319_v54 = vpop.permute.xlu1 %5318  ;;  %v5480_v60 = vmul.f32 %v5317_v51, %v12246_v17 }
 0x562   : > { %5624 = vrot.lane.b32.xlu0 %v5474_v38, %s8663_s25  ;;  %v5481_v41 = vmul.f32 %v5319_v54, %v12251_v12 }
 0x563   : > { %5626 = vrot.lane.b32.xlu1 %v5475_v25, %s8663_s25 }
 0x564   : > { %v5321_v14 = vpop.permute.xlu0 %5320 }
 0x565   : > { %v5323_v11 = vpop.permute.xlu1 %5322  ;;  %v5482_v35 = vmul.f32 %v5321_v14, %v12264_v53 }
 0x566   : > { %5628 = vrot.lane.b32.xlu0 %v5476_v21, %s8663_s25  ;;  %v5483_v59 = vmul.f32 %v5323_v11, %v12269_v9 }
 0x567   : > { %5630 = vrot.lane.b32.xlu1 %v5477_v15, %s8663_s25 }
 0x568   : > { %v5325_v56 = vpop.permute.xlu0 %5324 }
 0x569   : > { %v5327_v0 = vpop.permute.xlu1 %5326  ;;  %v5484_v51 = vmul.f32 %v5325_v56, %v12278_v40 }
 0x56a   : > { %5632 = vrot.lane.b32.xlu0 %v5478_v39, %s8663_s25  ;;  %v5485_v54 = vmul.f32 %v5327_v0, %v12285_v63 }
 0x56b   : > { %5634 = vrot.lane.b32.xlu1 %v5479_v4, %s8663_s25 }
 0x56c   : > { %v5329_v38 = vpop.permute.xlu0 %5328 }
 0x56d   : > { %v5331_v25 = vpop.permute.xlu1 %5330  ;;  %v5486_v14 = vmul.f32 %v5329_v38, %v12296_v62 }
 0x56e   : > { %5636 = vrot.lane.b32.xlu0 %v5480_v60, %s8663_s25  ;;  %v5487_v11 = vmul.f32 %v5331_v25, %v12301_v48 }
 0x56f   : > { %5638 = vrot.lane.b32.xlu1 %v5481_v41, %s8663_s25 }
 0x570   : > { %v5333_v21 = vpop.permute.xlu0 %5332 }
 0x571   : > { %v5335_v15 = vpop.permute.xlu1 %5334  ;;  %v5488_v56 = vmul.f32 %v5333_v21, %v12314_v27 }
 0x572   : > { %5640 = vrot.lane.b32.xlu0 %v5482_v35, %s8663_s25  ;;  %v5489_v0 = vmul.f32 %v5335_v15, %v12319_v42 }
 0x573   : > { %5642 = vrot.lane.b32.xlu1 %v5483_v59, %s8663_s25 }
 0x574   : > { %v5337_v39 = vpop.permute.xlu0 %5336 }
 0x575   : > { %v5339_v4 = vpop.permute.xlu1 %5338  ;;  %v5490_v38 = vmul.f32 %v5337_v39, %v12326_v58 }
 0x576   : > { %5644 = vrot.lane.b32.xlu0 %v5484_v51, %s8663_s25  ;;  %v5491_v25 = vmul.f32 %v5339_v4, %v12333_v33 }
 0x577   : > { %5646 = vrot.lane.b32.xlu1 %v5485_v54, %s8663_s25 }
 0x578   : > { %v5341_v60 = vpop.permute.xlu0 %5340 }
 0x579   : > { %v5343_v41 = vpop.permute.xlu1 %5342  ;;  %v5492_v21 = vmul.f32 %v5341_v60, %v12344_v28 }
 0x57a   : > { %5648 = vrot.lane.b32.xlu0 %v5486_v14, %s8663_s25  ;;  %v5493_v15 = vmul.f32 %v5343_v41, %v12349_v13 }
 0x57b   : > { %5650 = vrot.lane.b32.xlu1 %v5487_v11, %s8663_s25 }
 0x57c   : > { %v5345_v35 = vpop.permute.xlu0 %5344 }
 0x57d   : > { %v5347_v59 = vpop.permute.xlu1 %5346  ;;  %v5494_v39 = vmul.f32 %v5345_v35, %v12363_v2 }
 0x57e   : > { %5652 = vrot.lane.b32.xlu0 %v5488_v56, %s8663_s25  ;;  %v5495_v4 = vmul.f32 %v5347_v59, %v12368_v23 }
 0x57f   : > { %5654 = vrot.lane.b32.xlu1 %v5489_v0, %s8663_s25 }
 0x580   : > { %v5349_v51 = vpop.permute.xlu0 %5348 }
 0x581   : > { %v5351_v54 = vpop.permute.xlu1 %5350  ;;  %v5496_v60 = vmul.f32 %v5349_v51, %v12377_v3 }
 0x582   : > { %5656 = vrot.lane.b32.xlu0 %v5490_v38, %s8663_s25  ;;  %v5497_v41 = vmul.f32 %v5351_v54, %v12384_v46 }
 0x583   : > { %5658 = vrot.lane.b32.xlu1 %v5491_v25, %s8663_s25 }
 0x584   : > { %v5353_v14 = vpop.permute.xlu0 %5352 }
 0x585   : > { %v5355_v11 = vpop.permute.xlu1 %5354  ;;  %v5498_v35 = vmul.f32 %v5353_v14, %v12395_v31 }
 0x586   : > { %5660 = vrot.lane.b32.xlu0 %v5492_v21, %s8663_s25  ;;  %v5499_v59 = vmul.f32 %v5355_v11, %v12400_v50  ;;  %v14368_v50 = vld [vmem:[#allocation31_spill] sm:$0xff] }
 0x587   : > { %5662 = vrot.lane.b32.xlu1 %v5493_v15, %s8663_s25 }
 0x588   : > { %v5357_v56 = vpop.permute.xlu0 %5356 }
 0x589   : > { %v5359_v0 = vpop.permute.xlu1 %5358  ;;  %v5500_v51 = vmul.f32 %v5357_v56, %v12413_v49  ;;  %v14357_v49 = vld [vmem:[#allocation120_spill] sm:$0xff] }
 0x58a   : > { %5664 = vrot.lane.b32.xlu0 %v5494_v39, %s8663_s25  ;;  %v5501_v54 = vmul.f32 %v5359_v0, %v12418_v6 }
 0x58b   : > { %5666 = vrot.lane.b32.xlu1 %v5495_v4, %s8663_s25 }
 0x58c   : > { %v5361_v38 = vpop.permute.xlu0 %5360 }
 0x58d   : > { %v5363_v25 = vpop.permute.xlu1 %5362  ;;  %v5502_v14 = vmul.f32 %v5361_v38, %v12427_v5  ;;  %v14359_v5 = vld [vmem:[#allocation124_spill] sm:$0xff] }
 0x58e   : > { %5668 = vrot.lane.b32.xlu0 %v5496_v60, %s8663_s25  ;;  %v5503_v11 = vmul.f32 %v5363_v25, %v12434_v30 }
 0x58f   : > { %5670 = vrot.lane.b32.xlu1 %v5497_v41, %s8663_s25 }
 0x590   : > { %v5365_v21 = vpop.permute.xlu0 %5364 }
 0x591   : > { %v5367_v15 = vpop.permute.xlu1 %5366 }
 0x592   : > { %5672 = vrot.lane.b32.xlu0 %v5498_v35, %s8663_s25  ;;  %v14356_v35 = vld [vmem:[#allocation119_spill] sm:$0xff]  ;;  %v5505_v0 = vmul.f32 %v5367_v15, %v14357_v49 }
 0x593   : > { %5674 = vrot.lane.b32.xlu1 %v5499_v59, %s8663_s25  ;;  %v5504_v56 = vmul.f32 %v5365_v21, %v14356_v35  ;;  %v14361_v35 = vld [vmem:[#allocation127_spill] sm:$0xff] }
 0x594   : > { %v5369_v39 = vpop.permute.xlu0 %5368 }
 0x595   : > { %v5371_v4 = vpop.permute.xlu1 %5370 }
 0x596   : > { %5676 = vrot.lane.b32.xlu0 %v5500_v51, %s8663_s25  ;;  %v14358_v51 = vld [vmem:[#allocation123_spill] sm:$0xff]  ;;  %v5507_v25 = vmul.f32 %v5371_v4, %v14359_v5 }
 0x597   : > { %5678 = vrot.lane.b32.xlu1 %v5501_v54, %s8663_s25  ;;  %v5506_v38 = vmul.f32 %v5369_v39, %v14358_v51  ;;  %v14363_v51 = vld [vmem:[#allocation130_spill] sm:$0xff] }
 0x598   : > { %v5373_v60 = vpop.permute.xlu0 %5372 }
 0x599   : > { %v5375_v41 = vpop.permute.xlu1 %5374 }
 0x59a   : > { %5680 = vrot.lane.b32.xlu0 %v5502_v14, %s8663_s25  ;;  %v14360_v14 = vld [vmem:[#allocation125_spill] sm:$0xff]  ;;  %v5509_v15 = vmul.f32 %v5375_v41, %v14361_v35 }
 0x59b   : > { %5682 = vrot.lane.b32.xlu1 %v5503_v11, %s8663_s25  ;;  %v5508_v21 = vmul.f32 %v5373_v60, %v14360_v14  ;;  %v14365_v14 = vld [vmem:[#allocation132_spill] sm:$0xff] }
 0x59c   : > { %v5377_v59 = vpop.permute.xlu0 %5376 }
 0x59d   : > { %v5379_v6 = vpop.permute.xlu1 %5378 }
 0x59e   : > { %5684 = vrot.lane.b32.xlu0 %v5504_v56, %s8663_s25  ;;  %v14362_v56 = vld [vmem:[#allocation129_spill] sm:$0xff]  ;;  %v5511_v4 = vmul.f32 %v5379_v6, %v14363_v51 }
 0x59f   : > { %5686 = vrot.lane.b32.xlu1 %v5505_v0, %s8663_s25  ;;  %v5510_v39 = vmul.f32 %v5377_v59, %v14362_v56  ;;  %v14367_v56 = vld [vmem:[#allocation134_spill] sm:$0xff] }
 0x5a0   : > { %v5381_v54 = vpop.permute.xlu0 %5380 }
 0x5a1   : > { %v5383_v30 = vpop.permute.xlu1 %5382 }
 0x5a2   : > { %5688 = vrot.lane.b32.xlu0 %v5506_v38, %s8663_s25  ;;  %v14364_v38 = vld [vmem:[#allocation131_spill] sm:$0xff]  ;;  %v5513_v41 = vmul.f32 %v5383_v30, %v14365_v14  ;;  %v14373_v14 = vld [vmem:[#allocation28_spill] sm:$0xff] }
 0x5a3   : > { %5690 = vrot.lane.b32.xlu1 %v5507_v25, %s8663_s25  ;;  %v5512_v60 = vmul.f32 %v5381_v54, %v14364_v38  ;;  %v14370_v54 = vld [vmem:[#allocation19_spill] sm:$0xff] }
 0x5a4   : > { %v5385_v11 = vpop.permute.xlu0 %5384 }
 0x5a5   : > { %v5387_v49 = vpop.permute.xlu1 %5386 }
 0x5a6   : > { %5692 = vrot.lane.b32.xlu0 %v5508_v21, %s8663_s25  ;;  %v14366_v21 = vld [vmem:[#allocation133_spill] sm:$0xff]  ;;  %v5515_v6 = vmul.f32 %v5387_v49, %v14367_v56 }
 0x5a7   : > { %5694 = vrot.lane.b32.xlu1 %v5509_v15, %s8663_s25  ;;  %v5514_v59 = vmul.f32 %v5385_v11, %v14366_v21  ;;  %v14372_v21 = vld [vmem:[#allocation62_spill] sm:$0xff] }
 0x5a8   : > { %v5581_v0 = vpop.permute.xlu0 %5580  ;;  %v5134_v49 = vmul.f32 %v14373_v14, %v14372_v21  ;;  %v14377_v14 = vld [vmem:[#allocation16_spill] sm:$0xff] }
 0x5a9   : > { %v5583_v5 = vpop.permute.xlu1 %5582  ;;  %v5137_v21 = vmul.f32 %v14377_v14, %v14353_v20 }
 0x5aa   : > { %5696 = vrot.lane.b32.xlu0 %v5510_v39, %s8663_s25  ;;  %v14369_v39 = vld [vmem:[#allocation68_spill] sm:$0xff] }
 0x5ab   : > { %5698 = vrot.lane.b32.xlu1 %v5511_v4, %s8663_s25  ;;  %v5132_v31 = vmul.f32 %v14369_v39, %v14368_v50  ;;  %v14371_v4 = vld [vmem:[#allocation17_spill] sm:$0xff]  ;;  %v14375_v50 = vld [vmem:[#allocation40_spill] sm:$0xff] }
 0x5ac   : > { %v5585_v25 = vpop.permute.xlu0 %5584  ;;  %v5133_v38 = vmul.f32 %v14371_v4, %v14370_v54  ;;  %v14374_v39 = vld [vmem:[#allocation57_spill] sm:$0xff] }
 0x5ad   : > { %v5587_v35 = vpop.permute.xlu1 %5586  ;;  %v12655_v30 = vadd.f32 %v5581_v0, %v5132_v31  ;;  %v12667_v4 = vadd.f32 %v5585_v25, %v5134_v49 }
 0x5ae   : > { %5700 = vrot.lane.b32.xlu0 %v5512_v60, %s8663_s25 }
 0x5af   : > { %5702 = vrot.lane.b32.xlu1 %v5513_v41, %s8663_s25  ;;  %v12657_v41 = vadd.f32 %v5583_v5, %v5133_v38  ;;  %v14376_v38 = vld [vmem:[#allocation51_spill] sm:$0xff]  ;;  %8403 = vtanh.f32 %v12655_v30 }
 0x5b0   : > { %v5589_v15 = vpop.permute.xlu0 %5588 }
 0x5b1   : > { %v5591_v51 = vpop.permute.xlu1 %5590  ;;  %8405 = vtanh.f32 %v12657_v41 }
 0x5b2   : > { %5704 = vrot.lane.b32.xlu0 %v5514_v59, %s8663_s25  ;;  %v5135_v59 = vmul.f32 %v14375_v50, %v14374_v39  ;;  %v12681_v49 = vadd.f32 %v5591_v51, %v5137_v21  ;;  %v14380_v21 = vld [vmem:[#allocation53_spill] sm:$0xff]  ;;  %8407 = vtanh.f32 %v12667_v4 }
 0x5b3   : > { %5706 = vrot.lane.b32.xlu1 %v5515_v6, %s8663_s25  ;;  %v5136_v6 = vmul.f32 %v14376_v38, %v14352_v57  ;;  %v14379_v38 = vld [vmem:[#allocation39_spill] sm:$0xff]  ;;  %v5140_v20 = vmul.f32 %v14380_v21, %v12060_v52 }
 0x5b4   : > { %v5593_v60 = vpop.permute.xlu0 %5592  ;;  %v12669_v0 = vadd.f32 %v5587_v35, %v5135_v59  ;;  %v14378_v59 = vld [vmem:[#allocation27_spill] sm:$0xff]  ;;  %v5139_v57 = vmul.f32 %v14379_v38, %v14355_v7 }
 0x5b5   : > { %v5595_v11 = vpop.permute.xlu1 %5594  ;;  %v12679_v50 = vadd.f32 %v5589_v15, %v5136_v6  ;;  %v5138_v39 = vmul.f32 %v14378_v59, %v14354_v37  ;;  %v14381_v59 = vld [vmem:[#allocation59_spill] sm:$0xff] }
 0x5b6   : > { %6284 = vrot.lane.b32.xlu0 %v12655_v30, %s8665_s27  ;;  %v12693_v6 = vadd.f32 %v5595_v11, %v5139_v57  ;;  %v5141_v37 = vmul.f32 %v14381_v59, %v12067_v1  ;;  %v14382_v11 = vld [vmem:[#allocation30_spill] sm:$0xff]  ;;  %v14383_v21 = vld [vmem:[#allocation55_spill] sm:$0xff]  ;;  %8409 = vtanh.f32 %v12669_v0 }
 0x5b7   : > { %6286 = vrot.lane.b32.xlu1 %v12657_v41, %s8665_s27  ;;  %v12691_v14 = vadd.f32 %v5593_v60, %v5138_v39  ;;  %v5142_v7 = vmul.f32 %v14382_v11, %v12086_v61  ;;  %v5143_v52 = vmul.f32 %v14383_v21, %v12091_v43  ;;  %v14385_v11 = vld [vmem:[#allocation41_spill] sm:$0xff]  ;;  %v14462_v30 = vld [vmem:[#allocation122_spill] sm:$0xff]  ;;  %8411 = vtanh.f32 %v12679_v50 }
 0x5b8   : > { %v5597_v31 = vpop.permute.xlu0 %5596  ;;  %v5145_v61 = vmul.f32 %v14385_v11, %v12115_v24  ;;  %8413 = vtanh.f32 %v12681_v49 }
 0x5b9   : > { %v5599_v5 = vpop.permute.xlu1 %5598  ;;  %v12703_v38 = vadd.f32 %v5597_v31, %v5140_v20  ;;  %8415 = vtanh.f32 %v12691_v14 }
 0x5ba   : > { %6288 = vrot.lane.b32.xlu0 %v12667_v4, %s8665_s27  ;;  %v12705_v39 = vadd.f32 %v5599_v5, %v5141_v37  ;;  %v14384_v5 = vld [vmem:[#allocation44_spill] sm:$0xff]  ;;  %8417 = vtanh.f32 %v12693_v6 }
 0x5bb   : > { %6290 = vrot.lane.b32.xlu1 %v12669_v0, %s8665_s27  ;;  %v5144_v1 = vmul.f32 %v14384_v5, %v12110_v29  ;;  %v14387_v5 = vld [vmem:[#allocation42_spill] sm:$0xff]  ;;  %v14465_v4 = vld [vmem:[#allocation128_spill] sm:$0xff]  ;;  %8419 = vtanh.f32 %v12703_v38 }
 0x5bc   : > { %v5601_v25 = vpop.permute.xlu0 %5600  ;;  %v5147_v29 = vmul.f32 %v14387_v5, %v12137_v44  ;;  %8421 = vtanh.f32 %v12705_v39 }
 0x5bd   : > { %v5603_v35 = vpop.permute.xlu1 %5602  ;;  %v12715_v59 = vadd.f32 %v5601_v25, %v5142_v7 }
 0x5be   : > { %6292 = vrot.lane.b32.xlu0 %v12679_v50, %s8665_s27  ;;  %v12717_v31 = vadd.f32 %v5603_v35, %v5143_v52  ;;  %v14386_v35 = vld [vmem:[#allocation9_spill] sm:$0xff] }
 0x5bf   : > { %6294 = vrot.lane.b32.xlu1 %v12681_v49, %s8665_s27  ;;  %v5146_v43 = vmul.f32 %v14386_v35, %v12130_v8  ;;  %v14389_v35 = vld [vmem:[#allocation54_spill] sm:$0xff]  ;;  %8423 = vtanh.f32 %v12715_v59 }
 0x5c0   : > { %v5605_v15 = vpop.permute.xlu0 %5604  ;;  %v5149_v8 = vmul.f32 %v14389_v35, %v12153_v18  ;;  %8425 = vtanh.f32 %v12717_v31 }
 0x5c1   : > { %v5607_v51 = vpop.permute.xlu1 %5606  ;;  %v12727_v21 = vadd.f32 %v5605_v15, %v5144_v1 }
 0x5c2   : > { %6296 = vrot.lane.b32.xlu0 %v12691_v14, %s8665_s27  ;;  %v12729_v25 = vadd.f32 %v5607_v51, %v5145_v61  ;;  %v14388_v51 = vld [vmem:[#allocation7_spill] sm:$0xff] }
 0x5c3   : > { %6298 = vrot.lane.b32.xlu1 %v12693_v6, %s8665_s27  ;;  %v5148_v24 = vmul.f32 %v14388_v51, %v12148_v10  ;;  %v14391_v51 = vld [vmem:[#allocation29_spill] sm:$0xff]  ;;  %8427 = vtanh.f32 %v12727_v21 }
 0x5c4   : > { %v5609_v60 = vpop.permute.xlu0 %5608  ;;  %v5151_v10 = vmul.f32 %v14391_v51, %v12171_v22  ;;  %8429 = vtanh.f32 %v12729_v25 }
 0x5c5   : > { %v5611_v57 = vpop.permute.xlu1 %5610  ;;  %v12739_v11 = vadd.f32 %v5609_v60, %v5146_v43 }
 0x5c6   : > { %6300 = vrot.lane.b32.xlu0 %v12703_v38, %s8665_s27  ;;  %v12741_v15 = vadd.f32 %v5611_v57, %v5147_v29  ;;  %v14390_v57 = vld [vmem:[#allocation56_spill] sm:$0xff] }
 0x5c7   : > { %6302 = vrot.lane.b32.xlu1 %v12705_v39, %s8665_s27  ;;  %v5150_v44 = vmul.f32 %v14390_v57, %v12166_v45  ;;  %v14393_v57 = vld [vmem:[#allocation32_spill] sm:$0xff]  ;;  %8431 = vtanh.f32 %v12739_v11 }
 0x5c8   : > { %v5613_v20 = vpop.permute.xlu0 %5612  ;;  %v5153_v45 = vmul.f32 %v14393_v57, %v12187_v26  ;;  %8433 = vtanh.f32 %v12741_v15 }
 0x5c9   : > { %v5615_v37 = vpop.permute.xlu1 %5614  ;;  %v12751_v5 = vadd.f32 %v5613_v20, %v5148_v24 }
 0x5ca   : > { %6304 = vrot.lane.b32.xlu0 %v12715_v59, %s8665_s27  ;;  %v12753_v60 = vadd.f32 %v5615_v37, %v5149_v8  ;;  %v14392_v37 = vld [vmem:[#allocation20_spill] sm:$0xff] }
 0x5cb   : > { %6306 = vrot.lane.b32.xlu1 %v12717_v31, %s8665_s27  ;;  %v5152_v18 = vmul.f32 %v14392_v37, %v12181_v47  ;;  %v14395_v37 = vld [vmem:[#allocation43_spill] sm:$0xff] }
 0x5cc   : > { %v5617_v7 = vpop.permute.xlu0 %5616  ;;  %v5155_v47 = vmul.f32 %v14395_v37, %v12201_v19 }
 0x5cd   : > { %v5619_v52 = vpop.permute.xlu1 %5618  ;;  %v12763_v35 = vadd.f32 %v5617_v7, %v5150_v44 }
 0x5ce   : > { %6308 = vrot.lane.b32.xlu0 %v12727_v21, %s8665_s27  ;;  %v12765_v20 = vadd.f32 %v5619_v52, %v5151_v10  ;;  %v14394_v52 = vld [vmem:[#allocation50_spill] sm:$0xff] }
 0x5cf   : > { %6310 = vrot.lane.b32.xlu1 %v12729_v25, %s8665_s27  ;;  %v5154_v22 = vmul.f32 %v14394_v52, %v12196_v55  ;;  %v14397_v52 = vld [vmem:[#allocation8_spill] sm:$0xff] }
 0x5d0   : > { %v5621_v1 = vpop.permute.xlu0 %5620  ;;  %v5157_v55 = vmul.f32 %v14397_v52, %v12219_v36 }
 0x5d1   : > { %v5623_v61 = vpop.permute.xlu1 %5622  ;;  %v12775_v51 = vadd.f32 %v5621_v1, %v5152_v18 }
 0x5d2   : > { %6312 = vrot.lane.b32.xlu0 %v12739_v11, %s8665_s27  ;;  %v12777_v7 = vadd.f32 %v5623_v61, %v5153_v45  ;;  %v14396_v61 = vld [vmem:[#allocation58_spill] sm:$0xff] }
 0x5d3   : > { %6314 = vrot.lane.b32.xlu1 %v12741_v15, %s8665_s27  ;;  %v5156_v26 = vmul.f32 %v14396_v61, %v12214_v16  ;;  %v14399_v61 = vld [vmem:[#allocation11_spill] sm:$0xff] }
 0x5d4   : > { %v5625_v43 = vpop.permute.xlu0 %5624  ;;  %v5159_v16 = vmul.f32 %v14399_v61, %v12237_v32 }
 0x5d5   : > { %v5627_v29 = vpop.permute.xlu1 %5626  ;;  %v12787_v57 = vadd.f32 %v5625_v43, %v5154_v22 }
 0x5d6   : > { %6316 = vrot.lane.b32.xlu0 %v12751_v5, %s8665_s27  ;;  %v12789_v1 = vadd.f32 %v5627_v29, %v5155_v47  ;;  %v14398_v29 = vld [vmem:[#allocation46_spill] sm:$0xff] }
 0x5d7   : > { %6318 = vrot.lane.b32.xlu1 %v12753_v60, %s8665_s27  ;;  %v5158_v19 = vmul.f32 %v14398_v29, %v12230_v34  ;;  %v14401_v29 = vld [vmem:[#allocation45_spill] sm:$0xff] }
 0x5d8   : > { %v5629_v24 = vpop.permute.xlu0 %5628  ;;  %v5161_v34 = vmul.f32 %v14401_v29, %v12251_v12 }
 0x5d9   : > { %v5631_v8 = vpop.permute.xlu1 %5630  ;;  %v12799_v37 = vadd.f32 %v5629_v24, %v5156_v26 }
 0x5da   : > { %6320 = vrot.lane.b32.xlu0 %v12763_v35, %s8665_s27  ;;  %v12801_v43 = vadd.f32 %v5631_v8, %v5157_v55  ;;  %v14400_v8 = vld [vmem:[#allocation60_spill] sm:$0xff] }
 0x5db   : > { %6322 = vrot.lane.b32.xlu1 %v12765_v20, %s8665_s27  ;;  %v5160_v36 = vmul.f32 %v14400_v8, %v12246_v17  ;;  %v14403_v8 = vld [vmem:[#allocation48_spill] sm:$0xff] }
 0x5dc   : > { %v5633_v44 = vpop.permute.xlu0 %5632  ;;  %v5163_v17 = vmul.f32 %v14403_v8, %v12269_v9 }
 0x5dd   : > { %v5635_v10 = vpop.permute.xlu1 %5634  ;;  %v12811_v52 = vadd.f32 %v5633_v44, %v5158_v19 }
 0x5de   : > { %6324 = vrot.lane.b32.xlu0 %v12775_v51, %s8665_s27  ;;  %v12813_v24 = vadd.f32 %v5635_v10, %v5159_v16  ;;  %v14402_v10 = vld [vmem:[#allocation33_spill] sm:$0xff] }
 0x5df   : > { %6326 = vrot.lane.b32.xlu1 %v12777_v7, %s8665_s27  ;;  %v5162_v32 = vmul.f32 %v14402_v10, %v12264_v53  ;;  %v14405_v10 = vld [vmem:[#allocation47_spill] sm:$0xff] }
 0x5e0   : > { %v5637_v18 = vpop.permute.xlu0 %5636  ;;  %v5165_v53 = vmul.f32 %v14405_v10, %v12285_v63 }
 0x5e1   : > { %v5639_v45 = vpop.permute.xlu1 %5638  ;;  %v12823_v61 = vadd.f32 %v5637_v18, %v5160_v36 }
 0x5e2   : > { %6328 = vrot.lane.b32.xlu0 %v12787_v57, %s8665_s27  ;;  %v12825_v44 = vadd.f32 %v5639_v45, %v5161_v34  ;;  %v14404_v45 = vld [vmem:[#allocation36_spill] sm:$0xff] }
 0x5e3   : > { %6330 = vrot.lane.b32.xlu1 %v12789_v1, %s8665_s27  ;;  %v5164_v12 = vmul.f32 %v14404_v45, %v12278_v40  ;;  %v14407_v45 = vld [vmem:[#allocation66_spill] sm:$0xff] }
 0x5e4   : > { %v5641_v22 = vpop.permute.xlu0 %5640  ;;  %v5167_v40 = vmul.f32 %v14407_v45, %v12301_v48 }
 0x5e5   : > { %v5643_v47 = vpop.permute.xlu1 %5642  ;;  %v12835_v29 = vadd.f32 %v5641_v22, %v5162_v32 }
 0x5e6   : > { %6332 = vrot.lane.b32.xlu0 %v12799_v37, %s8665_s27  ;;  %v12837_v18 = vadd.f32 %v5643_v47, %v5163_v17  ;;  %v14406_v47 = vld [vmem:[#allocation23_spill] sm:$0xff] }
 0x5e7   : > { %6334 = vrot.lane.b32.xlu1 %v12801_v43, %s8665_s27  ;;  %v5166_v9 = vmul.f32 %v14406_v47, %v12296_v62  ;;  %v14409_v47 = vld [vmem:[#allocation65_spill] sm:$0xff] }
 0x5e8   : > { %v5645_v26 = vpop.permute.xlu0 %5644  ;;  %v5169_v62 = vmul.f32 %v14409_v47, %v12319_v42 }
 0x5e9   : > { %v5647_v55 = vpop.permute.xlu1 %5646  ;;  %v12847_v8 = vadd.f32 %v5645_v26, %v5164_v12 }
 0x5ea   : > { %6336 = vrot.lane.b32.xlu0 %v12811_v52, %s8665_s27  ;;  %v12849_v22 = vadd.f32 %v5647_v55, %v5165_v53  ;;  %v14408_v55 = vld [vmem:[#allocation49_spill] sm:$0xff] }
 0x5eb   : > { %6338 = vrot.lane.b32.xlu1 %v12813_v24, %s8665_s27  ;;  %v5168_v63 = vmul.f32 %v14408_v55, %v12314_v27  ;;  %v14411_v55 = vld [vmem:[#allocation70_spill] sm:$0xff] }
 0x5ec   : > { %v5649_v19 = vpop.permute.xlu0 %5648  ;;  %v5171_v27 = vmul.f32 %v14411_v55, %v12333_v33 }
 0x5ed   : > { %v5651_v16 = vpop.permute.xlu1 %5650  ;;  %v12859_v10 = vadd.f32 %v5649_v19, %v5166_v9 }
 0x5ee   : > { %6340 = vrot.lane.b32.xlu0 %v12823_v61, %s8665_s27  ;;  %v12861_v26 = vadd.f32 %v5651_v16, %v5167_v40  ;;  %v14410_v16 = vld [vmem:[#allocation37_spill] sm:$0xff] }
 0x5ef   : > { %6342 = vrot.lane.b32.xlu1 %v12825_v44, %s8665_s27  ;;  %v5170_v48 = vmul.f32 %v14410_v16, %v12326_v58  ;;  %v14413_v16 = vld [vmem:[#allocation75_spill] sm:$0xff] }
 0x5f0   : > { %v5653_v36 = vpop.permute.xlu0 %5652  ;;  %v5173_v58 = vmul.f32 %v14413_v16, %v12349_v13 }
 0x5f1   : > { %v5655_v34 = vpop.permute.xlu1 %5654  ;;  %v12871_v45 = vadd.f32 %v5653_v36, %v5168_v63 }
 0x5f2   : > { %6344 = vrot.lane.b32.xlu0 %v12835_v29, %s8665_s27  ;;  %v12873_v19 = vadd.f32 %v5655_v34, %v5169_v62  ;;  %v14412_v34 = vld [vmem:[#allocation74_spill] sm:$0xff] }
 0x5f3   : > { %6346 = vrot.lane.b32.xlu1 %v12837_v18, %s8665_s27  ;;  %v5172_v42 = vmul.f32 %v14412_v34, %v12344_v28  ;;  %v14415_v34 = vld [vmem:[#allocation80_spill] sm:$0xff] }
 0x5f4   : > { %v5657_v32 = vpop.permute.xlu0 %5656  ;;  %v5175_v28 = vmul.f32 %v14415_v34, %v12368_v23  ;;  %v14423_v23 = vld [vmem:[#allocation86_spill] sm:$0xff] }
 0x5f5   : > { %v5659_v17 = vpop.permute.xlu1 %5658  ;;  %v12883_v47 = vadd.f32 %v5657_v32, %v5170_v48 }
 0x5f6   : > { %6348 = vrot.lane.b32.xlu0 %v12847_v8, %s8665_s27  ;;  %v12885_v36 = vadd.f32 %v5659_v17, %v5171_v27  ;;  %v14414_v17 = vld [vmem:[#allocation78_spill] sm:$0xff] }
 0x5f7   : > { %6350 = vrot.lane.b32.xlu1 %v12849_v22, %s8665_s27  ;;  %v5174_v33 = vmul.f32 %v14414_v17, %v12363_v2  ;;  %v14419_v17 = vld [vmem:[#allocation83_spill] sm:$0xff] }
 0x5f8   : > { %v5661_v12 = vpop.permute.xlu0 %5660  ;;  %v5177_v2 = vmul.f32 %v14419_v17, %v12384_v46  ;;  %v14429_v46 = vld [vmem:[#allocation91_spill] sm:$0xff] }
 0x5f9   : > { %v5663_v53 = vpop.permute.xlu1 %5662  ;;  %v12895_v55 = vadd.f32 %v5661_v12, %v5172_v42 }
 0x5fa   : > { %6352 = vrot.lane.b32.xlu0 %v12859_v10, %s8665_s27  ;;  %v12897_v32 = vadd.f32 %v5663_v53, %v5173_v58  ;;  %v14418_v53 = vld [vmem:[#allocation82_spill] sm:$0xff] }
 0x5fb   : > { %6354 = vrot.lane.b32.xlu1 %v12861_v26, %s8665_s27  ;;  %v5176_v13 = vmul.f32 %v14418_v53, %v12377_v3  ;;  %v14424_v53 = vld [vmem:[#allocation110_spill] sm:$0xff]  ;;  %v14425_v3 = vld [vmem:[#allocation88_spill] sm:$0xff] }
 0x5fc   : > { %v5665_v9 = vpop.permute.xlu0 %5664 }
 0x5fd   : > { %v5667_v40 = vpop.permute.xlu1 %5666  ;;  %v12907_v16 = vadd.f32 %v5665_v9, %v5174_v33 }
 0x5fe   : > { %6356 = vrot.lane.b32.xlu0 %v12871_v45, %s8665_s27  ;;  %v12909_v12 = vadd.f32 %v5667_v40, %v5175_v28  ;;  %v14422_v40 = vld [vmem:[#allocation109_spill] sm:$0xff] }
 0x5ff   : > { %6358 = vrot.lane.b32.xlu1 %v12873_v19, %s8665_s27  ;;  %14416 = vst [vmem:[#allocation134_spill] sm:$0xff] %v12907_v16  ;;  %v5178_v54 = vmul.f32 %v14423_v23, %v14422_v40  ;;  %v14430_v23 = vld [vmem:[#allocation114_spill] sm:$0xff]  ;;  %v14431_v40 = vld [vmem:[#allocation92_spill] sm:$0xff] }
 0x600   : > { %v5669_v63 = vpop.permute.xlu0 %5668  ;;  %14417 = vst [vmem:[#allocation68_spill] sm:$0xff] %v12909_v12 }
 0x601   : > { %v5671_v62 = vpop.permute.xlu1 %5670  ;;  %v12919_v34 = vadd.f32 %v5669_v63, %v5176_v13 }
 0x602   : > { %6360 = vrot.lane.b32.xlu0 %v12883_v47, %s8665_s27  ;;  %v12921_v9 = vadd.f32 %v5671_v62, %v5177_v2  ;;  %v14428_v62 = vld [vmem:[#allocation113_spill] sm:$0xff] }
 0x603   : > { %6362 = vrot.lane.b32.xlu1 %v12885_v36, %s8665_s27  ;;  %14420 = vst [vmem:[#allocation17_spill] sm:$0xff] %v12919_v34 }
 0x604   : > { %v5673_v48 = vpop.permute.xlu0 %5672  ;;  %14421 = vst [vmem:[#allocation28_spill] sm:$0xff] %v12921_v9 }
 0x605   : > { %v5675_v27 = vpop.permute.xlu1 %5674  ;;  %v12931_v17 = vadd.f32 %v5673_v48, %v5178_v54 }
 0x606   : > { %6364 = vrot.lane.b32.xlu0 %v12895_v55, %s8665_s27 }
 0x607   : > { %6366 = vrot.lane.b32.xlu1 %v12897_v32, %s8665_s27  ;;  %14426 = vst [vmem:[#allocation40_spill] sm:$0xff] %v12931_v17 }
 0x608   : > { %v5677_v42 = vpop.permute.xlu0 %5676 }
 0x609   : > { %v5679_v58 = vpop.permute.xlu1 %5678 }
 0x60a   : > { %6368 = vrot.lane.b32.xlu0 %v12907_v16, %s8665_s27  ;;  %v5179_v16 = vmul.f32 %v14425_v3, %v14424_v53  ;;  %v14435_v53 = vld [vmem:[#allocation96_spill] sm:$0xff] }
 0x60b   : > { %6370 = vrot.lane.b32.xlu1 %v12909_v12, %s8665_s27  ;;  %v5180_v12 = vmul.f32 %v14429_v46, %v14428_v62  ;;  %v14436_v46 = vld [vmem:[#allocation117_spill] sm:$0xff]  ;;  %v14437_v62 = vld [vmem:[#allocation98_spill] sm:$0xff] }
 0x60c   : > { %v5681_v33 = vpop.permute.xlu0 %5680  ;;  %v12933_v63 = vadd.f32 %v5675_v27, %v5179_v16  ;;  %v14434_v16 = vld [vmem:[#allocation115_spill] sm:$0xff] }
 0x60d   : > { %v5683_v28 = vpop.permute.xlu1 %5682  ;;  %v12943_v3 = vadd.f32 %v5677_v42, %v5180_v12 }
 0x60e   : > { %6372 = vrot.lane.b32.xlu0 %v12919_v34, %s8665_s27  ;;  %14427 = vst [vmem:[#allocation51_spill] sm:$0xff] %v12933_v63  ;;  %v5181_v34 = vmul.f32 %v14431_v40, %v14430_v23  ;;  %v14441_v23 = vld [vmem:[#allocation101_spill] sm:$0xff] }
 0x60f   : > { %6374 = vrot.lane.b32.xlu1 %v12921_v9, %s8665_s27  ;;  %14432 = vst [vmem:[#allocation16_spill] sm:$0xff] %v12943_v3  ;;  %v5182_v9 = vmul.f32 %v14435_v53, %v14434_v16  ;;  %v14442_v53 = vld [vmem:[#allocation120_spill] sm:$0xff]  ;;  %v14443_v16 = vld [vmem:[#allocation102_spill] sm:$0xff] }
 0x610   : > { %v5685_v13 = vpop.permute.xlu0 %5684  ;;  %v12945_v48 = vadd.f32 %v5679_v58, %v5181_v34  ;;  %v14440_v34 = vld [vmem:[#allocation119_spill] sm:$0xff] }
 0x611   : > { %v5687_v2 = vpop.permute.xlu1 %5686  ;;  %v12955_v40 = vadd.f32 %v5681_v33, %v5182_v9 }
 0x612   : > { %6376 = vrot.lane.b32.xlu0 %v12931_v17, %s8665_s27  ;;  %14433 = vst [vmem:[#allocation27_spill] sm:$0xff] %v12945_v48  ;;  %v5183_v17 = vmul.f32 %v14437_v62, %v14436_v46  ;;  %v14447_v46 = vld [vmem:[#allocation106_spill] sm:$0xff] }
 0x613   : > { %6378 = vrot.lane.b32.xlu1 %v12933_v63, %s8665_s27  ;;  %14438 = vst [vmem:[#allocation39_spill] sm:$0xff] %v12955_v40  ;;  %v5184_v63 = vmul.f32 %v14441_v23, %v14440_v34  ;;  %v14448_v23 = vld [vmem:[#allocation124_spill] sm:$0xff] }
 0x614   : > { %v5689_v54 = vpop.permute.xlu0 %5688  ;;  %v12957_v12 = vadd.f32 %v5683_v28, %v5183_v17  ;;  %v14446_v17 = vld [vmem:[#allocation123_spill] sm:$0xff]  ;;  %v14449_v34 = vld [vmem:[#allocation108_spill] sm:$0xff] }
 0x615   : > { %v5691_v27 = vpop.permute.xlu1 %5690  ;;  %v12967_v62 = vadd.f32 %v5685_v13, %v5184_v63 }
 0x616   : > { %6380 = vrot.lane.b32.xlu0 %v12943_v3, %s8665_s27  ;;  %14439 = vst [vmem:[#allocation53_spill] sm:$0xff] %v12957_v12  ;;  %v5185_v3 = vmul.f32 %v14443_v16, %v14442_v53  ;;  %v14452_v53 = vld [vmem:[#allocation111_spill] sm:$0xff] }
 0x617   : > { %6382 = vrot.lane.b32.xlu1 %v12945_v48, %s8665_s27  ;;  %14444 = vst [vmem:[#allocation59_spill] sm:$0xff] %v12967_v62  ;;  %v5186_v48 = vmul.f32 %v14447_v46, %v14446_v17  ;;  %v14453_v46 = vld [vmem:[#allocation127_spill] sm:$0xff]  ;;  %v14454_v17 = vld [vmem:[#allocation112_spill] sm:$0xff] }
 0x618   : > { %v5693_v42 = vpop.permute.xlu0 %5692  ;;  %v12969_v9 = vadd.f32 %v5687_v2, %v5185_v3  ;;  %v14451_v3 = vld [vmem:[#allocation125_spill] sm:$0xff] }
 0x619   : > { %v5695_v58 = vpop.permute.xlu1 %5694  ;;  %v12979_v16 = vadd.f32 %v5689_v54, %v5186_v48 }
 0x61a   : > { %6384 = vrot.lane.b32.xlu0 %v12955_v40, %s8665_s27  ;;  %14445 = vst [vmem:[#allocation30_spill] sm:$0xff] %v12969_v9  ;;  %v5187_v40 = vmul.f32 %v14449_v34, %v14448_v23  ;;  %v14456_v23 = vld [vmem:[#allocation116_spill] sm:$0xff] }
 0x61b   : > { %6386 = vrot.lane.b32.xlu1 %v12957_v12, %s8665_s27  ;;  %14450 = vst [vmem:[#allocation55_spill] sm:$0xff] %v12979_v16  ;;  %v5188_v12 = vmul.f32 %v14452_v53, %v14451_v3  ;;  %v14457_v53 = vld [vmem:[#allocation130_spill] sm:$0xff] }
 0x61c   : > { %v5697_v33 = vpop.permute.xlu0 %5696  ;;  %v12981_v63 = vadd.f32 %v5691_v27, %v5187_v40  ;;  %v14455_v40 = vld [vmem:[#allocation129_spill] sm:$0xff]  ;;  %v14458_v3 = vld [vmem:[#allocation118_spill] sm:$0xff] }
 0x61d   : > { %v5699_v28 = vpop.permute.xlu1 %5698  ;;  %v12991_v34 = vadd.f32 %v5693_v42, %v5188_v12 }
 0x61e   : > { %6388 = vrot.lane.b32.xlu0 %v12967_v62, %s8665_s27  ;;  %v5189_v62 = vmul.f32 %v14454_v17, %v14453_v46  ;;  %v14459_v17 = vld [vmem:[#allocation131_spill] sm:$0xff] }
 0x61f   : > { %6390 = vrot.lane.b32.xlu1 %v12969_v9, %s8665_s27  ;;  %v5190_v9 = vmul.f32 %v14456_v23, %v14455_v40  ;;  %v14460_v23 = vld [vmem:[#allocation121_spill] sm:$0xff] }
 0x620   : > { %v5701_v13 = vpop.permute.xlu0 %5700  ;;  %v12993_v48 = vadd.f32 %v5695_v58, %v5189_v62  ;;  %v5192_v40 = vmul.f32 %v14460_v23, %v14459_v17 }
 0x621   : > { %v5703_v2 = vpop.permute.xlu1 %5702  ;;  %v13004_v42 = vadd.f32 %v5697_v33, %v5190_v9 }
 0x622   : > { %6392 = vrot.lane.b32.xlu0 %v12979_v16, %s8665_s27  ;;  %v5191_v16 = vmul.f32 %v14458_v3, %v14457_v53  ;;  %v14461_v3 = vld [vmem:[#allocation132_spill] sm:$0xff]  ;;  %v13020_v41 = vadd.f32 %v5701_v13, %v5192_v40  ;;  %v5195_v13 = vmul.f32 %v14465_v4, %v14367_v56 }
 0x623   : > { %6394 = vrot.lane.b32.xlu1 %v12981_v63, %s8665_s27  ;;  %v5193_v33 = vmul.f32 %v14462_v30, %v14461_v3 }
 0x624   : > { %v5705_v54 = vpop.permute.xlu0 %5704  ;;  %v13007_v58 = vadd.f32 %v5699_v28, %v5191_v16 }
 0x625   : > { %v5707_v27 = vpop.permute.xlu1 %5706  ;;  %v13023_v28 = vadd.f32 %v5703_v2, %v5193_v33 }
 0x626   : > { %6396 = vrot.lane.b32.xlu0 %v12991_v34, %s8665_s27  ;;  %v13039_v40 = vadd.f32 %v5707_v27, %v5195_v13 }
 0x627   : > { %6398 = vrot.lane.b32.xlu1 %v12993_v48, %s8665_s27 }
 0x628   : > { %v6285_v12 = vpop.permute.xlu0 %6284 }
 0x629   : > { %v6287_v62 = vpop.permute.xlu1 %6286  ;;  %6476 = vst.msk [vmem:[#allocation3] sm:$0xff] %vm1463_vm2, %v6285_v12  ;;  %v14463_v12 = vld [vmem:[#allocation133_spill] sm:$0xff] }
 0x62a   : > { %6477 = vst.msk [vmem:[#allocation3 + $0x8] sm:$0xff] %vm1463_vm2, %v6287_v62  ;;  %6400 = vrot.lane.b32.xlu0 %v13004_v42, %s8665_s27  ;;  %v14464_v62 = vld [vmem:[#allocation126_spill] sm:$0xff] }
 0x62b   : > { %6402 = vrot.lane.b32.xlu1 %v13007_v58, %s8665_s27  ;;  %v5194_v23 = vmul.f32 %v14464_v62, %v14463_v12 }
 0x62c   : > { %v6289_v9 = vpop.permute.xlu0 %6288 }
 0x62d   : > { %v6291_v16 = vpop.permute.xlu1 %6290  ;;  %6478 = vst.msk [vmem:[#allocation3 + $0x10] sm:$0xff] %vm1463_vm2, %v6289_v9  ;;  %v13036_v0 = vadd.f32 %v5705_v54, %v5194_v23  ;;  %v8404_v54 = vpop.eup %8403  ;;  %8435 = vtanh.f32 %v12751_v5 }
 0x62e   : > { %6479 = vst.msk [vmem:[#allocation3 + $0x18] sm:$0xff] %vm1463_vm2, %v6291_v16  ;;  %6404 = vrot.lane.b32.xlu0 %v13020_v41, %s8665_s27  ;;  %v8406_v27 = vpop.eup %8405  ;;  %8437 = vtanh.f32 %v12753_v60 }
 0x62f   : > { %6406 = vrot.lane.b32.xlu1 %v13023_v28, %s8665_s27  ;;  %v8408_v9 = vpop.eup %8407  ;;  %8439 = vtanh.f32 %v12763_v35 }
 0x630   : > { %v6293_v2 = vpop.permute.xlu0 %6292  ;;  %v8410_v6 = vpop.eup %8409  ;;  %8441 = vtanh.f32 %v12765_v20 }
 0x631   : > { %v6295_v30 = vpop.permute.xlu1 %6294  ;;  %6480 = vst.msk [vmem:[#allocation3 + $0x20] sm:$0xff] %vm1463_vm2, %v6293_v2  ;;  %v8412_v62 = vpop.eup %8411  ;;  %8443 = vtanh.f32 %v12775_v51 }
 0x632   : > { %6481 = vst.msk [vmem:[#allocation3 + $0x28] sm:$0xff] %vm1463_vm2, %v6295_v30  ;;  %6408 = vrot.lane.b32.xlu0 %v13036_v0, %s8665_s27  ;;  %v8414_v39 = vpop.eup %8413  ;;  %8445 = vtanh.f32 %v12777_v7 }
 0x633   : > { %6410 = vrot.lane.b32.xlu1 %v13039_v40, %s8665_s27  ;;  %v8416_v4 = vpop.eup %8415  ;;  %8447 = vtanh.f32 %v12787_v57 }
 0x634   : > { %v6297_v50 = vpop.permute.xlu0 %6296  ;;  %v8418_v31 = vpop.eup %8417  ;;  %8449 = vtanh.f32 %v12789_v1 }
 0x635   : > { %v6299_v49 = vpop.permute.xlu1 %6298  ;;  %6482 = vst.msk [vmem:[#allocation3 + $0x30] sm:$0xff] %vm1463_vm2, %v6297_v50  ;;  %v8420_v2 = vpop.eup %8419  ;;  %8451 = vtanh.f32 %v12799_v37 }
 0x636   : > { %6483 = vst.msk [vmem:[#allocation3 + $0x38] sm:$0xff] %vm1463_vm2, %v6299_v49  ;;  %5964 = vrot.lane.b32.xlu0 %v8404_v54, %s8664_s26  ;;  %v8422_v25 = vpop.eup %8421  ;;  %8453 = vtanh.f32 %v12801_v43 }
 0x637   : > { %5966 = vrot.lane.b32.xlu1 %v8406_v27, %s8664_s26  ;;  %v8424_v50 = vpop.eup %8423  ;;  %8455 = vtanh.f32 %v12811_v52 }
 0x638   : > { %v6301_v33 = vpop.permute.xlu0 %6300  ;;  %v8426_v15 = vpop.eup %8425  ;;  %8457 = vtanh.f32 %v12813_v24 }
 0x639   : > { %v6303_v14 = vpop.permute.xlu1 %6302  ;;  %6484 = vst.msk [vmem:[#allocation3 + $0x40] sm:$0xff] %vm1463_vm2, %v6301_v33  ;;  %v8428_v49 = vpop.eup %8427  ;;  %8459 = vtanh.f32 %v12823_v61 }
 0x63a   : > { %6485 = vst.msk [vmem:[#allocation3 + $0x48] sm:$0xff] %vm1463_vm2, %v6303_v14  ;;  %5968 = vrot.lane.b32.xlu0 %v8408_v9, %s8664_s26  ;;  %v8430_v60 = vpop.eup %8429  ;;  %8461 = vtanh.f32 %v12825_v44 }
 0x63b   : > { %5970 = vrot.lane.b32.xlu1 %v8410_v6, %s8664_s26  ;;  %v8432_v33 = vpop.eup %8431  ;;  %8463 = vtanh.f32 %v12835_v29 }
 0x63c   : > { %v6305_v16 = vpop.permute.xlu0 %6304  ;;  %v8434_v20 = vpop.eup %8433  ;;  %8465 = vtanh.f32 %v12837_v18 }
 0x63d   : > { %v6307_v38 = vpop.permute.xlu1 %6306  ;;  %6486 = vst.msk [vmem:[#allocation3 + $0x50] sm:$0xff] %vm1463_vm2, %v6305_v16  ;;  %v8436_v14 = vpop.eup %8435  ;;  %8467 = vtanh.f32 %v12847_v8 }
 0x63e   : > { %6487 = vst.msk [vmem:[#allocation3 + $0x58] sm:$0xff] %vm1463_vm2, %v6307_v38  ;;  %5972 = vrot.lane.b32.xlu0 %v8412_v62, %s8664_s26  ;;  %v8438_v7 = vpop.eup %8437  ;;  %8469 = vtanh.f32 %v12849_v22 }
 0x63f   : > { %5974 = vrot.lane.b32.xlu1 %v8414_v39, %s8664_s26  ;;  %v8440_v16 = vpop.eup %8439  ;;  %8471 = vtanh.f32 %v12859_v10 }
 0x640   : > { %v6309_v23 = vpop.permute.xlu0 %6308  ;;  %v8442_v1 = vpop.eup %8441  ;;  %8473 = vtanh.f32 %v12861_v26 }
 0x641   : > { %v6311_v59 = vpop.permute.xlu1 %6310  ;;  %6488 = vst.msk [vmem:[#allocation3 + $0x60] sm:$0xff] %vm1463_vm2, %v6309_v23  ;;  %v8444_v38 = vpop.eup %8443  ;;  %8475 = vtanh.f32 %v12871_v45 }
 0x642   : > { %6489 = vst.msk [vmem:[#allocation3 + $0x68] sm:$0xff] %vm1463_vm2, %v6311_v59  ;;  %5976 = vrot.lane.b32.xlu0 %v8416_v4, %s8664_s26  ;;  %v8446_v43 = vpop.eup %8445  ;;  %8477 = vtanh.f32 %v12873_v19 }
 0x643   : > { %5978 = vrot.lane.b32.xlu1 %v8418_v31, %s8664_s26  ;;  %v8448_v23 = vpop.eup %8447  ;;  %8479 = vtanh.f32 %v12883_v47 }
 0x644   : > { %v6313_v13 = vpop.permute.xlu0 %6312  ;;  %v8450_v24 = vpop.eup %8449  ;;  %8481 = vtanh.f32 %v12885_v36 }
 0x645   : > { %v6315_v21 = vpop.permute.xlu1 %6314  ;;  %6490 = vst.msk [vmem:[#allocation3 + $0x70] sm:$0xff] %vm1463_vm2, %v6313_v13  ;;  %v8452_v59 = vpop.eup %8451  ;;  %8483 = vtanh.f32 %v12895_v55 }
 0x646   : > { %6491 = vst.msk [vmem:[#allocation3 + $0x78] sm:$0xff] %vm1463_vm2, %v6315_v21  ;;  %5980 = vrot.lane.b32.xlu0 %v8420_v2, %s8664_s26  ;;  %v8454_v44 = vpop.eup %8453  ;;  %8485 = vtanh.f32 %v12897_v32 }
 0x647   : > { %5982 = vrot.lane.b32.xlu1 %v8422_v25, %s8664_s26  ;;  %v8456_v13 = vpop.eup %8455 }
 0x648   : > { %v6317_v30 = vpop.permute.xlu0 %6316  ;;  %v8458_v18 = vpop.eup %8457 }
 0x649   : > { %v6319_v11 = vpop.permute.xlu1 %6318  ;;  %6492 = vst.msk [vmem:[#allocation3 + $0x80] sm:$0xff] %vm1463_vm2, %v6317_v30  ;;  %v8460_v21 = vpop.eup %8459 }
 0x64a   : > { %6493 = vst.msk [vmem:[#allocation3 + $0x88] sm:$0xff] %vm1463_vm2, %v6319_v11  ;;  %5984 = vrot.lane.b32.xlu0 %v8424_v50, %s8664_s26  ;;  %v8462_v22 = vpop.eup %8461 }
 0x64b   : > { %5986 = vrot.lane.b32.xlu1 %v8426_v15, %s8664_s26  ;;  %v8464_v30 = vpop.eup %8463 }
 0x64c   : > { %v6321_v54 = vpop.permute.xlu0 %6320  ;;  %v8466_v26 = vpop.eup %8465 }
 0x64d   : > { %v6323_v5 = vpop.permute.xlu1 %6322  ;;  %6494 = vst.msk [vmem:[#allocation3 + $0x90] sm:$0xff] %vm1463_vm2, %v6321_v54  ;;  %v8468_v11 = vpop.eup %8467 }
 0x64e   : > { %6495 = vst.msk [vmem:[#allocation3 + $0x98] sm:$0xff] %vm1463_vm2, %v6323_v5  ;;  %5988 = vrot.lane.b32.xlu0 %v8428_v49, %s8664_s26  ;;  %v8470_v19 = vpop.eup %8469  ;;  %v14466_v49 = vld [vmem:[#allocation134_spill] sm:$0xff] }
 0x64f   : > { %5990 = vrot.lane.b32.xlu1 %v8430_v60, %s8664_s26  ;;  %v8472_v54 = vpop.eup %8471  ;;  %8487 = vtanh.f32 %v14466_v49 }
 0x650   : > { %v6325_v27 = vpop.permute.xlu0 %6324  ;;  %v8474_v36 = vpop.eup %8473 }
 0x651   : > { %v6327_v35 = vpop.permute.xlu1 %6326  ;;  %6496 = vst.msk [vmem:[#allocation3 + $0xa0] sm:$0xff] %vm1463_vm2, %v6325_v27  ;;  %v8476_v60 = vpop.eup %8475  ;;  %v14467_v27 = vld [vmem:[#allocation68_spill] sm:$0xff] }
 0x652   : > { %6497 = vst.msk [vmem:[#allocation3 + $0xa8] sm:$0xff] %vm1463_vm2, %v6327_v35  ;;  %5992 = vrot.lane.b32.xlu0 %v8432_v33, %s8664_s26  ;;  %8489 = vtanh.f32 %v14467_v27  ;;  %v8478_v32 = vpop.eup %8477  ;;  %v14468_v33 = vld [vmem:[#allocation17_spill] sm:$0xff] }
 0x653   : > { %5994 = vrot.lane.b32.xlu1 %v8434_v20, %s8664_s26  ;;  %8491 = vtanh.f32 %v14468_v33  ;;  %v8480_v20 = vpop.eup %8479 }
 0x654   : > { %v6329_v9 = vpop.permute.xlu0 %6328 }
 0x655   : > { %v6331_v51 = vpop.permute.xlu1 %6330  ;;  %6498 = vst.msk [vmem:[#allocation3 + $0xb0] sm:$0xff] %vm1463_vm2, %v6329_v9  ;;  %v14469_v9 = vld [vmem:[#allocation28_spill] sm:$0xff] }
 0x656   : > { %6499 = vst.msk [vmem:[#allocation3 + $0xb8] sm:$0xff] %vm1463_vm2, %v6331_v51  ;;  %5996 = vrot.lane.b32.xlu0 %v8436_v14, %s8664_s26  ;;  %8493 = vtanh.f32 %v14469_v9  ;;  %v8482_v51 = vpop.eup %8481 }
 0x657   : > { %5998 = vrot.lane.b32.xlu1 %v8438_v7, %s8664_s26  ;;  %v14470_v7 = vld [vmem:[#allocation40_spill] sm:$0xff] }
 0x658   : > { %v6333_v6 = vpop.permute.xlu0 %6332  ;;  %8495 = vtanh.f32 %v14470_v7 }
 0x659   : > { %v6335_v57 = vpop.permute.xlu1 %6334  ;;  %6500 = vst.msk [vmem:[#allocation3 + $0xc0] sm:$0xff] %vm1463_vm2, %v6333_v6 }
 0x65a   : > { %6501 = vst.msk [vmem:[#allocation3 + $0xc8] sm:$0xff] %vm1463_vm2, %v6335_v57  ;;  %6000 = vrot.lane.b32.xlu0 %v8440_v16, %s8664_s26  ;;  %v8484_v16 = vpop.eup %8483  ;;  %v14471_v57 = vld [vmem:[#allocation51_spill] sm:$0xff] }
 0x65b   : > { %6002 = vrot.lane.b32.xlu1 %v8442_v1, %s8664_s26  ;;  %8497 = vtanh.f32 %v14471_v57 }
 0x65c   : > { %v6337_v62 = vpop.permute.xlu0 %6336 }
 0x65d   : > { %v6339_v37 = vpop.permute.xlu1 %6338  ;;  %6502 = vst.msk [vmem:[#allocation3 + $0xd0] sm:$0xff] %vm1463_vm2, %v6337_v62  ;;  %v8486_v62 = vpop.eup %8485 }
 0x65e   : > { %6503 = vst.msk [vmem:[#allocation3 + $0xd8] sm:$0xff] %vm1463_vm2, %v6339_v37  ;;  %6004 = vrot.lane.b32.xlu0 %v8444_v38, %s8664_s26  ;;  %v14472_v38 = vld [vmem:[#allocation16_spill] sm:$0xff] }
 0x65f   : > { %6006 = vrot.lane.b32.xlu1 %v8446_v43, %s8664_s26  ;;  %8499 = vtanh.f32 %v14472_v38  ;;  %v8488_v43 = vpop.eup %8487 }
 0x660   : > { %v6341_v39 = vpop.permute.xlu0 %6340 }
 0x661   : > { %v6343_v52 = vpop.permute.xlu1 %6342  ;;  %6504 = vst.msk [vmem:[#allocation3 + $0xe0] sm:$0xff] %vm1463_vm2, %v6341_v39  ;;  %v14473_v39 = vld [vmem:[#allocation27_spill] sm:$0xff] }
 0x662   : > { %6505 = vst.msk [vmem:[#allocation3 + $0xe8] sm:$0xff] %vm1463_vm2, %v6343_v52  ;;  %6008 = vrot.lane.b32.xlu0 %v8448_v23, %s8664_s26  ;;  %8501 = vtanh.f32 %v14473_v39  ;;  %v8490_v52 = vpop.eup %8489 }
 0x663   : > { %6010 = vrot.lane.b32.xlu1 %v8450_v24, %s8664_s26  ;;  %v14474_v24 = vld [vmem:[#allocation39_spill] sm:$0xff] }
 0x664   : > { %v6345_v4 = vpop.permute.xlu0 %6344  ;;  %8503 = vtanh.f32 %v14474_v24 }
 0x665   : > { %v6347_v61 = vpop.permute.xlu1 %6346  ;;  %6506 = vst.msk [vmem:[#allocation3 + $0xf0] sm:$0xff] %vm1463_vm2, %v6345_v4 }
 0x666   : > { %6507 = vst.msk [vmem:[#allocation3 + $0xf8] sm:$0xff] %vm1463_vm2, %v6347_v61  ;;  %6012 = vrot.lane.b32.xlu0 %v8452_v59, %s8664_s26  ;;  %v8492_v59 = vpop.eup %8491  ;;  %v14475_v61 = vld [vmem:[#allocation53_spill] sm:$0xff] }
 0x667   : > { %6014 = vrot.lane.b32.xlu1 %v8454_v44, %s8664_s26  ;;  %8505 = vtanh.f32 %v14475_v61 }
 0x668   : > { %v6349_v31 = vpop.permute.xlu0 %6348 }
 0x669   : > { %v6351_v29 = vpop.permute.xlu1 %6350  ;;  %6508 = vst.msk [vmem:[#allocation3 + $0x100] sm:$0xff] %vm1463_vm2, %v6349_v31  ;;  %v8494_v31 = vpop.eup %8493 }
 0x66a   : > { %6509 = vst.msk [vmem:[#allocation3 + $0x108] sm:$0xff] %vm1463_vm2, %v6351_v29  ;;  %6016 = vrot.lane.b32.xlu0 %v8456_v13, %s8664_s26  ;;  %v14476_v13 = vld [vmem:[#allocation59_spill] sm:$0xff] }
 0x66b   : > { %6018 = vrot.lane.b32.xlu1 %v8458_v18, %s8664_s26  ;;  %8507 = vtanh.f32 %v14476_v13  ;;  %v8496_v18 = vpop.eup %8495 }
 0x66c   : > { %v6353_v2 = vpop.permute.xlu0 %6352 }
 0x66d   : > { %v6355_v8 = vpop.permute.xlu1 %6354  ;;  %6510 = vst.msk [vmem:[#allocation3 + $0x110] sm:$0xff] %vm1463_vm2, %v6353_v2  ;;  %v14477_v2 = vld [vmem:[#allocation30_spill] sm:$0xff] }
 0x66e   : > { %6511 = vst.msk [vmem:[#allocation3 + $0x118] sm:$0xff] %vm1463_vm2, %v6355_v8  ;;  %6020 = vrot.lane.b32.xlu0 %v8460_v21, %s8664_s26  ;;  %8509 = vtanh.f32 %v14477_v2  ;;  %v8498_v8 = vpop.eup %8497 }
 0x66f   : > { %6022 = vrot.lane.b32.xlu1 %v8462_v22, %s8664_s26  ;;  %v14478_v22 = vld [vmem:[#allocation55_spill] sm:$0xff] }
 0x670   : > { %v6357_v25 = vpop.permute.xlu0 %6356  ;;  %8511 = vtanh.f32 %v14478_v22 }
 0x671   : > { %v6359_v10 = vpop.permute.xlu1 %6358  ;;  %6512 = vst.msk [vmem:[#allocation3 + $0x120] sm:$0xff] %vm1463_vm2, %v6357_v25  ;;  %8513 = vtanh.f32 %v12981_v63 }
 0x672   : > { %6513 = vst.msk [vmem:[#allocation3 + $0x128] sm:$0xff] %vm1463_vm2, %v6359_v10  ;;  %6024 = vrot.lane.b32.xlu0 %v8464_v30, %s8664_s26  ;;  %v8500_v30 = vpop.eup %8499  ;;  %8515 = vtanh.f32 %v12991_v34 }
 0x673   : > { %6026 = vrot.lane.b32.xlu1 %v8466_v26, %s8664_s26  ;;  %v8502_v26 = vpop.eup %8501  ;;  %8517 = vtanh.f32 %v12993_v48 }
 0x674   : > { %v6361_v50 = vpop.permute.xlu0 %6360  ;;  %8519 = vtanh.f32 %v13004_v42 }
 0x675   : > { %v6363_v45 = vpop.permute.xlu1 %6362  ;;  %6514 = vst.msk [vmem:[#allocation3 + $0x130] sm:$0xff] %vm1463_vm2, %v6361_v50  ;;  %8521 = vtanh.f32 %v13007_v58 }
 0x676   : > { %6515 = vst.msk [vmem:[#allocation3 + $0x138] sm:$0xff] %vm1463_vm2, %v6363_v45  ;;  %6028 = vrot.lane.b32.xlu0 %v8468_v11, %s8664_s26  ;;  %v8504_v11 = vpop.eup %8503  ;;  %8523 = vtanh.f32 %v13020_v41 }
 0x677   : > { %6030 = vrot.lane.b32.xlu1 %v8470_v19, %s8664_s26  ;;  %v8506_v63 = vpop.eup %8505  ;;  %8525 = vtanh.f32 %v13023_v28 }
 0x678   : > { %v6365_v15 = vpop.permute.xlu0 %6364  ;;  %8527 = vtanh.f32 %v13036_v0 }
 0x679   : > { %v6367_v47 = vpop.permute.xlu1 %6366  ;;  %6516 = vst.msk [vmem:[#allocation3 + $0x140] sm:$0xff] %vm1463_vm2, %v6365_v15  ;;  %v8508_v15 = vpop.eup %8507  ;;  %8529 = vtanh.f32 %v13039_v40 }
 0x67a   : > { %6517 = vst.msk [vmem:[#allocation3 + $0x148] sm:$0xff] %vm1463_vm2, %v6367_v47  ;;  %6032 = vrot.lane.b32.xlu0 %v8472_v54, %s8664_s26 }
 0x67b   : > { %6034 = vrot.lane.b32.xlu1 %v8474_v36, %s8664_s26  ;;  %v8510_v48 = vpop.eup %8509 }
 0x67c   : > { %v6369_v5 = vpop.permute.xlu0 %6368 }
 0x67d   : > { %v6371_v55 = vpop.permute.xlu1 %6370  ;;  %6518 = vst.msk [vmem:[#allocation3 + $0x150] sm:$0xff] %vm1463_vm2, %v6369_v5  ;;  %v8512_v47 = vpop.eup %8511 }
 0x67e   : > { %6519 = vst.msk [vmem:[#allocation3 + $0x158] sm:$0xff] %vm1463_vm2, %v6371_v55  ;;  %6036 = vrot.lane.b32.xlu0 %v8476_v60, %s8664_s26  ;;  %v8514_v58 = vpop.eup %8513 }
 0x67f   : > { %6038 = vrot.lane.b32.xlu1 %v8478_v32, %s8664_s26  ;;  %v8516_v49 = vpop.eup %8515 }
 0x680   : > { %v6373_v35 = vpop.permute.xlu0 %6372  ;;  %v8518_v28 = vpop.eup %8517 }
 0x681   : > { %v6375_v14 = vpop.permute.xlu1 %6374  ;;  %6520 = vst.msk [vmem:[#allocation3 + $0x160] sm:$0xff] %vm1463_vm2, %v6373_v35  ;;  %v8520_v60 = vpop.eup %8519 }
 0x682   : > { %6521 = vst.msk [vmem:[#allocation3 + $0x168] sm:$0xff] %vm1463_vm2, %v6375_v14  ;;  %6040 = vrot.lane.b32.xlu0 %v8480_v20, %s8664_s26  ;;  %v8522_v55 = vpop.eup %8521 }
 0x683   : > { %6042 = vrot.lane.b32.xlu1 %v8482_v51, %s8664_s26  ;;  %v8524_v40 = vpop.eup %8523  ;;  %v14479_v51 = vld [vmem:[#allocation31_spill] sm:$0xff] }
 0x684   : > { %v6377_v6 = vpop.permute.xlu0 %6376  ;;  %v8526_v33 = vpop.eup %8525 }
 0x685   : > { %v6379_v1 = vpop.permute.xlu1 %6378  ;;  %6522 = vst.msk [vmem:[#allocation3 + $0x170] sm:$0xff] %vm1463_vm2, %v6377_v6  ;;  %v8528_v20 = vpop.eup %8527 }
 0x686   : > { %6523 = vst.msk [vmem:[#allocation3 + $0x178] sm:$0xff] %vm1463_vm2, %v6379_v1  ;;  %6044 = vrot.lane.b32.xlu0 %v8484_v16, %s8664_s26  ;;  %v8530_v14 = vpop.eup %8529  ;;  %v14480_v16 = vld [vmem:[#allocation19_spill] sm:$0xff] }
 0x687   : > { %6046 = vrot.lane.b32.xlu1 %v8486_v62, %s8664_s26  ;;  %v14481_v62 = vld [vmem:[#allocation62_spill] sm:$0xff] }
 0x688   : > { %v6381_v37 = vpop.permute.xlu0 %6380 }
 0x689   : > { %v6383_v23 = vpop.permute.xlu1 %6382  ;;  %6524 = vst.msk [vmem:[#allocation3 + $0x180] sm:$0xff] %vm1463_vm2, %v6381_v37 }
 0x68a   : > { %6525 = vst.msk [vmem:[#allocation3 + $0x188] sm:$0xff] %vm1463_vm2, %v6383_v23  ;;  %6048 = vrot.lane.b32.xlu0 %v8488_v43, %s8664_s26  ;;  %v14482_v43 = vld [vmem:[#allocation57_spill] sm:$0xff] }
 0x68b   : > { %6050 = vrot.lane.b32.xlu1 %v8490_v52, %s8664_s26  ;;  %v14483_v52 = vld [vmem:[#allocation22_spill] sm:$0xff] }
 0x68c   : > { %v6385_v4 = vpop.permute.xlu0 %6384 }
 0x68d   : > { %v6387_v44 = vpop.permute.xlu1 %6386  ;;  %6526 = vst.msk [vmem:[#allocation3 + $0x190] sm:$0xff] %vm1463_vm2, %v6385_v4 }
 0x68e   : > { %6527 = vst.msk [vmem:[#allocation3 + $0x198] sm:$0xff] %vm1463_vm2, %v6387_v44  ;;  %6052 = vrot.lane.b32.xlu0 %v8492_v59, %s8664_s26  ;;  %v14484_v59 = vld [vmem:[#allocation34_spill] sm:$0xff] }
 0x68f   : > { %6054 = vrot.lane.b32.xlu1 %v8494_v31, %s8664_s26  ;;  %v14485_v31 = vld [vmem:[#allocation61_spill] sm:$0xff] }
 0x690   : > { %v6389_v29 = vpop.permute.xlu0 %6388 }
 0x691   : > { %v6391_v21 = vpop.permute.xlu1 %6390  ;;  %6528 = vst.msk [vmem:[#allocation3 + $0x1a0] sm:$0xff] %vm1463_vm2, %v6389_v29 }
 0x692   : > { %6529 = vst.msk [vmem:[#allocation3 + $0x1a8] sm:$0xff] %vm1463_vm2, %v6391_v21  ;;  %6056 = vrot.lane.b32.xlu0 %v8496_v18, %s8664_s26  ;;  %v14486_v18 = vld [vmem:[#allocation10_spill] sm:$0xff] }
 0x693   : > { %6058 = vrot.lane.b32.xlu1 %v8498_v8, %s8664_s26  ;;  %v14487_v8 = vld [vmem:[#allocation21_spill] sm:$0xff] }
 0x694   : > { %v6393_v25 = vpop.permute.xlu0 %6392 }
 0x695   : > { %v6395_v10 = vpop.permute.xlu1 %6394  ;;  %6530 = vst.msk [vmem:[#allocation3 + $0x1b0] sm:$0xff] %vm1463_vm2, %v6393_v25 }
 0x696   : > { %6531 = vst.msk [vmem:[#allocation3 + $0x1b8] sm:$0xff] %vm1463_vm2, %v6395_v10  ;;  %6060 = vrot.lane.b32.xlu0 %v8500_v30, %s8664_s26  ;;  %v14488_v30 = vld [vmem:[#allocation64_spill] sm:$0xff] }
 0x697   : > { %6062 = vrot.lane.b32.xlu1 %v8502_v26, %s8664_s26 }
 0x698   : > { %v6397_v50 = vpop.permute.xlu0 %6396 }
 0x699   : > { %v6399_v45 = vpop.permute.xlu1 %6398  ;;  %6532 = vst.msk [vmem:[#allocation3 + $0x1c0] sm:$0xff] %vm1463_vm2, %v6397_v50  ;;  %v14489_v50 = vld [vmem:[#allocation13_spill] sm:$0xff] }
 0x69a   : > { %6533 = vst.msk [vmem:[#allocation3 + $0x1c8] sm:$0xff] %vm1463_vm2, %v6399_v45  ;;  %6064 = vrot.lane.b32.xlu0 %v8504_v11, %s8664_s26 }
 0x69b   : > { %6066 = vrot.lane.b32.xlu1 %v8506_v63, %s8664_s26  ;;  %v14490_v63 = vld [vmem:[#allocation24_spill] sm:$0xff] }
 0x69c   : > { %v6401_v19 = vpop.permute.xlu0 %6400 }
 0x69d   : > { %v6403_v34 = vpop.permute.xlu1 %6402  ;;  %6534 = vst.msk [vmem:[#allocation3 + $0x1d0] sm:$0xff] %vm1463_vm2, %v6401_v19 }
 0x69e   : > { %6535 = vst.msk [vmem:[#allocation3 + $0x1d8] sm:$0xff] %vm1463_vm2, %v6403_v34  ;;  %6068 = vrot.lane.b32.xlu0 %v8508_v15, %s8664_s26  ;;  %v14491_v34 = vld [vmem:[#allocation63_spill] sm:$0xff] }
 0x69f   : > { %6070 = vrot.lane.b32.xlu1 %v8510_v48, %s8664_s26 }
 0x6a0   : > { %v6405_v54 = vpop.permute.xlu0 %6404 }
 0x6a1   : > { %v6407_v42 = vpop.permute.xlu1 %6406  ;;  %6536 = vst.msk [vmem:[#allocation3 + $0x1e0] sm:$0xff] %vm1463_vm2, %v6405_v54 }
 0x6a2   : > { %6537 = vst.msk [vmem:[#allocation3 + $0x1e8] sm:$0xff] %vm1463_vm2, %v6407_v42  ;;  %6072 = vrot.lane.b32.xlu0 %v8512_v47, %s8664_s26  ;;  %v14492_v47 = vld [vmem:[#allocation12_spill] sm:$0xff] }
 0x6a3   : > { %6074 = vrot.lane.b32.xlu1 %v8514_v58, %s8664_s26 }
 0x6a4   : > { %v6409_v36 = vpop.permute.xlu0 %6408 }
 0x6a5   : > { %v6411_v41 = vpop.permute.xlu1 %6410  ;;  %6538 = vst.msk [vmem:[#allocation3 + $0x1f0] sm:$0xff] %vm1463_vm2, %v6409_v36  ;;  %v14493_v36 = vld [vmem:[#allocation35_spill] sm:$0xff] }
 0x6a6   : > { %6539 = vst.msk [vmem:[#allocation3 + $0x1f8] sm:$0xff] %vm1463_vm2, %v6411_v41  ;;  %6076 = vrot.lane.b32.xlu0 %v8516_v49, %s8664_s26 }
 0x6a7   : > { %6078 = vrot.lane.b32.xlu1 %v8518_v28, %s8664_s26  ;;  %v14494_v28 = vld [vmem:[#allocation15_spill] sm:$0xff] }
 0x6a8   : > { %v5965_v5 = vpop.permute.xlu0 %5964 }
 0x6a9   : > { %v5967_v27 = vpop.permute.xlu1 %5966  ;;  %v6156_v7 = vmul.f32 %v5965_v5, %v14479_v51 }
 0x6aa   : > { %6080 = vrot.lane.b32.xlu0 %v8520_v60, %s8664_s26  ;;  %v6157_v57 = vmul.f32 %v5967_v27, %v14480_v16  ;;  %v14495_v27 = vld [vmem:[#allocation26_spill] sm:$0xff] }
 0x6ab   : > { %6082 = vrot.lane.b32.xlu1 %v8522_v55, %s8664_s26 }
 0x6ac   : > { %v5969_v0 = vpop.permute.xlu0 %5968 }
 0x6ad   : > { %v5971_v32 = vpop.permute.xlu1 %5970  ;;  %v6158_v38 = vmul.f32 %v5969_v0, %v14481_v62 }
 0x6ae   : > { %6084 = vrot.lane.b32.xlu0 %v8524_v40, %s8664_s26  ;;  %v6159_v39 = vmul.f32 %v5971_v32, %v14482_v43  ;;  %v14496_v40 = vld [vmem:[#allocation38_spill] sm:$0xff] }
 0x6af   : > { %6086 = vrot.lane.b32.xlu1 %v8526_v33, %s8664_s26 }
 0x6b0   : > { %v5973_v35 = vpop.permute.xlu0 %5972 }
 0x6b1   : > { %v5975_v9 = vpop.permute.xlu1 %5974  ;;  %v6160_v24 = vmul.f32 %v5973_v35, %v14483_v52  ;;  %v14497_v35 = vld [vmem:[#allocation14_spill] sm:$0xff] }
 0x6b2   : > { %6088 = vrot.lane.b32.xlu0 %v8528_v20, %s8664_s26  ;;  %v6161_v61 = vmul.f32 %v5975_v9, %v14484_v59 }
 0x6b3   : > { %6090 = vrot.lane.b32.xlu1 %v8530_v14, %s8664_s26  ;;  %v14498_v14 = vld [vmem:[#allocation25_spill] sm:$0xff] }
 0x6b4   : > { %v5977_v6 = vpop.permute.xlu0 %5976 }
 0x6b5   : > { %v5979_v1 = vpop.permute.xlu1 %5978  ;;  %v6162_v13 = vmul.f32 %v5977_v6, %v14485_v31  ;;  %v14499_v6 = vld [vmem:[#allocation69_spill] sm:$0xff] }
 0x6b6   : > { %6572 = vrot.lane.b32.xlu0 %v6156_v7, %s8663_s25  ;;  %v6163_v2 = vmul.f32 %v5979_v1, %v14486_v18  ;;  %v14500_v1 = vld [vmem:[#allocation71_spill] sm:$0xff] }
 0x6b7   : > { %6574 = vrot.lane.b32.xlu1 %v6157_v57, %s8663_s25 }
 0x6b8   : > { %v5981_v37 = vpop.permute.xlu0 %5980 }
 0x6b9   : > { %v5983_v23 = vpop.permute.xlu1 %5982  ;;  %v6164_v22 = vmul.f32 %v5981_v37, %v14487_v8  ;;  %v14501_v37 = vld [vmem:[#allocation72_spill] sm:$0xff] }
 0x6ba   : > { %6576 = vrot.lane.b32.xlu0 %v6158_v38, %s8663_s25  ;;  %v6165_v10 = vmul.f32 %v5983_v23, %v14488_v30  ;;  %v14502_v23 = vld [vmem:[#allocation73_spill] sm:$0xff] }
 0x6bb   : > { %6578 = vrot.lane.b32.xlu1 %v6159_v39, %s8663_s25 }
 0x6bc   : > { %v5985_v4 = vpop.permute.xlu0 %5984 }
 0x6bd   : > { %v5987_v44 = vpop.permute.xlu1 %5986  ;;  %v6166_v11 = vmul.f32 %v5985_v4, %v14489_v50  ;;  %v14503_v4 = vld [vmem:[#allocation76_spill] sm:$0xff] }
 0x6be   : > { %6580 = vrot.lane.b32.xlu0 %v6160_v24, %s8663_s25  ;;  %v6167_v19 = vmul.f32 %v5987_v44, %v14490_v63  ;;  %v14504_v44 = vld [vmem:[#allocation77_spill] sm:$0xff] }
 0x6bf   : > { %6582 = vrot.lane.b32.xlu1 %v6161_v61, %s8663_s25 }
 0x6c0   : > { %v5989_v29 = vpop.permute.xlu0 %5988 }
 0x6c1   : > { %v5991_v21 = vpop.permute.xlu1 %5990  ;;  %v6168_v48 = vmul.f32 %v5989_v29, %v14491_v34  ;;  %v14505_v29 = vld [vmem:[#allocation79_spill] sm:$0xff] }
 0x6c2   : > { %6584 = vrot.lane.b32.xlu0 %v6162_v13, %s8663_s25  ;;  %v6169_v42 = vmul.f32 %v5991_v21, %v14492_v47  ;;  %v14506_v21 = vld [vmem:[#allocation81_spill] sm:$0xff] }
 0x6c3   : > { %6586 = vrot.lane.b32.xlu1 %v6163_v2, %s8663_s25 }
 0x6c4   : > { %v5993_v25 = vpop.permute.xlu0 %5992 }
 0x6c5   : > { %v5995_v26 = vpop.permute.xlu1 %5994  ;;  %v6170_v49 = vmul.f32 %v5993_v25, %v14493_v36  ;;  %v14507_v25 = vld [vmem:[#allocation67_spill] sm:$0xff] }
 0x6c6   : > { %6588 = vrot.lane.b32.xlu0 %v6164_v22, %s8663_s25  ;;  %v6171_v5 = vmul.f32 %v5995_v26, %v14494_v28  ;;  %v14508_v26 = vld [vmem:[#allocation52_spill] sm:$0xff] }
 0x6c7   : > { %6590 = vrot.lane.b32.xlu1 %v6165_v10, %s8663_s25 }
 0x6c8   : > { %v5997_v45 = vpop.permute.xlu0 %5996 }
 0x6c9   : > { %v5999_v15 = vpop.permute.xlu1 %5998  ;;  %v6172_v55 = vmul.f32 %v5997_v45, %v14495_v27  ;;  %v14509_v45 = vld [vmem:[#allocation84_spill] sm:$0xff] }
 0x6ca   : > { %6592 = vrot.lane.b32.xlu0 %v6166_v11, %s8663_s25  ;;  %v6173_v32 = vmul.f32 %v5999_v15, %v14496_v40  ;;  %v14510_v15 = vld [vmem:[#allocation18_spill] sm:$0xff] }
 0x6cb   : > { %6594 = vrot.lane.b32.xlu1 %v6167_v19, %s8663_s25 }
 0x6cc   : > { %v6001_v54 = vpop.permute.xlu0 %6000 }
 0x6cd   : > { %v6003_v58 = vpop.permute.xlu1 %6002  ;;  %v6174_v20 = vmul.f32 %v6001_v54, %v14497_v35  ;;  %v14511_v54 = vld [vmem:[#allocation85_spill] sm:$0xff] }
 0x6ce   : > { %6596 = vrot.lane.b32.xlu0 %v6168_v48, %s8663_s25  ;;  %v6175_v51 = vmul.f32 %v6003_v58, %v14498_v14  ;;  %v14512_v58 = vld [vmem:[#allocation87_spill] sm:$0xff] }
 0x6cf   : > { %6598 = vrot.lane.b32.xlu1 %v6169_v42, %s8663_s25 }
 0x6d0   : > { %v6005_v41 = vpop.permute.xlu0 %6004 }
 0x6d1   : > { %v6007_v60 = vpop.permute.xlu1 %6006  ;;  %v6176_v16 = vmul.f32 %v6005_v41, %v14499_v6  ;;  %v14513_v41 = vld [vmem:[#allocation89_spill] sm:$0xff] }
 0x6d2   : > { %6600 = vrot.lane.b32.xlu0 %v6170_v49, %s8663_s25  ;;  %v6177_v62 = vmul.f32 %v6007_v60, %v14500_v1  ;;  %v14514_v60 = vld [vmem:[#allocation90_spill] sm:$0xff] }
 0x6d3   : > { %6602 = vrot.lane.b32.xlu1 %v6171_v5, %s8663_s25 }
 0x6d4   : > { %v6009_v0 = vpop.permute.xlu0 %6008 }
 0x6d5   : > { %v6011_v33 = vpop.permute.xlu1 %6010  ;;  %v6178_v43 = vmul.f32 %v6009_v0, %v14501_v37  ;;  %v14515_v0 = vld [vmem:[#allocation93_spill] sm:$0xff] }
 0x6d6   : > { %6604 = vrot.lane.b32.xlu0 %v6172_v55, %s8663_s25  ;;  %v6179_v52 = vmul.f32 %v6011_v33, %v14502_v23  ;;  %v14516_v33 = vld [vmem:[#allocation94_spill] sm:$0xff] }
 0x6d7   : > { %6606 = vrot.lane.b32.xlu1 %v6173_v32, %s8663_s25 }
 0x6d8   : > { %v6013_v9 = vpop.permute.xlu0 %6012 }
 0x6d9   : > { %v6015_v7 = vpop.permute.xlu1 %6014  ;;  %v6180_v59 = vmul.f32 %v6013_v9, %v14503_v4  ;;  %v14517_v9 = vld [vmem:[#allocation95_spill] sm:$0xff] }
 0x6da   : > { %6608 = vrot.lane.b32.xlu0 %v6174_v20, %s8663_s25  ;;  %v6181_v31 = vmul.f32 %v6015_v7, %v14504_v44  ;;  %v14518_v7 = vld [vmem:[#allocation97_spill] sm:$0xff] }
 0x6db   : > { %6610 = vrot.lane.b32.xlu1 %v6175_v51, %s8663_s25 }
 0x6dc   : > { %v6017_v57 = vpop.permute.xlu0 %6016 }
 0x6dd   : > { %v6019_v38 = vpop.permute.xlu1 %6018  ;;  %v6182_v18 = vmul.f32 %v6017_v57, %v14505_v29  ;;  %v14519_v57 = vld [vmem:[#allocation99_spill] sm:$0xff] }
 0x6de   : > { %6612 = vrot.lane.b32.xlu0 %v6176_v16, %s8663_s25  ;;  %v6183_v8 = vmul.f32 %v6019_v38, %v14506_v21  ;;  %v14520_v38 = vld [vmem:[#allocation100_spill] sm:$0xff] }
 0x6df   : > { %6614 = vrot.lane.b32.xlu1 %v6177_v62, %s8663_s25 }
 0x6e0   : > { %v6021_v39 = vpop.permute.xlu0 %6020 }
 0x6e1   : > { %v6023_v24 = vpop.permute.xlu1 %6022  ;;  %v6184_v30 = vmul.f32 %v6021_v39, %v14507_v25  ;;  %v14521_v39 = vld [vmem:[#allocation103_spill] sm:$0xff] }
 0x6e2   : > { %6616 = vrot.lane.b32.xlu0 %v6178_v43, %s8663_s25  ;;  %v6185_v50 = vmul.f32 %v6023_v24, %v14508_v26  ;;  %v14522_v24 = vld [vmem:[#allocation104_spill] sm:$0xff] }
 0x6e3   : > { %6618 = vrot.lane.b32.xlu1 %v6179_v52, %s8663_s25 }
 0x6e4   : > { %v6025_v61 = vpop.permute.xlu0 %6024 }
 0x6e5   : > { %v6027_v13 = vpop.permute.xlu1 %6026  ;;  %v6186_v63 = vmul.f32 %v6025_v61, %v14509_v45  ;;  %v14523_v61 = vld [vmem:[#allocation105_spill] sm:$0xff] }
 0x6e6   : > { %6620 = vrot.lane.b32.xlu0 %v6180_v59, %s8663_s25  ;;  %v6187_v34 = vmul.f32 %v6027_v13, %v14510_v15  ;;  %v14524_v13 = vld [vmem:[#allocation107_spill] sm:$0xff] }
 0x6e7   : > { %6622 = vrot.lane.b32.xlu1 %v6181_v31, %s8663_s25 }
 0x6e8   : > { %v6029_v2 = vpop.permute.xlu0 %6028 }
 0x6e9   : > { %v6031_v22 = vpop.permute.xlu1 %6030  ;;  %v6188_v47 = vmul.f32 %v6029_v2, %v14511_v54  ;;  %v14525_v2 = vld [vmem:[#allocation109_spill] sm:$0xff] }
 0x6ea   : > { %6624 = vrot.lane.b32.xlu0 %v6182_v18, %s8663_s25  ;;  %v6189_v36 = vmul.f32 %v6031_v22, %v14512_v58  ;;  %v14526_v22 = vld [vmem:[#allocation110_spill] sm:$0xff] }
 0x6eb   : > { %6626 = vrot.lane.b32.xlu1 %v6183_v8, %s8663_s25 }
 0x6ec   : > { %v6033_v10 = vpop.permute.xlu0 %6032 }
 0x6ed   : > { %v6035_v11 = vpop.permute.xlu1 %6034  ;;  %v6190_v28 = vmul.f32 %v6033_v10, %v14513_v41  ;;  %v14527_v10 = vld [vmem:[#allocation113_spill] sm:$0xff] }
 0x6ee   : > { %6628 = vrot.lane.b32.xlu0 %v6184_v30, %s8663_s25  ;;  %v6191_v27 = vmul.f32 %v6035_v11, %v14514_v60  ;;  %v14528_v11 = vld [vmem:[#allocation114_spill] sm:$0xff] }
 0x6ef   : > { %6630 = vrot.lane.b32.xlu1 %v6185_v50, %s8663_s25 }
 0x6f0   : > { %v6037_v19 = vpop.permute.xlu0 %6036 }
 0x6f1   : > { %v6039_v48 = vpop.permute.xlu1 %6038  ;;  %v6192_v40 = vmul.f32 %v6037_v19, %v14515_v0  ;;  %v14529_v19 = vld [vmem:[#allocation115_spill] sm:$0xff] }
 0x6f2   : > { %6632 = vrot.lane.b32.xlu0 %v6186_v63, %s8663_s25  ;;  %v6193_v35 = vmul.f32 %v6039_v48, %v14516_v33  ;;  %v14530_v48 = vld [vmem:[#allocation117_spill] sm:$0xff] }
 0x6f3   : > { %6634 = vrot.lane.b32.xlu1 %v6187_v34, %s8663_s25 }
 0x6f4   : > { %v6041_v42 = vpop.permute.xlu0 %6040 }
 0x6f5   : > { %v6043_v49 = vpop.permute.xlu1 %6042  ;;  %v6194_v14 = vmul.f32 %v6041_v42, %v14517_v9  ;;  %v14531_v42 = vld [vmem:[#allocation119_spill] sm:$0xff] }
 0x6f6   : > { %6732 = vrot.lane.b32.xlu0 %v6188_v47, %s8663_s25  ;;  %v6195_v6 = vmul.f32 %v6043_v49, %v14518_v7  ;;  %v14532_v49 = vld [vmem:[#allocation120_spill] sm:$0xff] }
 0x6f7   : > { %6734 = vrot.lane.b32.xlu1 %v6189_v36, %s8663_s25 }
 0x6f8   : > { %v6045_v5 = vpop.permute.xlu0 %6044 }
 0x6f9   : > { %v6047_v55 = vpop.permute.xlu1 %6046  ;;  %v6196_v1 = vmul.f32 %v6045_v5, %v14519_v57  ;;  %v14533_v5 = vld [vmem:[#allocation123_spill] sm:$0xff] }
 0x6fa   : > { %6736 = vrot.lane.b32.xlu0 %v6190_v28, %s8663_s25  ;;  %v6197_v37 = vmul.f32 %v6047_v55, %v14520_v38  ;;  %v14534_v55 = vld [vmem:[#allocation124_spill] sm:$0xff] }
 0x6fb   : > { %6738 = vrot.lane.b32.xlu1 %v6191_v27, %s8663_s25 }
 0x6fc   : > { %v6049_v32 = vpop.permute.xlu0 %6048 }
 0x6fd   : > { %v6051_v20 = vpop.permute.xlu1 %6050  ;;  %v6198_v23 = vmul.f32 %v6049_v32, %v14521_v39  ;;  %v14535_v32 = vld [vmem:[#allocation125_spill] sm:$0xff] }
 0x6fe   : > { %6740 = vrot.lane.b32.xlu0 %v6192_v40, %s8663_s25  ;;  %v6199_v4 = vmul.f32 %v6051_v20, %v14522_v24 }
 0x6ff   : > { %6742 = vrot.lane.b32.xlu1 %v6193_v35, %s8663_s25 }
 0x700   : > { %v6053_v51 = vpop.permute.xlu0 %6052 }
 0x701   : > { %v6055_v16 = vpop.permute.xlu1 %6054  ;;  %v6200_v44 = vmul.f32 %v6053_v51, %v14523_v61 }
 0x702   : > { %6744 = vrot.lane.b32.xlu0 %v6194_v14, %s8663_s25  ;;  %v6201_v29 = vmul.f32 %v6055_v16, %v14524_v13  ;;  %v14536_v14 = vld [vmem:[#allocation129_spill] sm:$0xff] }
 0x703   : > { %6746 = vrot.lane.b32.xlu1 %v6195_v6, %s8663_s25 }
 0x704   : > { %v6057_v62 = vpop.permute.xlu0 %6056 }
 0x705   : > { %v6059_v43 = vpop.permute.xlu1 %6058  ;;  %v6202_v21 = vmul.f32 %v6057_v62, %v14525_v2 }
 0x706   : > { %6748 = vrot.lane.b32.xlu0 %v6196_v1, %s8663_s25  ;;  %v6203_v25 = vmul.f32 %v6059_v43, %v14526_v22 }
 0x707   : > { %6750 = vrot.lane.b32.xlu1 %v6197_v37, %s8663_s25 }
 0x708   : > { %v6061_v52 = vpop.permute.xlu0 %6060 }
 0x709   : > { %v6063_v59 = vpop.permute.xlu1 %6062  ;;  %v6204_v26 = vmul.f32 %v6061_v52, %v14527_v10 }
 0x70a   : > { %6752 = vrot.lane.b32.xlu0 %v6198_v23, %s8663_s25  ;;  %v6205_v45 = vmul.f32 %v6063_v59, %v14528_v11 }
 0x70b   : > { %6754 = vrot.lane.b32.xlu1 %v6199_v4, %s8663_s25 }
 0x70c   : > { %v6065_v31 = vpop.permute.xlu0 %6064 }
 0x70d   : > { %v6067_v18 = vpop.permute.xlu1 %6066  ;;  %v6206_v15 = vmul.f32 %v6065_v31, %v14529_v19 }
 0x70e   : > { %6756 = vrot.lane.b32.xlu0 %v6200_v44, %s8663_s25  ;;  %v6207_v54 = vmul.f32 %v6067_v18, %v14530_v48 }
 0x70f   : > { %6758 = vrot.lane.b32.xlu1 %v6201_v29, %s8663_s25 }
 0x710   : > { %v6069_v8 = vpop.permute.xlu0 %6068 }
 0x711   : > { %v6071_v30 = vpop.permute.xlu1 %6070  ;;  %v6208_v58 = vmul.f32 %v6069_v8, %v14531_v42 }
 0x712   : > { %6760 = vrot.lane.b32.xlu0 %v6202_v21, %s8663_s25  ;;  %v6209_v41 = vmul.f32 %v6071_v30, %v14532_v49 }
 0x713   : > { %6762 = vrot.lane.b32.xlu1 %v6203_v25, %s8663_s25 }
 0x714   : > { %v6073_v50 = vpop.permute.xlu0 %6072 }
 0x715   : > { %v6075_v63 = vpop.permute.xlu1 %6074  ;;  %v6210_v60 = vmul.f32 %v6073_v50, %v14533_v5 }
 0x716   : > { %6764 = vrot.lane.b32.xlu0 %v6204_v26, %s8663_s25  ;;  %v6211_v0 = vmul.f32 %v6075_v63, %v14534_v55 }
 0x717   : > { %6766 = vrot.lane.b32.xlu1 %v6205_v45, %s8663_s25 }
 0x718   : > { %v6077_v34 = vpop.permute.xlu0 %6076 }
 0x719   : > { %v6079_v47 = vpop.permute.xlu1 %6078  ;;  %v6212_v33 = vmul.f32 %v6077_v34, %v14535_v32 }
 0x71a   : > { %6768 = vrot.lane.b32.xlu0 %v6206_v15, %s8663_s25  ;;  %v6213_v20 = vmul.f32 %v6079_v47, %v14453_v46 }
 0x71b   : > { %6770 = vrot.lane.b32.xlu1 %v6207_v54, %s8663_s25 }
 0x71c   : > { %v6081_v36 = vpop.permute.xlu0 %6080 }
 0x71d   : > { %v6083_v28 = vpop.permute.xlu1 %6082  ;;  %v6214_v51 = vmul.f32 %v6081_v36, %v14536_v14 }
 0x71e   : > { %6772 = vrot.lane.b32.xlu0 %v6208_v58, %s8663_s25  ;;  %v6215_v6 = vmul.f32 %v6083_v28, %v14457_v53 }
 0x71f   : > { %6774 = vrot.lane.b32.xlu1 %v6209_v41, %s8663_s25 }
 0x720   : > { %v6085_v27 = vpop.permute.xlu0 %6084 }
 0x721   : > { %v6087_v40 = vpop.permute.xlu1 %6086  ;;  %v6216_v46 = vmul.f32 %v6085_v27, %v14459_v17 }
 0x722   : > { %6776 = vrot.lane.b32.xlu0 %v6210_v60, %s8663_s25  ;;  %v6217_v1 = vmul.f32 %v6087_v40, %v14461_v3 }
 0x723   : > { %6778 = vrot.lane.b32.xlu1 %v6211_v0, %s8663_s25 }
 0x724   : > { %v6089_v35 = vpop.permute.xlu0 %6088 }
 0x725   : > { %v6091_v9 = vpop.permute.xlu1 %6090  ;;  %v6218_v53 = vmul.f32 %v6089_v35, %v14463_v12 }
 0x726   : > { %6780 = vrot.lane.b32.xlu0 %v6212_v33, %s8663_s25  ;;  %v6219_v17 = vmul.f32 %v6091_v9, %v14367_v56 }
 0x727   : > { %6782 = vrot.lane.b32.xlu1 %v6213_v20, %s8663_s25 }
 0x728   : > { %v13344_v7 = vpop.permute.xlu0 %6572 }
 0x729   : > { %v13347_v16 = vpop.permute.xlu1 %6574  ;;  %6668 = vst.msk [vmem:[#allocation2 + $0x19] sm:$0xff] %vm1463_vm2, %v13344_v7 }
 0x72a   : > { %6669 = vst.msk [vmem:[#allocation2 + $0x21] sm:$0xff] %vm1463_vm2, %v13347_v16  ;;  %6784 = vrot.lane.b32.xlu0 %v6214_v51, %s8663_s25 }
 0x72b   : > { %6786 = vrot.lane.b32.xlu1 %v6215_v6, %s8663_s25 }
 0x72c   : > { %v13356_v57 = vpop.permute.xlu0 %6576 }
 0x72d   : > { %v13359_v62 = vpop.permute.xlu1 %6578  ;;  %6670 = vst.msk [vmem:[#allocation2 + $0x31] sm:$0xff] %vm1463_vm2, %v13356_v57 }
 0x72e   : > { %6671 = vst.msk [vmem:[#allocation2 + $0x39] sm:$0xff] %vm1463_vm2, %v13359_v62  ;;  %6788 = vrot.lane.b32.xlu0 %v6216_v46, %s8663_s25 }
 0x72f   : > { %6790 = vrot.lane.b32.xlu1 %v6217_v1, %s8663_s25 }
 0x730   : > { %v13368_v38 = vpop.permute.xlu0 %6580 }
 0x731   : > { %v13371_v37 = vpop.permute.xlu1 %6582  ;;  %6672 = vst.msk [vmem:[#allocation2 + $0x49] sm:$0xff] %vm1463_vm2, %v13368_v38 }
 0x732   : > { %6673 = vst.msk [vmem:[#allocation2 + $0x51] sm:$0xff] %vm1463_vm2, %v13371_v37  ;;  %6792 = vrot.lane.b32.xlu0 %v6218_v53, %s8663_s25 }
 0x733   : > { %6794 = vrot.lane.b32.xlu1 %v6219_v17, %s8663_s25 }
 0x734   : > { %v13379_v3 = vpop.permute.xlu0 %6584 }
 0x735   : > { %v13381_v43 = vpop.permute.xlu1 %6586  ;;  %6674 = vst.msk [vmem:[#allocation2 + $0x61] sm:$0xff] %vm1463_vm2, %v13379_v3 }
 0x736   : > { %6675 = vst.msk [vmem:[#allocation2 + $0x69] sm:$0xff] %vm1463_vm2, %v13381_v43 }
 0x738   : > { %v13387_v56 = vpop.permute.xlu0 %6588 }
 0x739   : > { %v13389_v12 = vpop.permute.xlu1 %6590  ;;  %6676 = vst.msk [vmem:[#allocation2 + $0x79] sm:$0xff] %vm1463_vm2, %v13387_v56 }
 0x73a   : > { %6677 = vst.msk [vmem:[#allocation2 + $0x81] sm:$0xff] %vm1463_vm2, %v13389_v12 }
 0x73c   : > { %v13395_v39 = vpop.permute.xlu0 %6592 }
 0x73d   : > { %v13397_v23 = vpop.permute.xlu1 %6594  ;;  %6678 = vst.msk [vmem:[#allocation2 + $0x91] sm:$0xff] %vm1463_vm2, %v13395_v39 }
 0x73e   : > { %6679 = vst.msk [vmem:[#allocation2 + $0x99] sm:$0xff] %vm1463_vm2, %v13397_v23 }
 0x740   : > { %v13403_v52 = vpop.permute.xlu0 %6596 }
 0x741   : > { %v13405_v24 = vpop.permute.xlu1 %6598  ;;  %6680 = vst.msk [vmem:[#allocation2 + $0xa9] sm:$0xff] %vm1463_vm2, %v13403_v52 }
 0x742   : > { %6681 = vst.msk [vmem:[#allocation2 + $0xb1] sm:$0xff] %vm1463_vm2, %v13405_v24 }
 0x744   : > { %v13411_v4 = vpop.permute.xlu0 %6600 }
 0x745   : > { %v13413_v59 = vpop.permute.xlu1 %6602  ;;  %6682 = vst.msk [vmem:[#allocation2 + $0xc1] sm:$0xff] %vm1463_vm2, %v13411_v4 }
 0x746   : > { %6683 = vst.msk [vmem:[#allocation2 + $0xc9] sm:$0xff] %vm1463_vm2, %v13413_v59 }
 0x748   : > { %v13419_v61 = vpop.permute.xlu0 %6604 }
 0x749   : > { %v13421_v44 = vpop.permute.xlu1 %6606  ;;  %6684 = vst.msk [vmem:[#allocation2 + $0xd9] sm:$0xff] %vm1463_vm2, %v13419_v61 }
 0x74a   : > { %6685 = vst.msk [vmem:[#allocation2 + $0xe1] sm:$0xff] %vm1463_vm2, %v13421_v44 }
 0x74c   : > { %v13427_v31 = vpop.permute.xlu0 %6608 }
 0x74d   : > { %v13429_v13 = vpop.permute.xlu1 %6610  ;;  %6686 = vst.msk [vmem:[#allocation2 + $0xf1] sm:$0xff] %vm1463_vm2, %v13427_v31 }
 0x74e   : > { %6687 = vst.msk [vmem:[#allocation2 + $0xf9] sm:$0xff] %vm1463_vm2, %v13429_v13 }
 0x750   : > { %v13435_v29 = vpop.permute.xlu0 %6612 }
 0x751   : > { %v13437_v18 = vpop.permute.xlu1 %6614  ;;  %6688 = vst.msk [vmem:[#allocation2 + $0x109] sm:$0xff] %vm1463_vm2, %v13435_v29 }
 0x752   : > { %6689 = vst.msk [vmem:[#allocation2 + $0x111] sm:$0xff] %vm1463_vm2, %v13437_v18 }
 0x754   : > { %v13443_v2 = vpop.permute.xlu0 %6616 }
 0x755   : > { %v13445_v21 = vpop.permute.xlu1 %6618  ;;  %6690 = vst.msk [vmem:[#allocation2 + $0x121] sm:$0xff] %vm1463_vm2, %v13443_v2 }
 0x756   : > { %6691 = vst.msk [vmem:[#allocation2 + $0x129] sm:$0xff] %vm1463_vm2, %v13445_v21 }
 0x758   : > { %v13451_v8 = vpop.permute.xlu0 %6620 }
 0x759   : > { %v13453_v22 = vpop.permute.xlu1 %6622  ;;  %6692 = vst.msk [vmem:[#allocation2 + $0x139] sm:$0xff] %vm1463_vm2, %v13451_v8 }
 0x75a   : > { %6693 = vst.msk [vmem:[#allocation2 + $0x141] sm:$0xff] %vm1463_vm2, %v13453_v22 }
 0x75c   : > { %v13459_v25 = vpop.permute.xlu0 %6624 }
 0x75d   : > { %v13461_v30 = vpop.permute.xlu1 %6626  ;;  %6694 = vst.msk [vmem:[#allocation2 + $0x151] sm:$0xff] %vm1463_vm2, %v13459_v25 }
 0x75e   : > { %6695 = vst.msk [vmem:[#allocation2 + $0x159] sm:$0xff] %vm1463_vm2, %v13461_v30 }
 0x760   : > { %v13467_v10 = vpop.permute.xlu0 %6628 }
 0x761   : > { %v13469_v26 = vpop.permute.xlu1 %6630  ;;  %6696 = vst.msk [vmem:[#allocation2 + $0x169] sm:$0xff] %vm1463_vm2, %v13467_v10 }
 0x762   : > { %6697 = vst.msk [vmem:[#allocation2 + $0x171] sm:$0xff] %vm1463_vm2, %v13469_v26 }
 0x764   : > { %v13475_v50 = vpop.permute.xlu0 %6632 }
 0x765   : > { %v13477_v11 = vpop.permute.xlu1 %6634  ;;  %6698 = vst.msk [vmem:[#allocation2 + $0x181] sm:$0xff] %vm1463_vm2, %v13475_v50 }
 0x766   : > { %6699 = vst.msk [vmem:[#allocation2 + $0x189] sm:$0xff] %vm1463_vm2, %v13477_v11 }
 0x768   : > { %v13483_v45 = vpop.permute.xlu0 %6732 }
 0x769   : > { %v13485_v63 = vpop.permute.xlu1 %6734  ;;  %6828 = vst.msk [vmem:[#allocation2 + $0x1c9] sm:$0xff] %vm1463_vm2, %v13483_v45 }
 0x76a   : > { %6829 = vst.msk [vmem:[#allocation2 + $0x1d1] sm:$0xff] %vm1463_vm2, %v13485_v63 }
 0x76c   : > { %v13491_v19 = vpop.permute.xlu0 %6736 }
 0x76d   : > { %v13493_v15 = vpop.permute.xlu1 %6738  ;;  %6830 = vst.msk [vmem:[#allocation2 + $0x1e1] sm:$0xff] %vm1463_vm2, %v13491_v19 }
 0x76e   : > { %6831 = vst.msk [vmem:[#allocation2 + $0x1e9] sm:$0xff] %vm1463_vm2, %v13493_v15 }
 0x770   : > { %v13499_v34 = vpop.permute.xlu0 %6740 }
 0x771   : > { %v13501_v48 = vpop.permute.xlu1 %6742  ;;  %6832 = vst.msk [vmem:[#allocation2 + $0x1f9] sm:$0xff] %vm1463_vm2, %v13499_v34 }
 0x772   : > { %6833 = vst.msk [vmem:[#allocation2 + $0x201] sm:$0xff] %vm1463_vm2, %v13501_v48 }
 0x774   : > { %v13507_v54 = vpop.permute.xlu0 %6744 }
 0x775   : > { %v13509_v47 = vpop.permute.xlu1 %6746  ;;  %6834 = vst.msk [vmem:[#allocation2 + $0x211] sm:$0xff] %vm1463_vm2, %v13507_v54 }
 0x776   : > { %6835 = vst.msk [vmem:[#allocation2 + $0x219] sm:$0xff] %vm1463_vm2, %v13509_v47 }
 0x778   : > { %v13515_v42 = vpop.permute.xlu0 %6748 }
 0x779   : > { %v13517_v58 = vpop.permute.xlu1 %6750  ;;  %6836 = vst.msk [vmem:[#allocation2 + $0x229] sm:$0xff] %vm1463_vm2, %v13515_v42 }
 0x77a   : > { %6837 = vst.msk [vmem:[#allocation2 + $0x231] sm:$0xff] %vm1463_vm2, %v13517_v58 }
 0x77c   : > { %v13523_v36 = vpop.permute.xlu0 %6752 }
 0x77d   : > { %v13525_v49 = vpop.permute.xlu1 %6754  ;;  %6838 = vst.msk [vmem:[#allocation2 + $0x241] sm:$0xff] %vm1463_vm2, %v13523_v36 }
 0x77e   : > { %6839 = vst.msk [vmem:[#allocation2 + $0x249] sm:$0xff] %vm1463_vm2, %v13525_v49 }
 0x780   : > { %v13531_v41 = vpop.permute.xlu0 %6756 }
 0x781   : > { %v13533_v28 = vpop.permute.xlu1 %6758  ;;  %6840 = vst.msk [vmem:[#allocation2 + $0x259] sm:$0xff] %vm1463_vm2, %v13531_v41 }
 0x782   : > { %6841 = vst.msk [vmem:[#allocation2 + $0x261] sm:$0xff] %vm1463_vm2, %v13533_v28 }
 0x784   : > { %v13539_v5 = vpop.permute.xlu0 %6760 }
 0x785   : > { %v13541_v60 = vpop.permute.xlu1 %6762  ;;  %6842 = vst.msk [vmem:[#allocation2 + $0x271] sm:$0xff] %vm1463_vm2, %v13539_v5 }
 0x786   : > { %6843 = vst.msk [vmem:[#allocation2 + $0x279] sm:$0xff] %vm1463_vm2, %v13541_v60 }
 0x788   : > { %v13547_v27 = vpop.permute.xlu0 %6764 }
 0x789   : > { %v13549_v55 = vpop.permute.xlu1 %6766  ;;  %6844 = vst.msk [vmem:[#allocation2 + $0x289] sm:$0xff] %vm1463_vm2, %v13547_v27 }
 0x78a   : > { %6845 = vst.msk [vmem:[#allocation2 + $0x291] sm:$0xff] %vm1463_vm2, %v13549_v55 }
 0x78c   : > { %v13555_v0 = vpop.permute.xlu0 %6768 }
 0x78d   : > { %v13557_v40 = vpop.permute.xlu1 %6770  ;;  %6846 = vst.msk [vmem:[#allocation2 + $0x2a1] sm:$0xff] %vm1463_vm2, %v13555_v0 }
 0x78e   : > { %6847 = vst.msk [vmem:[#allocation2 + $0x2a9] sm:$0xff] %vm1463_vm2, %v13557_v40 }
 0x790   : > { %v13563_v32 = vpop.permute.xlu0 %6772 }
 0x791   : > { %v13565_v33 = vpop.permute.xlu1 %6774  ;;  %6848 = vst.msk [vmem:[#allocation2 + $0x2b9] sm:$0xff] %vm1463_vm2, %v13563_v32 }
 0x792   : > { %6849 = vst.msk [vmem:[#allocation2 + $0x2c1] sm:$0xff] %vm1463_vm2, %v13565_v33 }
 0x794   : > { %v13571_v35 = vpop.permute.xlu0 %6776 }
 0x795   : > { %v13573_v20 = vpop.permute.xlu1 %6778  ;;  %6850 = vst.msk [vmem:[#allocation2 + $0x2d1] sm:$0xff] %vm1463_vm2, %v13571_v35 }
 0x796   : > { %6851 = vst.msk [vmem:[#allocation2 + $0x2d9] sm:$0xff] %vm1463_vm2, %v13573_v20 }
 0x798   : > { %v13579_v9 = vpop.permute.xlu0 %6780 }
 0x799   : > { %v13581_v14 = vpop.permute.xlu1 %6782  ;;  %6852 = vst.msk [vmem:[#allocation2 + $0x2e9] sm:$0xff] %vm1463_vm2, %v13579_v9 }
 0x79a   : > { %6853 = vst.msk [vmem:[#allocation2 + $0x2f1] sm:$0xff] %vm1463_vm2, %v13581_v14 }
 0x79c   : > { %v13587_v51 = vpop.permute.xlu0 %6784 }
 0x79d   : > { %v13589_v6 = vpop.permute.xlu1 %6786  ;;  %6854 = vst.msk [vmem:[#allocation2 + $0x301] sm:$0xff] %vm1463_vm2, %v13587_v51 }
 0x79e   : > { %6855 = vst.msk [vmem:[#allocation2 + $0x309] sm:$0xff] %vm1463_vm2, %v13589_v6 }
 0x7a0   : > { %v13595_v46 = vpop.permute.xlu0 %6788 }
 0x7a1   : > { %v13597_v1 = vpop.permute.xlu1 %6790  ;;  %6856 = vst.msk [vmem:[#allocation2 + $0x319] sm:$0xff] %vm1463_vm2, %v13595_v46 }
 0x7a2   : > { %6857 = vst.msk [vmem:[#allocation2 + $0x321] sm:$0xff] %vm1463_vm2, %v13597_v1  ;;  %6863 = sbr.rel (%p7063_p6) target bundleno = 1991 (0x7c7), region = 44 }
 0x7a4   : > { %v13603_v53 = vpop.permute.xlu0 %6792 }
 0x7a5   : > { %v13605_v17 = vpop.permute.xlu1 %6794  ;;  %6858 = vst.msk [vmem:[#allocation2 + $0x331] sm:$0xff] %vm1463_vm2, %v13603_v53 }
 0x7a6   : > { %6859 = vst.msk [vmem:[#allocation2 + $0x339] sm:$0xff] %vm1463_vm2, %v13605_v17 }
 0x7a7   : > { %6864 = vst.msk [vmem:[#allocation4] sm:$0xff] %vm1463_vm2, %v13344_v7  ;;  %6865 = vst.msk [vmem:[#allocation4 + $0x8] sm:$0xff] %vm1463_vm2, %v13347_v16 }
 0x7a8   : > { %6866 = vst.msk [vmem:[#allocation4 + $0x10] sm:$0xff] %vm1463_vm2, %v13356_v57  ;;  %6867 = vst.msk [vmem:[#allocation4 + $0x18] sm:$0xff] %vm1463_vm2, %v13359_v62 }
 0x7a9   : > { %6868 = vst.msk [vmem:[#allocation4 + $0x20] sm:$0xff] %vm1463_vm2, %v13368_v38  ;;  %6869 = vst.msk [vmem:[#allocation4 + $0x28] sm:$0xff] %vm1463_vm2, %v13371_v37 }
 0x7aa   : > { %6870 = vst.msk [vmem:[#allocation4 + $0x30] sm:$0xff] %vm1463_vm2, %v13379_v3  ;;  %6871 = vst.msk [vmem:[#allocation4 + $0x38] sm:$0xff] %vm1463_vm2, %v13381_v43 }
 0x7ab   : > { %6872 = vst.msk [vmem:[#allocation4 + $0x40] sm:$0xff] %vm1463_vm2, %v13387_v56  ;;  %6873 = vst.msk [vmem:[#allocation4 + $0x48] sm:$0xff] %vm1463_vm2, %v13389_v12 }
 0x7ac   : > { %6874 = vst.msk [vmem:[#allocation4 + $0x50] sm:$0xff] %vm1463_vm2, %v13395_v39  ;;  %6875 = vst.msk [vmem:[#allocation4 + $0x58] sm:$0xff] %vm1463_vm2, %v13397_v23 }
 0x7ad   : > { %6876 = vst.msk [vmem:[#allocation4 + $0x60] sm:$0xff] %vm1463_vm2, %v13403_v52  ;;  %6877 = vst.msk [vmem:[#allocation4 + $0x68] sm:$0xff] %vm1463_vm2, %v13405_v24 }
 0x7ae   : > { %6878 = vst.msk [vmem:[#allocation4 + $0x70] sm:$0xff] %vm1463_vm2, %v13411_v4  ;;  %6879 = vst.msk [vmem:[#allocation4 + $0x78] sm:$0xff] %vm1463_vm2, %v13413_v59 }
 0x7af   : > { %6880 = vst.msk [vmem:[#allocation4 + $0x80] sm:$0xff] %vm1463_vm2, %v13419_v61  ;;  %6881 = vst.msk [vmem:[#allocation4 + $0x88] sm:$0xff] %vm1463_vm2, %v13421_v44 }
 0x7b0   : > { %6882 = vst.msk [vmem:[#allocation4 + $0x90] sm:$0xff] %vm1463_vm2, %v13427_v31  ;;  %6883 = vst.msk [vmem:[#allocation4 + $0x98] sm:$0xff] %vm1463_vm2, %v13429_v13 }
 0x7b1   : > { %6884 = vst.msk [vmem:[#allocation4 + $0xa0] sm:$0xff] %vm1463_vm2, %v13435_v29  ;;  %6885 = vst.msk [vmem:[#allocation4 + $0xa8] sm:$0xff] %vm1463_vm2, %v13437_v18 }
 0x7b2   : > { %6886 = vst.msk [vmem:[#allocation4 + $0xb0] sm:$0xff] %vm1463_vm2, %v13443_v2  ;;  %6887 = vst.msk [vmem:[#allocation4 + $0xb8] sm:$0xff] %vm1463_vm2, %v13445_v21 }
 0x7b3   : > { %6888 = vst.msk [vmem:[#allocation4 + $0xc0] sm:$0xff] %vm1463_vm2, %v13451_v8  ;;  %6889 = vst.msk [vmem:[#allocation4 + $0xc8] sm:$0xff] %vm1463_vm2, %v13453_v22 }
 0x7b4   : > { %6890 = vst.msk [vmem:[#allocation4 + $0xd0] sm:$0xff] %vm1463_vm2, %v13459_v25  ;;  %6891 = vst.msk [vmem:[#allocation4 + $0xd8] sm:$0xff] %vm1463_vm2, %v13461_v30 }
 0x7b5   : > { %6892 = vst.msk [vmem:[#allocation4 + $0xe0] sm:$0xff] %vm1463_vm2, %v13467_v10  ;;  %6893 = vst.msk [vmem:[#allocation4 + $0xe8] sm:$0xff] %vm1463_vm2, %v13469_v26 }
 0x7b6   : > { %6894 = vst.msk [vmem:[#allocation4 + $0xf0] sm:$0xff] %vm1463_vm2, %v13475_v50  ;;  %6895 = vst.msk [vmem:[#allocation4 + $0xf8] sm:$0xff] %vm1463_vm2, %v13477_v11 }
 0x7b7   : > { %6896 = vst.msk [vmem:[#allocation4 + $0x100] sm:$0xff] %vm1463_vm2, %v13483_v45  ;;  %6897 = vst.msk [vmem:[#allocation4 + $0x108] sm:$0xff] %vm1463_vm2, %v13485_v63 }
 0x7b8   : > { %6898 = vst.msk [vmem:[#allocation4 + $0x110] sm:$0xff] %vm1463_vm2, %v13491_v19  ;;  %6899 = vst.msk [vmem:[#allocation4 + $0x118] sm:$0xff] %vm1463_vm2, %v13493_v15 }
 0x7b9   : > { %6900 = vst.msk [vmem:[#allocation4 + $0x120] sm:$0xff] %vm1463_vm2, %v13499_v34  ;;  %6901 = vst.msk [vmem:[#allocation4 + $0x128] sm:$0xff] %vm1463_vm2, %v13501_v48 }
 0x7ba   : > { %6902 = vst.msk [vmem:[#allocation4 + $0x130] sm:$0xff] %vm1463_vm2, %v13507_v54  ;;  %6903 = vst.msk [vmem:[#allocation4 + $0x138] sm:$0xff] %vm1463_vm2, %v13509_v47 }
 0x7bb   : > { %6904 = vst.msk [vmem:[#allocation4 + $0x140] sm:$0xff] %vm1463_vm2, %v13515_v42  ;;  %6905 = vst.msk [vmem:[#allocation4 + $0x148] sm:$0xff] %vm1463_vm2, %v13517_v58 }
 0x7bc   : > { %6906 = vst.msk [vmem:[#allocation4 + $0x150] sm:$0xff] %vm1463_vm2, %v13523_v36  ;;  %6907 = vst.msk [vmem:[#allocation4 + $0x158] sm:$0xff] %vm1463_vm2, %v13525_v49 }
 0x7bd   : > { %6908 = vst.msk [vmem:[#allocation4 + $0x160] sm:$0xff] %vm1463_vm2, %v13531_v41  ;;  %6909 = vst.msk [vmem:[#allocation4 + $0x168] sm:$0xff] %vm1463_vm2, %v13533_v28 }
 0x7be   : > { %6910 = vst.msk [vmem:[#allocation4 + $0x170] sm:$0xff] %vm1463_vm2, %v13539_v5  ;;  %6911 = vst.msk [vmem:[#allocation4 + $0x178] sm:$0xff] %vm1463_vm2, %v13541_v60 }
 0x7bf   : > { %6912 = vst.msk [vmem:[#allocation4 + $0x180] sm:$0xff] %vm1463_vm2, %v13547_v27  ;;  %6913 = vst.msk [vmem:[#allocation4 + $0x188] sm:$0xff] %vm1463_vm2, %v13549_v55 }
 0x7c0   : > { %6914 = vst.msk [vmem:[#allocation4 + $0x190] sm:$0xff] %vm1463_vm2, %v13555_v0  ;;  %6915 = vst.msk [vmem:[#allocation4 + $0x198] sm:$0xff] %vm1463_vm2, %v13557_v40 }
 0x7c1   : > { %6916 = vst.msk [vmem:[#allocation4 + $0x1a0] sm:$0xff] %vm1463_vm2, %v13563_v32  ;;  %6917 = vst.msk [vmem:[#allocation4 + $0x1a8] sm:$0xff] %vm1463_vm2, %v13565_v33 }
 0x7c2   : > { %6918 = vst.msk [vmem:[#allocation4 + $0x1b0] sm:$0xff] %vm1463_vm2, %v13571_v35  ;;  %6919 = vst.msk [vmem:[#allocation4 + $0x1b8] sm:$0xff] %vm1463_vm2, %v13573_v20 }
 0x7c3   : > { %6920 = vst.msk [vmem:[#allocation4 + $0x1c0] sm:$0xff] %vm1463_vm2, %v13579_v9  ;;  %6921 = vst.msk [vmem:[#allocation4 + $0x1c8] sm:$0xff] %vm1463_vm2, %v13581_v14 }
 0x7c4   : > { %6922 = vst.msk [vmem:[#allocation4 + $0x1d0] sm:$0xff] %vm1463_vm2, %v13587_v51  ;;  %6923 = vst.msk [vmem:[#allocation4 + $0x1d8] sm:$0xff] %vm1463_vm2, %v13589_v6 }
 0x7c5   : > { %6924 = vst.msk [vmem:[#allocation4 + $0x1e0] sm:$0xff] %vm1463_vm2, %v13595_v46  ;;  %6925 = vst.msk [vmem:[#allocation4 + $0x1e8] sm:$0xff] %vm1463_vm2, %v13597_v1 }
 0x7c6   : > { %6926 = vst.msk [vmem:[#allocation4 + $0x1f0] sm:$0xff] %vm1463_vm2, %v13603_v53  ;;  %6927 = vst.msk [vmem:[#allocation4 + $0x1f8] sm:$0xff] %vm1463_vm2, %v13605_v17 }
 0x7c7 PF: > { %p13742_p7 = scmp.eq.s32.totalorder %s7000_s18, 7  ;;  %s8669_s25 = smov [#allocation4]  }
 0x7c8   : > { %s6938_s26 = sshll.u32 %s8669_s25, 4  ;;  %s6939_s26 = int_to_ptr.vmem [resolvable:$true] %s6938_s26 }
 0x7c9   : > { %s8610_s27 = scalar_lea.vmem %s6939_s26, 8192  ;;  %p8617_p11 = scmp.lt.s32.totalorder %s6939_s26, %s6939_s26 }
 0x7ca   : > { %p8611_p8 = scmp.ne.s32.totalorder %s6939_s26, %s8610_s27  ;;  %p8618_p12 = scmp.lt.s32.totalorder %s8610_s27, %s8610_s27 }
 0x7cc   : > { %p8612_p9 = pnand %p8611_p8, %p13742_p7  ;;  %p8619_p13 = por %p8618_p12, %p8617_p11 }
 0x7ce   : > { %p8613_p10 = pneg %p8612_p9 }
 0x7d0   : > { %p8620_p0 = pnand %p8619_p13, %p8613_p10 }
 0x7d2   : > { %8623 = shalt.err (!%p8620_p0)
}
 0x7d3   : > { %s8670_s13 = smov 128   ;;  %s8671_s18 = smov 8  }
 0x7d4   : > { %7256 = dma.vmem_to_hbm [thread:$0]  (%p13742_p7), %s6939_s26, 8192, %s13770_s4, [#allocation5], %s8670_s13, %s8670_s13, %s8671_s18  }
 0x7d5   : > { %8647 = dma.done.wait (%p13742_p7), [#allocation5], 8192  }
 0x7d6   : > { %8649 = vsyncadd (%p13742_p7), [#allocation5], 4294959104 }
 0x7d7 PF: > { %s15_s17 = sadd.s32 1, %s8660_s17   ;;  %s14538_s15 = smov %s8656_s16 }
 0x7d8   : > { %p12_p1 = scmp.ge.s32.totalorder %s15_s17, 10   ;;  %s14539_s16 = smov %s14541_s19 }
 0x7da   :  { %14 = sbr.rel (!%p12_p1) target bundleno = 2 (0x2), region = 77 }
 0x7df   :  { %6954 = vsyncpa [#allocation5], 1 }
 0x7e0   :  { %6956 = vsyncpa [#allocation5 + $0x1], 1 }

</bundles_post_ra>
